<compile_context>
chip_gen: v7x
topology: tpu7x:2x2x1
jax: 0.10.0
libtpu: 0.0.40
codegen_flags: <defaults>
</compile_context>

<pallas_src>
import functools

import jax
import jax.numpy as jnp
from jax.experimental import pallas as pl
from jax.experimental.pallas import tpu as pltpu

BN_EPS = 1e-5


def _relu6(x):
    return jnp.minimum(jnp.maximum(x, 0.0), 6.0)


def _round_up(x, m):
    return ((x + m - 1) // m) * m


def _default_hidden_dtype():
    """bf16 hidden scratch on chips with a bf16 VPU; f32 on v5e and older."""
    try:
        kind = jax.devices()[0].device_kind.lower()
    except Exception:
        return jnp.bfloat16
    if ("v2" in kind) or ("v3" in kind) or ("v4" in kind) or ("v5" in kind):
        return jnp.float32
    return jnp.bfloat16


def _vmem_capacity_bytes():
    try:
        return int(pltpu.get_tpu_info().vmem_capacity_bytes)
    except Exception:
        return 64 << 20  # conservative (v7x per-core VMEM)


def _choose_tile_h(h_out, stride, w_pad, c_hid, hid_itemsize, target, budget):
    """Largest divisor of h_out (whole image allowed) whose hidden scratch fits
    the budget; prefer tiles that keep the output block sublane-aligned."""
    best = 1
    for d in sorted((d for d in range(1, h_out + 1) if h_out % d == 0),
                    reverse=True):
        rows_in = (d - 1) * stride + 3
        if rows_in * w_pad * c_hid * hid_itemsize > budget:
            continue
        if d != h_out and d > target:
            continue
        if d % 8 == 0 or d == h_out:
            return d
        best = max(best, d)
    # TODO(synk): cdiv + pl.when-guarded partial last tile for prime h_out.
    return best


# -----------------------------------------------------------------------------
# Fused InvertedResidual kernel.  One grid step = one batch image x one tile of
# output rows.  The expanded hidden activation lives only in VMEM scratch.
# -----------------------------------------------------------------------------
def _inverted_residual_kernel(*refs, stride, tile_h, h_in, w_in, w_out_pad,
                              has_expand, use_res):
    if has_expand:
        (x_ref, we_ref, be_ref, wd_ref, bd_ref, wp_ref, bp_ref,
         o_ref, hid_ref) = refs
    else:
        (x_ref, wd_ref, bd_ref, wp_ref, bp_ref, o_ref, hid_ref) = refs

    rows_in, w_pad, c_hid = hid_ref.shape
    c_out = wp_ref.shape[-1]
    hid_dtype = hid_ref.dtype

    r = pl.program_id(1)
    row0 = pl.multiple_of(r * (tile_h * stride), tile_h * stride)

    # Row slab (with the 3x3 halo) of the zero-padded bf16 input image.
    x_rows = x_ref[pl.ds(row0, rows_in)]                 # (rows_in, w_pad, c_in)

    # --- pointwise expansion: 1x1 conv (MXU, bf16 x bf16 -> f32) + bias + ReLU6
    if has_expand:
        c_in = x_rows.shape[-1]
        xm = x_rows.reshape(rows_in * w_pad, c_in)
        h = jnp.dot(xm, we_ref[...], preferred_element_type=jnp.float32)
        h = _relu6(h + be_ref[...])                      # BN scale folded in we
        hid_ref[...] = h.reshape(rows_in, w_pad, c_hid).astype(hid_dtype)

        # ReLU6(bias) at zero-padded positions is nonzero, so re-zero the
        # spatial padding ring: halo columns always, halo rows only when the
        # slab actually touches the padded image border.
        hid_ref[:, 0:1, :] = jnp.zeros((rows_in, 1, c_hid), hid_dtype)
        hid_ref[:, w_in + 1:, :] = jnp.zeros(
            (rows_in, w_pad - w_in - 1, c_hid), hid_dtype)
        zrow = jnp.zeros((1, w_pad, c_hid), hid_dtype)

        @pl.when(row0 == 0)
        def _zero_top():
            hid_ref[0:1, :, :] = zrow

        @pl.when(row0 + rows_in - 1 >= h_in + 1)
        def _zero_bottom():
            hid_ref[rows_in - 1:rows_in, :, :] = zrow
    else:
        # expand_ratio == 1: hidden == input; its padding ring is already zero.
        hid_ref[...] = x_rows.astype(hid_dtype)

    # --- depthwise 3x3 (stride 1 or 2) + bias + ReLU6: 9-tap VPU MAC ---------
    # TODO(synk): deinterleave even/odd width columns for stride=2 so all taps
    # become unit-stride reads (and use pltpu.roll for the kw shifts).
    acc = None
    for k in range(9):
        kh, kw = divmod(k, 3)
        if stride == 1:
            tap = hid_ref[kh:kh + tile_h, kw:kw + w_out_pad, :]
        else:
            tap = hid_ref[pl.ds(kh, tile_h, stride),
                          pl.ds(kw, w_out_pad, stride), :]
        term = tap.astype(jnp.float32) * wd_ref[k].reshape(1, 1, c_hid)
        acc = term if acc is None else acc + term
    d = _relu6(acc + bd_ref[...].reshape(1, 1, c_hid))   # (tile_h, w_out_pad, c_hid)

    # --- pointwise projection: 1x1 conv (MXU) + bias, optional residual add --
    dm = d.reshape(tile_h * w_out_pad, c_hid).astype(jnp.bfloat16)
    y = jnp.dot(dm, wp_ref[...], preferred_element_type=jnp.float32)
    y = y + bp_ref[...]                                  # BN scale folded in wp
    if use_res:                                          # stride==1, c_in==c_out
        res = x_rows[1:1 + tile_h, 1:1 + w_out_pad, :].astype(jnp.float32)
        y = y + res.reshape(tile_h * w_out_pad, c_out)
    # Dense, aligned store of the full padded slab; width crop happens outside.
    o_ref[...] = y.astype(o_ref.dtype)


# -----------------------------------------------------------------------------
# Wrapper: builds specs, padding, tiling and VMEM budget; NHWC activations.
# -----------------------------------------------------------------------------
def inverted_residual(x_nhwc, params, *, stride, tile_h_target=32,
                      hidden_dtype=None):
    if stride not in (1, 2):
        raise ValueError(f"stride should be 1 or 2 instead of {stride}")
    n, h_in, w_in, c_in = x_nhwc.shape
    expand = params["expand"]
    wd, sd, bd = params["dw"]
    wpj, sp, bp = params["project"]
    c_hid = wd.shape[-1]
    c_out = wpj.shape[-1]
    has_expand = expand is not None
    if not has_expand:
        assert c_hid == c_in, "expand_ratio==1 requires hidden == inp"
    use_res = (stride == 1) and (c_in == c_out)

    if hidden_dtype is None:
        hidden_dtype = _default_hidden_dtype()
    hid_itemsize = jnp.dtype(hidden_dtype).itemsize

    h_out = (h_in - 1) // stride + 1
    w_out = (w_in - 1) // stride + 1
    # Round the output width up to x8 and pad the input width so every
    # in-kernel reshape is sublane-aligned and all 3x3 taps stay in range.
    w_out_pad = _round_up(w_out, 8)
    w_pad = _round_up(max(w_in + 2, (w_out_pad - 1) * stride + 3), 8)
    h_pad = h_in + 2

    cap = _vmem_capacity_bytes()
    tile_h = _choose_tile_h(h_out, stride, w_pad, c_hid, hid_itemsize,
                            tile_h_target, max(8 << 20, cap // 8))
    n_row_tiles = h_out // tile_h
    rows_in = (tile_h - 1) * stride + 3

    # bf16 input: both 1x1 convs consume bf16 on the MXU anyway.
    # TODO(synk): fold the halo handling into the kernel to avoid this separate
    # XLA pad (one extra HBM round-trip of the input).
    xp = jnp.pad(x_nhwc.astype(jnp.bfloat16),
                 ((0, 0), (1, 1), (1, w_pad - w_in - 1), (0, 0)))

    in_arrays = [xp]
    in_specs = [pl.BlockSpec((None, h_pad, w_pad, c_in),
                             lambda i, r: (i, 0, 0, 0))]
    if has_expand:
        we, se, be = expand
        # Fold the BN scale into the expansion weights (bias stays separate).
        in_arrays += [(we * se[None, :]).astype(jnp.bfloat16),
                      be.reshape(1, c_hid).astype(jnp.float32)]
        in_specs += [pl.BlockSpec((c_in, c_hid), lambda i, r: (0, 0)),
                     pl.BlockSpec((1, c_hid), lambda i, r: (0, 0))]

    in_arrays += [(wd * sd).reshape(9, c_hid).astype(jnp.float32),   # BN folded
                  bd.reshape(1, c_hid).astype(jnp.float32),
                  (wpj * sp[None, :]).astype(jnp.bfloat16),          # BN folded
                  bp.reshape(1, c_out).astype(jnp.float32)]
    in_specs += [pl.BlockSpec((9, c_hid), lambda i, r: (0, 0)),
                 pl.BlockSpec((1, c_hid), lambda i, r: (0, 0)),
                 pl.BlockSpec((c_hid, c_out), lambda i, r: (0, 0)),
                 pl.BlockSpec((1, c_out), lambda i, r: (0, 0))]

    # Flattened (h, w_pad) output rows -> dense, 8-aligned output blocks; the
    # crop to w_out happens outside the kernel.
    out_shape = jax.ShapeDtypeStruct((n, h_out * w_out_pad, c_out), jnp.float32)
    out_spec = pl.BlockSpec((None, tile_h * w_out_pad, c_out),
                            lambda i, r: (i, r, 0))

    # VMEM budget: Pallas double-buffers every input block (weights included)
    # plus the output block; add the hidden scratch and headroom, clamp per
    # generation (v5e/v6e 128 MiB, v7x 64 MiB).
    in_block_bytes = h_pad * w_pad * c_in * 2
    if has_expand:
        in_block_bytes += c_in * c_hid * 2 + 8 * c_hid * 4
    in_block_bytes += 16 * c_hid * 4 + 8 * c_hid * 4
    in_block_bytes += c_hid * c_out * 2 + 8 * c_out * 4
    out_block_bytes = tile_h * w_out_pad * c_out * 4
    scratch_bytes = rows_in * w_pad * c_hid * hid_itemsize
    need = 2 * (in_block_bytes + out_block_bytes) + scratch_bytes + (4 << 20)
    vmem_limit = int(min(max(need, 32 << 20), int(cap * 0.9)))

    kernel = functools.partial(
        _inverted_residual_kernel,
        stride=stride, tile_h=tile_h, h_in=h_in, w_in=w_in,
        w_out_pad=w_out_pad, has_expand=has_expand, use_res=use_res)

    y = pl.pallas_call(
        kernel,
        grid=(n, n_row_tiles),
        in_specs=in_specs,
        out_specs=out_spec,
        out_shape=out_shape,
        scratch_shapes=[pltpu.VMEM((rows_in, w_pad, c_hid), hidden_dtype)],
        compiler_params=pltpu.CompilerParams(
            # Row axis "arbitrary" so the batch axis carries the megacore split
            # (the input block is per-batch; row-sharding would duplicate DMA).
            dimension_semantics=("parallel", "arbitrary"),
            vmem_limit_bytes=vmem_limit),
    )(*in_arrays)

    return y.reshape(n, h_out, w_out_pad, c_out)[:, :, :w_out, :]


def inverted_residual_nchw(x_nchw, params, *, stride):
    """Same I/O convention as the PyTorch module (NCHW)."""
    x = jnp.transpose(x_nchw, (0, 2, 3, 1))
    y = inverted_residual(x, params, stride=stride)
    return jnp.transpose(y, (0, 3, 1, 2))


# -------------------------- parameter construction ---------------------------
def _fold_bn(c):
    # PyTorch BatchNorm2d init (gamma=1, beta=0, running stats 0/1), eval fold.
    scale = jnp.full((c,), 1.0 / (1.0 + BN_EPS) ** 0.5, dtype=jnp.float32)
    bias = jnp.zeros((c,), dtype=jnp.float32)
    return scale, bias


def _kaiming(key, shape, fan_out):
    return ((2.0 / float(fan_out)) ** 0.5) * jax.random.normal(
        key, shape, dtype=jnp.float32)


def init_inverted_residual(key, inp, oup, expand_ratio):
    hidden = int(round(inp * expand_ratio))
    k1, k2, k3 = jax.random.split(key, 3)
    params = {}
    if expand_ratio != 1:
        params["expand"] = (_kaiming(k1, (inp, hidden), fan_out=hidden),
                            *_fold_bn(hidden))
    else:
        params["expand"] = None
    params["dw"] = (_kaiming(k2, (3, 3, hidden), fan_out=9), *_fold_bn(hidden))
    params["project"] = (_kaiming(k3, (hidden, oup), fan_out=oup), *_fold_bn(oup))
    return params


# --------------------------- plain-JAX reference -----------------------------
def inverted_residual_reference(x_nchw, params, *, stride):
    x = jnp.transpose(x_nchw, (0, 2, 3, 1)).astype(jnp.float32)
    h = x
    if params["expand"] is not None:
        we, se, be = params["expand"]
        h = jnp.einsum("nhwc,cd->nhwd", h, we,
                       precision=jax.lax.Precision.HIGHEST)
        h = jnp.clip(h * se + be, 0.0, 6.0)
    wd, sd, bd = params["dw"]
    c_hid = wd.shape[-1]
    d = jax.lax.conv_general_dilated(
        h, wd.reshape(3, 3, 1, c_hid),
        window_strides=(stride, stride), padding=((1, 1), (1, 1)),
        dimension_numbers=("NHWC", "HWIO", "NHWC"),
        feature_group_count=c_hid,
        precision=jax.lax.Precision.HIGHEST)
    d = jnp.clip(d * sd + bd, 0.0, 6.0)
    wpj, sp, bp = params["project"]
    y = jnp.einsum("nhwc,cd->nhwd", d, wpj,
                   precision=jax.lax.Precision.HIGHEST)
    y = y * sp + bp
    if stride == 1 and x.shape[-1] == y.shape[-1]:
        y = y + x
    return jnp.transpose(y, (0, 3, 1, 2))


if __name__ == "__main__":
    root = jax.random.PRNGKey(0)
    kx, kp1, kp2, kp3 = jax.random.split(root, 4)

    # NCHW input like the PyTorch module: batch=2, 32 channels, 16x16 spatial.
    x = jax.random.normal(kx, (2, 32, 16, 16), dtype=jnp.float32)

    configs = [
        # (key, inp, oup, stride, expand_ratio): residual / downsample / no-expand
        (kp1, 32, 32, 1, 6),
        (kp2, 32, 64, 2, 6),
        (kp3, 32, 16, 1, 1),
    ]
    for key, inp, oup, stride, t in configs:
        params = init_inverted_residual(key, inp, oup, t)
        out = jax.block_until_ready(
            inverted_residual_nchw(x, params, stride=stride))
        ref = inverted_residual_reference(x, params, stride=stride)
        h_out = (16 - 1) // stride + 1
        assert out.shape == (2, oup, h_out, h_out), out.shape
        assert out.dtype == jnp.float32
        assert bool(jnp.all(jnp.isfinite(out)))
        err = float(jnp.max(jnp.abs(out - ref)))
        # bf16 input / bf16 MXU operands (and possibly bf16 hidden scratch)
        # against an all-f32 HIGHEST-precision reference -> loose tolerance.
        assert err < 0.35, f"max |err| = {err} for config {(inp, oup, stride, t)}"
    print("KERNEL_OK")
</pallas_src>

<mosaic_0001>
module attributes {stable_mosaic.version = 11 : i64} {
  func.func @_inverted_residual_kernel(%arg0: i32, %arg1: i32, %arg2: memref<1x18x24x32xbf16, #tpu.memory_space<vmem>>, %arg3: memref<32x192xbf16, #tpu.memory_space<vmem>>, %arg4: memref<1x192xf32, #tpu.memory_space<vmem>>, %arg5: memref<9x192xf32, #tpu.memory_space<vmem>>, %arg6: memref<1x192xf32, #tpu.memory_space<vmem>>, %arg7: memref<192x32xbf16, #tpu.memory_space<vmem>>, %arg8: memref<1x32xf32, #tpu.memory_space<vmem>>, %arg9: memref<1x256x32xf32, #tpu.memory_space<vmem>>, %arg10: memref<18x24x192xbf16, #tpu.memory_space<vmem>>) attributes {dimension_semantics = [#tpu.dimension_semantics<parallel>, #tpu.dimension_semantics<arbitrary>], iteration_bounds = array<i64: 2, 1>, scalar_prefetch = 0 : i64, scratch_operands = 1 : i64, tpu.core_type = #tpu.core_type<tc>, window_params = [{transform_indices = @transform_0, window_bounds = array<i64: 1, 18, 24, 32>}, {pipeline_mode = #tpu.pipeline_mode<synchronous>, transform_indices = @transform_1, window_bounds = array<i64: 32, 192>}, {pipeline_mode = #tpu.pipeline_mode<synchronous>, transform_indices = @transform_2, window_bounds = array<i64: 1, 192>}, {pipeline_mode = #tpu.pipeline_mode<synchronous>, transform_indices = @transform_3, window_bounds = array<i64: 9, 192>}, {pipeline_mode = #tpu.pipeline_mode<synchronous>, transform_indices = @transform_4, window_bounds = array<i64: 1, 192>}, {pipeline_mode = #tpu.pipeline_mode<synchronous>, transform_indices = @transform_5, window_bounds = array<i64: 192, 32>}, {pipeline_mode = #tpu.pipeline_mode<synchronous>, transform_indices = @transform_6, window_bounds = array<i64: 1, 32>}, {transform_indices = @transform_7, window_bounds = array<i64: 1, 256, 32>}]} {
    %c16_i32 = arith.constant 16 : i32
    %0 = arith.muli %arg1, %c16_i32 : i32
    %1 = tpu.assume_multiple %0, 16 : i32
    %c0 = arith.constant 0 : index
    %2 = arith.index_cast %1 : i32 to index
    %c0_0 = arith.constant 0 : index
    %c0_1 = arith.constant 0 : index
    %3 = vector.load %arg2[%c0, %2, %c0_0, %c0_1] : memref<1x18x24x32xbf16, #tpu.memory_space<vmem>>, vector<1x18x24x32xbf16>
    %4 = vector.shape_cast %3 : vector<1x18x24x32xbf16> to vector<18x24x32xbf16>
    %5 = vector.shape_cast %4 : vector<18x24x32xbf16> to vector<432x32xbf16>
    %c0_2 = arith.constant 0 : index
    %c0_3 = arith.constant 0 : index
    %6 = vector.load %arg3[%c0_2, %c0_3] : memref<32x192xbf16, #tpu.memory_space<vmem>>, vector<32x192xbf16>
    %cst = arith.constant dense<0.000000e+00> : vector<432x192xf32>
    %7 = tpu.matmul %5, %6, %cst {dimension_numbers = #tpu.dot_dimension_numbers<[1], [0], [0], [1], [0, 0, 1, 1], [], []>} : vector<432x32xbf16>, vector<32x192xbf16>, vector<432x192xf32> -> vector<432x192xf32>
    %c0_4 = arith.constant 0 : index
    %c0_5 = arith.constant 0 : index
    %8 = vector.load %arg4[%c0_4, %c0_5] : memref<1x192xf32, #tpu.memory_space<vmem>>, vector<1x192xf32>
    %9 = vector.broadcast %8 : vector<1x192xf32> to vector<432x192xf32>
    %10 = arith.addf %7, %9 : vector<432x192xf32>
    %cst_6 = arith.constant 0.000000e+00 : f32
    %11 = vector.broadcast %cst_6 : f32 to vector<432x192xf32>
    %12 = arith.maximumf %10, %11 : vector<432x192xf32>
    %cst_7 = arith.constant 6.000000e+00 : f32
    %13 = vector.broadcast %cst_7 : f32 to vector<432x192xf32>
    %14 = arith.minimumf %12, %13 : vector<432x192xf32>
    %15 = vector.shape_cast %14 : vector<432x192xf32> to vector<18x24x192xf32>
    %16 = arith.truncf %15 : vector<18x24x192xf32> to vector<18x24x192xbf16>
    %c0_8 = arith.constant 0 : index
    %c0_9 = arith.constant 0 : index
    %c0_10 = arith.constant 0 : index
    %17 = vector.load %arg10[%c0_8, %c0_9, %c0_10] : memref<18x24x192xbf16, #tpu.memory_space<vmem>>, vector<18x24x192xbf16>
    tpu.vector_store %arg10[%c0_8, %c0_9, %c0_10], %16 {strides = array<i32>} : memref<18x24x192xbf16, #tpu.memory_space<vmem>>, vector<18x24x192xbf16>,
    %cst_11 = arith.constant 0.000000e+00 : bf16
    %18 = vector.broadcast %cst_11 : bf16 to vector<18x1x192xbf16>
    %c0_12 = arith.constant 0 : index
    %c0_13 = arith.constant 0 : index
    %c0_14 = arith.constant 0 : index
    %19 = vector.load %arg10[%c0_12, %c0_13, %c0_14] : memref<18x24x192xbf16, #tpu.memory_space<vmem>>, vector<18x1x192xbf16>
    tpu.vector_store %arg10[%c0_12, %c0_13, %c0_14], %18 {strides = array<i32>} : memref<18x24x192xbf16, #tpu.memory_space<vmem>>, vector<18x1x192xbf16>,
    %cst_15 = arith.constant 0.000000e+00 : bf16
    %20 = vector.broadcast %cst_15 : bf16 to vector<18x7x192xbf16>
    %c0_16 = arith.constant 0 : index
    %c17 = arith.constant 17 : index
    %c0_17 = arith.constant 0 : index
    %21 = vector.load %arg10[%c0_16, %c17, %c0_17] : memref<18x24x192xbf16, #tpu.memory_space<vmem>>, vector<18x7x192xbf16>
    tpu.vector_store %arg10[%c0_16, %c17, %c0_17], %20 {strides = array<i32>} : memref<18x24x192xbf16, #tpu.memory_space<vmem>>, vector<18x7x192xbf16>,
    %cst_18 = arith.constant 0.000000e+00 : bf16
    %22 = vector.broadcast %cst_18 : bf16 to vector<1x24x192xbf16>
    %c0_i32 = arith.constant 0 : i32
    %23 = arith.cmpi eq, %1, %c0_i32 : i32
    %24 = arith.extui %23 : i1 to i32
    %c0_i32_19 = arith.constant 0 : i32
    %25 = arith.cmpi ne, %24, %c0_i32_19 : i32
    scf.if %25 {
      %c0_70 = arith.constant 0 : index
      %c0_71 = arith.constant 0 : index
      %c0_72 = arith.constant 0 : index
      %124 = vector.load %arg10[%c0_70, %c0_71, %c0_72] : memref<18x24x192xbf16, #tpu.memory_space<vmem>>, vector<1x24x192xbf16>
      tpu.vector_store %arg10[%c0_70, %c0_71, %c0_72], %22 {strides = array<i32>} : memref<18x24x192xbf16, #tpu.memory_space<vmem>>, vector<1x24x192xbf16>,
    } else {
    }
    %c18_i32 = arith.constant 18 : i32
    %26 = arith.addi %1, %c18_i32 : i32
    %c1_i32 = arith.constant 1 : i32
    %27 = arith.subi %26, %c1_i32 : i32
    %c17_i32 = arith.constant 17 : i32
    %28 = arith.cmpi sge, %27, %c17_i32 : i32
    %29 = arith.extui %28 : i1 to i32
    %c0_i32_20 = arith.constant 0 : i32
    %30 = arith.cmpi ne, %29, %c0_i32_20 : i32
    scf.if %30 {
      %c17_70 = arith.constant 17 : index
      %c0_71 = arith.constant 0 : index
      %c0_72 = arith.constant 0 : index
      %124 = vector.load %arg10[%c17_70, %c0_71, %c0_72] : memref<18x24x192xbf16, #tpu.memory_space<vmem>>, vector<1x24x192xbf16>
      tpu.vector_store %arg10[%c17_70, %c0_71, %c0_72], %22 {strides = array<i32>} : memref<18x24x192xbf16, #tpu.memory_space<vmem>>, vector<1x24x192xbf16>,
    } else {
    }
    %c0_21 = arith.constant 0 : index
    %c0_22 = arith.constant 0 : index
    %c0_23 = arith.constant 0 : index
    %31 = vector.load %arg10[%c0_21, %c0_22, %c0_23] : memref<18x24x192xbf16, #tpu.memory_space<vmem>>, vector<16x16x192xbf16>
    %32 = arith.extf %31 : vector<16x16x192xbf16> to vector<16x16x192xf32>
    %c0_24 = arith.constant 0 : index
    %c0_25 = arith.constant 0 : index
    %33 = vector.load %arg5[%c0_24, %c0_25] : memref<9x192xf32, #tpu.memory_space<vmem>>, vector<1x192xf32>
    %34 = vector.shape_cast %33 : vector<1x192xf32> to vector<192xf32>
    %35 = vector.shape_cast %34 : vector<192xf32> to vector<1x1x192xf32>
    %36 = vector.broadcast %35 : vector<1x1x192xf32> to vector<16x16x192xf32>
    %37 = arith.mulf %32, %36 : vector<16x16x192xf32>
    %c0_26 = arith.constant 0 : index
    %c1 = arith.constant 1 : index
    %c0_27 = arith.constant 0 : index
    %38 = vector.load %arg10[%c0_26, %c1, %c0_27] : memref<18x24x192xbf16, #tpu.memory_space<vmem>>, vector<16x16x192xbf16>
    %39 = arith.extf %38 : vector<16x16x192xbf16> to vector<16x16x192xf32>
    %c1_28 = arith.constant 1 : index
    %c0_29 = arith.constant 0 : index
    %40 = vector.load %arg5[%c1_28, %c0_29] : memref<9x192xf32, #tpu.memory_space<vmem>>, vector<1x192xf32>
    %41 = vector.shape_cast %40 : vector<1x192xf32> to vector<192xf32>
    %42 = vector.shape_cast %41 : vector<192xf32> to vector<1x1x192xf32>
    %43 = vector.broadcast %42 : vector<1x1x192xf32> to vector<16x16x192xf32>
    %44 = arith.mulf %39, %43 : vector<16x16x192xf32>
    %45 = arith.addf %37, %44 : vector<16x16x192xf32>
    %c0_30 = arith.constant 0 : index
    %c2 = arith.constant 2 : index
    %c0_31 = arith.constant 0 : index
    %46 = vector.load %arg10[%c0_30, %c2, %c0_31] : memref<18x24x192xbf16, #tpu.memory_space<vmem>>, vector<16x16x192xbf16>
    %47 = arith.extf %46 : vector<16x16x192xbf16> to vector<16x16x192xf32>
    %c2_32 = arith.constant 2 : index
    %c0_33 = arith.constant 0 : index
    %48 = vector.load %arg5[%c2_32, %c0_33] : memref<9x192xf32, #tpu.memory_space<vmem>>, vector<1x192xf32>
    %49 = vector.shape_cast %48 : vector<1x192xf32> to vector<192xf32>
    %50 = vector.shape_cast %49 : vector<192xf32> to vector<1x1x192xf32>
    %51 = vector.broadcast %50 : vector<1x1x192xf32> to vector<16x16x192xf32>
    %52 = arith.mulf %47, %51 : vector<16x16x192xf32>
    %53 = arith.addf %45, %52 : vector<16x16x192xf32>
    %c1_34 = arith.constant 1 : index
    %c0_35 = arith.constant 0 : index
    %c0_36 = arith.constant 0 : index
    %54 = vector.load %arg10[%c1_34, %c0_35, %c0_36] : memref<18x24x192xbf16, #tpu.memory_space<vmem>>, vector<16x16x192xbf16>
    %55 = arith.extf %54 : vector<16x16x192xbf16> to vector<16x16x192xf32>
    %c3 = arith.constant 3 : index
    %c0_37 = arith.constant 0 : index
    %56 = vector.load %arg5[%c3, %c0_37] : memref<9x192xf32, #tpu.memory_space<vmem>>, vector<1x192xf32>
    %57 = vector.shape_cast %56 : vector<1x192xf32> to vector<192xf32>
    %58 = vector.shape_cast %57 : vector<192xf32> to vector<1x1x192xf32>
    %59 = vector.broadcast %58 : vector<1x1x192xf32> to vector<16x16x192xf32>
    %60 = arith.mulf %55, %59 : vector<16x16x192xf32>
    %61 = arith.addf %53, %60 : vector<16x16x192xf32>
    %c1_38 = arith.constant 1 : index
    %c1_39 = arith.constant 1 : index
    %c0_40 = arith.constant 0 : index
    %62 = vector.load %arg10[%c1_38, %c1_39, %c0_40] : memref<18x24x192xbf16, #tpu.memory_space<vmem>>, vector<16x16x192xbf16>
    %63 = arith.extf %62 : vector<16x16x192xbf16> to vector<16x16x192xf32>
    %c4 = arith.constant 4 : index
    %c0_41 = arith.constant 0 : index
    %64 = vector.load %arg5[%c4, %c0_41] : memref<9x192xf32, #tpu.memory_space<vmem>>, vector<1x192xf32>
    %65 = vector.shape_cast %64 : vector<1x192xf32> to vector<192xf32>
    %66 = vector.shape_cast %65 : vector<192xf32> to vector<1x1x192xf32>
    %67 = vector.broadcast %66 : vector<1x1x192xf32> to vector<16x16x192xf32>
    %68 = arith.mulf %63, %67 : vector<16x16x192xf32>
    %69 = arith.addf %61, %68 : vector<16x16x192xf32>
    %c1_42 = arith.constant 1 : index
    %c2_43 = arith.constant 2 : index
    %c0_44 = arith.constant 0 : index
    %70 = vector.load %arg10[%c1_42, %c2_43, %c0_44] : memref<18x24x192xbf16, #tpu.memory_space<vmem>>, vector<16x16x192xbf16>
    %71 = arith.extf %70 : vector<16x16x192xbf16> to vector<16x16x192xf32>
    %c5 = arith.constant 5 : index
    %c0_45 = arith.constant 0 : index
    %72 = vector.load %arg5[%c5, %c0_45] : memref<9x192xf32, #tpu.memory_space<vmem>>, vector<1x192xf32>
    %73 = vector.shape_cast %72 : vector<1x192xf32> to vector<192xf32>
    %74 = vector.shape_cast %73 : vector<192xf32> to vector<1x1x192xf32>
    %75 = vector.broadcast %74 : vector<1x1x192xf32> to vector<16x16x192xf32>
    %76 = arith.mulf %71, %75 : vector<16x16x192xf32>
    %77 = arith.addf %69, %76 : vector<16x16x192xf32>
    %c2_46 = arith.constant 2 : index
    %c0_47 = arith.constant 0 : index
    %c0_48 = arith.constant 0 : index
    %78 = vector.load %arg10[%c2_46, %c0_47, %c0_48] : memref<18x24x192xbf16, #tpu.memory_space<vmem>>, vector<16x16x192xbf16>
    %79 = arith.extf %78 : vector<16x16x192xbf16> to vector<16x16x192xf32>
    %c6 = arith.constant 6 : index
    %c0_49 = arith.constant 0 : index
    %80 = vector.load %arg5[%c6, %c0_49] : memref<9x192xf32, #tpu.memory_space<vmem>>, vector<1x192xf32>
    %81 = vector.shape_cast %80 : vector<1x192xf32> to vector<192xf32>
    %82 = vector.shape_cast %81 : vector<192xf32> to vector<1x1x192xf32>
    %83 = vector.broadcast %82 : vector<1x1x192xf32> to vector<16x16x192xf32>
    %84 = arith.mulf %79, %83 : vector<16x16x192xf32>
    %85 = arith.addf %77, %84 : vector<16x16x192xf32>
    %c2_50 = arith.constant 2 : index
    %c1_51 = arith.constant 1 : index
    %c0_52 = arith.constant 0 : index
    %86 = vector.load %arg10[%c2_50, %c1_51, %c0_52] : memref<18x24x192xbf16, #tpu.memory_space<vmem>>, vector<16x16x192xbf16>
    %87 = arith.extf %86 : vector<16x16x192xbf16> to vector<16x16x192xf32>
    %c7 = arith.constant 7 : index
    %c0_53 = arith.constant 0 : index
    %88 = vector.load %arg5[%c7, %c0_53] : memref<9x192xf32, #tpu.memory_space<vmem>>, vector<1x192xf32>
    %89 = vector.shape_cast %88 : vector<1x192xf32> to vector<192xf32>
    %90 = vector.shape_cast %89 : vector<192xf32> to vector<1x1x192xf32>
    %91 = vector.broadcast %90 : vector<1x1x192xf32> to vector<16x16x192xf32>
    %92 = arith.mulf %87, %91 : vector<16x16x192xf32>
    %93 = arith.addf %85, %92 : vector<16x16x192xf32>
    %c2_54 = arith.constant 2 : index
    %c2_55 = arith.constant 2 : index
    %c0_56 = arith.constant 0 : index
    %94 = vector.load %arg10[%c2_54, %c2_55, %c0_56] : memref<18x24x192xbf16, #tpu.memory_space<vmem>>, vector<16x16x192xbf16>
    %95 = arith.extf %94 : vector<16x16x192xbf16> to vector<16x16x192xf32>
    %c8 = arith.constant 8 : index
    %c0_57 = arith.constant 0 : index
    %96 = vector.load %arg5[%c8, %c0_57] : memref<9x192xf32, #tpu.memory_space<vmem>>, vector<1x192xf32>
    %97 = vector.shape_cast %96 : vector<1x192xf32> to vector<192xf32>
    %98 = vector.shape_cast %97 : vector<192xf32> to vector<1x1x192xf32>
    %99 = vector.broadcast %98 : vector<1x1x192xf32> to vector<16x16x192xf32>
    %100 = arith.mulf %95, %99 : vector<16x16x192xf32>
    %101 = arith.addf %93, %100 : vector<16x16x192xf32>
    %c0_58 = arith.constant 0 : index
    %c0_59 = arith.constant 0 : index
    %102 = vector.load %arg6[%c0_58, %c0_59] : memref<1x192xf32, #tpu.memory_space<vmem>>, vector<1x192xf32>
    %103 = vector.shape_cast %102 : vector<1x192xf32> to vector<1x1x192xf32>
    %104 = vector.broadcast %103 : vector<1x1x192xf32> to vector<16x16x192xf32>
    %105 = arith.addf %101, %104 : vector<16x16x192xf32>
    %cst_60 = arith.constant 0.000000e+00 : f32
    %106 = vector.broadcast %cst_60 : f32 to vector<16x16x192xf32>
    %107 = arith.maximumf %105, %106 : vector<16x16x192xf32>
    %cst_61 = arith.constant 6.000000e+00 : f32
    %108 = vector.broadcast %cst_61 : f32 to vector<16x16x192xf32>
    %109 = arith.minimumf %107, %108 : vector<16x16x192xf32>
    %110 = vector.shape_cast %109 : vector<16x16x192xf32> to vector<256x192xf32>
    %111 = arith.truncf %110 : vector<256x192xf32> to vector<256x192xbf16>
    %c0_62 = arith.constant 0 : index
    %c0_63 = arith.constant 0 : index
    %112 = vector.load %arg7[%c0_62, %c0_63] : memref<192x32xbf16, #tpu.memory_space<vmem>>, vector<192x32xbf16>
    %cst_64 = arith.constant dense<0.000000e+00> : vector<256x32xf32>
    %113 = tpu.matmul %111, %112, %cst_64 {dimension_numbers = #tpu.dot_dimension_numbers<[1], [0], [0], [1], [0, 0, 1, 1], [], []>} : vector<256x192xbf16>, vector<192x32xbf16>, vector<256x32xf32> -> vector<256x32xf32>
    %c0_65 = arith.constant 0 : index
    %c0_66 = arith.constant 0 : index
    %114 = vector.load %arg8[%c0_65, %c0_66] : memref<1x32xf32, #tpu.memory_space<vmem>>, vector<1x32xf32>
    %115 = vector.broadcast %114 : vector<1x32xf32> to vector<256x32xf32>
    %116 = arith.addf %113, %115 : vector<256x32xf32>
    %117 = vector.extract_strided_slice %4 {offsets = [1, 1, 0], sizes = [16, 16, 32], strides = [1, 1, 1]} : vector<18x24x32xbf16> to vector<16x16x32xbf16>
    %118 = arith.extf %117 : vector<16x16x32xbf16> to vector<16x16x32xf32>
    %119 = vector.shape_cast %118 : vector<16x16x32xf32> to vector<256x32xf32>
    %120 = arith.addf %116, %119 : vector<256x32xf32>
    %c0_67 = arith.constant 0 : index
    %c0_68 = arith.constant 0 : index
    %c0_69 = arith.constant 0 : index
    %121 = vector.load %arg9[%c0_67, %c0_68, %c0_69] : memref<1x256x32xf32, #tpu.memory_space<vmem>>, vector<1x256x32xf32>
    %122 = vector.shape_cast %121 : vector<1x256x32xf32> to vector<256x32xf32>
    %123 = vector.shape_cast %120 : vector<256x32xf32> to vector<1x256x32xf32>
    tpu.vector_store %arg9[%c0_67, %c0_68, %c0_69], %123 {strides = array<i32>} : memref<1x256x32xf32, #tpu.memory_space<vmem>>, vector<1x256x32xf32>,
    return
  }
  func.func @transform_0(%arg0: i32, %arg1: i32) -> (i32, i32, i32, i32) {
    %c0_i32 = arith.constant 0 : i32
    %c0_i32_0 = arith.constant 0 : i32
    %c0_i32_1 = arith.constant 0 : i32
    %c0_i32_2 = arith.constant 0 : i32
    return %arg0, %c0_i32, %c0_i32_0, %c0_i32_1 : i32, i32, i32, i32
  }
  func.func @transform_1(%arg0: i32, %arg1: i32) -> (i32, i32) {
    %c0_i32 = arith.constant 0 : i32
    %c0_i32_0 = arith.constant 0 : i32
    %c0_i32_1 = arith.constant 0 : i32
    return %c0_i32, %c0_i32_0 : i32, i32
  }
  func.func @transform_2(%arg0: i32, %arg1: i32) -> (i32, i32) {
    %c0_i32 = arith.constant 0 : i32
    %c0_i32_0 = arith.constant 0 : i32
    %c0_i32_1 = arith.constant 0 : i32
    return %c0_i32, %c0_i32_0 : i32, i32
  }
  func.func @transform_3(%arg0: i32, %arg1: i32) -> (i32, i32) {
    %c0_i32 = arith.constant 0 : i32
    %c0_i32_0 = arith.constant 0 : i32
    %c0_i32_1 = arith.constant 0 : i32
    return %c0_i32, %c0_i32_0 : i32, i32
  }
  func.func @transform_4(%arg0: i32, %arg1: i32) -> (i32, i32) {
    %c0_i32 = arith.constant 0 : i32
    %c0_i32_0 = arith.constant 0 : i32
    %c0_i32_1 = arith.constant 0 : i32
    return %c0_i32, %c0_i32_0 : i32, i32
  }
  func.func @transform_5(%arg0: i32, %arg1: i32) -> (i32, i32) {
    %c0_i32 = arith.constant 0 : i32
    %c0_i32_0 = arith.constant 0 : i32
    %c0_i32_1 = arith.constant 0 : i32
    return %c0_i32, %c0_i32_0 : i32, i32
  }
  func.func @transform_6(%arg0: i32, %arg1: i32) -> (i32, i32) {
    %c0_i32 = arith.constant 0 : i32
    %c0_i32_0 = arith.constant 0 : i32
    %c0_i32_1 = arith.constant 0 : i32
    return %c0_i32, %c0_i32_0 : i32, i32
  }
  func.func @transform_7(%arg0: i32, %arg1: i32) -> (i32, i32, i32) {
    %c0_i32 = arith.constant 0 : i32
    %c0_i32_0 = arith.constant 0 : i32
    return %arg0, %arg1, %c0_i32 : i32, i32, i32
  }
}

</mosaic_0001>

<bundles_post_ra>
// kernel: tpu_custom_call.1
= control target key start
LH: loop header
LB: loop body
LE: loop exit
PB: predicated region body
PF: predicated region fallthrough
CT: control target
= control target key end

     0   :  { %12 = vsyncpa [#allocation4], 0  ;;  %s10554_s0 = inlined_call_operand.hbm [shape: bf16[2,18,24,32], index: 0, kind: input, shape index: {}]   ;;  %s10555_s1 = inlined_call_operand.vmem [shape: bf16[32,192], index: 1, kind: input, shape index: {}]   ;;  %s10556_s2 = inlined_call_operand.vmem [shape: f32[1,192], index: 2, kind: input, shape index: {}]   ;;  %s10557_s3 = inlined_call_operand.vmem [shape: f32[9,192], index: 3, kind: input, shape index: {}]   ;;  %s10558_s4 = inlined_call_operand.vmem [shape: f32[1,192], index: 4, kind: input, shape index: {}]   ;;  %s10559_s5 = inlined_call_operand.vmem [shape: bf16[192,32], index: 5, kind: input, shape index: {}]   ;;  %s10560_s6 = inlined_call_operand.vmem [shape: f32[1,32], index: 6, kind: input, shape index: {}]   ;;  %s10561_s7 = inlined_call_operand.vmem [shape: f32[2,256,32], index: 7, kind: output, shape index: {}]  }
   0x1   :  { %14 = vsyncpa [#allocation4 + $0x1], 0  ;;  %s7015_s24 = smov 0   ;;  %s7017_s25 = smov 0  }
   0x2   :  { %s7019_s26 = smov 0   ;;  %s7021_s27 = smov 0  }
   0x3   :  { %s7023_s28 = smov 0   ;;  %s7025_s29 = smov 0  }
   0x4 LB: > { %s6519_s30 = sadd.s32 4294967295, %s6969_s29   ;;  %s32_s8 = sadd.s32 1, %s6965_s28  ;;  %s6969_s29 = sphi %s7025_s29, %s20_s29   ;;  %s6965_s28 = sphi %s7023_s28, %s10787_s28   ;;  %s6961_s27 = sphi %s7021_s27, %s10786_s27   ;;  %s6957_s26 = sphi %s7019_s26, %s10785_s26   ;;  %s6953_s25 = sphi %s7017_s25, %s10784_s25   ;;  %s6949_s24 = sphi %s7015_s24, %s10783_s24  }
   0x5   : > { %p34_p0 = scmp.ge.s32.totalorder %s32_s8, 2  ;;  %s39_s9 = sadd.s32 1, %s6957_s26 }
   0x6   : > { %p46_p1 = scmp.ne.s32.totalorder %s6957_s26, %s6953_s25  ;;  %p47_p2 = scmp.eq.s32.totalorder %s6969_s29, 0 }
   0x7   : > { %s10789_s8 = smov (%p34_p0, %s32_s8), 0  ;;  %p52_p4 = scmp.ne.s32.totalorder %s6953_s25, %s6949_s24 }
   0x8   : > { %p48_p3 = por %p47_p2, %p46_p1  ;;  %s36_s10 = ssub.s32 %s6965_s28, %s10789_s8 }
   0x9   : > { %p53_p5 = scmp.eq.s32.totalorder %s6519_s30, 0  ;;  %p37_p6 = scmp.eq.s32.totalorder %s36_s10, 0 }
   0xa   : > { %p6742_p8 = scmp.lt.s32.totalorder %s6969_s29, 2  ;;  %s248_s13 = sand.u32 1, %s6957_s26  }
   0xb   : > { %p7054_p7 = por %p53_p5, %p52_p4  ;;  %s6734_s14 = smul.u32 3456, %s6965_s28 }
   0xc   : > { %s7060_s12 = scalar_select %p37_p6, %s6957_s26, %s39_s9  }
   0xd   : > { %s6733_s15 = smul.u32 216, %s248_s13  ;;  %s7067_s18 = scalar_lea.hbm %s10554_s0, %s6734_s14 }
   0xe   : > { %p7069_p9 = pnand %p6742_p8, %p48_p3  ;;  %s7075_s22 = scalar_lea.sflag [#allocation4], %s248_s13 }
   0xf   : > { %s252_s20 = scalar_lea.vmem [#allocation3], %s6733_s15  ;;  %s6889_s23 = scalar_lea.hbm %s7067_s18, 3456 }
  0x10   : > { %s259_s21 = sshll.u32 %s252_s20, 4  ;;  %p6890_p10 = scmp.ne.s32.totalorder %s7067_s18, %s6889_s23  ;;  %s7073_s21 = int_to_ptr.vmem [resolvable:$true] %s259_s21 }
  0x11   : > { %p6891_p11 = pneg %p7069_p9  ;;  %s6894_s9 = scalar_lea.hbm %s10554_s0, 6912 }
  0x12   : > { %p6895_p0 = scmp.lt.u32.totalorder %s7067_s18, %s10554_s0  ;;  %p6896_p1 = scmp.lt.u32.totalorder %s6894_s9, %s6889_s23 }
  0x13   : > { %p6892_p12 = pnand %p6891_p11, %p6890_p10  ;;  %p6898_p3 = scmp.lt.u32.totalorder %s6889_s23, %s7067_s18 }
  0x14   : > { %p6897_p2 = por %p6896_p1, %p6895_p0 }
  0x15   : > { %p6893_p13 = pneg %p6892_p12 }
  0x16   : > { %p6899_p4 = por %p6898_p3, %p6897_p2 }
  0x18   : > { %p6900_p5 = pnand %p6899_p4, %p6893_p13 }
  0x1a   : > { %6903 = shalt.err (!%p6900_p5)
}
  0x1b   : > { %s6904_s13 = scalar_lea.vmem %s7073_s21, 3456  ;;  %s6971_s15 = smov [#allocation3]  }
  0x1c   : > { %p6905_p6 = scmp.ne.s32.totalorder %s7073_s21, %s6904_s13  ;;  %s6909_s16 = sshll.u32 %s6971_s15, 4  ;;  %s6910_s16 = int_to_ptr.vmem [resolvable:$false] %s6909_s16 }
  0x1d   : > { %s6911_s17 = scalar_lea.vmem %s6910_s16, 6912  ;;  %p6912_p12 = scmp.lt.s32.totalorder %s7073_s21, %s6910_s16 }
  0x1e   : > { %p6907_p8 = pnand %p6905_p6, %p6891_p11  ;;  %p6913_p0 = scmp.lt.s32.totalorder %s6911_s17, %s6904_s13 }
  0x20   : > { %p6908_p10 = pneg %p6907_p8  ;;  %p6914_p1 = por %p6913_p0, %p6912_p12 }
  0x22   : > { %p6915_p2 = pnand %p6914_p1, %p6908_p10 }
  0x24   : > { %6918 = shalt.err (!%p6915_p2)
}
  0x25   : > { %s6972_s20 = smov 64   ;;  %s6973_s23 = smov 4  }
  0x26   : > { %6741 = dma.hbm_to_vmem [thread:$0]  (!%p7069_p9), %s7067_s18, 3456, %s7073_s21, %s7075_s22, %s6972_s20, %s6972_s20, %s6973_s23  }
  0x27   : > { %p6524_p11 = scmp.ge.s32.totalorder %s6969_s29, 1  ;;  %p267_p13 = scmp.lt.s32.totalorder %s6969_s29, 3 }
  0x29   : > { %p268_p3 = pnand %p6524_p11, %p267_p13 }
  0x2b   : > { %271 = sbr.rel (%p268_p3) target bundleno = 1307 (0x51b), region = 48 }
  0x32   : > { %s273_s24 = sand.u32 1, %s6953_s25  }
  0x33   : > { %s6735_s30 = smul.u32 216, %s273_s24  ;;  %s274_s9 = scalar_lea.sflag [#allocation4], %s273_s24 }
  0x35   : > { %s7106_s10 = scalar_lea.vmem [#allocation3], %s6735_s30 }
  0x36   : > { %6944 = dma.done.wait (%p7054_p7), %s274_s9, 3456  }
  0x37   : > { %6946 = vsyncadd (%p7054_p7), %s274_s9, 4294963840  ;;  %v10562_v0 = vmov 0   ;;  %v6794_v1 = vld [vmem:[%s10555_s1 + $0x4] ss:$8 sps:$4 sm:$0xff]   ;;  %v6796_v2 = vld [vmem:[%s10555_s1] ss:$8 sps:$4 sm:$0xff]   ;;  %v387_v43 = vlaneseq }
  0x38   : > { %666 = vmatprep.mubr.bf16.mxu0 %v10562_v0  ;;  %5992 = vmatprep.subr.bf16.mxu1 %v10562_v0  ;;  %v6797_v3 = vld [vmem:[%s10555_s1 + $0x14] ss:$8 sps:$4 sm:$0xff]   ;;  %v6799_v4 = vld [vmem:[%s10555_s1 + $0x10] ss:$8 sps:$4 sm:$0xff]   ;;  %vm552_vm0 = vcmask 261120   ;;  %v333_v8 = vld [vmem:[%s7106_s10 + $0x18] sm:$0xff]  }
  0x39   : > { %634 = vmatprep.subr.bf16.mxu0 %v6794_v1  ;;  %v6800_v5 = vld [vmem:[%s7106_s10] sm:$0xff]   ;;  %v329_v6 = vld [vmem:[%s7106_s10 + $0x8] sm:$0xff]   ;;  %v331_v7 = vld [vmem:[%s7106_s10 + $0x10] sm:$0xff]   ;;  %v388_v44 = vshrl.u32 %v387_v43, 7  ;;  %vm1513_vm1 = vcmask 1043456   ;;  %vm1514_vm2 = vcmask 523268  }
  0x3a   : > { %635 = vmatpush1.bf16.msra.mxu0 %v6796_v2  ;;  %v335_v9 = vld [vmem:[%s7106_s10 + $0x20] sm:$0xff]   ;;  %v337_v10 = vld [vmem:[%s7106_s10 + $0x28] sm:$0xff]   ;;  %v339_v11 = vld [vmem:[%s7106_s10 + $0x30] sm:$0xff]   ;;  %vm1570_vm4 = vcmask 1040384   ;;  %vm1571_vm5 = vsmask.f32 256 }
  0x3b   : > { %636 = vmatprep.subr.bf16.mxu0 %v6797_v3  ;;  %v341_v12 = vld [vmem:[%s7106_s10 + $0x38] sm:$0xff]   ;;  %v343_v13 = vld [vmem:[%s7106_s10 + $0x40] sm:$0xff]   ;;  %v345_v14 = vld [vmem:[%s7106_s10 + $0x48] sm:$0xff]   ;;  %v7252_v46 = vsub.s32 0, %v388_v44  ;;  %v7257_v48 = vsub.s32 1, %v388_v44  ;;  %vm1573_vm6 = vcmask 520196  }
  0x3c   : > { %v347_v15 = vld [vmem:[%s7106_s10 + $0x50] sm:$0xff]   ;;  %v349_v16 = vld [vmem:[%s7106_s10 + $0x58] sm:$0xff]   ;;  %v351_v17 = vld [vmem:[%s7106_s10 + $0x60] sm:$0xff]   ;;  %vm1574_vm7 = vsmask.f32 4352  ;;  %p313_p7 = scmp.lt.s32.totalorder %s6961_s27, 1 }
  0x3d   : > { %v353_v18 = vld [vmem:[%s7106_s10 + $0x68] sm:$0xff]   ;;  %v355_v19 = vld [vmem:[%s7106_s10 + $0x70] sm:$0xff]   ;;  %v357_v20 = vld [vmem:[%s7106_s10 + $0x78] sm:$0xff]   ;;  %vm1632_vm8 = vsmask.f32 7938 }
  0x3e   : > { %637 = vmatpush1.bf16.msra.mxu0 %v6799_v4  ;;  %v6827_v21 = vld [vmem:[%s10559_s5] sm:$0xff]   ;;  %v6828_v22 = vld [vmem:[%s10559_s5 + $0x8] sm:$0xff]   ;;  %v6829_v24 = vld [vmem:[%s10559_s5 + $0x10] sm:$0xff]   ;;  %vm1635_vm11 = vsmask.f32 7954  ;;  %s10791_s27 = smov (!%p313_p7, %s6961_s27), 1 }
  0x3f   : > { %5993 = vmatpush1.bf16.msra.mxu1 %v6827_v21  ;;  %v359_v23 = vld [vmem:[%s7106_s10 + $0x80] sm:$0xff]   ;;  %v6830_v25 = vld [vmem:[%s10559_s5 + $0x18] sm:$0xff]   ;;  %v6831_v27 = vld [vmem:[%s10559_s5 + $0x20] sm:$0xff]   ;;  %s6678_s23 = sshll.u32 %s10791_s27, 8 }
  0x40   : > { %5994 = vmatprep.subr.bf16.mxu1 %v10562_v0  ;;  %v361_v26 = vld [vmem:[%s7106_s10 + $0x88] sm:$0xff]   ;;  %v6832_v28 = vld [vmem:[%s10559_s5 + $0x28] sm:$0xff]   ;;  %v363_v29 = vld [vmem:[%s7106_s10 + $0x90] sm:$0xff]   ;;  %s10369_s30 = scalar_lea.vmem %s10561_s7, %s6678_s23 }
  0x41   : > { %6558 = vmatmul.mubr.msk.bf16.vlgmr.msra.gmra.mrb[0].mxu0 %vm552_vm0, %v6800_v5  ;;  %v6833_v30 = vld [vmem:[%s10559_s5 + $0x30] sm:$0xff]   ;;  %v6834_v31 = vld [vmem:[%s10559_s5 + $0x38] sm:$0xff]   ;;  %v365_v32 = vld [vmem:[%s7106_s10 + $0x98] sm:$0xff]  }
  0x42   : > { %676 = vmatprep.mubr.bf16.mxu0 %v10562_v0  ;;  %v6835_v33 = vld [vmem:[%s10559_s5 + $0x40] sm:$0xff]   ;;  %v6836_v34 = vld [vmem:[%s10559_s5 + $0x48] sm:$0xff]   ;;  %v6837_v36 = vld [vmem:[%s10559_s5 + $0x50] sm:$0xff]  }
  0x43   : > { %5995 = vmatpush1.bf16.msra.mxu1 %v6828_v22  ;;  %v367_v35 = vld [vmem:[%s7106_s10 + $0xa0] sm:$0xff]   ;;  %v6838_v37 = vld [vmem:[%s10559_s5 + $0x58] sm:$0xff]   ;;  %v373_v40 = vld [vmem:[%s7106_s10 + $0xb8] sm:$0xff]  }
  0x44   : > { %5996 = vmatprep.subr.bf16.mxu1 %v10562_v0  ;;  %v369_v38 = vld [vmem:[%s7106_s10 + $0xa8] sm:$0xff]   ;;  %v371_v39 = vld [vmem:[%s7106_s10 + $0xb0] sm:$0xff]   ;;  %v375_v41 = vld [vmem:[%s7106_s10 + $0xc0] sm:$0xff]  }
  0x45   : > { %v377_v42 = vld [vmem:[%s7106_s10 + $0xc8] sm:$0xff]   ;;  %v6826_v45 = vld [vmem:[%s7106_s10 + $0xd0] sm:$0xff]   ;;  %vm7272_vm3 = vmor %vm1514_vm2, %vm1513_vm1 }
  0x46   : > { %v385_v47 = vld [vmem:[%s10556_s2] sm:$0x3]  ;;  %vm7287_vm9 = vmand %vm1570_vm4, %vm1571_vm5  ;;  %v6641_v22 = vld [vmem:[%s10557_s3 + $0x3] ss:$8 sm:$0x3]  ;;  %vm5943_vm4 = vcmask 523264  }
  0x47   : > { %5997 = vmatpush1.bf16.msra.mxu1 %v6829_v24  ;;  %v7261_v49 = vrot.slane %v385_v47, %v7252_v46  ;;  %v7264_v50 = vrot.slane %v385_v47, %v7257_v48  ;;  %vm7297_vm10 = vmand %vm1573_vm6, %vm1574_vm7  ;;  %v6644_v44 = vld [vmem:[%s10557_s3 + $0x6] ss:$8 sm:$0x3] }
  0x48   : > { %5998 = vmatprep.subr.bf16.mxu1 %v10562_v0  ;;  %vm7332_vm12 = vmor %vm7297_vm10, %vm7287_vm9 }
  0x49   : > { %6559 = vmatmul.mubr.msk.bf16.gmra.mrb[4].mxu0 %vm552_vm0, %v329_v6  ;;  %vm7380_vm13 = vmand %vm1513_vm1, %vm1632_vm8  ;;  %vm2133_vm1 = vcmask 1046528  }
  0x4a   : > { %686 = vmatprep.mubr.bf16.mxu0 %v10562_v0  ;;  %vm7399_vm14 = vmand %vm1514_vm2, %vm1635_vm11  ;;  %vm2675_vm2 = vcmask 1045504  }
  0x4b   : > { %5999 = vmatpush1.bf16.msra.mxu1 %v6830_v25  ;;  %vm7422_vm15 = vmor %vm7399_vm14, %vm7380_vm13 }
  0x4c   : > { %6000 = vmatprep.subr.bf16.mxu1 %v10562_v0 }
  0x4f   : > { %6001 = vmatpush1.bf16.msra.mxu1 %v6831_v27  ;;  %v6642_v27 = vld [vmem:[%s10557_s3 + $0x4] ss:$8 sm:$0x3] }
  0x50   : > { %6002 = vmatprep.subr.bf16.mxu1 %v10562_v0  ;;  %v7352_v43 = vrot.slane %v6642_v27, %v7252_v46 }
  0x51   : > { %6560 = vmatmul.mubr.msk.bf16.gmra.mrb[8].mxu0 %vm552_vm0, %v331_v7 }
  0x52   : > { %696 = vmatprep.mubr.bf16.mxu0 %v10562_v0 }
  0x53   : > { %6003 = vmatpush1.bf16.msra.mxu1 %v6832_v28 }
  0x54   : > { %6004 = vmatprep.subr.bf16.mxu1 %v10562_v0 }
  0x57   : > { %6005 = vmatpush1.bf16.msra.mxu1 %v6833_v30 }
  0x58   : > { %6006 = vmatprep.subr.bf16.mxu1 %v10562_v0 }
  0x59   : > { %6561 = vmatmul.mubr.msk.bf16.gmra.mrb[12].mxu0 %vm552_vm0, %v333_v8 }
  0x5a   : > { %706 = vmatprep.mubr.bf16.mxu0 %v10562_v0 }
  0x5b   : > { %6007 = vmatpush1.bf16.msra.mxu1 %v6834_v31 }
  0x5c   : > { %6008 = vmatprep.subr.bf16.mxu1 %v10562_v0 }
  0x5f   : > { %6009 = vmatpush1.bf16.msra.mxu1 %v6835_v33  ;;  %v10604_v33 = vmov 0 }
  0x60   : > { %6010 = vmatprep.subr.bf16.mxu1 %v10562_v0  ;;  %v10605_v33 = vsel %vm7332_vm12, 4294967295, %v10604_v33 }
  0x61   : > { %6562 = vmatmul.mubr.msk.bf16.gmra.mrb[16].mxu0 %vm552_vm0, %v335_v9  ;;  %v6640_v9 = vld [vmem:[%s10557_s3 + $0x2] ss:$8 sm:$0x3]  ;;  %10606 = vst [vmem:[#allocation6_spill] sm:$0xff] %v10605_v33 }
  0x62   : > { %716 = vmatprep.mubr.bf16.mxu0 %v10562_v0  ;;  %v7311_v25 = vrot.slane %v6640_v9, %v7252_v46 }
  0x63   : > { %6011 = vmatpush1.bf16.msra.mxu1 %v6836_v34 }
  0x64   : > { %6012 = vmatprep.subr.bf16.mxu1 %v10562_v0 }
  0x67   : > { %6013 = vmatpush1.bf16.msra.mxu1 %v6837_v36 }
  0x68   : > { %6014 = vmatprep.subr.bf16.mxu1 %v10562_v0 }
  0x69   : > { %6563 = vmatmul.mubr.msk.bf16.gmra.mrb[20].mxu0 %vm552_vm0, %v337_v10 }
  0x6a   : > { %726 = vmatprep.mubr.bf16.mxu0 %v10562_v0 }
  0x6b   : > { %6015 = vmatpush1.bf16.msra.mxu1 %v6838_v37  ;;  %v7343_v37 = vrot.slane %v6641_v22, %v7252_v46 }
  0x71   : > { %6564 = vmatmul.mubr.msk.bf16.gmra.mrb[24].mxu0 %vm552_vm0, %v339_v11 }
  0x72   : > { %736 = vmatprep.mubr.bf16.mxu0 %v10562_v0 }
  0x79   : > { %6565 = vmatmul.mubr.msk.bf16.gmra.mrb[28].mxu0 %vm552_vm0, %v341_v12 }
  0x7a   : > { %746 = vmatprep.mubr.bf16.mxu0 %v10562_v0 }
  0x81   : > { %6566 = vmatmul.mubr.msk.bf16.gmra.mrb[32].mxu0 %vm552_vm0, %v343_v13  ;;  %v6639_v13 = vld [vmem:[%s10557_s3 + $0x1] ss:$8 sm:$0x3] }
  0x82   : > { %756 = vmatprep.mubr.bf16.mxu0 %v10562_v0  ;;  %v7320_v30 = vrot.slane %v6639_v13, %v7252_v46  ;;  %v7323_v31 = vrot.slane %v6639_v13, %v7257_v48 }
  0x89   : > { %6567 = vmatmul.mubr.msk.bf16.gmra.mrb[36].mxu0 %vm552_vm0, %v345_v14 }
  0x8a   : > { %766 = vmatprep.mubr.bf16.mxu0 %v10562_v0 }
  0x91   : > { %6568 = vmatmul.mubr.msk.bf16.gmra.mrb[40].mxu0 %vm552_vm0, %v347_v15 }
  0x92   : > { %776 = vmatprep.mubr.bf16.mxu0 %v10562_v0 }
  0x99   : > { %6569 = vmatmul.mubr.msk.bf16.gmra.mrb[44].mxu0 %vm552_vm0, %v349_v16 }
  0x9a   : > { %786 = vmatprep.mubr.bf16.mxu0 %v10562_v0 }
  0xa1   : > { %6570 = vmatmul.mubr.msk.bf16.gmra.mrb[48].mxu0 %vm552_vm0, %v351_v17 }
  0xa2   : > { %796 = vmatprep.mubr.bf16.mxu0 %v10562_v0 }
  0xa9   : > { %6571 = vmatmul.mubr.msk.bf16.gmra.mrb[52].mxu0 %vm552_vm0, %v353_v18  ;;  %v1804_v18 = vld [vmem:[%s10557_s3] ss:$8 sm:$0x3] }
  0xaa   : > { %806 = vmatprep.mubr.bf16.mxu0 %v10562_v0  ;;  %v7340_v36 = vrot.slane %v1804_v18, %v7257_v48 }
  0xb1   : > { %6572 = vmatmul.mubr.msk.bf16.gmra.mrb[56].mxu0 %vm552_vm0, %v355_v19 }
  0xb2   : > { %816 = vmatprep.mubr.bf16.mxu0 %v10562_v0 }
  0xb9   : > { %6573 = vmatmul.mubr.msk.bf16.gmra.mrb[60].mxu0 %vm552_vm0, %v357_v20 }
  0xba   : > { %826 = vmatprep.mubr.bf16.mxu0 %v10562_v0 }
  0xc1   : > { %6574 = vmatmul.mubr.msk.bf16.gmra.mrb[64].mxu0 %vm552_vm0, %v359_v23 }
  0xc2   : > { %836 = vmatprep.mubr.bf16.mxu0 %v10562_v0 }
  0xc9   : > { %6575 = vmatmul.mubr.msk.bf16.gmra.mrb[68].mxu0 %vm552_vm0, %v361_v26  ;;  %v7314_v26 = vrot.slane %v6640_v9, %v7257_v48 }
  0xca   : > { %846 = vmatprep.mubr.bf16.mxu0 %v10562_v0 }
  0xd1   : > { %6576 = vmatmul.mubr.msk.bf16.gmra.mrb[72].mxu0 %vm552_vm0, %v363_v29 }
  0xd2   : > { %856 = vmatprep.mubr.bf16.mxu0 %v10562_v0 }
  0xd9   : > { %6577 = vmatmul.mubr.msk.bf16.gmra.mrb[76].mxu0 %vm552_vm0, %v365_v32  ;;  %v6643_v32 = vld [vmem:[%s10557_s3 + $0x5] ss:$8 sm:$0x3] }
  0xda   : > { %866 = vmatprep.mubr.bf16.mxu0 %v10562_v0 }
  0xe1   : > { %6578 = vmatmul.mubr.msk.bf16.gmra.mrb[80].mxu0 %vm552_vm0, %v367_v35  ;;  %v7337_v35 = vrot.slane %v1804_v18, %v7252_v46 }
  0xe2   : > { %876 = vmatprep.mubr.bf16.mxu0 %v10562_v0 }
  0xe3   : > { %10607 = vst [vmem:[#allocation7_spill] sm:$0xff] %v7337_v35 }
  0xe9   : > { %6579 = vmatmul.mubr.msk.bf16.gmra.mrb[84].mxu0 %vm552_vm0, %v369_v38  ;;  %v6646_v38 = vld [vmem:[%s10557_s3 + $0x10] ss:$8 sm:$0x3] }
  0xea   : > { %886 = vmatprep.mubr.bf16.mxu0 %v10562_v0 }
  0xf1   : > { %6580 = vmatmul.mubr.msk.bf16.gmra.mrb[88].mxu0 %vm552_vm0, %v371_v39 }
  0xf2   : > { %896 = vmatprep.mubr.bf16.mxu0 %v10562_v0 }
  0xf9   : > { %6581 = vmatmul.mubr.msk.bf16.gmra.mrb[92].mxu0 %vm552_vm0, %v373_v40 }
  0xfa   : > { %906 = vmatprep.mubr.bf16.mxu0 %v10562_v0 }
 0x101   : > { %6582 = vmatmul.mubr.msk.bf16.gmra.mrb[96].mxu0 %vm552_vm0, %v375_v41 }
 0x102   : > { %916 = vmatprep.mubr.bf16.mxu0 %v10562_v0 }
 0x109   : > { %6583 = vmatmul.mubr.msk.bf16.gmra.mrb[100].mxu0 %vm552_vm0, %v377_v42  ;;  %v7349_v42 = vrot.slane %v6641_v22, %v7257_v48 }
 0x10a   : > { %926 = vmatprep.mubr.bf16.mxu0 %v10562_v0 }
 0x111   : > { %6584 = vmatmul.mubr.msk.bf16.gmra.mrb[104].mxu0 %vm552_vm0, %v6826_v45 }
 0x114   : > { %v668_v51 = vpop.f32.mrb[0].mxu0 }
 0x115   : > { %v669_v52 = vadd.f32 %v668_v51, %v7261_v49  ;;  %v670_v53 = vpop.f32.mrb[1].mxu0 }
 0x116   : > { %v671_v54 = vadd.f32 %v670_v53, %v7264_v50  ;;  %v672_v55 = vpop.f32.mrb[2].mxu0  ;;  %v7362_v53 = vrot.slane %v6643_v32, %v7252_v46 }
 0x117   : > { %v937_v56 = vmax.f32 %v669_v52, 0.0  ;;  %v673_v57 = vadd.f32 %v672_v55, %v7261_v49  ;;  %v674_v58 = vpop.f32.mrb[3].mxu0  ;;  %v7359_v52 = vrot.slane %v6642_v27, %v7257_v48  ;;  %v6645_v55 = vld [vmem:[%s10557_s3 + $0x7] ss:$8 sm:$0x3] }
 0x118   : > { %v938_v59 = vmax.f32 %v671_v54, 0.0  ;;  %v675_v60 = vadd.f32 %v674_v58, %v7264_v50  ;;  %v7365_v54 = vrot.slane %v6643_v32, %v7257_v48  ;;  %v7413_v18 = vrot.slane %v6645_v55, %v7257_v48 }
 0x119   : > { %v1045_v61 = vmin.f32 %v937_v56, 6.0  ;;  %v939_v62 = vmax.f32 %v673_v57, 0.0  ;;  %10608 = vst [vmem:[#allocation8_spill] sm:$0xff] %v7359_v52 }
 0x11a   : > { %v1046_v63 = vmin.f32 %v938_v59, 6.0  ;;  %v940_v1 = vmax.f32 %v675_v60, 0.0  ;;  %10609 = vst [vmem:[#allocation9_spill] sm:$0xff] %v7365_v54  ;;  %v7376_v60 = vrot.slane %v6646_v38, %v7252_v46  ;;  %10616 = vst [vmem:[#allocation12_spill] sm:$0xff] %v7413_v18 }
 0x11b   : > { %v1047_v3 = vmin.f32 %v939_v62, 6.0 }
 0x11c   : > { %v6679_v4 = vpack.c.bf16 %v1046_v63, %v1045_v61  ;;  %v1048_v5 = vmin.f32 %v940_v1, 6.0  ;;  %v678_v6 = vpop.f32.mrb[4].mxu0 }
 0x11d   : > { %v679_v7 = vadd.f32 %v678_v6, %v7261_v49  ;;  %v680_v8 = vpop.f32.mrb[5].mxu0 }
 0x11e   : > { %1516 = vst.msk [vmem:[#allocation2] sm:$0xff] %vm7272_vm3, %v6679_v4  ;;  %v6680_v10 = vpack.c.bf16 %v1048_v5, %v1047_v3  ;;  %v681_v11 = vadd.f32 %v680_v8, %v7264_v50  ;;  %v682_v12 = vpop.f32.mrb[6].mxu0  ;;  %v7386_v3 = vrot.slane %v6644_v44, %v7252_v46  ;;  %v7389_v4 = vrot.slane %v6646_v38, %v7257_v48  ;;  %v5604_v5 = vld [vmem:[%s10558_s4] sm:$0x3] }
 0x11f   : > { %v941_v15 = vmax.f32 %v679_v7, 0.0  ;;  %v683_v16 = vadd.f32 %v682_v12, %v7261_v49  ;;  %v684_v17 = vpop.f32.mrb[7].mxu0  ;;  %v7416_v19 = vrot.slane %v5604_v5, %v7252_v46 }
 0x120   : > { %1517 = vst.msk [vmem:[#allocation2 + $0x8] sm:$0xff] %vm7272_vm3, %v6680_v10  ;;  %v942_v20 = vmax.f32 %v681_v11, 0.0  ;;  %v685_v21 = vadd.f32 %v684_v17, %v7264_v50  ;;  %10612 = vst [vmem:[#allocation10_spill] sm:$0xff] %v7389_v4  ;;  %v7407_v10 = vrot.slane %v6644_v44, %v7257_v48  ;;  %v7410_v11 = vrot.slane %v6645_v55, %v7252_v46 }
 0x121   : > { %1697 = vst.msk [vmem:[#allocation2 + $0x8] sm:$0xff] %vm7272_vm3, %v10562_v0  ;;  %v1049_v23 = vmin.f32 %v941_v15, 6.0  ;;  %v943_v24 = vmax.f32 %v683_v16, 0.0 }
 0x122   : > { %v1050_v28 = vmin.f32 %v942_v20, 6.0  ;;  %v944_v29 = vmax.f32 %v685_v21, 0.0  ;;  %10615 = vst [vmem:[#allocation11_spill] sm:$0xff] %v7407_v10  ;;  %v10617_v20 = vmov 0 }
 0x123   : > { %v1051_v34 = vmin.f32 %v943_v24, 6.0  ;;  %v10618_v20 = vsel %vm7422_vm15, 4294967295, %v10617_v20  ;;  %v7433_v24 = vrot.slane %v5604_v5, %v7257_v48 }
 0x124   : > { %v6681_v39 = vpack.c.bf16 %v1050_v28, %v1049_v23  ;;  %v1052_v40 = vmin.f32 %v944_v29, 6.0  ;;  %v688_v41 = vpop.f32.mrb[8].mxu0  ;;  %10619 = vst [vmem:[#allocation13_spill] sm:$0xff] %v10618_v20 }
 0x125   : > { %v1577_v45 = vld [vmem:[#allocation2] sm:$0x11]  ;;  %v689_v47 = vadd.f32 %v688_v41, %v7261_v49  ;;  %v690_v51 = vpop.f32.mrb[9].mxu0 }
 0x126   : > { %v1578_v56 = vsel %vm7332_vm12, 0, %v1577_v45  ;;  %1518 = vst.msk [vmem:[#allocation2 + $0x10] sm:$0xff] %vm7272_vm3, %v6681_v39  ;;  %v6682_v57 = vpack.c.bf16 %v1052_v40, %v1051_v34  ;;  %v691_v58 = vadd.f32 %v690_v51, %v7264_v50  ;;  %v692_v59 = vpop.f32.mrb[10].mxu0 }
 0x127   : > { %1579 = vst [vmem:[#allocation2] sm:$0x11] %v1578_v56  ;;  %v945_v62 = vmax.f32 %v689_v47, 0.0  ;;  %v693_v63 = vadd.f32 %v692_v59, %v7261_v49  ;;  %v694_v1 = vpop.f32.mrb[11].mxu0 }
 0x128   : > { %1696 = vst.msk [vmem:[#allocation2] sm:$0xff] %vm7272_vm3, %v10562_v0  ;;  %1519 = vst.msk [vmem:[#allocation2 + $0x18] sm:$0xff] %vm7272_vm3, %v6682_v57  ;;  %v946_v7 = vmax.f32 %v691_v58, 0.0  ;;  %v695_v8 = vadd.f32 %v694_v1, %v7264_v50  ;;  %v1709_v9 = vld [vmem:[#allocation2 + $0x8] sm:$0xff] }
 0x129   : > { %v1053_v12 = vmin.f32 %v945_v62, 6.0  ;;  %v947_v13 = vmax.f32 %v693_v63, 0.0  ;;  %v1742_v14 = vunpack.c.l.bf16 %v1709_v9  ;;  %v1743_v15 = vunpack.c.h.bf16 %v1709_v9 }
 0x12a   : > { %v1054_v16 = vmin.f32 %v946_v7, 6.0  ;;  %v948_v17 = vmax.f32 %v695_v8, 0.0 }
 0x12b   : > { %v1055_v21 = vmin.f32 %v947_v13, 6.0  ;;  %v7427_v22 = vmul.f32 %v7323_v31, %v1743_v15  ;;  %v7430_v23 = vmul.f32 %v7314_v26, %v1743_v15  ;;  %v7436_v29 = vmul.f32 %v7340_v36, %v1743_v15 }
 0x12c   : > { %v6683_v46 = vpack.c.bf16 %v1054_v16, %v1053_v12  ;;  %v1056_v27 = vmin.f32 %v948_v17, 6.0  ;;  %v698_v28 = vpop.f32.mrb[12].mxu0  ;;  %v7439_v32 = vmul.f32 %v7320_v30, %v1742_v14  ;;  %v7445_v48 = vmul.f32 %v7311_v25, %v1742_v14 }
 0x12d   : > { %v1638_v34 = vld [vmem:[#allocation2 + $0x10] sm:$0xff]  ;;  %v699_v38 = vadd.f32 %v698_v28, %v7261_v49  ;;  %v700_v39 = vpop.f32.mrb[13].mxu0  ;;  %v2138_v40 = vrot.slane %v7427_v22, 1  ;;  %v2680_v41 = vrot.slane %v7430_v23, 2  ;;  %v7455_v62 = vmul.f32 %v7337_v35, %v1742_v14 }
 0x12e   : > { %v1639_v44 = vsel %vm7422_vm15, 0, %v1638_v34  ;;  %1520 = vst.msk [vmem:[#allocation2 + $0x20] sm:$0xff] %vm7272_vm3, %v6683_v46  ;;  %v6684_v45 = vpack.c.bf16 %v1056_v27, %v1055_v21  ;;  %v701_v47 = vadd.f32 %v700_v39, %v7264_v50  ;;  %v702_v51 = vpop.f32.mrb[14].mxu0 }
 0x12f   : > { %1640 = vst [vmem:[#allocation2 + $0x10] sm:$0xff] %v1639_v44  ;;  %v1580_v56 = vld [vmem:[#allocation2 + $0x18] sm:$0x11]  ;;  %v949_v57 = vmax.f32 %v699_v38, 0.0  ;;  %v703_v58 = vadd.f32 %v702_v51, %v7261_v49  ;;  %v704_v59 = vpop.f32.mrb[15].mxu0  ;;  %v1708_v61 = vld [vmem:[#allocation2] sm:$0xff] }
 0x130   : > { %1698 = vst.msk [vmem:[#allocation2 + $0x10] sm:$0xff] %vm7272_vm3, %v10562_v0  ;;  %v1581_v1 = vsel %vm7332_vm12, 0, %v1580_v56  ;;  %1521 = vst.msk [vmem:[#allocation2 + $0x28] sm:$0xff] %vm7272_vm3, %v6684_v45  ;;  %v950_v5 = vmax.f32 %v701_v47, 0.0  ;;  %v705_v6 = vadd.f32 %v704_v59, %v7264_v50  ;;  %v1740_v7 = vunpack.c.l.bf16 %v1708_v61  ;;  %v7466_v8 = vld [vmem:[#allocation2] sm:$0xee] }
 0x131   : > { %v7468_v9 = vld [vmem:[#allocation2 + $0x18] sm:$0xee]  ;;  %1582 = vst [vmem:[#allocation2 + $0x18] sm:$0x11] %v1581_v1  ;;  %v1057_v12 = vmin.f32 %v949_v57, 6.0  ;;  %v951_v13 = vmax.f32 %v703_v58, 0.0  ;;  %v1741_v14 = vunpack.c.h.bf16 %v1708_v61  ;;  %v2439_v46 = vunpack.c.h.bf16 %v7466_v8 }
 0x132   : > { %v1058_v16 = vmin.f32 %v950_v5, 6.0  ;;  %v952_v17 = vmax.f32 %v705_v6, 0.0  ;;  %v7472_v21 = vmul.f32 %v7320_v30, %v1740_v7  ;;  %v3760_v51 = vunpack.c.h.bf16 %v7468_v9 }
 0x133   : > { %v1059_v27 = vmin.f32 %v951_v13, 6.0  ;;  %v1817_v28 = vmul.f32 %v7340_v36, %v1741_v14  ;;  %v1942_v34 = vmul.f32 %v7323_v31, %v1741_v14  ;;  %v2484_v47 = vmul.f32 %v7314_v26, %v2439_v46 }
 0x134   : > { %v6685_v39 = vpack.c.bf16 %v1058_v16, %v1057_v12  ;;  %v1060_v44 = vmin.f32 %v952_v17, 6.0  ;;  %v708_v45 = vpop.f32.mrb[16].mxu0  ;;  %v7482_v61 = vmul.f32 %v7337_v35, %v1740_v7 }
 0x135   : > { %v709_v56 = vadd.f32 %v708_v45, %v7261_v49  ;;  %v710_v57 = vpop.f32.mrb[17].mxu0  ;;  %v2137_v58 = vrot.slane %v1942_v34, 1  ;;  %v2966_v59 = vld [vmem:[#allocation2 + $0x20] sm:$0xff]  ;;  %v2679_v13 = vrot.slane %v2484_v47, 2 }
 0x136   : > { %1522 = vst.msk [vmem:[#allocation2 + $0x30] sm:$0xff] %vm7272_vm3, %v6685_v39  ;;  %v6686_v5 = vpack.c.bf16 %v1060_v44, %v1059_v27  ;;  %v711_v6 = vadd.f32 %v710_v57, %v7264_v50  ;;  %v712_v12 = vpop.f32.mrb[18].mxu0  ;;  %v7488_v14 = vunpack.c.l.bf16 %v2966_v59  ;;  %v7496_v0 = vunpack.c.h.bf16 %v2966_v59 }
 0x137   : > { %v1641_v16 = vld [vmem:[#allocation2 + $0x28] sm:$0xff]  ;;  %v953_v17 = vmax.f32 %v709_v56, 0.0  ;;  %v713_v46 = vadd.f32 %v712_v12, %v7261_v49  ;;  %v714_v34 = vpop.f32.mrb[19].mxu0  ;;  %v7491_v45 = vld [vmem:[#allocation2 + $0x10] sm:$0x11]  ;;  %v2139_v7 = vsel %vm2133_vm1, %v2137_v58, %v2138_v40 }
 0x138   : > { %v1642_v27 = vsel %vm7422_vm15, 0, %v1641_v16  ;;  %1523 = vst.msk [vmem:[#allocation2 + $0x38] sm:$0xff] %vm7272_vm3, %v6686_v5  ;;  %v954_v39 = vmax.f32 %v711_v6, 0.0  ;;  %v715_v44 = vadd.f32 %v714_v34, %v7264_v50  ;;  %v2965_v56 = vld [vmem:[#allocation2 + $0x18] sm:$0xff]  ;;  %v1897_v38 = vunpack.c.h.bf16 %v7491_v45 }
 0x139   : > { %1643 = vst [vmem:[#allocation2 + $0x28] sm:$0xff] %v1642_v27  ;;  %v1061_v57 = vmin.f32 %v953_v17, 6.0  ;;  %v955_v12 = vmax.f32 %v713_v46, 0.0  ;;  %v2359_v58 = vadd.f32 %v2139_v7, %v1817_v28  ;;  %v2681_v16 = vsel %vm2675_vm2, %v2679_v13, %v2680_v41 }
 0x13a   : > { %v1062_v59 = vmin.f32 %v954_v39, 6.0  ;;  %v956_v63 = vmax.f32 %v715_v44, 0.0  ;;  %v7508_v15 = vunpack.c.l.bf16 %v2965_v56  ;;  %v1946_v6 = vmul.f32 %v7323_v31, %v1897_v38 }
 0x13b   : > { %v1063_v5 = vmin.f32 %v955_v12, 6.0  ;;  %v2488_v34 = vmul.f32 %v7314_v26, %v1897_v38  ;;  %v2901_v1 = vadd.f32 %v2681_v16, %v2359_v58  ;;  %v7512_v55 = vunpack.c.h.bf16 %v2965_v56 }
 0x13c   : > { %v6687_v27 = vpack.c.bf16 %v1062_v59, %v1061_v57  ;;  %v1064_v17 = vmin.f32 %v956_v63, 6.0  ;;  %v718_v46 = vpop.f32.mrb[20].mxu0  ;;  %v3077_v28 = vmul.f32 %v7349_v42, %v7496_v0  ;;  %v2142_v44 = vrot.slane %v1946_v6, 1 }
 0x13d   : > { %v1583_v7 = vld [vmem:[#allocation2 + $0x30] sm:$0x11]  ;;  %v719_v39 = vadd.f32 %v718_v46, %v7261_v49  ;;  %v720_v13 = vpop.f32.mrb[21].mxu0  ;;  %v2684_v47 = vrot.slane %v2488_v34, 2  ;;  %v3266_v12 = vmul.f32 %v7359_v52, %v7496_v0  ;;  %v3075_v58 = vmul.f32 %v7349_v42, %v7512_v55 }
 0x13e   : > { %v1584_v38 = vsel %vm7332_vm12, 0, %v1583_v7  ;;  %1524 = vst.msk [vmem:[#allocation2 + $0x40] sm:$0xff] %vm7272_vm3, %v6687_v27  ;;  %v6688_v63 = vpack.c.bf16 %v1064_v17, %v1063_v5  ;;  %v721_v56 = vadd.f32 %v720_v13, %v7264_v50  ;;  %v722_v57 = vpop.f32.mrb[22].mxu0  ;;  %v2143_v34 = vsel %vm2133_vm1, %v2138_v40, %v2142_v44 }
 0x13f   : > { %1585 = vst [vmem:[#allocation2 + $0x30] sm:$0x11] %v1584_v38  ;;  %v957_v59 = vmax.f32 %v719_v39, 0.0  ;;  %v723_v16 = vadd.f32 %v722_v57, %v7261_v49  ;;  %v724_v6 = vpop.f32.mrb[23].mxu0  ;;  %v2685_v27 = vsel %vm2675_vm2, %v2680_v41, %v2684_v47  ;;  %v2361_v46 = vadd.f32 %v2143_v34, %v7436_v29 }
 0x140   : > { %1525 = vst.msk [vmem:[#allocation2 + $0x48] sm:$0xff] %vm7272_vm3, %v6688_v63  ;;  %v958_v5 = vmax.f32 %v721_v56, 0.0  ;;  %v725_v17 = vadd.f32 %v724_v6, %v7264_v50  ;;  %v3139_v7 = vadd.f32 %v3075_v58, %v2901_v1  ;;  %v7537_v39 = vld [vmem:[#allocation2 + $0x28] sm:$0x11]  ;;  %v3264_v47 = vmul.f32 %v7359_v52, %v7512_v55 }
 0x141   : > { %v1065_v13 = vmin.f32 %v957_v59, 6.0  ;;  %v959_v38 = vmax.f32 %v723_v16, 0.0  ;;  %v3219_v40 = vunpack.c.h.bf16 %v7537_v39  ;;  %v2903_v41 = vadd.f32 %v2685_v27, %v2361_v46 }
 0x142   : > { %v1066_v23 = vmin.f32 %v958_v5, 6.0  ;;  %v960_v44 = vmax.f32 %v725_v17, 0.0  ;;  %v3459_v57 = vrot.slane %v3266_v12, 1  ;;  %v3805_v29 = vmul.f32 %v7365_v54, %v3760_v51 }
 0x143   : > { %v1067_v63 = vmin.f32 %v959_v38, 6.0  ;;  %v3268_v56 = vmul.f32 %v7359_v52, %v3219_v40  ;;  %v3141_v16 = vadd.f32 %v3077_v28, %v2903_v41  ;;  %v3458_v6 = vrot.slane %v3264_v47, 1 }
 0x144   : > { %v6689_v1 = vpack.c.bf16 %v1066_v23, %v1065_v13  ;;  %v1068_v58 = vmin.f32 %v960_v44, 6.0  ;;  %v728_v59 = vpop.f32.mrb[24].mxu0  ;;  %v3807_v46 = vmul.f32 %v7365_v54, %v7496_v0  ;;  %v3809_v38 = vmul.f32 %v7365_v54, %v3219_v40 }
 0x145   : > { %v1644_v34 = vld [vmem:[#allocation2 + $0x40] sm:$0xff]  ;;  %v729_v5 = vadd.f32 %v728_v59, %v7261_v49  ;;  %v730_v27 = vpop.f32.mrb[25].mxu0  ;;  %v3463_v17 = vrot.slane %v3268_v56, 1  ;;  %v3460_v23 = vsel %vm2133_vm1, %v3458_v6, %v3459_v57  ;;  %v4286_v6 = vld [vmem:[#allocation2 + $0x38] sm:$0xff] }
 0x146   : > { %v1645_v12 = vsel %vm7422_vm15, 0, %v1644_v34  ;;  %1526 = vst.msk [vmem:[#allocation2 + $0x50] sm:$0xff] %vm7272_vm3, %v6689_v1  ;;  %v6690_v51 = vpack.c.bf16 %v1068_v58, %v1067_v63  ;;  %v731_v28 = vadd.f32 %v730_v27, %v7264_v50  ;;  %v732_v13 = vpop.f32.mrb[26].mxu0  ;;  %v3680_v59 = vadd.f32 %v3460_v23, %v3139_v7  ;;  %v4285_v22 = vld [vmem:[#allocation2 + $0x30] sm:$0xff] }
 0x147   : > { %1646 = vst [vmem:[#allocation2 + $0x40] sm:$0xff] %v1645_v12  ;;  %v1586_v44 = vld [vmem:[#allocation2 + $0x48] sm:$0x11]  ;;  %v961_v41 = vmax.f32 %v729_v5, 0.0  ;;  %v733_v47 = vadd.f32 %v732_v13, %v7261_v49  ;;  %v734_v56 = vpop.f32.mrb[27].mxu0  ;;  %v3464_v40 = vsel %vm2133_vm1, %v3459_v57, %v3463_v17  ;;  %v3999_v12 = vrot.slane %v3805_v29, 2 }
 0x148   : > { %v1587_v34 = vsel %vm7332_vm12, 0, %v1586_v44  ;;  %1527 = vst.msk [vmem:[#allocation2 + $0x58] sm:$0xff] %vm7272_vm3, %v6690_v51  ;;  %v962_v63 = vmax.f32 %v731_v28, 0.0  ;;  %v735_v1 = vadd.f32 %v734_v56, %v7264_v50  ;;  %v3682_v58 = vadd.f32 %v3464_v40, %v3141_v16  ;;  %v7571_v28 = vld [vmem:[#allocation2 + $0x30] sm:$0xee] }
 0x149   : > { %1588 = vst [vmem:[#allocation2 + $0x48] sm:$0x11] %v1587_v34  ;;  %v1069_v5 = vmin.f32 %v961_v41, 6.0  ;;  %v963_v27 = vmax.f32 %v733_v47, 0.0  ;;  %v4000_v13 = vrot.slane %v3807_v46, 2  ;;  %v4004_v7 = vrot.slane %v3809_v38, 2 }
 0x14a   : > { %v1070_v35 = vmin.f32 %v962_v63, 6.0  ;;  %v964_v57 = vmax.f32 %v735_v1, 0.0  ;;  %v7564_v17 = vunpack.c.l.bf16 %v4285_v22  ;;  %v7567_v54 = vunpack.c.h.bf16 %v4285_v22 }
 0x14b   : > { %v1071_v23 = vmin.f32 %v963_v27, 6.0  ;;  %v4001_v44 = vsel %vm2675_vm2, %v3999_v12, %v4000_v13  ;;  %v7569_v51 = vunpack.c.l.bf16 %v4286_v6  ;;  %v4005_v29 = vsel %vm2675_vm2, %v4000_v13, %v4004_v7 }
 0x14c   : > { %v6691_v16 = vpack.c.bf16 %v1070_v35, %v1069_v5  ;;  %v1072_v56 = vmin.f32 %v964_v57, 6.0  ;;  %v738_v41 = vpop.f32.mrb[28].mxu0  ;;  %v4221_v46 = vadd.f32 %v4001_v44, %v3680_v59  ;;  %v4223_v40 = vadd.f32 %v4005_v29, %v3682_v58 }
 0x14d   : > { %v739_v47 = vadd.f32 %v738_v41, %v7261_v49  ;;  %v740_v38 = vpop.f32.mrb[29].mxu0  ;;  %v7575_v34 = vunpack.c.h.bf16 %v4286_v6  ;;  %v4395_v22 = vmul.f32 %v7407_v10, %v7567_v54  ;;  %v4584_v59 = vmul.f32 %v7413_v18, %v7567_v54 }
 0x14e   : > { %1528 = vst.msk [vmem:[#allocation2 + $0x60] sm:$0xff] %vm7272_vm3, %v6691_v16  ;;  %v6692_v63 = vpack.c.bf16 %v1072_v56, %v1071_v23  ;;  %v741_v35 = vadd.f32 %v740_v38, %v7264_v50  ;;  %v742_v1 = vpop.f32.mrb[30].mxu0  ;;  %v7582_v5 = vld [vmem:[#allocation2 + $0x40] sm:$0x11] }
 0x14f   : > { %v1647_v58 = vld [vmem:[#allocation2 + $0x58] sm:$0xff]  ;;  %v965_v6 = vmax.f32 %v739_v47, 0.0  ;;  %v743_v12 = vadd.f32 %v742_v1, %v7261_v49  ;;  %v744_v13 = vpop.f32.mrb[31].mxu0  ;;  %v4397_v57 = vmul.f32 %v7407_v10, %v7575_v34  ;;  %v4459_v7 = vadd.f32 %v4395_v22, %v4221_v46 }
 0x150   : > { %v1648_v23 = vsel %vm7422_vm15, 0, %v1647_v58  ;;  %1529 = vst.msk [vmem:[#allocation2 + $0x68] sm:$0xff] %vm7272_vm3, %v6692_v63  ;;  %v966_v44 = vmax.f32 %v741_v35, 0.0  ;;  %v745_v16 = vadd.f32 %v744_v13, %v7264_v50  ;;  %v4539_v38 = vunpack.c.h.bf16 %v7582_v5 }
 0x151   : > { %1649 = vst [vmem:[#allocation2 + $0x58] sm:$0xff] %v1648_v23  ;;  %v1073_v41 = vmin.f32 %v965_v6, 6.0  ;;  %v967_v29 = vmax.f32 %v743_v12, 0.0  ;;  %v4461_v47 = vadd.f32 %v4397_v57, %v4223_v40  ;;  %v4586_v46 = vmul.f32 %v7413_v18, %v7575_v34 }
 0x152   : > { %v1074_v1 = vmin.f32 %v966_v44, 6.0  ;;  %v968_v27 = vmax.f32 %v745_v16, 0.0  ;;  %v4778_v22 = vrot.slane %v4584_v59, 1  ;;  %v4588_v63 = vmul.f32 %v7413_v18, %v4539_v38 }
 0x153   : > { %v1075_v58 = vmin.f32 %v967_v29, 6.0  ;;  %v5080_v35 = vunpack.c.h.bf16 %v7571_v28  ;;  %v5127_v13 = vmul.f32 %v7389_v4, %v7575_v34  ;;  %v4779_v40 = vrot.slane %v4586_v46, 1 }
 0x154   : > { %v6693_v23 = vpack.c.bf16 %v1074_v1, %v1073_v41  ;;  %v1076_v6 = vmin.f32 %v968_v27, 6.0  ;;  %v748_v12 = vpop.f32.mrb[32].mxu0  ;;  %v5129_v57 = vmul.f32 %v7389_v4, %v4539_v38  ;;  %v4783_v10 = vrot.slane %v4588_v63, 1 }
 0x155   : > { %v1589_v44 = vld [vmem:[#allocation2 + $0x60] sm:$0x11]  ;;  %v749_v16 = vadd.f32 %v748_v12, %v7261_v49  ;;  %v750_v56 = vpop.f32.mrb[33].mxu0  ;;  %v5125_v59 = vmul.f32 %v7389_v4, %v5080_v35  ;;  %v5320_v29 = vrot.slane %v5127_v13, 2  ;;  %v4780_v38 = vsel %vm2133_vm1, %v4778_v22, %v4779_v40 }
 0x156   : > { %v1590_v18 = vsel %vm7332_vm12, 0, %v1589_v44  ;;  %1530 = vst.msk [vmem:[#allocation2 + $0x70] sm:$0xff] %vm7272_vm3, %v6693_v23  ;;  %v6694_v41 = vpack.c.bf16 %v1076_v6, %v1075_v58  ;;  %v751_v27 = vadd.f32 %v750_v56, %v7264_v50  ;;  %v752_v1 = vpop.f32.mrb[34].mxu0  ;;  %v4784_v35 = vsel %vm2133_vm1, %v4779_v40, %v4783_v10 }
 0x157   : > { %1591 = vst [vmem:[#allocation2 + $0x60] sm:$0x11] %v1590_v18  ;;  %v969_v46 = vmax.f32 %v749_v16, 0.0  ;;  %v753_v12 = vadd.f32 %v752_v1, %v7261_v49  ;;  %v754_v63 = vpop.f32.mrb[35].mxu0  ;;  %v5000_v13 = vadd.f32 %v4780_v38, %v4459_v7  ;;  %v5002_v58 = vadd.f32 %v4784_v35, %v4461_v47 }
 0x158   : > { %1531 = vst.msk [vmem:[#allocation2 + $0x78] sm:$0xff] %vm7272_vm3, %v6694_v41  ;;  %v970_v44 = vmax.f32 %v751_v27, 0.0  ;;  %v755_v23 = vadd.f32 %v754_v63, %v7264_v50  ;;  %v5319_v6 = vrot.slane %v5125_v59, 2  ;;  %v5324_v52 = vrot.slane %v5129_v57, 2 }
 0x159   : > { %v1077_v56 = vmin.f32 %v969_v46, 6.0  ;;  %v971_v4 = vmax.f32 %v753_v12, 0.0  ;;  %v10620_v18 = vunpack.c.l.bf16 %v7491_v45  ;;  %v10621_v7 = vrot.slane %v7439_v32, 1 }
 0x15a   : > { %v1078_v16 = vmin.f32 %v970_v44, 6.0  ;;  %v972_v1 = vmax.f32 %v755_v23, 0.0  ;;  %v5321_v10 = vsel %vm2675_vm2, %v5319_v6, %v5320_v29  ;;  %v10622_v40 = vrot.slane %v7472_v21, 1 }
 0x15b   : > { %v1945_v22 = vmul.f32 %v7320_v30, %v10620_v18  ;;  %v1079_v27 = vmin.f32 %v971_v4, 6.0  ;;  %v5325_v47 = vsel %vm2675_vm2, %v5320_v29, %v5324_v52  ;;  %v5541_v59 = vadd.f32 %v5321_v10, %v5000_v13 }
 0x15c   : > { %v2136_v41 = vsel %vm2133_vm1, %v10622_v40, %v10621_v7  ;;  %v6695_v38 = vpack.c.bf16 %v1078_v16, %v1077_v56  ;;  %v1080_v46 = vmin.f32 %v972_v1, 6.0  ;;  %v758_v12 = vpop.f32.mrb[36].mxu0  ;;  %v5543_v63 = vadd.f32 %v5325_v47, %v5002_v58 }
 0x15d   : > { %v2140_v57 = vrot.slane %v1945_v22, 1  ;;  %v2358_v35 = vadd.f32 %v2136_v41, %v7482_v61  ;;  %v1650_v44 = vld [vmem:[#allocation2 + $0x70] sm:$0xff]  ;;  %v759_v23 = vadd.f32 %v758_v12, %v7261_v49  ;;  %v760_v6 = vpop.f32.mrb[37].mxu0  ;;  %v5617_v21 = vadd.f32 %v7433_v24, %v5541_v59 }
 0x15e   : > { %v10623_v18 = vmov %v10621_v7  ;;  %v10624_v52 = vunpack.c.l.bf16 %v7466_v8  ;;  %v1651_v13 = vsel %vm7422_vm15, 0, %v1650_v44  ;;  %1532 = vst.msk [vmem:[#allocation2 + $0x80] sm:$0xff] %vm7272_vm3, %v6695_v38  ;;  %v6696_v61 = vpack.c.bf16 %v1080_v46, %v1079_v27  ;;  %v762_v56 = vpop.f32.mrb[38].mxu0 }
 0x15f   : > { %v2141_v4 = vsel %vm2133_vm1, %v10623_v18, %v2140_v57  ;;  %v761_v58 = vadd.f32 %v760_v6, %v7264_v50  ;;  %v5619_v22 = vadd.f32 %v7433_v24, %v5543_v63  ;;  %1652 = vst [vmem:[#allocation2 + $0x70] sm:$0xff] %v1651_v13  ;;  %v1592_v32 = vld [vmem:[#allocation2 + $0x78] sm:$0x11]  ;;  %v973_v16 = vmax.f32 %v759_v23, 0.0  ;;  %v764_v8 = vpop.f32.mrb[39].mxu0 }
 0x160   : > { %v2483_v29 = vmul.f32 %v7311_v25, %v10624_v52  ;;  %v763_v1 = vadd.f32 %v762_v56, %v7261_v49  ;;  %v5681_v10 = vmax.f32 %v5617_v21, 0.0  ;;  %v2360_v7 = vadd.f32 %v2141_v4, %v7455_v62  ;;  %1533 = vst.msk [vmem:[#allocation2 + $0x88] sm:$0xff] %vm7272_vm3, %v6696_v61 }
 0x161   : > { %v1593_v40 = vsel %vm7332_vm12, 0, %v1592_v32  ;;  %v974_v41 = vmax.f32 %v761_v58, 0.0  ;;  %v765_v27 = vadd.f32 %v764_v8, %v7264_v50  ;;  %v5683_v47 = vmax.f32 %v5619_v22, 0.0 }
 0x162   : > { %1594 = vst [vmem:[#allocation2 + $0x78] sm:$0x11] %v1593_v40  ;;  %v1081_v59 = vmin.f32 %v973_v16, 6.0  ;;  %v975_v57 = vmax.f32 %v763_v1, 0.0  ;;  %v5745_v38 = vmin.f32 %v5681_v10, 6.0  ;;  %v10625_v46 = vunpack.c.l.bf16 %v7491_v45 }
 0x163   : > { %v1082_v63 = vmin.f32 %v974_v41, 6.0  ;;  %v976_v62 = vmax.f32 %v765_v27, 0.0  ;;  %v5747_v44 = vmin.f32 %v5683_v47, 6.0  ;;  %v2676_v23 = vrot.slane %v2483_v29, 2 }
 0x164   : > { %v2487_v12 = vmul.f32 %v7311_v25, %v10625_v46  ;;  %v1083_v6 = vmin.f32 %v975_v57, 6.0  ;;  %v3074_v18 = vmul.f32 %v7343_v37, %v7508_v15  ;;  %v3076_v4 = vmul.f32 %v7343_v37, %v7488_v14  ;;  %v768_v56 = vpop.f32.mrb[40].mxu0 }
 0x165   : > { %v6697_v52 = vpack.c.bf16 %v1082_v63, %v1081_v59  ;;  %v1084_v13 = vmin.f32 %v976_v62, 6.0  ;;  %v5809_v61 = vpack.c.bf16 %v5747_v44, %v5745_v38  ;;  %v10626_v58 = vrot.slane %v7445_v48, 2  ;;  %v770_v8 = vpop.f32.mrb[41].mxu0 }
 0x166   : > { %v2682_v21 = vrot.slane %v2487_v12, 2  ;;  %v3263_v16 = vmul.f32 %v7352_v43, %v7508_v15  ;;  %v3265_v1 = vmul.f32 %v7352_v43, %v7488_v14  ;;  %v10628_v41 = vunpack.c.l.bf16 %v7537_v39  ;;  %v772_v47 = vpop.f32.mrb[42].mxu0 }
 0x167   : > { %v2678_v45 = vsel %vm2675_vm2, %v2676_v23, %v10626_v58  ;;  %v10627_v22 = vmov %v10626_v58  ;;  %1534 = vst.msk [vmem:[#allocation2 + $0x90] sm:$0xff] %vm7272_vm3, %v6697_v52  ;;  %v6698_v10 = vpack.c.bf16 %v1084_v13, %v1083_v6  ;;  %6660 = vmatprep.mubr.msk.bf16.mxu1 %vm5943_vm4, %v5809_v61  ;;  %v1653_v59 = vld [vmem:[#allocation2 + $0x88] sm:$0xff]  ;;  %v3806_v12 = vmul.f32 %v7362_v53, %v7488_v14  ;;  %v774_v63 = vpop.f32.mrb[43].mxu0 }
 0x168   : > { %v2683_v29 = vsel %vm2675_vm2, %v10627_v22, %v2682_v21  ;;  %v2900_v32 = vadd.f32 %v2678_v45, %v2358_v35  ;;  %v3267_v48 = vmul.f32 %v7352_v43, %v10628_v41  ;;  %v10629_v35 = vunpack.c.l.bf16 %v7468_v9 }
 0x169   : > { %v2902_v40 = vadd.f32 %v2683_v29, %v2360_v7  ;;  %v3455_v38 = vrot.slane %v3263_v16, 1  ;;  %v3456_v46 = vrot.slane %v3265_v1, 1  ;;  %v1654_v7 = vsel %vm7422_vm15, 0, %v1653_v59  ;;  %1535 = vst.msk [vmem:[#allocation2 + $0x98] sm:$0xff] %vm7272_vm3, %v6698_v10 }
 0x16a   : > { %v3804_v27 = vmul.f32 %v7362_v53, %v10629_v35  ;;  %v3138_v57 = vadd.f32 %v3074_v18, %v2900_v32  ;;  %v3461_v44 = vrot.slane %v3267_v48, 1  ;;  %v10630_v9 = vmov %v10628_v41  ;;  %1655 = vst [vmem:[#allocation2 + $0x88] sm:$0xff] %v1654_v7 }
 0x16b   : > { %v3140_v62 = vadd.f32 %v3076_v4, %v2902_v40  ;;  %v3808_v23 = vmul.f32 %v7362_v53, %v10630_v9  ;;  %v3457_v6 = vsel %vm2133_vm1, %v3455_v38, %v3456_v46  ;;  %v3997_v18 = vrot.slane %v3806_v12, 2 }
 0x16c   : > { %v3996_v21 = vrot.slane %v3804_v27, 2  ;;  %v4394_v52 = vmul.f32 %v7386_v3, %v7564_v17  ;;  %v3462_v13 = vsel %vm2133_vm1, %v3456_v46, %v3461_v44  ;;  %v3679_v61 = vadd.f32 %v3457_v6, %v3138_v57  ;;  %v778_v48 = vpop.f32.mrb[44].mxu0 }
 0x16d   : > { %v4002_v58 = vrot.slane %v3808_v23, 2  ;;  %v4396_v4 = vmul.f32 %v7386_v3, %v7569_v51  ;;  %v3681_v45 = vadd.f32 %v3462_v13, %v3140_v62  ;;  %v4583_v22 = vmul.f32 %v7410_v11, %v7564_v17  ;;  %v7704_v46 = vpop.f32.mrb[45].mxu0 }
 0x16e   : > { %v3998_v39 = vsel %vm2675_vm2, %v3996_v21, %v3997_v18  ;;  %v4585_v29 = vmul.f32 %v7410_v11, %v7569_v51  ;;  %v10631_v1 = vunpack.c.l.bf16 %v7582_v5  ;;  %v10632_v40 = vunpack.c.l.bf16 %v7571_v28  ;;  %v1595_v35 = vld [vmem:[#allocation2 + $0x90] sm:$0x11]  ;;  %v7711_v9 = vpop.f32.mrb[46].mxu0 }
 0x16f   : > { %v4003_v32 = vsel %vm2675_vm2, %v3997_v18, %v4002_v58  ;;  %v4220_v16 = vadd.f32 %v3998_v39, %v3679_v61  ;;  %v4775_v59 = vrot.slane %v4583_v22, 1  ;;  %v5126_v38 = vmul.f32 %v7376_v60, %v7569_v51  ;;  %v7714_v13 = vpop.f32.mrb[47].mxu0 }
 0x170   : > { %v4587_v10 = vmul.f32 %v7410_v11, %v10631_v1  ;;  %v5124_v41 = vmul.f32 %v7376_v60, %v10632_v40  ;;  %v4222_v27 = vadd.f32 %v4003_v32, %v3681_v45  ;;  %v4776_v57 = vrot.slane %v4585_v29, 1 }
 0x171   : > { %v1596_v12 = vsel %vm7332_vm12, 0, %v1595_v35  ;;  %v4458_v7 = vadd.f32 %v4394_v52, %v4220_v16  ;;  %v10633_v44 = vmov %v10631_v1  ;;  %v5317_v18 = vrot.slane %v5126_v38, 2 }
 0x172   : > { %v4781_v62 = vrot.slane %v4587_v10, 1  ;;  %v5128_v28 = vmul.f32 %v7376_v60, %v10633_v44  ;;  %1597 = vst [vmem:[#allocation2 + $0x90] sm:$0x11] %v1596_v12  ;;  %v4460_v23 = vadd.f32 %v4396_v4, %v4222_v27  ;;  %v4777_v6 = vsel %vm2133_vm1, %v4775_v59, %v4776_v57  ;;  %v7724_v27 = vld [vmem:[#allocation2 + $0x28] sm:$0x11] }
 0x173   : > { %v5316_v21 = vrot.slane %v5124_v41, 2  ;;  %v4999_v58 = vadd.f32 %v4777_v6, %v4458_v7  ;;  %v769_v52 = vadd.f32 %v768_v56, %v7261_v49  ;;  %v771_v22 = vadd.f32 %v770_v8, %v7264_v50  ;;  %v7737_v6 = vld [vmem:[#allocation2 + $0x18] sm:$0xee] }
 0x174   : > { %v4782_v61 = vsel %vm2133_vm1, %v4776_v57, %v4781_v62  ;;  %v5322_v45 = vrot.slane %v5128_v28, 2  ;;  %v773_v29 = vadd.f32 %v772_v47, %v7261_v49  ;;  %v775_v1 = vadd.f32 %v774_v63, %v7264_v50  ;;  %v7729_v47 = vpop.f32.mrb[48].mxu0 }
 0x175   : > { %v5001_v39 = vadd.f32 %v4782_v61, %v4460_v23  ;;  %v5318_v5 = vsel %vm2675_vm2, %v5316_v21, %v5317_v18  ;;  %v977_v16 = vmax.f32 %v769_v52, 0.0  ;;  %v978_v40 = vmax.f32 %v771_v22, 0.0  ;;  %v7732_v62 = vpop.f32.mrb[49].mxu0 }
 0x176   : > { %v5323_v4 = vsel %vm2675_vm2, %v5317_v18, %v5322_v45  ;;  %v5540_v32 = vadd.f32 %v5318_v5, %v4999_v58  ;;  %v979_v41 = vmax.f32 %v773_v29, 0.0  ;;  %v779_v35 = vadd.f32 %v778_v48, %v7261_v49  ;;  %v7739_v21 = vpop.f32.mrb[50].mxu0 }
 0x177   : > { %v5542_v10 = vadd.f32 %v5323_v4, %v5001_v39  ;;  %v1085_v59 = vmin.f32 %v977_v16, 6.0  ;;  %v980_v57 = vmax.f32 %v775_v1, 0.0  ;;  %v1821_v8 = vmul.f32 %v7512_v55, %v7340_v36  ;;  %v7745_v52 = vpop.f32.mrb[51].mxu0 }
 0x178   : > { %v5616_v56 = vadd.f32 %v7416_v19, %v5540_v32  ;;  %v1086_v12 = vmin.f32 %v978_v40, 6.0  ;;  %v1087_v63 = vmin.f32 %v979_v41, 6.0  ;;  %v981_v7 = vmax.f32 %v779_v35, 0.0 }
 0x179   : > { %v5618_v38 = vadd.f32 %v7416_v19, %v5542_v10  ;;  %v1088_v48 = vmin.f32 %v980_v57, 6.0  ;;  %v1823_v28 = vmul.f32 %v7496_v0, %v7340_v36  ;;  %v1899_v23 = vunpack.c.h.bf16 %v7724_v27 }
 0x17a   : > { %v5680_v44 = vmax.f32 %v5616_v56, 0.0  ;;  %v6699_v61 = vpack.c.bf16 %v1086_v12, %v1085_v59  ;;  %v7741_v58 = vmin.f32 %v981_v7, 6.0  ;;  %v1948_v45 = vmul.f32 %v7512_v55, %v7323_v31  ;;  %v7755_v55 = vld [vmem:[#allocation2 + $0x40] sm:$0x11] }
 0x17b   : > { %v5682_v18 = vmax.f32 %v5618_v38, 0.0  ;;  %v6700_v5 = vpack.c.bf16 %v1088_v48, %v1087_v63  ;;  %v1950_v22 = vmul.f32 %v7496_v0, %v7323_v31  ;;  %v1952_v29 = vmul.f32 %v7323_v31, %v1899_v23 }
 0x17c   : > { %v5744_v39 = vmin.f32 %v5680_v44, 6.0  ;;  %1536 = vst.msk [vmem:[#allocation2 + $0xa0] sm:$0xff] %vm7272_vm3, %v6699_v61  ;;  %v2147_v32 = vrot.slane %v1948_v45, 1  ;;  %v2441_v16 = vunpack.c.h.bf16 %v7737_v6  ;;  %v2492_v1 = vmul.f32 %v7496_v0, %v7314_v26  ;;  %v7765_v0 = vld [vmem:[#allocation2 + $0x30] sm:$0xee]  ;;  %v7770_v48 = vpop.f32.mrb[52].mxu0 }
 0x17d   : > { %v5746_v4 = vmin.f32 %v5682_v18, 6.0  ;;  %1537 = vst.msk [vmem:[#allocation2 + $0xa8] sm:$0xff] %vm7272_vm3, %v6700_v5  ;;  %v2148_v10 = vrot.slane %v1950_v22, 1  ;;  %v2152_v40 = vrot.slane %v1952_v29, 1  ;;  %v2494_v41 = vmul.f32 %v7314_v26, %v1899_v23  ;;  %10634 = vst [vmem:[#allocation14_spill] sm:$0xff] %v7770_v48  ;;  %v10635_v45 = vld [vmem:[#allocation8_spill] sm:$0xff] }
 0x17e   : > { %v3079_v35 = vmul.f32 %v7567_v54, %v7349_v42  ;;  %v2490_v59 = vmul.f32 %v7314_v26, %v2441_v16  ;;  %v2690_v57 = vrot.slane %v2492_v1, 2  ;;  %v3081_v38 = vmul.f32 %v7575_v34, %v7349_v42  ;;  %v7774_v5 = vpop.f32.mrb[53].mxu0  ;;  %v7791_v48 = vld [vmem:[#allocation2 + $0x48] sm:$0xff] }
 0x17f   : > { %v5808_v56 = vpack.c.bf16 %v5746_v4, %v5744_v39  ;;  %v2149_v12 = vsel %vm2133_vm1, %v2147_v32, %v2148_v10  ;;  %v2153_v63 = vsel %vm2133_vm1, %v2148_v10, %v2152_v40  ;;  %v2694_v7 = vrot.slane %v2494_v41, 2  ;;  %10636 = vst [vmem:[#allocation15_spill] sm:$0xff] %v7774_v5  ;;  %v7781_v16 = vpop.f32.mrb[54].mxu0  ;;  %v10638_v10 = vld [vmem:[#allocation9_spill] sm:$0xff]  ;;  %v7786_v41 = vld [vmem:[#allocation2 + $0x48] sm:$0xee] }
 0x180   : > { %v3221_v44 = vunpack.c.h.bf16 %v7755_v55  ;;  %v2363_v23 = vadd.f32 %v2149_v12, %v1821_v8  ;;  %v2365_v18 = vadd.f32 %v2153_v63, %v1823_v28  ;;  %v2689_v61 = vrot.slane %v2490_v59, 2  ;;  %10637 = vst [vmem:[#allocation16_spill] sm:$0xff] %v7781_v16  ;;  %v7793_v16 = vld [vmem:[#allocation2 + $0x50] sm:$0xff] }
 0x181   : > { %6025 = vmatmul.mubr.bf16.vlgmr.msra.gmra.mrb[0].mxu1 %v5808_v56  ;;  %v3270_v39 = vmul.f32 %v7567_v54, %v10635_v45  ;;  %v2695_v22 = vsel %vm2675_vm2, %v2690_v57, %v2694_v7  ;;  %v3272_v29 = vmul.f32 %v7575_v34, %v10635_v45  ;;  %v3762_v32 = vunpack.c.h.bf16 %v7765_v0  ;;  %v7788_v56 = vpop.f32.mrb[55].mxu0 }
 0x182   : > { %v3274_v4 = vmul.f32 %v10635_v45, %v3221_v44  ;;  %v2691_v8 = vsel %vm2675_vm2, %v2689_v61, %v2690_v57  ;;  %v2907_v28 = vadd.f32 %v2695_v22, %v2365_v18  ;;  %v3813_v40 = vmul.f32 %v7575_v34, %v10638_v10  ;;  %10639 = vst [vmem:[#allocation17_spill] sm:$0xff] %v7788_v56  ;;  %v7798_v45 = vld [vmem:[#allocation2 + $0x58] sm:$0x11] }
 0x183   : > { %v3468_v1 = vrot.slane %v3270_v39, 1  ;;  %v1656_v59 = vld [vmem:[#allocation2 + $0xa0] sm:$0xff]  ;;  %v2905_v12 = vadd.f32 %v2691_v8, %v2363_v23  ;;  %v3469_v63 = vrot.slane %v3272_v29, 1  ;;  %v3811_v5 = vmul.f32 %v10638_v10, %v3762_v32 }
 0x184   : > { %v3473_v7 = vrot.slane %v3274_v4, 1  ;;  %v1657_v57 = vsel %vm7422_vm15, 0, %v1656_v59  ;;  %v1598_v18 = vld [vmem:[#allocation2 + $0xa8] sm:$0x11]  ;;  %v3145_v61 = vadd.f32 %v3081_v38, %v2907_v28  ;;  %v3815_v39 = vmul.f32 %v10638_v10, %v3221_v44 }
 0x185   : > { %v4010_v22 = vrot.slane %v3813_v40, 2  ;;  %1658 = vst [vmem:[#allocation2 + $0xa0] sm:$0xff] %v1657_v57  ;;  %v1599_v23 = vsel %vm7332_vm12, 0, %v1598_v18  ;;  %v3143_v29 = vadd.f32 %v3079_v35, %v2905_v12  ;;  %v3470_v4 = vsel %vm2133_vm1, %v3468_v1, %v3469_v63  ;;  %v7812_v35 = vpop.f32.mrb[56].mxu0 }
 0x186   : > { %v3474_v32 = vsel %vm2133_vm1, %v3469_v63, %v3473_v7  ;;  %1600 = vst [vmem:[#allocation2 + $0xa8] sm:$0x11] %v1599_v23  ;;  %v4009_v56 = vrot.slane %v3811_v5, 2  ;;  %v4014_v59 = vrot.slane %v3815_v39, 2  ;;  %v7805_v38 = vunpack.c.h.bf16 %v7791_v48  ;;  %10641 = vst [vmem:[#allocation19_spill] sm:$0xff] %v7812_v35  ;;  %v10642_v5 = vld [vmem:[#allocation11_spill] sm:$0xff] }
 0x187   : > { %v3686_v8 = vadd.f32 %v3474_v32, %v3145_v61  ;;  %v3684_v44 = vadd.f32 %v3470_v4, %v3143_v29  ;;  %v7808_v28 = vunpack.c.h.bf16 %v7793_v16  ;;  %v4541_v40 = vunpack.c.h.bf16 %v7798_v45  ;;  %v10643_v7 = vld [vmem:[#allocation12_spill] sm:$0xff]  ;;  %v7820_v61 = vpop.f32.mrb[57].mxu0 }
 0x188   : > { %v5082_v57 = vunpack.c.h.bf16 %v7786_v41  ;;  %v4011_v1 = vsel %vm2675_vm2, %v4009_v56, %v4010_v22  ;;  %v4015_v12 = vsel %vm2675_vm2, %v4010_v22, %v4014_v59  ;;  %v4399_v63 = vmul.f32 %v10642_v5, %v7805_v38  ;;  %10644 = vst [vmem:[#allocation20_spill] sm:$0xff] %v7820_v61  ;;  %v10645_v22 = vld [vmem:[#allocation10_spill] sm:$0xff] }
 0x189   : > { %10640 = vst [vmem:[#allocation18_spill] sm:$0xff] %v7808_v28  ;;  %v4590_v18 = vmul.f32 %v10643_v7, %v7805_v38  ;;  %v4225_v39 = vadd.f32 %v4011_v1, %v3684_v44  ;;  %v4227_v23 = vadd.f32 %v4015_v12, %v3686_v8  ;;  %v4401_v29 = vmul.f32 %v10642_v5, %v7808_v28 }
 0x18a   : > { %v4592_v4 = vmul.f32 %v10643_v7, %v7808_v28  ;;  %v4594_v56 = vmul.f32 %v10643_v7, %v4541_v40  ;;  %v5131_v59 = vmul.f32 %v10645_v22, %v5082_v57  ;;  %v5133_v35 = vmul.f32 %v10645_v22, %v7808_v28 }
 0x18b   : > { %v4788_v32 = vrot.slane %v4590_v18, 1  ;;  %v4463_v33 = vadd.f32 %v4399_v63, %v4225_v39  ;;  %v4465_v10 = vadd.f32 %v4401_v29, %v4227_v23  ;;  %v5135_v44 = vmul.f32 %v10645_v22, %v4541_v40  ;;  %v10646_v18 = vld [vmem:[#allocation7_spill] sm:$0xff] }
 0x18c   : > { %v4789_v20 = vrot.slane %v4592_v4, 1  ;;  %v4793_v8 = vrot.slane %v4594_v56, 1  ;;  %v5329_v1 = vrot.slane %v5131_v59, 2  ;;  %v5330_v12 = vrot.slane %v5133_v35, 2 }
 0x18d   : > { %v781_v61 = vadd.f32 %v7704_v46, %v7264_v50  ;;  %v5334_v7 = vrot.slane %v5135_v44, 2  ;;  %v1820_v57 = vmul.f32 %v7508_v15, %v10646_v18  ;;  %v1822_v28 = vmul.f32 %v7488_v14, %v10646_v18 }
 0x18e   : > { %v4790_v5 = vsel %vm2133_vm1, %v4788_v32, %v4789_v20  ;;  %v4794_v63 = vsel %vm2133_vm1, %v4789_v20, %v4793_v8  ;;  %v5331_v40 = vsel %vm2675_vm2, %v5329_v1, %v5330_v12  ;;  %v1898_v46 = vunpack.c.l.bf16 %v7724_v27 }
 0x18f   : > { %v5004_v39 = vadd.f32 %v4790_v5, %v4463_v33  ;;  %v982_v23 = vmax.f32 %v781_v61, 0.0  ;;  %v5006_v29 = vadd.f32 %v4794_v63, %v4465_v10  ;;  %v5335_v35 = vsel %vm2675_vm2, %v5330_v12, %v5334_v7  ;;  %v7850_v7 = vpop.f32.mrb[58].mxu0 }
 0x190   : > { %v1947_v4 = vmul.f32 %v7508_v15, %v7320_v30  ;;  %v1949_v59 = vmul.f32 %v7488_v14, %v7320_v30  ;;  %v2440_v44 = vunpack.c.l.bf16 %v7737_v6  ;;  %v1951_v33 = vmul.f32 %v7320_v30, %v1898_v46  ;;  %v7855_v1 = vpop.f32.mrb[59].mxu0 }
 0x191   : > { %v5545_v56 = vadd.f32 %v5331_v40, %v5004_v39  ;;  %v1090_v32 = vmin.f32 %v982_v23, 6.0  ;;  %v5547_v20 = vadd.f32 %v5335_v35, %v5006_v29  ;;  %v2491_v10 = vmul.f32 %v7488_v14, %v7311_v25  ;;  %10647 = vst [vmem:[#allocation10_spill] sm:$0xff] %v7855_v1 }
 0x192   : > { %v2144_v5 = vrot.slane %v1947_v4, 1  ;;  %v2145_v61 = vrot.slane %v1949_v59, 1  ;;  %v2489_v8 = vmul.f32 %v7311_v25, %v2440_v44  ;;  %v2150_v12 = vrot.slane %v1951_v33, 1 }
 0x193   : > { %v5621_v27 = vadd.f32 %v7433_v24, %v5545_v56  ;;  %v6701_v15 = vpack.c.bf16 %v1090_v32, %v7741_v58  ;;  %v5623_v6 = vadd.f32 %v7433_v24, %v5547_v20  ;;  %v2493_v63 = vmul.f32 %v7311_v25, %v1898_v46  ;;  %v7865_v32 = vpop.f32.mrb[60].mxu0 }
 0x194   : > { %v2687_v39 = vrot.slane %v2491_v10, 2  ;;  %v2146_v14 = vsel %vm2133_vm1, %v2144_v5, %v2145_v61  ;;  %v2686_v23 = vrot.slane %v2489_v8, 2  ;;  %v3078_v58 = vmul.f32 %v7564_v17, %v7343_v37  ;;  %10648 = vst [vmem:[#allocation21_spill] sm:$0xff] %v7865_v32  ;;  %v7870_v33 = vpop.f32.mrb[61].mxu0 }
 0x195   : > { %v5685_v40 = vmax.f32 %v5621_v27, 0.0  ;;  %1538 = vst.msk [vmem:[#allocation2 + $0xb0] sm:$0xff] %vm7272_vm3, %v6701_v15  ;;  %v5687_v29 = vmax.f32 %v5623_v6, 0.0  ;;  %v2151_v35 = vsel %vm2133_vm1, %v2145_v61, %v2150_v12  ;;  %v2362_v4 = vadd.f32 %v2146_v14, %v1820_v57  ;;  %10649 = vst [vmem:[#allocation22_spill] sm:$0xff] %v7870_v33  ;;  %v7874_v61 = vpop.f32.mrb[62].mxu0 }
 0x196   : > { %v2692_v56 = vrot.slane %v2493_v63, 2  ;;  %v2364_v46 = vadd.f32 %v2151_v35, %v1822_v28  ;;  %v2688_v44 = vsel %vm2675_vm2, %v2686_v23, %v2687_v39  ;;  %v3080_v20 = vmul.f32 %v7569_v51, %v7343_v37  ;;  %10650 = vst [vmem:[#allocation23_spill] sm:$0xff] %v7874_v61  ;;  %v7881_v12 = vpop.f32.mrb[63].mxu0 }
 0x197   : > { %v5749_v59 = vmin.f32 %v5685_v40, 6.0  ;;  %v5751_v5 = vmin.f32 %v5687_v29, 6.0  ;;  %v2904_v27 = vadd.f32 %v2688_v44, %v2362_v4  ;;  %v3220_v15 = vunpack.c.l.bf16 %v7755_v55  ;;  %10651 = vst [vmem:[#allocation24_spill] sm:$0xff] %v7881_v12 }
 0x198   : > { %v2693_v10 = vsel %vm2675_vm2, %v2687_v39, %v2692_v56  ;;  %v3269_v8 = vmul.f32 %v7564_v17, %v7352_v43  ;;  %v3271_v28 = vmul.f32 %v7569_v51, %v7352_v43  ;;  %v3761_v6 = vunpack.c.l.bf16 %v7765_v0 }
 0x199   : > { %v2906_v57 = vadd.f32 %v2693_v10, %v2364_v46  ;;  %v5811_v63 = vpack.c.bf16 %v5751_v5, %v5749_v59  ;;  %v3142_v40 = vadd.f32 %v3078_v58, %v2904_v27  ;;  %v3273_v39 = vmul.f32 %v7352_v43, %v3220_v15 }
 0x19a   : > { %v3812_v55 = vmul.f32 %v7569_v51, %v7362_v53  ;;  %v3465_v23 = vrot.slane %v3269_v8, 1  ;;  %v3466_v29 = vrot.slane %v3271_v28, 1  ;;  %v3810_v35 = vmul.f32 %v7362_v53, %v3761_v6 }
 0x19b   : > { %v3144_v14 = vadd.f32 %v3080_v20, %v2906_v57  ;;  %6661 = vmatprep.mubr.msk.bf16.mxu1 %vm5943_vm4, %v5811_v63  ;;  %v3471_v4 = vrot.slane %v3273_v39, 1  ;;  %v3814_v56 = vmul.f32 %v7362_v53, %v3220_v15  ;;  %v7890_v46 = vunpack.c.l.bf16 %v7791_v48 }
 0x19c   : > { %v4007_v0 = vrot.slane %v3812_v55, 2  ;;  %v3467_v58 = vsel %vm2133_vm1, %v3465_v23, %v3466_v29  ;;  %v4006_v59 = vrot.slane %v3810_v35, 2  ;;  %v7894_v44 = vunpack.c.l.bf16 %v7793_v16 }
 0x19d   : > { %v4540_v20 = vunpack.c.l.bf16 %v7798_v45  ;;  %v3472_v5 = vsel %vm2133_vm1, %v3466_v29, %v3471_v4  ;;  %v3683_v10 = vadd.f32 %v3467_v58, %v3142_v40  ;;  %v4012_v27 = vrot.slane %v3814_v56, 2 }
 0x19e   : > { %v4398_v57 = vmul.f32 %v7386_v3, %v7890_v46  ;;  %v3685_v15 = vadd.f32 %v3472_v5, %v3144_v14  ;;  %v4008_v8 = vsel %vm2675_vm2, %v4006_v59, %v4007_v0  ;;  %v4400_v48 = vmul.f32 %v7386_v3, %v7894_v44 }
 0x19f   : > { %v4589_v28 = vmul.f32 %v7410_v11, %v7890_v46  ;;  %v4013_v16 = vsel %vm2675_vm2, %v4007_v0, %v4012_v27  ;;  %v4224_v6 = vadd.f32 %v4008_v8, %v3683_v10  ;;  %v4591_v45 = vmul.f32 %v7410_v11, %v7894_v44 }
 0x1a0   : > { %v4593_v63 = vmul.f32 %v7410_v11, %v4540_v20  ;;  %v4226_v40 = vadd.f32 %v4013_v16, %v3685_v15  ;;  %v5081_v55 = vunpack.c.l.bf16 %v7786_v41  ;;  %v5132_v14 = vmul.f32 %v7376_v60, %v7894_v44 }
 0x1a1   : > { %v4785_v39 = vrot.slane %v4589_v28, 1  ;;  %v4462_v23 = vadd.f32 %v4398_v57, %v4224_v6  ;;  %v4786_v29 = vrot.slane %v4591_v45, 1  ;;  %v5134_v4 = vmul.f32 %v7376_v60, %v4540_v20 }
 0x1a2   : > { %v4791_v35 = vrot.slane %v4593_v63, 1  ;;  %v4464_v56 = vadd.f32 %v4400_v48, %v4226_v40  ;;  %v5130_v0 = vmul.f32 %v7376_v60, %v5081_v55  ;;  %v5327_v58 = vrot.slane %v5132_v14, 2 }
 0x1a3   : > { %v783_v59 = vadd.f32 %v7711_v9, %v7261_v49  ;;  %v4787_v5 = vsel %vm2133_vm1, %v4785_v39, %v4786_v29  ;;  %v5332_v41 = vrot.slane %v5134_v4, 2  ;;  %v785_v27 = vadd.f32 %v7714_v13, %v7264_v50 }
 0x1a4   : > { %v4792_v10 = vsel %vm2133_vm1, %v4786_v29, %v4791_v35  ;;  %v5003_v57 = vadd.f32 %v4787_v5, %v4462_v23  ;;  %v5326_v8 = vrot.slane %v5130_v0, 2  ;;  %v789_v16 = vadd.f32 %v7729_v47, %v7261_v49  ;;  %v7933_v35 = vld [vmem:[#allocation2 + $0x40] sm:$0x11] }
 0x1a5   : > { %v5005_v15 = vadd.f32 %v4792_v10, %v4464_v56  ;;  %v983_v28 = vmax.f32 %v783_v59, 0.0  ;;  %v5333_v20 = vsel %vm2675_vm2, %v5327_v58, %v5332_v41  ;;  %v984_v48 = vmax.f32 %v785_v27, 0.0 }
 0x1a6   : > { %v791_v9 = vadd.f32 %v7732_v62, %v7264_v50  ;;  %v5328_v6 = vsel %vm2675_vm2, %v5326_v8, %v5327_v58  ;;  %v793_v13 = vadd.f32 %v7739_v21, %v7261_v49  ;;  %v985_v55 = vmax.f32 %v789_v16, 0.0  ;;  %v7936_v58 = vld [vmem:[#allocation2 + $0x30] sm:$0xee] }
 0x1a7   : > { %v5546_v45 = vadd.f32 %v5333_v20, %v5005_v15  ;;  %v1091_v63 = vmin.f32 %v983_v28, 6.0  ;;  %v5544_v40 = vadd.f32 %v5328_v6, %v5003_v57  ;;  %v1092_v39 = vmin.f32 %v984_v48, 6.0 }
 0x1a8   : > { %v986_v14 = vmax.f32 %v791_v9, 0.0  ;;  %v987_v29 = vmax.f32 %v793_v13, 0.0  ;;  %v795_v47 = vadd.f32 %v7745_v52, %v7264_v50  ;;  %v1825_v62 = vmul.f32 %v7567_v54, %v7340_v36 }
 0x1a9   : > { %v5622_v23 = vadd.f32 %v7416_v19, %v5546_v45  ;;  %v5620_v4 = vadd.f32 %v7416_v19, %v5544_v40  ;;  %v6702_v56 = vpack.c.bf16 %v1092_v39, %v1091_v63  ;;  %v1093_v0 = vmin.f32 %v985_v55, 6.0  ;;  %v7955_v39 = vld [vmem:[#allocation2 + $0x58] sm:$0x11] }
 0x1aa   : > { %v1094_v21 = vmin.f32 %v986_v14, 6.0  ;;  %v1095_v5 = vmin.f32 %v987_v29, 6.0  ;;  %v988_v10 = vmax.f32 %v795_v47, 0.0  ;;  %v1827_v41 = vmul.f32 %v7575_v34, %v7340_v36 }
 0x1ab   : > { %v5686_v59 = vmax.f32 %v5622_v23, 0.0  ;;  %v5684_v27 = vmax.f32 %v5620_v4, 0.0  ;;  %1539 = vst.msk [vmem:[#allocation2 + $0xb8] sm:$0xff] %vm7272_vm3, %v6702_v56  ;;  %v1901_v57 = vunpack.c.h.bf16 %v7933_v35  ;;  %v1954_v15 = vmul.f32 %v7567_v54, %v7323_v31  ;;  %v10652_v56 = vld [vmem:[#allocation18_spill] sm:$0xff] }
 0x1ac   : > { %v6703_v52 = vpack.c.bf16 %v1094_v21, %v1093_v0  ;;  %v1096_v28 = vmin.f32 %v988_v10, 6.0  ;;  %v1956_v20 = vmul.f32 %v7575_v34, %v7323_v31  ;;  %v2443_v48 = vunpack.c.h.bf16 %v7936_v58  ;;  %v10653_v10 = vld [vmem:[#allocation8_spill] sm:$0xff] }
 0x1ad   : > { %v5750_v8 = vmin.f32 %v5686_v59, 6.0  ;;  %v5748_v16 = vmin.f32 %v5684_v27, 6.0  ;;  %v1958_v9 = vmul.f32 %v7323_v31, %v1901_v57  ;;  %v2157_v6 = vrot.slane %v1954_v15, 1 }
 0x1ae   : > { %1540 = vst.msk [vmem:[#allocation2 + $0xc0] sm:$0xff] %vm7272_vm3, %v6703_v52  ;;  %v2498_v45 = vmul.f32 %v7575_v34, %v7314_v26  ;;  %v6704_v63 = vpack.c.bf16 %v1096_v28, %v1095_v5  ;;  %v2158_v13 = vrot.slane %v1956_v20, 1  ;;  %v2496_v54 = vmul.f32 %v7314_v26, %v2443_v48  ;;  %v7968_v52 = vld [vmem:[#allocation2 + $0x48] sm:$0xee] }
 0x1af   : > { %v2500_v40 = vmul.f32 %v7314_v26, %v1901_v57  ;;  %v5810_v55 = vpack.c.bf16 %v5750_v8, %v5748_v16  ;;  %v2162_v14 = vrot.slane %v1958_v9, 1  ;;  %v3083_v29 = vmul.f32 %v7805_v38, %v7349_v42 }
 0x1b0   : > { %v2700_v23 = vrot.slane %v2498_v45, 2  ;;  %1541 = vst.msk [vmem:[#allocation2 + $0xc8] sm:$0xff] %vm7272_vm3, %v6704_v63  ;;  %v2159_v47 = vsel %vm2133_vm1, %v2157_v6, %v2158_v13  ;;  %v2699_v34 = vrot.slane %v2496_v54, 2  ;;  %v3085_v0 = vmul.f32 %v10652_v56, %v7349_v42  ;;  %v10655_v54 = vld [vmem:[#allocation9_spill] sm:$0xff] }
 0x1b1   : > { %v2704_v4 = vrot.slane %v2500_v40, 2  ;;  %6033 = vmatmul.mubr.bf16.gmra.mrb[4].mxu1 %v5810_v55  ;;  %v2163_v21 = vsel %vm2133_vm1, %v2158_v13, %v2162_v14  ;;  %v2367_v59 = vadd.f32 %v2159_v47, %v1825_v62  ;;  %v3223_v5 = vunpack.c.h.bf16 %v7955_v39  ;;  %v7980_v55 = vld [vmem:[#allocation2 + $0x60] sm:$0xff] }
 0x1b2   : > { %v3276_v27 = vmul.f32 %v7805_v38, %v10653_v10  ;;  %v1659_v57 = vld [vmem:[#allocation2 + $0xb8] sm:$0xff]  ;;  %v2369_v15 = vadd.f32 %v2163_v21, %v1827_v41  ;;  %v2701_v8 = vsel %vm2675_vm2, %v2699_v34, %v2700_v23  ;;  %v3278_v20 = vmul.f32 %v10652_v56, %v10653_v10  ;;  %v7985_v21 = vld [vmem:[#allocation2 + $0x68] sm:$0xff] }
 0x1b3   : > { %v2705_v28 = vsel %vm2675_vm2, %v2700_v23, %v2704_v4  ;;  %v1660_v16 = vsel %vm7422_vm15, 0, %v1659_v57  ;;  %v2909_v62 = vadd.f32 %v2701_v8, %v2367_v59  ;;  %v3280_v9 = vmul.f32 %v10653_v10, %v3223_v5  ;;  %v7987_v59 = vld [vmem:[#allocation2 + $0x70] sm:$0x11] }
 0x1b4   : > { %v3478_v6 = vrot.slane %v3276_v27, 1  ;;  %1661 = vst [vmem:[#allocation2 + $0xb8] sm:$0xff] %v1660_v16  ;;  %v2911_v63 = vadd.f32 %v2705_v28, %v2369_v15  ;;  %v3479_v13 = vrot.slane %v3278_v20, 1  ;;  %v3764_v41 = vunpack.c.h.bf16 %v7968_v52  ;;  %v7991_v28 = vld [vmem:[#allocation2 + $0x60] sm:$0xee] }
 0x1b5   : > { %v1601_v45 = vld [vmem:[#allocation2 + $0xc0] sm:$0x11]  ;;  %v3819_v40 = vmul.f32 %v10652_v56, %v10655_v54  ;;  %v3147_v47 = vadd.f32 %v3083_v29, %v2909_v62  ;;  %v3483_v34 = vrot.slane %v3280_v9, 1  ;;  %v3821_v4 = vmul.f32 %v10655_v54, %v3223_v5 }
 0x1b6   : > { %v1602_v23 = vsel %vm7332_vm12, 0, %v1601_v45  ;;  %v3149_v27 = vadd.f32 %v3085_v0, %v2911_v63  ;;  %v3480_v57 = vsel %vm2133_vm1, %v3478_v6, %v3479_v13  ;;  %v3817_v15 = vmul.f32 %v10655_v54, %v3764_v41  ;;  %v10657_v63 = vld [vmem:[#allocation11_spill] sm:$0xff] }
 0x1b7   : > { %1603 = vst [vmem:[#allocation2 + $0xc0] sm:$0x11] %v1602_v23  ;;  %v4020_v8 = vrot.slane %v3819_v40, 2  ;;  %v3484_v20 = vsel %vm2133_vm1, %v3479_v13, %v3483_v34  ;;  %v3688_v16 = vadd.f32 %v3480_v57, %v3147_v47  ;;  %v4024_v29 = vrot.slane %v3821_v4, 2  ;;  %v10658_v40 = vld [vmem:[#allocation12_spill] sm:$0xff] }
 0x1b8   : > { %v7995_v62 = vunpack.c.h.bf16 %v7980_v55  ;;  %v3690_v5 = vadd.f32 %v3484_v20, %v3149_v27  ;;  %v4019_v9 = vrot.slane %v3817_v15, 2  ;;  %v7998_v45 = vunpack.c.h.bf16 %v7985_v21 }
 0x1b9   : > { %v4543_v0 = vunpack.c.h.bf16 %v7987_v59  ;;  %v4025_v6 = vsel %vm2675_vm2, %v4020_v8, %v4024_v29  ;;  %v5084_v23 = vunpack.c.h.bf16 %v7991_v28  ;;  %v1824_v32 = vmul.f32 %v7564_v17, %v10646_v18 }
 0x1ba   : > { %v4403_v41 = vmul.f32 %v10657_v63, %v7995_v62  ;;  %v4596_v13 = vmul.f32 %v10658_v40, %v7995_v62  ;;  %v4021_v47 = vsel %vm2675_vm2, %v4019_v9, %v4020_v8  ;;  %v4231_v34 = vadd.f32 %v4025_v6, %v3690_v5 }
 0x1bb   : > { %v4405_v4 = vmul.f32 %v10657_v63, %v7998_v45  ;;  %v4598_v27 = vmul.f32 %v10658_v40, %v7998_v45  ;;  %v4229_v57 = vadd.f32 %v4021_v47, %v3688_v16  ;;  %v4600_v15 = vmul.f32 %v10658_v40, %v4543_v0 }
 0x1bc   : > { %v4798_v20 = vrot.slane %v4596_v13, 1  ;;  %v5137_v29 = vmul.f32 %v10645_v22, %v5084_v23  ;;  %v5139_v33 = vmul.f32 %v10645_v22, %v7998_v45  ;;  %v5141_v8 = vmul.f32 %v10645_v22, %v4543_v0 }
 0x1bd   : > { %v4469_v12 = vadd.f32 %v4405_v4, %v4231_v34  ;;  %v4799_v61 = vrot.slane %v4598_v27, 1  ;;  %v4467_v5 = vadd.f32 %v4403_v41, %v4229_v57  ;;  %v4803_v9 = vrot.slane %v4600_v15, 1 }
 0x1be   : > { %v5339_v6 = vrot.slane %v5137_v29, 2  ;;  %v5340_v47 = vrot.slane %v5139_v33, 2  ;;  %v5344_v1 = vrot.slane %v5141_v8, 2  ;;  %v1826_v13 = vmul.f32 %v7569_v51, %v10646_v18  ;;  %v8032_v8 = vpop.f32.mrb[64].mxu0 }
 0x1bf   : > { %v4800_v16 = vsel %vm2133_vm1, %v4798_v20, %v4799_v61  ;;  %v4804_v23 = vsel %vm2133_vm1, %v4799_v61, %v4803_v9  ;;  %v1900_v4 = vunpack.c.l.bf16 %v7933_v35  ;;  %v1953_v0 = vmul.f32 %v7564_v17, %v7320_v30  ;;  %10659 = vst [vmem:[#allocation18_spill] sm:$0xff] %v8032_v8  ;;  %v8037_v9 = vpop.f32.mrb[65].mxu0  ;;  %v10670_v8 = vld [vmem:[#allocation20_spill] sm:$0xff] }
 0x1c0   : > { %v5008_v34 = vadd.f32 %v4800_v16, %v4467_v5  ;;  %v5010_v41 = vadd.f32 %v4804_v23, %v4469_v12  ;;  %v5341_v27 = vsel %vm2675_vm2, %v5339_v6, %v5340_v47  ;;  %v5345_v57 = vsel %vm2675_vm2, %v5340_v47, %v5344_v1  ;;  %10660 = vst [vmem:[#allocation8_spill] sm:$0xff] %v8037_v9 }
 0x1c1   : > { %v1955_v33 = vmul.f32 %v7569_v51, %v7320_v30  ;;  %v1957_v20 = vmul.f32 %v7320_v30, %v1900_v4  ;;  %v2154_v29 = vrot.slane %v1953_v0, 1  ;;  %v2442_v61 = vunpack.c.l.bf16 %v7936_v58 }
 0x1c2   : > { %v5549_v15 = vadd.f32 %v5341_v27, %v5008_v34  ;;  %v5551_v35 = vadd.f32 %v5345_v57, %v5010_v41  ;;  %v2497_v17 = vmul.f32 %v7569_v51, %v7311_v25  ;;  %v2499_v12 = vmul.f32 %v7311_v25, %v1900_v4 }
 0x1c3   : > { %v2155_v5 = vrot.slane %v1955_v33, 1  ;;  %v2160_v6 = vrot.slane %v1957_v20, 1  ;;  %v2495_v16 = vmul.f32 %v7311_v25, %v2442_v61  ;;  %v3082_v47 = vmul.f32 %v7890_v46, %v7343_v37  ;;  %v8049_v61 = vpop.f32.mrb[66].mxu0 }
 0x1c4   : > { %v5625_v1 = vadd.f32 %v7433_v24, %v5549_v15  ;;  %v5627_v58 = vadd.f32 %v7433_v24, %v5551_v35  ;;  %v2697_v34 = vrot.slane %v2497_v17, 2  ;;  %v2702_v0 = vrot.slane %v2499_v12, 2  ;;  %10661 = vst [vmem:[#allocation13_spill] sm:$0xff] %v8049_v61 }
 0x1c5   : > { %v2156_v23 = vsel %vm2133_vm1, %v2154_v29, %v2155_v5  ;;  %v2161_v51 = vsel %vm2133_vm1, %v2155_v5, %v2160_v6  ;;  %v2696_v27 = vrot.slane %v2495_v16, 2  ;;  %v3084_v20 = vmul.f32 %v7894_v44, %v7343_v37  ;;  %v8055_v5 = vpop.f32.mrb[67].mxu0 }
 0x1c6   : > { %v5689_v41 = vmax.f32 %v5625_v1, 0.0  ;;  %v2366_v4 = vadd.f32 %v2156_v23, %v1824_v32  ;;  %v5691_v57 = vmax.f32 %v5627_v58, 0.0  ;;  %v2368_v33 = vadd.f32 %v2161_v51, %v1826_v13  ;;  %10662 = vst [vmem:[#allocation9_spill] sm:$0xff] %v8055_v5  ;;  %v8059_v6 = vpop.f32.mrb[68].mxu0 }
 0x1c7   : > { %v2703_v15 = vsel %vm2675_vm2, %v2697_v34, %v2702_v0  ;;  %v2698_v35 = vsel %vm2675_vm2, %v2696_v27, %v2697_v34  ;;  %v3222_v29 = vunpack.c.l.bf16 %v7955_v39  ;;  %v3275_v17 = vmul.f32 %v7890_v46, %v7352_v43  ;;  %10663 = vst [vmem:[#allocation6_spill] sm:$0xff] %v8059_v6  ;;  %v8161_v6 = vld [vmem:[#allocation2 + $0x78] sm:$0xff] }
 0x1c8   : > { %v5753_v9 = vmin.f32 %v5689_v41, 6.0  ;;  %v5755_v32 = vmin.f32 %v5691_v57, 6.0  ;;  %v2908_v12 = vadd.f32 %v2698_v35, %v2366_v4  ;;  %v2910_v13 = vadd.f32 %v2703_v15, %v2368_v33 }
 0x1c9   : > { %v3277_v1 = vmul.f32 %v7894_v44, %v7352_v43  ;;  %v3279_v16 = vmul.f32 %v7352_v43, %v3222_v29  ;;  %v3475_v58 = vrot.slane %v3275_v17, 1  ;;  %v3763_v23 = vunpack.c.l.bf16 %v7968_v52 }
 0x1ca   : > { %v3818_v39 = vmul.f32 %v7894_v44, %v7362_v53  ;;  %v5813_v34 = vpack.c.bf16 %v5755_v32, %v5753_v9  ;;  %v3146_v0 = vadd.f32 %v3082_v47, %v2908_v12  ;;  %v3148_v41 = vadd.f32 %v3084_v20, %v2910_v13 }
 0x1cb   : > { %v3476_v51 = vrot.slane %v3277_v1, 1  ;;  %v3481_v27 = vrot.slane %v3279_v16, 1  ;;  %v3816_v4 = vmul.f32 %v7362_v53, %v3763_v23  ;;  %v3820_v57 = vmul.f32 %v7362_v53, %v3222_v29 }
 0x1cc   : > { %v4017_v33 = vrot.slane %v3818_v39, 2  ;;  %6662 = vmatprep.mubr.msk.bf16.mxu1 %vm5943_vm4, %v5813_v34  ;;  %v8070_v35 = vunpack.c.l.bf16 %v7980_v55  ;;  %v8073_v52 = vunpack.c.l.bf16 %v7985_v21  ;;  %v4542_v9 = vunpack.c.l.bf16 %v7987_v59 }
 0x1cd   : > { %v3477_v15 = vsel %vm2133_vm1, %v3475_v58, %v3476_v51  ;;  %v3482_v47 = vsel %vm2133_vm1, %v3476_v51, %v3481_v27  ;;  %v4016_v17 = vrot.slane %v3816_v4, 2  ;;  %v4022_v32 = vrot.slane %v3820_v57, 2 }
 0x1ce   : > { %v3687_v20 = vadd.f32 %v3477_v15, %v3146_v0  ;;  %v3689_v12 = vadd.f32 %v3482_v47, %v3148_v41  ;;  %v4402_v29 = vmul.f32 %v7386_v3, %v8070_v35  ;;  %v4404_v13 = vmul.f32 %v7386_v3, %v8073_v52  ;;  %v10664_v15 = vld [vmem:[#allocation14_spill] sm:$0xff] }
 0x1cf   : > { %v4595_v55 = vmul.f32 %v7410_v11, %v8070_v35  ;;  %v4018_v21 = vsel %vm2675_vm2, %v4016_v17, %v4017_v33  ;;  %v4023_v1 = vsel %vm2675_vm2, %v4017_v33, %v4022_v32  ;;  %v4597_v59 = vmul.f32 %v7410_v11, %v8073_v52 }
 0x1d0   : > { %v4599_v16 = vmul.f32 %v7410_v11, %v4542_v9  ;;  %v4228_v58 = vadd.f32 %v4018_v21, %v3687_v20  ;;  %v4230_v23 = vadd.f32 %v4023_v1, %v3689_v12  ;;  %v5083_v34 = vunpack.c.l.bf16 %v7991_v28 }
 0x1d1   : > { %v4795_v39 = vrot.slane %v4595_v55, 1  ;;  %v4796_v0 = vrot.slane %v4597_v59, 1  ;;  %v5138_v51 = vmul.f32 %v7376_v60, %v8073_v52  ;;  %v5140_v27 = vmul.f32 %v7376_v60, %v4542_v9  ;;  %v10665_v9 = vld [vmem:[#allocation15_spill] sm:$0xff] }
 0x1d2   : > { %v4801_v41 = vrot.slane %v4599_v16, 1  ;;  %v4466_v4 = vadd.f32 %v4402_v29, %v4228_v58  ;;  %v4468_v57 = vadd.f32 %v4404_v13, %v4230_v23  ;;  %v5136_v33 = vmul.f32 %v7376_v60, %v5083_v34  ;;  %v10666_v13 = vld [vmem:[#allocation16_spill] sm:$0xff]  ;;  %v10667_v58 = vld [vmem:[#allocation17_spill] sm:$0xff] }
 0x1d3   : > { %v799_v47 = vadd.f32 %v10664_v15, %v7261_v49  ;;  %v4797_v20 = vsel %vm2133_vm1, %v4795_v39, %v4796_v0  ;;  %v5337_v32 = vrot.slane %v5138_v51, 2  ;;  %v5342_v28 = vrot.slane %v5140_v27, 2  ;;  %v8107_v15 = vld [vmem:[#allocation2 + $0x58] sm:$0x11] }
 0x1d4   : > { %v4802_v17 = vsel %vm2133_vm1, %v4796_v0, %v4801_v41  ;;  %v5007_v12 = vadd.f32 %v4797_v20, %v4466_v4  ;;  %v5336_v21 = vrot.slane %v5136_v33, 2  ;;  %v801_v29 = vadd.f32 %v10665_v9, %v7264_v50  ;;  %v10668_v41 = vld [vmem:[#allocation19_spill] sm:$0xff] }
 0x1d5   : > { %v5009_v55 = vadd.f32 %v4802_v17, %v4468_v57  ;;  %v989_v1 = vmax.f32 %v799_v47, 0.0  ;;  %v5343_v59 = vsel %vm2675_vm2, %v5337_v32, %v5342_v28  ;;  %v803_v16 = vadd.f32 %v10666_v13, %v7261_v49 }
 0x1d6   : > { %v805_v23 = vadd.f32 %v10667_v58, %v7264_v50  ;;  %v5338_v39 = vsel %vm2675_vm2, %v5336_v21, %v5337_v32  ;;  %v809_v51 = vadd.f32 %v10668_v41, %v7261_v49  ;;  %v990_v4 = vmax.f32 %v801_v29, 0.0 }
 0x1d7   : > { %v5550_v34 = vadd.f32 %v5343_v59, %v5009_v55  ;;  %v1097_v0 = vmin.f32 %v989_v1, 6.0  ;;  %v5548_v27 = vadd.f32 %v5338_v39, %v5007_v12  ;;  %v991_v57 = vmax.f32 %v803_v16, 0.0  ;;  %v8115_v12 = vld [vmem:[#allocation2 + $0x48] sm:$0xee] }
 0x1d8   : > { %v992_v33 = vmax.f32 %v805_v23, 0.0  ;;  %v993_v20 = vmax.f32 %v809_v51, 0.0  ;;  %v1829_v17 = vmul.f32 %v7805_v38, %v7340_v36  ;;  %v1831_v32 = vmul.f32 %v10652_v56, %v7340_v36 }
 0x1d9   : > { %v5626_v47 = vadd.f32 %v7416_v19, %v5550_v34  ;;  %v5624_v28 = vadd.f32 %v7416_v19, %v5548_v27  ;;  %v1098_v55 = vmin.f32 %v990_v4, 6.0  ;;  %v1099_v21 = vmin.f32 %v991_v57, 6.0  ;;  %v8126_v4 = vpop.f32.mrb[69].mxu0 }
 0x1da   : > { %v1100_v1 = vmin.f32 %v992_v33, 6.0  ;;  %v8117_v9 = vmin.f32 %v993_v20, 6.0  ;;  %v1903_v29 = vunpack.c.h.bf16 %v8107_v15  ;;  %v1960_v13 = vmul.f32 %v7805_v38, %v7323_v31  ;;  %10669 = vst [vmem:[#allocation14_spill] sm:$0xff] %v8126_v4 }
 0x1db   : > { %v5690_v59 = vmax.f32 %v5626_v47, 0.0  ;;  %v5688_v16 = vmax.f32 %v5624_v28, 0.0  ;;  %v6705_v58 = vpack.c.bf16 %v1098_v55, %v1097_v0  ;;  %v1962_v39 = vmul.f32 %v10652_v56, %v7323_v31  ;;  %v8135_v47 = vld [vmem:[#allocation2 + $0x70] sm:$0x11] }
 0x1dc   : > { %v6706_v23 = vpack.c.bf16 %v1100_v1, %v1099_v21  ;;  %v1964_v41 = vmul.f32 %v7323_v31, %v1903_v29  ;;  %v2167_v51 = vrot.slane %v1960_v13, 1  ;;  %v2445_v27 = vunpack.c.h.bf16 %v8115_v12 }
 0x1dd   : > { %v5754_v34 = vmin.f32 %v5690_v59, 6.0  ;;  %v5752_v57 = vmin.f32 %v5688_v16, 6.0  ;;  %1542 = vst.msk [vmem:[#allocation2 + $0xd0] sm:$0xff] %vm7272_vm3, %v6705_v58  ;;  %v2168_v38 = vrot.slane %v1962_v39, 1  ;;  %v2504_v0 = vmul.f32 %v10652_v56, %v7314_v26  ;;  %v8143_v58 = vld [vmem:[#allocation2 + $0x60] sm:$0xee] }
 0x1de   : > { %1543 = vst.msk [vmem:[#allocation2 + $0xd8] sm:$0xff] %vm7272_vm3, %v6706_v23  ;;  %v2506_v33 = vmul.f32 %v7314_v26, %v1903_v29  ;;  %v2172_v20 = vrot.slane %v1964_v41, 1  ;;  %v2502_v28 = vmul.f32 %v7314_v26, %v2445_v27  ;;  %v3087_v55 = vmul.f32 %v7995_v62, %v7349_v42 }
 0x1df   : > { %v3089_v21 = vmul.f32 %v7998_v45, %v7349_v42  ;;  %v5812_v1 = vpack.c.bf16 %v5754_v34, %v5752_v57  ;;  %v2169_v59 = vsel %vm2133_vm1, %v2167_v51, %v2168_v38  ;;  %v2710_v13 = vrot.slane %v2504_v0, 2 }
 0x1e0   : > { %v2714_v16 = vrot.slane %v2506_v33, 2  ;;  %v2173_v56 = vsel %vm2133_vm1, %v2168_v38, %v2172_v20  ;;  %v2371_v29 = vadd.f32 %v2169_v59, %v1829_v17  ;;  %v2709_v23 = vrot.slane %v2502_v28, 2  ;;  %v8157_v28 = vld [vmem:[#allocation2 + $0x80] sm:$0xff] }
 0x1e1   : > { %v3225_v39 = vunpack.c.h.bf16 %v8135_v47  ;;  %6041 = vmatmul.mubr.bf16.gmra.mrb[8].mxu1 %v5812_v1  ;;  %v2373_v41 = vadd.f32 %v2173_v56, %v1831_v32  ;;  %v3282_v4 = vmul.f32 %v7995_v62, %v10653_v10  ;;  %v3284_v34 = vmul.f32 %v7998_v45, %v10653_v10 }
 0x1e2   : > { %v2715_v27 = vsel %vm2675_vm2, %v2710_v13, %v2714_v16  ;;  %v2711_v51 = vsel %vm2675_vm2, %v2709_v23, %v2710_v13  ;;  %v3766_v38 = vunpack.c.h.bf16 %v8143_v58  ;;  %v3825_v17 = vmul.f32 %v7998_v45, %v10655_v54 }
 0x1e3   : > { %v3286_v57 = vmul.f32 %v10653_v10, %v3225_v39  ;;  %v2913_v0 = vadd.f32 %v2711_v51, %v2371_v29  ;;  %v2915_v33 = vadd.f32 %v2715_v27, %v2373_v41  ;;  %v3488_v32 = vrot.slane %v3282_v4, 1  ;;  %v8167_v27 = vld [vmem:[#allocation2 + $0x88] sm:$0x11] }
 0x1e4   : > { %v3489_v20 = vrot.slane %v3284_v34, 1  ;;  %v1662_v1 = vld [vmem:[#allocation2 + $0xd0] sm:$0xff]  ;;  %v3823_v56 = vmul.f32 %v10655_v54, %v3766_v38  ;;  %v3827_v13 = vmul.f32 %v10655_v54, %v3225_v39  ;;  %v4030_v23 = vrot.slane %v3825_v17, 2  ;;  %v8169_v34 = vld [vmem:[#allocation2 + $0x78] sm:$0xee] }
 0x1e5   : > { %v1604_v59 = vld [vmem:[#allocation2 + $0xd8] sm:$0x11]  ;;  %v3493_v16 = vrot.slane %v3286_v57, 1  ;;  %v1663_v5 = vsel %vm7422_vm15, 0, %v1662_v1  ;;  %v3151_v4 = vadd.f32 %v3087_v55, %v2913_v0  ;;  %v3153_v41 = vadd.f32 %v3089_v21, %v2915_v33 }
 0x1e6   : > { %v1605_v29 = vsel %vm7332_vm12, 0, %v1604_v59  ;;  %1664 = vst [vmem:[#allocation2 + $0xd0] sm:$0xff] %v1663_v5  ;;  %v3490_v51 = vsel %vm2133_vm1, %v3488_v32, %v3489_v20  ;;  %v4029_v57 = vrot.slane %v3823_v56, 2  ;;  %v4034_v38 = vrot.slane %v3827_v13, 2 }
 0x1e7   : > { %1606 = vst [vmem:[#allocation2 + $0xd8] sm:$0x11] %v1605_v29  ;;  %v3494_v39 = vsel %vm2133_vm1, %v3489_v20, %v3493_v16  ;;  %v3692_v17 = vadd.f32 %v3490_v51, %v3151_v4  ;;  %v8174_v1 = vunpack.c.h.bf16 %v8161_v6  ;;  %v8177_v55 = vunpack.c.h.bf16 %v8157_v28 }
 0x1e8   : > { %v3694_v61 = vadd.f32 %v3494_v39, %v3153_v41  ;;  %v4031_v21 = vsel %vm2675_vm2, %v4029_v57, %v4030_v23  ;;  %v4035_v0 = vsel %vm2675_vm2, %v4030_v23, %v4034_v38  ;;  %v4545_v5 = vunpack.c.h.bf16 %v8167_v27 }
 0x1e9   : > { %v5086_v33 = vunpack.c.h.bf16 %v8169_v34  ;;  %v4233_v32 = vadd.f32 %v4031_v21, %v3692_v17  ;;  %v4407_v59 = vmul.f32 %v10657_v63, %v8174_v1  ;;  %v4409_v16 = vmul.f32 %v10657_v63, %v8177_v55 }
 0x1ea   : > { %v4235_v20 = vadd.f32 %v4035_v0, %v3694_v61  ;;  %v4602_v56 = vmul.f32 %v10658_v40, %v8174_v1  ;;  %v4604_v13 = vmul.f32 %v10658_v40, %v8177_v55  ;;  %v4606_v23 = vmul.f32 %v10658_v40, %v4545_v5 }
 0x1eb   : > { %v5143_v29 = vmul.f32 %v10645_v22, %v5086_v33  ;;  %v4471_v4 = vadd.f32 %v4407_v59, %v4233_v32  ;;  %v5145_v61 = vmul.f32 %v10645_v22, %v8177_v55  ;;  %v5147_v51 = vmul.f32 %v10645_v22, %v4545_v5 }
 0x1ec   : > { %v4473_v41 = vadd.f32 %v4409_v16, %v4235_v20  ;;  %v4808_v39 = vrot.slane %v4602_v56, 1  ;;  %v4809_v57 = vrot.slane %v4604_v13, 1  ;;  %v4813_v38 = vrot.slane %v4606_v23, 1 }
 0x1ed   : > { %v5349_v17 = vrot.slane %v5143_v29, 2  ;;  %v5350_v21 = vrot.slane %v5145_v61, 2  ;;  %v5354_v0 = vrot.slane %v5147_v51, 2  ;;  %v811_v63 = vadd.f32 %v10670_v8, %v7264_v50 }
 0x1ee   : > { %v1828_v40 = vmul.f32 %v7890_v46, %v10646_v18  ;;  %v4810_v33 = vsel %vm2133_vm1, %v4808_v39, %v4809_v57  ;;  %v4814_v32 = vsel %vm2133_vm1, %v4809_v57, %v4813_v38  ;;  %v1830_v20 = vmul.f32 %v7894_v44, %v10646_v18 }
 0x1ef   : > { %v1902_v5 = vunpack.c.l.bf16 %v8107_v15  ;;  %v5012_v59 = vadd.f32 %v4810_v33, %v4471_v4  ;;  %v5014_v16 = vadd.f32 %v4814_v32, %v4473_v41  ;;  %v5351_v56 = vsel %vm2675_vm2, %v5349_v17, %v5350_v21 }
 0x1f0   : > { %v5355_v13 = vsel %vm2675_vm2, %v5350_v21, %v5354_v0  ;;  %v994_v23 = vmax.f32 %v811_v63, 0.0  ;;  %v1959_v8 = vmul.f32 %v7890_v46, %v7320_v30  ;;  %v1961_v29 = vmul.f32 %v7894_v44, %v7320_v30  ;;  %v8215_v63 = vpop.f32.mrb[70].mxu0 }
 0x1f1   : > { %v1963_v61 = vmul.f32 %v7320_v30, %v1902_v5  ;;  %v5553_v51 = vadd.f32 %v5351_v56, %v5012_v59  ;;  %v5555_v39 = vadd.f32 %v5355_v13, %v5014_v16  ;;  %v2444_v57 = vunpack.c.l.bf16 %v8115_v12  ;;  %v8221_v32 = vpop.f32.mrb[71].mxu0 }
 0x1f2   : > { %v2503_v15 = vmul.f32 %v7894_v44, %v7311_v25  ;;  %v1102_v4 = vmin.f32 %v994_v23, 6.0  ;;  %v2164_v41 = vrot.slane %v1959_v8, 1  ;;  %v2165_v38 = vrot.slane %v1961_v29, 1  ;;  %v8226_v29 = vpop.f32.mrb[72].mxu0 }
 0x1f3   : > { %v2170_v17 = vrot.slane %v1963_v61, 1  ;;  %v5629_v46 = vadd.f32 %v7433_v24, %v5553_v51  ;;  %v5631_v21 = vadd.f32 %v7433_v24, %v5555_v39  ;;  %v2501_v0 = vmul.f32 %v7311_v25, %v2444_v57  ;;  %10671 = vst [vmem:[#allocation15_spill] sm:$0xff] %v8226_v29  ;;  %v8234_v39 = vpop.f32.mrb[73].mxu0 }
 0x1f4   : > { %v2505_v33 = vmul.f32 %v7311_v25, %v1902_v5  ;;  %v6707_v12 = vpack.c.bf16 %v1102_v4, %v8117_v9  ;;  %v2166_v44 = vsel %vm2133_vm1, %v2164_v41, %v2165_v38  ;;  %v2707_v16 = vrot.slane %v2503_v15, 2  ;;  %10672 = vst [vmem:[#allocation16_spill] sm:$0xff] %v8234_v39  ;;  %v8239_v4 = vpop.f32.mrb[74].mxu0 }
 0x1f5   : > { %v2171_v59 = vsel %vm2133_vm1, %v2165_v38, %v2170_v17  ;;  %v5693_v56 = vmax.f32 %v5629_v46, 0.0  ;;  %v5695_v13 = vmax.f32 %v5631_v21, 0.0  ;;  %v2370_v23 = vadd.f32 %v2166_v44, %v1828_v40  ;;  %10673 = vst [vmem:[#allocation17_spill] sm:$0xff] %v8239_v4  ;;  %v8246_v21 = vpop.f32.mrb[75].mxu0 }
 0x1f6   : > { %v2372_v8 = vadd.f32 %v2171_v59, %v1830_v20  ;;  %1544 = vst.msk [vmem:[#allocation2 + $0xe0] sm:$0xff] %vm7272_vm3, %v6707_v12  ;;  %v2706_v61 = vrot.slane %v2501_v0, 2  ;;  %v2712_v5 = vrot.slane %v2505_v33, 2  ;;  %v3086_v51 = vmul.f32 %v8070_v35, %v7343_v37  ;;  %10674 = vst [vmem:[#allocation19_spill] sm:$0xff] %v8246_v21 }
 0x1f7   : > { %v3088_v9 = vmul.f32 %v8073_v52, %v7343_v37  ;;  %v5757_v57 = vmin.f32 %v5693_v56, 6.0  ;;  %v5759_v15 = vmin.f32 %v5695_v13, 6.0  ;;  %v3224_v40 = vunpack.c.l.bf16 %v8135_v47 }
 0x1f8   : > { %v3281_v20 = vmul.f32 %v8070_v35, %v7352_v43  ;;  %v2708_v41 = vsel %vm2675_vm2, %v2706_v61, %v2707_v16  ;;  %v2713_v38 = vsel %vm2675_vm2, %v2707_v16, %v2712_v5  ;;  %v3283_v17 = vmul.f32 %v8073_v52, %v7352_v43 }
 0x1f9   : > { %v3765_v46 = vunpack.c.l.bf16 %v8143_v58  ;;  %v5815_v0 = vpack.c.bf16 %v5759_v15, %v5757_v57  ;;  %v2912_v33 = vadd.f32 %v2708_v41, %v2370_v23  ;;  %v2914_v12 = vadd.f32 %v2713_v38, %v2372_v8 }
 0x1fa   : > { %v3285_v47 = vmul.f32 %v7352_v43, %v3224_v40  ;;  %v3485_v44 = vrot.slane %v3281_v20, 1  ;;  %v3486_v59 = vrot.slane %v3283_v17, 1  ;;  %v3824_v13 = vmul.f32 %v8073_v52, %v7362_v53 }
 0x1fb   : > { %v3822_v56 = vmul.f32 %v7362_v53, %v3765_v46  ;;  %6663 = vmatprep.mubr.msk.bf16.mxu1 %vm5943_vm4, %v5815_v0  ;;  %v3150_v16 = vadd.f32 %v3086_v51, %v2912_v33  ;;  %v3152_v61 = vadd.f32 %v3088_v9, %v2914_v12  ;;  %v3826_v58 = vmul.f32 %v7362_v53, %v3224_v40 }
 0x1fc   : > { %v3491_v5 = vrot.slane %v3285_v47, 1  ;;  %v3487_v57 = vsel %vm2133_vm1, %v3485_v44, %v3486_v59  ;;  %v4027_v8 = vrot.slane %v3824_v13, 2  ;;  %v8256_v15 = vunpack.c.l.bf16 %v8161_v6 }
 0x1fd   : > { %v4026_v23 = vrot.slane %v3822_v56, 2  ;;  %v3691_v41 = vadd.f32 %v3487_v57, %v3150_v16  ;;  %v4032_v38 = vrot.slane %v3826_v58, 2  ;;  %v8260_v17 = vunpack.c.l.bf16 %v8157_v28 }
 0x1fe   : > { %v3492_v20 = vsel %vm2133_vm1, %v3486_v59, %v3491_v5  ;;  %v4406_v9 = vmul.f32 %v7386_v3, %v8256_v15  ;;  %v4544_v40 = vunpack.c.l.bf16 %v8167_v27  ;;  %v4601_v12 = vmul.f32 %v7410_v11, %v8256_v15 }
 0x1ff   : > { %v3693_v46 = vadd.f32 %v3492_v20, %v3152_v61  ;;  %v4028_v51 = vsel %vm2675_vm2, %v4026_v23, %v4027_v8  ;;  %v4033_v0 = vsel %vm2675_vm2, %v4027_v8, %v4032_v38  ;;  %v4408_v6 = vmul.f32 %v7386_v3, %v8260_v17 }
 0x200   : > { %v4232_v33 = vadd.f32 %v4028_v51, %v3691_v41  ;;  %v4603_v28 = vmul.f32 %v7410_v11, %v8260_v17  ;;  %v4605_v44 = vmul.f32 %v7410_v11, %v4544_v40  ;;  %v5085_v59 = vunpack.c.l.bf16 %v8169_v34  ;;  %v10675_v41 = vld [vmem:[#allocation10_spill] sm:$0xff] }
 0x201   : > { %v4234_v47 = vadd.f32 %v4033_v0, %v3693_v46  ;;  %v4805_v13 = vrot.slane %v4601_v12, 1  ;;  %v5144_v27 = vmul.f32 %v7376_v60, %v8260_v17  ;;  %v5146_v16 = vmul.f32 %v7376_v60, %v4544_v40 }
 0x202   : > { %v4470_v56 = vadd.f32 %v4406_v9, %v4232_v33  ;;  %v4806_v5 = vrot.slane %v4603_v28, 1  ;;  %v4811_v58 = vrot.slane %v4605_v44, 1  ;;  %v5142_v57 = vmul.f32 %v7376_v60, %v5085_v59  ;;  %v10676_v9 = vld [vmem:[#allocation21_spill] sm:$0xff]  ;;  %v10677_v44 = vld [vmem:[#allocation22_spill] sm:$0xff] }
 0x203   : > { %v4472_v61 = vadd.f32 %v4408_v6, %v4234_v47  ;;  %v5347_v23 = vrot.slane %v5144_v27, 2  ;;  %v5352_v8 = vrot.slane %v5146_v16, 2  ;;  %v813_v20 = vadd.f32 %v7850_v7, %v7261_v49 }
 0x204   : > { %v815_v34 = vadd.f32 %v10675_v41, %v7264_v50  ;;  %v4807_v38 = vsel %vm2133_vm1, %v4805_v13, %v4806_v5  ;;  %v4812_v46 = vsel %vm2133_vm1, %v4806_v5, %v4811_v58  ;;  %v5346_v51 = vrot.slane %v5142_v57, 2  ;;  %v10678_v5 = vld [vmem:[#allocation23_spill] sm:$0xff] }
 0x205   : > { %v819_v40 = vadd.f32 %v10676_v9, %v7261_v49  ;;  %v5011_v0 = vadd.f32 %v4807_v38, %v4470_v56  ;;  %v5013_v33 = vadd.f32 %v4812_v46, %v4472_v61  ;;  %v5353_v6 = vsel %vm2675_vm2, %v5347_v23, %v5352_v8  ;;  %v10679_v61 = vld [vmem:[#allocation24_spill] sm:$0xff] }
 0x206   : > { %v995_v12 = vmax.f32 %v813_v20, 0.0  ;;  %v5348_v47 = vsel %vm2675_vm2, %v5346_v51, %v5347_v23  ;;  %v996_v28 = vmax.f32 %v815_v34, 0.0  ;;  %v821_v59 = vadd.f32 %v10677_v44, %v7264_v50  ;;  %v8295_v20 = vld [vmem:[#allocation2 + $0x70] sm:$0x11] }
 0x207   : > { %v997_v7 = vmax.f32 %v819_v40, 0.0  ;;  %v5552_v27 = vadd.f32 %v5348_v47, %v5011_v0  ;;  %v5554_v13 = vadd.f32 %v5353_v6, %v5013_v33  ;;  %v823_v58 = vadd.f32 %v10678_v5, %v7261_v49  ;;  %v8303_v33 = vld [vmem:[#allocation2 + $0x60] sm:$0xee] }
 0x208   : > { %v1103_v16 = vmin.f32 %v995_v12, 6.0  ;;  %v1104_v57 = vmin.f32 %v996_v28, 6.0  ;;  %v998_v56 = vmax.f32 %v821_v59, 0.0  ;;  %v825_v8 = vadd.f32 %v10679_v61, %v7264_v50 }
 0x209   : > { %v1105_v41 = vmin.f32 %v997_v7, 6.0  ;;  %v5628_v23 = vadd.f32 %v7416_v19, %v5552_v27  ;;  %v5630_v34 = vadd.f32 %v7416_v19, %v5554_v13  ;;  %v999_v38 = vmax.f32 %v823_v58, 0.0 }
 0x20a   : > { %v1833_v46 = vmul.f32 %v7995_v62, %v7340_v36  ;;  %v6708_v51 = vpack.c.bf16 %v1104_v57, %v1103_v16  ;;  %v1106_v9 = vmin.f32 %v998_v56, 6.0  ;;  %v1000_v40 = vmax.f32 %v825_v8, 0.0 }
 0x20b   : > { %v1835_v0 = vmul.f32 %v7998_v45, %v7340_v36  ;;  %v5692_v6 = vmax.f32 %v5628_v23, 0.0  ;;  %v5694_v12 = vmax.f32 %v5630_v34, 0.0  ;;  %v1107_v47 = vmin.f32 %v999_v38, 6.0  ;;  %v8320_v38 = vld [vmem:[#allocation2 + $0x88] sm:$0x11] }
 0x20c   : > { %v1905_v28 = vunpack.c.h.bf16 %v8295_v20  ;;  %1545 = vst.msk [vmem:[#allocation2 + $0xe8] sm:$0xff] %vm7272_vm3, %v6708_v51  ;;  %v6709_v7 = vpack.c.bf16 %v1106_v9, %v1105_v41  ;;  %v1108_v44 = vmin.f32 %v1000_v40, 6.0  ;;  %v1966_v59 = vmul.f32 %v7995_v62, %v7323_v31 }
 0x20d   : > { %v1968_v27 = vmul.f32 %v7998_v45, %v7323_v31  ;;  %v5756_v13 = vmin.f32 %v5692_v6, 6.0  ;;  %v5758_v16 = vmin.f32 %v5694_v12, 6.0  ;;  %v2447_v58 = vunpack.c.h.bf16 %v8303_v33  ;;  %v8329_v6 = vld [vmem:[#allocation2 + $0x78] sm:$0xee] }
 0x20e   : > { %v1970_v5 = vmul.f32 %v7323_v31, %v1905_v28  ;;  %1546 = vst.msk [vmem:[#allocation2 + $0xf0] sm:$0xff] %vm7272_vm3, %v6709_v7  ;;  %v6710_v57 = vpack.c.bf16 %v1108_v44, %v1107_v47  ;;  %v2177_v56 = vrot.slane %v1966_v59, 1  ;;  %v2510_v41 = vmul.f32 %v7998_v45, %v7314_v26 }
 0x20f   : > { %v2178_v61 = vrot.slane %v1968_v27, 1  ;;  %v5814_v8 = vpack.c.bf16 %v5758_v16, %v5756_v13  ;;  %v2508_v23 = vmul.f32 %v7314_v26, %v2447_v58  ;;  %v2512_v34 = vmul.f32 %v7314_v26, %v1905_v28 }
 0x210   : > { %v2182_v62 = vrot.slane %v1970_v5, 1  ;;  %1547 = vst.msk [vmem:[#allocation2 + $0xf8] sm:$0xff] %vm7272_vm3, %v6710_v57  ;;  %v2720_v9 = vrot.slane %v2510_v41, 2  ;;  %v3091_v40 = vmul.f32 %v8174_v1, %v7349_v42  ;;  %v3093_v45 = vmul.f32 %v8177_v55, %v7349_v42 }
 0x211   : > { %v2179_v51 = vsel %vm2133_vm1, %v2177_v56, %v2178_v61  ;;  %6049 = vmatmul.mubr.bf16.gmra.mrb[12].mxu1 %v5814_v8  ;;  %v2719_v28 = vrot.slane %v2508_v23, 2  ;;  %v2724_v7 = vrot.slane %v2512_v34, 2  ;;  %v3227_v59 = vunpack.c.h.bf16 %v8320_v38 }
 0x212   : > { %v2183_v12 = vsel %vm2133_vm1, %v2178_v61, %v2182_v62  ;;  %v2375_v47 = vadd.f32 %v2179_v51, %v1833_v46  ;;  %v3288_v27 = vmul.f32 %v8174_v1, %v10653_v10  ;;  %v3290_v13 = vmul.f32 %v8177_v55, %v10653_v10 }
 0x213   : > { %v2377_v44 = vadd.f32 %v2183_v12, %v1835_v0  ;;  %v1665_v16 = vld [vmem:[#allocation2 + $0xe8] sm:$0xff]  ;;  %v2721_v5 = vsel %vm2675_vm2, %v2719_v28, %v2720_v9  ;;  %v2725_v58 = vsel %vm2675_vm2, %v2720_v9, %v2724_v7  ;;  %v3768_v57 = vunpack.c.h.bf16 %v8329_v6  ;;  %v8347_v9 = vld [vmem:[#allocation2 + $0x90] sm:$0xff]  ;;  %v8349_v12 = vld [vmem:[#allocation2 + $0x98] sm:$0xff] }
 0x214   : > { %v3831_v46 = vmul.f32 %v8177_v55, %v10655_v54  ;;  %v1666_v0 = vsel %vm7422_vm15, 0, %v1665_v16  ;;  %v2917_v56 = vadd.f32 %v2721_v5, %v2375_v47  ;;  %v3292_v41 = vmul.f32 %v10653_v10, %v3227_v59  ;;  %v8353_v16 = vld [vmem:[#allocation2 + $0xa0] sm:$0x11] }
 0x215   : > { %v2919_v61 = vadd.f32 %v2725_v58, %v2377_v44  ;;  %1667 = vst [vmem:[#allocation2 + $0xe8] sm:$0xff] %v1666_v0  ;;  %v1607_v8 = vld [vmem:[#allocation2 + $0xf0] sm:$0x11]  ;;  %v3498_v62 = vrot.slane %v3288_v27, 1  ;;  %v3499_v23 = vrot.slane %v3290_v13, 1  ;;  %v3829_v34 = vmul.f32 %v10655_v54, %v3768_v57 }
 0x216   : > { %v3833_v51 = vmul.f32 %v10655_v54, %v3227_v59  ;;  %v1608_v28 = vsel %vm7332_vm12, 0, %v1607_v8  ;;  %v3155_v7 = vadd.f32 %v3091_v40, %v2917_v56  ;;  %v3503_v44 = vrot.slane %v3292_v41, 1  ;;  %v8363_v40 = vld [vmem:[#allocation2 + $0x90] sm:$0xee]  ;;  %v10680_v8 = vld [vmem:[#allocation11_spill] sm:$0xff] }
 0x217   : > { %v3157_v47 = vadd.f32 %v3093_v45, %v2919_v61  ;;  %1609 = vst [vmem:[#allocation2 + $0xf0] sm:$0x11] %v1608_v28  ;;  %v3500_v27 = vsel %vm2133_vm1, %v3498_v62, %v3499_v23  ;;  %v4039_v13 = vrot.slane %v3829_v34, 2  ;;  %v4040_v5 = vrot.slane %v3831_v46, 2  ;;  %v10681_v34 = vld [vmem:[#allocation12_spill] sm:$0xff] }
 0x218   : > { %v4044_v58 = vrot.slane %v3833_v51, 2  ;;  %v3504_v59 = vsel %vm2133_vm1, %v3499_v23, %v3503_v44  ;;  %v3696_v57 = vadd.f32 %v3500_v27, %v3155_v7  ;;  %v8358_v0 = vunpack.c.h.bf16 %v8347_v9 }
 0x219   : > { %v8361_v21 = vunpack.c.h.bf16 %v8349_v12  ;;  %v3698_v45 = vadd.f32 %v3504_v59, %v3157_v47  ;;  %v4041_v56 = vsel %vm2675_vm2, %v4039_v13, %v4040_v5  ;;  %v4547_v41 = vunpack.c.h.bf16 %v8353_v16 }
 0x21a   : > { %v4045_v61 = vsel %vm2675_vm2, %v4040_v5, %v4044_v58  ;;  %v4237_v46 = vadd.f32 %v4041_v56, %v3696_v57  ;;  %v4411_v62 = vmul.f32 %v10680_v8, %v8358_v0  ;;  %v4608_v51 = vmul.f32 %v10681_v34, %v8358_v0 }
 0x21b   : > { %v4413_v23 = vmul.f32 %v10680_v8, %v8361_v21  ;;  %v4239_v28 = vadd.f32 %v4045_v61, %v3698_v45  ;;  %v4610_v7 = vmul.f32 %v10681_v34, %v8361_v21  ;;  %v4612_v47 = vmul.f32 %v10681_v34, %v4547_v41 }
 0x21c   : > { %v5088_v44 = vunpack.c.h.bf16 %v8363_v40  ;;  %v4475_v27 = vadd.f32 %v4411_v62, %v4237_v46  ;;  %v4818_v13 = vrot.slane %v4608_v51, 1  ;;  %v5151_v5 = vmul.f32 %v10645_v22, %v8361_v21 }
 0x21d   : > { %v5153_v58 = vmul.f32 %v10645_v22, %v4547_v41  ;;  %v4477_v59 = vadd.f32 %v4413_v23, %v4239_v28  ;;  %v4819_v57 = vrot.slane %v4610_v7, 1  ;;  %v4823_v56 = vrot.slane %v4612_v47, 1 }
 0x21e   : > { %v5149_v4 = vmul.f32 %v10645_v22, %v5088_v44  ;;  %v5360_v45 = vrot.slane %v5151_v5, 2  ;;  %v1832_v39 = vmul.f32 %v8070_v35, %v10646_v18  ;;  %v1834_v29 = vmul.f32 %v8073_v52, %v10646_v18 }
 0x21f   : > { %v5364_v61 = vrot.slane %v5153_v58, 2  ;;  %v4820_v46 = vsel %vm2133_vm1, %v4818_v13, %v4819_v57  ;;  %v4824_v62 = vsel %vm2133_vm1, %v4819_v57, %v4823_v56  ;;  %v1904_v41 = vunpack.c.l.bf16 %v8295_v20 }
 0x220   : > { %v5359_v51 = vrot.slane %v5149_v4, 2  ;;  %v5016_v23 = vadd.f32 %v4820_v46, %v4475_v27  ;;  %v5018_v28 = vadd.f32 %v4824_v62, %v4477_v59  ;;  %v1965_v47 = vmul.f32 %v8070_v35, %v7320_v30  ;;  %v8399_v27 = vpop.f32.mrb[76].mxu0 }
 0x221   : > { %v5365_v7 = vsel %vm2675_vm2, %v5360_v45, %v5364_v61  ;;  %v1967_v5 = vmul.f32 %v8073_v52, %v7320_v30  ;;  %v1969_v58 = vmul.f32 %v7320_v30, %v1904_v41  ;;  %v2446_v13 = vunpack.c.l.bf16 %v8303_v33  ;;  %10682 = vst [vmem:[#allocation20_spill] sm:$0xff] %v8399_v27  ;;  %v8403_v46 = vpop.f32.mrb[77].mxu0 }
 0x222   : > { %v5361_v44 = vsel %vm2675_vm2, %v5359_v51, %v5360_v45  ;;  %v5559_v4 = vadd.f32 %v5365_v7, %v5018_v28  ;;  %v2174_v56 = vrot.slane %v1965_v47, 1  ;;  %v2509_v20 = vmul.f32 %v8073_v52, %v7311_v25  ;;  %10683 = vst [vmem:[#allocation10_spill] sm:$0xff] %v8403_v46  ;;  %v8416_v46 = vpop.f32.mrb[78].mxu0 }
 0x223   : > { %v5557_v57 = vadd.f32 %v5361_v44, %v5016_v23  ;;  %v2175_v59 = vrot.slane %v1967_v5, 1  ;;  %v2180_v61 = vrot.slane %v1969_v58, 1  ;;  %v2507_v35 = vmul.f32 %v7311_v25, %v2446_v13  ;;  %10684 = vst [vmem:[#allocation21_spill] sm:$0xff] %v8416_v46 }
 0x224   : > { %v2511_v45 = vmul.f32 %v7311_v25, %v1904_v41  ;;  %v5635_v33 = vadd.f32 %v7433_v24, %v5559_v4  ;;  %v2717_v51 = vrot.slane %v2509_v20, 2  ;;  %v3090_v23 = vmul.f32 %v8256_v15, %v7343_v37 }
 0x225   : > { %v5633_v62 = vadd.f32 %v7433_v24, %v5557_v57  ;;  %v2176_v52 = vsel %vm2133_vm1, %v2174_v56, %v2175_v59  ;;  %v2181_v28 = vsel %vm2133_vm1, %v2175_v59, %v2180_v61  ;;  %v2716_v7 = vrot.slane %v2507_v35, 2  ;;  %v8418_v35 = vpop.f32.mrb[79].mxu0 }
 0x226   : > { %v2722_v47 = vrot.slane %v2511_v45, 2  ;;  %v5699_v5 = vmax.f32 %v5635_v33, 0.0  ;;  %v2374_v58 = vadd.f32 %v2176_v52, %v1832_v39  ;;  %v2376_v41 = vadd.f32 %v2181_v28, %v1834_v29  ;;  %10685 = vst [vmem:[#allocation22_spill] sm:$0xff] %v8418_v35  ;;  %v8426_v33 = vpop.f32.mrb[80].mxu0 }
 0x227   : > { %v5697_v44 = vmax.f32 %v5633_v62, 0.0  ;;  %v2718_v13 = vsel %vm2675_vm2, %v2716_v7, %v2717_v51  ;;  %v3092_v4 = vmul.f32 %v8260_v17, %v7343_v37  ;;  %v3226_v20 = vunpack.c.l.bf16 %v8320_v38  ;;  %10686 = vst [vmem:[#allocation23_spill] sm:$0xff] %v8426_v33 }
 0x228   : > { %v2723_v57 = vsel %vm2675_vm2, %v2717_v51, %v2722_v47  ;;  %v5763_v27 = vmin.f32 %v5699_v5, 6.0  ;;  %v2916_v59 = vadd.f32 %v2718_v13, %v2374_v58  ;;  %v3287_v29 = vmul.f32 %v8256_v15, %v7352_v43 }
 0x229   : > { %v5761_v56 = vmin.f32 %v5697_v44, 6.0  ;;  %v2918_v61 = vadd.f32 %v2723_v57, %v2376_v41  ;;  %v3289_v39 = vmul.f32 %v8260_v17, %v7352_v43  ;;  %v3291_v45 = vmul.f32 %v7352_v43, %v3226_v20 }
 0x22a   : > { %v3767_v62 = vunpack.c.l.bf16 %v8329_v6  ;;  %v3154_v51 = vadd.f32 %v3090_v23, %v2916_v59  ;;  %v3830_v28 = vmul.f32 %v8260_v17, %v7362_v53  ;;  %v3495_v7 = vrot.slane %v3287_v29, 1 }
 0x22b   : > { %v5817_v38 = vpack.c.bf16 %v5763_v27, %v5761_v56  ;;  %v3156_v52 = vadd.f32 %v3092_v4, %v2918_v61  ;;  %v3496_v47 = vrot.slane %v3289_v39, 1  ;;  %v3501_v44 = vrot.slane %v3291_v45, 1 }
 0x22c   : > { %v3828_v5 = vmul.f32 %v7362_v53, %v3767_v62  ;;  %v3832_v58 = vmul.f32 %v7362_v53, %v3226_v20  ;;  %v4037_v41 = vrot.slane %v3830_v28, 2  ;;  %v8434_v6 = vunpack.c.l.bf16 %v8347_v9 }
 0x22d   : > { %6664 = vmatprep.mubr.msk.bf16.mxu1 %vm5943_vm4, %v5817_v38  ;;  %v8437_v27 = vunpack.c.l.bf16 %v8349_v12  ;;  %v3497_v23 = vsel %vm2133_vm1, %v3495_v7, %v3496_v47  ;;  %v3502_v13 = vsel %vm2133_vm1, %v3496_v47, %v3501_v44  ;;  %v4546_v4 = vunpack.c.l.bf16 %v8353_v16 }
 0x22e   : > { %v4036_v57 = vrot.slane %v3828_v5, 2  ;;  %v3695_v56 = vadd.f32 %v3497_v23, %v3154_v51  ;;  %v3697_v59 = vadd.f32 %v3502_v13, %v3156_v52  ;;  %v4042_v61 = vrot.slane %v3832_v58, 2 }
 0x22f   : > { %v4410_v20 = vmul.f32 %v7386_v3, %v8434_v6  ;;  %v4412_v9 = vmul.f32 %v7386_v3, %v8437_v27  ;;  %v4607_v12 = vmul.f32 %v7410_v11, %v8434_v6  ;;  %v4609_v39 = vmul.f32 %v7410_v11, %v8437_v27 }
 0x230   : > { %v4038_v29 = vsel %vm2675_vm2, %v4036_v57, %v4037_v41  ;;  %v4043_v45 = vsel %vm2675_vm2, %v4037_v41, %v4042_v61  ;;  %v4611_v62 = vmul.f32 %v7410_v11, %v4546_v4  ;;  %v5087_v38 = vunpack.c.l.bf16 %v8363_v40  ;;  %v10687_v57 = vld [vmem:[#allocation18_spill] sm:$0xff] }
 0x231   : > { %v4236_v16 = vadd.f32 %v4038_v29, %v3695_v56  ;;  %v4238_v51 = vadd.f32 %v4043_v45, %v3697_v59  ;;  %v4815_v52 = vrot.slane %v4607_v12, 1  ;;  %v4816_v28 = vrot.slane %v4609_v39, 1 }
 0x232   : > { %v5150_v7 = vmul.f32 %v7376_v60, %v8437_v27  ;;  %v4821_v44 = vrot.slane %v4611_v62, 1  ;;  %v5148_v5 = vmul.f32 %v7376_v60, %v5087_v38  ;;  %v5152_v58 = vmul.f32 %v7376_v60, %v4546_v4  ;;  %v10690_v38 = vld [vmem:[#allocation9_spill] sm:$0xff] }
 0x233   : > { %v4474_v47 = vadd.f32 %v4410_v20, %v4236_v16  ;;  %v4476_v23 = vadd.f32 %v4412_v9, %v4238_v51  ;;  %v4817_v41 = vsel %vm2133_vm1, %v4815_v52, %v4816_v28  ;;  %v829_v56 = vadd.f32 %v10687_v57, %v7261_v49  ;;  %v10688_v20 = vld [vmem:[#allocation8_spill] sm:$0xff]  ;;  %v10689_v16 = vld [vmem:[#allocation13_spill] sm:$0xff]  ;;  %v10691_v52 = vld [vmem:[#allocation6_spill] sm:$0xff] }
 0x234   : > { %v5357_v13 = vrot.slane %v5150_v7, 2  ;;  %v4822_v40 = vsel %vm2133_vm1, %v4816_v28, %v4821_v44  ;;  %v5356_v61 = vrot.slane %v5148_v5, 2  ;;  %v5362_v29 = vrot.slane %v5152_v58, 2  ;;  %v8472_v58 = vld [vmem:[#allocation2 + $0x88] sm:$0x11] }
 0x235   : > { %v5015_v59 = vadd.f32 %v4817_v41, %v4474_v47  ;;  %v5017_v12 = vadd.f32 %v4822_v40, %v4476_v23  ;;  %v1001_v39 = vmax.f32 %v829_v56, 0.0  ;;  %v831_v45 = vadd.f32 %v10688_v20, %v7264_v50 }
 0x236   : > { %v833_v4 = vadd.f32 %v10689_v16, %v7261_v49  ;;  %v5358_v9 = vsel %vm2675_vm2, %v5356_v61, %v5357_v13  ;;  %v5363_v62 = vsel %vm2675_vm2, %v5357_v13, %v5362_v29  ;;  %v835_v51 = vadd.f32 %v10690_v38, %v7264_v50 }
 0x237   : > { %v839_v28 = vadd.f32 %v10691_v52, %v7261_v49  ;;  %v5556_v7 = vadd.f32 %v5358_v9, %v5015_v59  ;;  %v5558_v47 = vadd.f32 %v5363_v62, %v5017_v12  ;;  %v1109_v44 = vmin.f32 %v1001_v39, 6.0  ;;  %v8480_v59 = vld [vmem:[#allocation2 + $0x78] sm:$0xee] }
 0x238   : > { %v1002_v5 = vmax.f32 %v831_v45, 0.0  ;;  %v1003_v23 = vmax.f32 %v833_v4, 0.0  ;;  %v1004_v41 = vmax.f32 %v835_v51, 0.0  ;;  %v1837_v56 = vmul.f32 %v8174_v1, %v7340_v36 }
 0x239   : > { %v1005_v57 = vmax.f32 %v839_v28, 0.0  ;;  %v5632_v13 = vadd.f32 %v7416_v19, %v5556_v7  ;;  %v5634_v40 = vadd.f32 %v7416_v19, %v5558_v47  ;;  %v1839_v29 = vmul.f32 %v8177_v55, %v7340_v36  ;;  %v8491_v7 = vpop.f32.mrb[81].mxu0 }
 0x23a   : > { %v1110_v61 = vmin.f32 %v1002_v5, 6.0  ;;  %v1111_v12 = vmin.f32 %v1003_v23, 6.0  ;;  %v1112_v39 = vmin.f32 %v1004_v41, 6.0  ;;  %v1907_v45 = vunpack.c.h.bf16 %v8472_v58  ;;  %10692 = vst [vmem:[#allocation24_spill] sm:$0xff] %v8491_v7 }
 0x23b   : > { %v8482_v20 = vmin.f32 %v1005_v57, 6.0  ;;  %v5696_v16 = vmax.f32 %v5632_v13, 0.0  ;;  %v5698_v4 = vmax.f32 %v5634_v40, 0.0  ;;  %v1972_v62 = vmul.f32 %v8174_v1, %v7323_v31  ;;  %v8501_v40 = vld [vmem:[#allocation2 + $0xa0] sm:$0x11] }
 0x23c   : > { %v6711_v9 = vpack.c.bf16 %v1110_v61, %v1109_v44  ;;  %v6712_v38 = vpack.c.bf16 %v1112_v39, %v1111_v12  ;;  %v1974_v51 = vmul.f32 %v8177_v55, %v7323_v31  ;;  %v1976_v52 = vmul.f32 %v7323_v31, %v1907_v45 }
 0x23d   : > { %v2449_v28 = vunpack.c.h.bf16 %v8480_v59  ;;  %v5760_v47 = vmin.f32 %v5696_v16, 6.0  ;;  %v5762_v5 = vmin.f32 %v5698_v4, 6.0  ;;  %v2187_v23 = vrot.slane %v1972_v62, 1 }
 0x23e   : > { %1548 = vst.msk [vmem:[#allocation2 + $0x100] sm:$0xff] %vm7272_vm3, %v6711_v9  ;;  %v2516_v44 = vmul.f32 %v8177_v55, %v7314_v26  ;;  %1549 = vst.msk [vmem:[#allocation2 + $0x108] sm:$0xff] %vm7272_vm3, %v6712_v38  ;;  %v2188_v1 = vrot.slane %v1974_v51, 1  ;;  %v2192_v41 = vrot.slane %v1976_v52, 1  ;;  %v2518_v13 = vmul.f32 %v7314_v26, %v1907_v45  ;;  %v8507_v55 = vld [vmem:[#allocation2 + $0x90] sm:$0xee] }
 0x23f   : > { %v2514_v57 = vmul.f32 %v7314_v26, %v2449_v28  ;;  %v5816_v61 = vpack.c.bf16 %v5762_v5, %v5760_v47  ;;  %v3095_v39 = vmul.f32 %v8358_v0, %v7349_v42  ;;  %v3097_v16 = vmul.f32 %v8361_v21, %v7349_v42 }
 0x240   : > { %v2730_v12 = vrot.slane %v2516_v44, 2  ;;  %v2189_v4 = vsel %vm2133_vm1, %v2187_v23, %v2188_v1  ;;  %v2193_v9 = vsel %vm2133_vm1, %v2188_v1, %v2192_v41  ;;  %v2734_v38 = vrot.slane %v2518_v13, 2 }
 0x241   : > { %v2729_v62 = vrot.slane %v2514_v57, 2  ;;  %6057 = vmatmul.mubr.bf16.gmra.mrb[16].mxu1 %v5816_v61  ;;  %v2379_v45 = vadd.f32 %v2189_v4, %v1837_v56  ;;  %v2381_v51 = vadd.f32 %v2193_v9, %v1839_v29  ;;  %v3229_v52 = vunpack.c.h.bf16 %v8501_v40 }
 0x242   : > { %v3294_v28 = vmul.f32 %v8358_v0, %v10653_v10  ;;  %v2735_v5 = vsel %vm2675_vm2, %v2730_v12, %v2734_v38  ;;  %v3296_v44 = vmul.f32 %v8361_v21, %v10653_v10  ;;  %v3770_v23 = vunpack.c.h.bf16 %v8507_v55 }
 0x243   : > { %v2731_v47 = vsel %vm2675_vm2, %v2729_v62, %v2730_v12  ;;  %v2923_v41 = vadd.f32 %v2735_v5, %v2381_v51  ;;  %v3298_v57 = vmul.f32 %v10653_v10, %v3229_v52  ;;  %v3837_v4 = vmul.f32 %v8361_v21, %v10655_v54  ;;  %v8524_v12 = vld [vmem:[#allocation2 + $0xa8] sm:$0xff]  ;;  %v8526_v62 = vld [vmem:[#allocation2 + $0xb0] sm:$0xff]  ;;  %v8530_v5 = vld [vmem:[#allocation2 + $0xb8] sm:$0x11] }
 0x244   : > { %v2921_v1 = vadd.f32 %v2731_v47, %v2379_v45  ;;  %v3508_v56 = vrot.slane %v3294_v28, 1  ;;  %v3509_v13 = vrot.slane %v3296_v44, 1  ;;  %v3835_v61 = vmul.f32 %v10655_v54, %v3770_v23 }
 0x245   : > { %v1668_v29 = vld [vmem:[#allocation2 + $0x100] sm:$0xff]  ;;  %v3839_v9 = vmul.f32 %v10655_v54, %v3229_v52  ;;  %v1610_v45 = vld [vmem:[#allocation2 + $0x108] sm:$0x11]  ;;  %v3161_v47 = vadd.f32 %v3097_v16, %v2923_v41  ;;  %v3513_v28 = vrot.slane %v3298_v57, 1  ;;  %v4050_v7 = vrot.slane %v3837_v4, 2 }
 0x246   : > { %v1669_v38 = vsel %vm7422_vm15, 0, %v1668_v29  ;;  %v3159_v51 = vadd.f32 %v3095_v39, %v2921_v1  ;;  %v1611_v44 = vsel %vm7332_vm12, 0, %v1610_v45  ;;  %v3510_v23 = vsel %vm2133_vm1, %v3508_v56, %v3509_v13  ;;  %v8544_v57 = vld [vmem:[#allocation2 + $0xa8] sm:$0xee] }
 0x247   : > { %1670 = vst [vmem:[#allocation2 + $0x100] sm:$0xff] %v1669_v38  ;;  %v4049_v52 = vrot.slane %v3835_v61, 2  ;;  %1612 = vst [vmem:[#allocation2 + $0x108] sm:$0x11] %v1611_v44  ;;  %v3514_v33 = vsel %vm2133_vm1, %v3509_v13, %v3513_v28  ;;  %v4054_v46 = vrot.slane %v3839_v9, 2  ;;  %v8537_v29 = vunpack.c.h.bf16 %v8524_v12 }
 0x248   : > { %v3700_v35 = vadd.f32 %v3510_v23, %v3159_v51  ;;  %v3702_v39 = vadd.f32 %v3514_v33, %v3161_v47  ;;  %v8541_v1 = vunpack.c.h.bf16 %v8526_v62  ;;  %v4549_v41 = vunpack.c.h.bf16 %v8530_v5 }
 0x249   : > { %v4051_v16 = vsel %vm2675_vm2, %v4049_v52, %v4050_v7  ;;  %v4055_v56 = vsel %vm2675_vm2, %v4050_v7, %v4054_v46  ;;  %v4415_v13 = vmul.f32 %v10680_v8, %v8537_v29  ;;  %v4614_v4 = vmul.f32 %v10681_v34, %v8537_v29 }
 0x24a   : > { %v4241_v61 = vadd.f32 %v4051_v16, %v3700_v35  ;;  %v4243_v9 = vadd.f32 %v4055_v56, %v3702_v39  ;;  %v4417_v33 = vmul.f32 %v10680_v8, %v8541_v1  ;;  %v4616_v38 = vmul.f32 %v10681_v34, %v8541_v1  ;;  %v10693_v16 = vld [vmem:[#allocation14_spill] sm:$0xff] }
 0x24b   : > { %v4618_v45 = vmul.f32 %v10681_v34, %v4549_v41  ;;  %v4828_v47 = vrot.slane %v4614_v4, 1  ;;  %v5090_v46 = vunpack.c.h.bf16 %v8544_v57  ;;  %v5157_v35 = vmul.f32 %v10645_v22, %v8541_v1 }
 0x24c   : > { %v4479_v51 = vadd.f32 %v4415_v13, %v4241_v61  ;;  %v4481_v7 = vadd.f32 %v4417_v33, %v4243_v9  ;;  %v4829_v28 = vrot.slane %v4616_v38, 1  ;;  %v5159_v23 = vmul.f32 %v10645_v22, %v4549_v41 }
 0x24d   : > { %v4833_v44 = vrot.slane %v4618_v45, 1  ;;  %v5155_v52 = vmul.f32 %v10645_v22, %v5090_v46  ;;  %v5370_v39 = vrot.slane %v5157_v35, 2  ;;  %v841_v56 = vadd.f32 %v10693_v16, %v7264_v50 }
 0x24e   : > { %v1836_v61 = vmul.f32 %v8256_v15, %v10646_v18  ;;  %v4830_v13 = vsel %vm2133_vm1, %v4828_v47, %v4829_v28  ;;  %v5374_v34 = vrot.slane %v5159_v23, 2  ;;  %v1838_v9 = vmul.f32 %v8260_v17, %v10646_v18 }
 0x24f   : > { %v4834_v4 = vsel %vm2133_vm1, %v4829_v28, %v4833_v44  ;;  %v5020_v33 = vadd.f32 %v4830_v13, %v4479_v51  ;;  %v5369_v41 = vrot.slane %v5155_v52, 2  ;;  %v1006_v45 = vmax.f32 %v841_v56, 0.0 }
 0x250   : > { %v5022_v38 = vadd.f32 %v4834_v4, %v4481_v7  ;;  %v5375_v46 = vsel %vm2675_vm2, %v5370_v39, %v5374_v34  ;;  %v1906_v35 = vunpack.c.l.bf16 %v8472_v58  ;;  %v1971_v16 = vmul.f32 %v8256_v15, %v7320_v30  ;;  %v8578_v34 = vpop.f32.mrb[82].mxu0 }
 0x251   : > { %v1973_v47 = vmul.f32 %v8260_v17, %v7320_v30  ;;  %v5371_v28 = vsel %vm2675_vm2, %v5369_v41, %v5370_v39  ;;  %v1114_v23 = vmin.f32 %v1006_v45, 6.0  ;;  %v2448_v18 = vunpack.c.l.bf16 %v8480_v59  ;;  %v8585_v4 = vpop.f32.mrb[83].mxu0 }
 0x252   : > { %v5563_v44 = vadd.f32 %v5375_v46, %v5022_v38  ;;  %v5561_v51 = vadd.f32 %v5371_v28, %v5020_v33  ;;  %v1975_v7 = vmul.f32 %v7320_v30, %v1906_v35  ;;  %v2184_v52 = vrot.slane %v1971_v16, 1  ;;  %10694 = vst [vmem:[#allocation18_spill] sm:$0xff] %v8585_v4 }
 0x253   : > { %v2185_v56 = vrot.slane %v1973_v47, 1  ;;  %v6713_v15 = vpack.c.bf16 %v1114_v23, %v8482_v20  ;;  %v2513_v13 = vmul.f32 %v7311_v25, %v2448_v18  ;;  %v2515_v39 = vmul.f32 %v8260_v17, %v7311_v25 }
 0x254   : > { %v5639_v58 = vadd.f32 %v7433_v24, %v5563_v44  ;;  %v5637_v59 = vadd.f32 %v7433_v24, %v5561_v51  ;;  %v2190_v38 = vrot.slane %v1975_v7, 1  ;;  %v2517_v41 = vmul.f32 %v7311_v25, %v1906_v35  ;;  %v8595_v44 = vpop.f32.mrb[84].mxu0 }
 0x255   : > { %v2186_v33 = vsel %vm2133_vm1, %v2184_v52, %v2185_v56  ;;  %1550 = vst.msk [vmem:[#allocation2 + $0x110] sm:$0xff] %vm7272_vm3, %v6713_v15  ;;  %v2726_v20 = vrot.slane %v2513_v13, 2  ;;  %v2727_v16 = vrot.slane %v2515_v39, 2  ;;  %v3094_v28 = vmul.f32 %v8434_v6, %v7343_v37  ;;  %10695 = vst [vmem:[#allocation8_spill] sm:$0xff] %v8595_v44  ;;  %v8600_v52 = vpop.f32.mrb[85].mxu0 }
 0x256   : > { %v5703_v45 = vmax.f32 %v5639_v58, 0.0  ;;  %v2378_v46 = vadd.f32 %v2186_v33, %v1836_v61  ;;  %v5701_v18 = vmax.f32 %v5637_v59, 0.0  ;;  %v2191_v47 = vsel %vm2133_vm1, %v2185_v56, %v2190_v38  ;;  %10696 = vst [vmem:[#allocation13_spill] sm:$0xff] %v8600_v52  ;;  %v8604_v13 = vpop.f32.mrb[86].mxu0  ;;  %v10704_v52 = vld [vmem:[#allocation7_spill] sm:$0xff] }
 0x257   : > { %v2732_v17 = vrot.slane %v2517_v41, 2  ;;  %v2380_v51 = vadd.f32 %v2191_v47, %v1838_v9  ;;  %v2728_v35 = vsel %vm2675_vm2, %v2726_v20, %v2727_v16  ;;  %v3096_v7 = vmul.f32 %v8437_v27, %v7343_v37  ;;  %10697 = vst [vmem:[#allocation9_spill] sm:$0xff] %v8604_v13  ;;  %v8611_v38 = vpop.f32.mrb[87].mxu0 }
 0x258   : > { %v5767_v23 = vmin.f32 %v5703_v45, 6.0  ;;  %v5765_v61 = vmin.f32 %v5701_v18, 6.0  ;;  %v2920_v15 = vadd.f32 %v2728_v35, %v2378_v46  ;;  %v3228_v56 = vunpack.c.l.bf16 %v8501_v40  ;;  %10698 = vst [vmem:[#allocation6_spill] sm:$0xff] %v8611_v38 }
 0x259   : > { %v2733_v58 = vsel %vm2675_vm2, %v2727_v16, %v2732_v17  ;;  %v3293_v59 = vmul.f32 %v8434_v6, %v7352_v43  ;;  %v3295_v9 = vmul.f32 %v8437_v27, %v7352_v43  ;;  %v3769_v33 = vunpack.c.l.bf16 %v8507_v55 }
 0x25a   : > { %v2922_v39 = vadd.f32 %v2733_v58, %v2380_v51  ;;  %v5819_v41 = vpack.c.bf16 %v5767_v23, %v5765_v61  ;;  %v3158_v45 = vadd.f32 %v3094_v28, %v2920_v15  ;;  %v3297_v20 = vmul.f32 %v7352_v43, %v3228_v56 }
 0x25b   : > { %v3836_v40 = vmul.f32 %v8437_v27, %v7362_v53  ;;  %v3505_v16 = vrot.slane %v3293_v59, 1  ;;  %v3506_v18 = vrot.slane %v3295_v9, 1  ;;  %v3834_v47 = vmul.f32 %v7362_v53, %v3769_v33 }
 0x25c   : > { %v3160_v46 = vadd.f32 %v3096_v7, %v2922_v39  ;;  %6665 = vmatprep.mubr.msk.bf16.mxu1 %vm5943_vm4, %v5819_v41  ;;  %v3511_v17 = vrot.slane %v3297_v20, 1  ;;  %v3838_v51 = vmul.f32 %v7362_v53, %v3228_v56  ;;  %v8620_v35 = vunpack.c.l.bf16 %v8524_v12 }
 0x25d   : > { %v4047_v55 = vrot.slane %v3836_v40, 2  ;;  %v3507_v28 = vsel %vm2133_vm1, %v3505_v16, %v3506_v18  ;;  %v4046_v23 = vrot.slane %v3834_v47, 2  ;;  %v8624_v61 = vunpack.c.l.bf16 %v8526_v62 }
 0x25e   : > { %v4548_v7 = vunpack.c.l.bf16 %v8530_v5  ;;  %v3512_v58 = vsel %vm2133_vm1, %v3506_v18, %v3511_v17  ;;  %v3699_v15 = vadd.f32 %v3507_v28, %v3158_v45  ;;  %v4052_v39 = vrot.slane %v3838_v51, 2 }
 0x25f   : > { %v4414_v59 = vmul.f32 %v7386_v3, %v8620_v35  ;;  %v3701_v56 = vadd.f32 %v3512_v58, %v3160_v46  ;;  %v4048_v9 = vsel %vm2675_vm2, %v4046_v23, %v4047_v55  ;;  %v4416_v12 = vmul.f32 %v7386_v3, %v8624_v61 }
 0x260   : > { %v4613_v33 = vmul.f32 %v7410_v11, %v8620_v35  ;;  %v4053_v62 = vsel %vm2675_vm2, %v4047_v55, %v4052_v39  ;;  %v4240_v41 = vadd.f32 %v4048_v9, %v3699_v15  ;;  %v4615_v5 = vmul.f32 %v7410_v11, %v8624_v61 }
 0x261   : > { %v4617_v45 = vmul.f32 %v7410_v11, %v4548_v7  ;;  %v4242_v20 = vadd.f32 %v4053_v62, %v3701_v56  ;;  %v5089_v46 = vunpack.c.l.bf16 %v8544_v57  ;;  %v5156_v16 = vmul.f32 %v7376_v60, %v8624_v61 }
 0x262   : > { %v4825_v40 = vrot.slane %v4613_v33, 1  ;;  %v4478_v18 = vadd.f32 %v4414_v59, %v4240_v41  ;;  %v4826_v47 = vrot.slane %v4615_v5, 1  ;;  %v5158_v51 = vmul.f32 %v7376_v60, %v4548_v7  ;;  %v10699_v41 = vld [vmem:[#allocation15_spill] sm:$0xff] }
 0x263   : > { %v4831_v17 = vrot.slane %v4617_v45, 1  ;;  %v4480_v28 = vadd.f32 %v4416_v12, %v4242_v20  ;;  %v5154_v55 = vmul.f32 %v7376_v60, %v5089_v46  ;;  %v5367_v23 = vrot.slane %v5156_v16, 2  ;;  %v10701_v16 = vld [vmem:[#allocation17_spill] sm:$0xff] }
 0x264   : > { %v843_v58 = vadd.f32 %v8215_v63, %v7261_v49  ;;  %v4827_v15 = vsel %vm2133_vm1, %v4825_v40, %v4826_v47  ;;  %v5372_v57 = vrot.slane %v5158_v51, 2  ;;  %v845_v56 = vadd.f32 %v8221_v32, %v7264_v50  ;;  %v10700_v63 = vld [vmem:[#allocation16_spill] sm:$0xff] }
 0x265   : > { %v4832_v39 = vsel %vm2133_vm1, %v4826_v47, %v4831_v17  ;;  %v5019_v59 = vadd.f32 %v4827_v15, %v4478_v18  ;;  %v5366_v33 = vrot.slane %v5154_v55, 2  ;;  %v849_v5 = vadd.f32 %v10699_v41, %v7261_v49 }
 0x266   : > { %v5021_v9 = vadd.f32 %v4832_v39, %v4480_v28  ;;  %v1007_v62 = vmax.f32 %v843_v58, 0.0  ;;  %v5373_v7 = vsel %vm2675_vm2, %v5367_v23, %v5372_v57  ;;  %v1008_v12 = vmax.f32 %v845_v56, 0.0  ;;  %v10702_v58 = vld [vmem:[#allocation19_spill] sm:$0xff]  ;;  %v8663_v57 = vld [vmem:[#allocation2 + $0xa0] sm:$0x11] }
 0x267   : > { %v851_v45 = vadd.f32 %v10700_v63, %v7264_v50  ;;  %v5368_v20 = vsel %vm2675_vm2, %v5366_v33, %v5367_v23  ;;  %v853_v32 = vadd.f32 %v10701_v16, %v7261_v49  ;;  %v1009_v17 = vmax.f32 %v849_v5, 0.0 }
 0x268   : > { %v5562_v40 = vadd.f32 %v5373_v7, %v5021_v9  ;;  %v1115_v46 = vmin.f32 %v1007_v62, 6.0  ;;  %v5560_v18 = vadd.f32 %v5368_v20, %v5019_v59  ;;  %v1116_v47 = vmin.f32 %v1008_v12, 6.0  ;;  %v8666_v59 = vld [vmem:[#allocation2 + $0x90] sm:$0xee] }
 0x269   : > { %v1010_v51 = vmax.f32 %v851_v45, 0.0  ;;  %v1011_v55 = vmax.f32 %v853_v32, 0.0  ;;  %v855_v15 = vadd.f32 %v10702_v58, %v7264_v50  ;;  %v1841_v39 = vmul.f32 %v8358_v0, %v7340_v36 }
 0x26a   : > { %v5638_v28 = vadd.f32 %v7416_v19, %v5562_v40  ;;  %v5636_v23 = vadd.f32 %v7416_v19, %v5560_v18  ;;  %v6714_v56 = vpack.c.bf16 %v1116_v47, %v1115_v46  ;;  %v1117_v9 = vmin.f32 %v1009_v17, 6.0 }
 0x26b   : > { %v1118_v33 = vmin.f32 %v1010_v51, 6.0  ;;  %v1119_v7 = vmin.f32 %v1011_v55, 6.0  ;;  %v1012_v12 = vmax.f32 %v855_v15, 0.0  ;;  %v1843_v41 = vmul.f32 %v8361_v21, %v7340_v36  ;;  %v8685_v15 = vld [vmem:[#allocation2 + $0xb8] sm:$0x11] }
 0x26c   : > { %v5702_v62 = vmax.f32 %v5638_v28, 0.0  ;;  %v5700_v5 = vmax.f32 %v5636_v23, 0.0  ;;  %1551 = vst.msk [vmem:[#allocation2 + $0x118] sm:$0xff] %vm7272_vm3, %v6714_v56  ;;  %v1909_v45 = vunpack.c.h.bf16 %v8663_v57  ;;  %v1978_v20 = vmul.f32 %v8358_v0, %v7323_v31 }
 0x26d   : > { %v6715_v63 = vpack.c.bf16 %v1118_v33, %v1117_v9  ;;  %v1120_v46 = vmin.f32 %v1012_v12, 6.0  ;;  %v1980_v16 = vmul.f32 %v8361_v21, %v7323_v31  ;;  %v2451_v32 = vunpack.c.h.bf16 %v8666_v59 }
 0x26e   : > { %v5766_v40 = vmin.f32 %v5702_v62, 6.0  ;;  %v5764_v18 = vmin.f32 %v5700_v5, 6.0  ;;  %v1982_v47 = vmul.f32 %v7323_v31, %v1909_v45  ;;  %v2197_v17 = vrot.slane %v1978_v20, 1 }
 0x26f   : > { %1552 = vst.msk [vmem:[#allocation2 + $0x120] sm:$0xff] %vm7272_vm3, %v6715_v63  ;;  %v2522_v51 = vmul.f32 %v8361_v21, %v7314_v26  ;;  %v6716_v28 = vpack.c.bf16 %v1120_v46, %v1119_v7  ;;  %v2198_v55 = vrot.slane %v1980_v16, 1  ;;  %v2520_v0 = vmul.f32 %v7314_v26, %v2451_v32 }
 0x270   : > { %v2524_v58 = vmul.f32 %v7314_v26, %v1909_v45  ;;  %v5818_v23 = vpack.c.bf16 %v5766_v40, %v5764_v18  ;;  %v2202_v56 = vrot.slane %v1982_v47, 1  ;;  %v3099_v33 = vmul.f32 %v8537_v29, %v7349_v42  ;;  %v8698_v40 = vld [vmem:[#allocation2 + $0xa8] sm:$0xee] }
 0x271   : > { %v2740_v9 = vrot.slane %v2522_v51, 2  ;;  %1553 = vst.msk [vmem:[#allocation2 + $0x128] sm:$0xff] %vm7272_vm3, %v6716_v28  ;;  %v2199_v62 = vsel %vm2133_vm1, %v2197_v17, %v2198_v55  ;;  %v2739_v21 = vrot.slane %v2520_v0, 2  ;;  %v3101_v12 = vmul.f32 %v8541_v1, %v7349_v42 }
 0x272   : > { %v2744_v7 = vrot.slane %v2524_v58, 2  ;;  %6065 = vmatmul.mubr.bf16.gmra.mrb[20].mxu1 %v5818_v23  ;;  %v2203_v5 = vsel %vm2133_vm1, %v2198_v55, %v2202_v56  ;;  %v2383_v63 = vadd.f32 %v2199_v62, %v1841_v39  ;;  %v3231_v45 = vunpack.c.h.bf16 %v8685_v15  ;;  %v8710_v56 = vld [vmem:[#allocation2 + $0xc0] sm:$0xff] }
 0x273   : > { %v3300_v20 = vmul.f32 %v8537_v29, %v10653_v10  ;;  %v1671_v46 = vld [vmem:[#allocation2 + $0x118] sm:$0xff]  ;;  %v2385_v16 = vadd.f32 %v2203_v5, %v1843_v41  ;;  %v2741_v32 = vsel %vm2675_vm2, %v2739_v21, %v2740_v9  ;;  %v3302_v47 = vmul.f32 %v8541_v1, %v10653_v10  ;;  %v8715_v5 = vld [vmem:[#allocation2 + $0xc8] sm:$0xff] }
 0x274   : > { %v2745_v18 = vsel %vm2675_vm2, %v2740_v9, %v2744_v7  ;;  %v1672_v17 = vsel %vm7422_vm15, 0, %v1671_v46  ;;  %v2925_v39 = vadd.f32 %v2741_v32, %v2383_v63  ;;  %v3304_v51 = vmul.f32 %v10653_v10, %v3231_v45  ;;  %v8717_v63 = vld [vmem:[#allocation2 + $0xd0] sm:$0x11] }
 0x275   : > { %v3518_v28 = vrot.slane %v3300_v20, 1  ;;  %1673 = vst [vmem:[#allocation2 + $0x118] sm:$0xff] %v1672_v17  ;;  %v2927_v0 = vadd.f32 %v2745_v18, %v2385_v16  ;;  %v3519_v58 = vrot.slane %v3302_v47, 1  ;;  %v3772_v41 = vunpack.c.h.bf16 %v8698_v40  ;;  %v8721_v18 = vld [vmem:[#allocation2 + $0xc0] sm:$0xee] }
 0x276   : > { %v1613_v55 = vld [vmem:[#allocation2 + $0x120] sm:$0x11]  ;;  %v3843_v23 = vmul.f32 %v8541_v1, %v10655_v54  ;;  %v3163_v62 = vadd.f32 %v3099_v33, %v2925_v39  ;;  %v3523_v21 = vrot.slane %v3304_v51, 1  ;;  %v3845_v7 = vmul.f32 %v10655_v54, %v3231_v45 }
 0x277   : > { %v1614_v9 = vsel %vm7332_vm12, 0, %v1613_v55  ;;  %v3165_v20 = vadd.f32 %v3101_v12, %v2927_v0  ;;  %v3520_v46 = vsel %vm2133_vm1, %v3518_v28, %v3519_v58  ;;  %v3841_v16 = vmul.f32 %v10655_v54, %v3772_v41  ;;  %v10703_v41 = vld [vmem:[#allocation12_spill] sm:$0xff] }
 0x278   : > { %1615 = vst [vmem:[#allocation2 + $0x120] sm:$0x11] %v1614_v9  ;;  %v4060_v32 = vrot.slane %v3843_v23, 2  ;;  %v3524_v47 = vsel %vm2133_vm1, %v3519_v58, %v3523_v21  ;;  %v3704_v17 = vadd.f32 %v3520_v46, %v3163_v62  ;;  %v4064_v33 = vrot.slane %v3845_v7, 2 }
 0x279   : > { %v8725_v39 = vunpack.c.h.bf16 %v8710_v56  ;;  %v3706_v45 = vadd.f32 %v3524_v47, %v3165_v20  ;;  %v4059_v51 = vrot.slane %v3841_v16, 2  ;;  %v8728_v55 = vunpack.c.h.bf16 %v8715_v5 }
 0x27a   : > { %v4551_v12 = vunpack.c.h.bf16 %v8717_v63  ;;  %v4065_v28 = vsel %vm2675_vm2, %v4060_v32, %v4064_v33  ;;  %v5092_v23 = vunpack.c.h.bf16 %v8721_v18  ;;  %v1840_v44 = vmul.f32 %v8434_v6, %v10704_v52 }
 0x27b   : > { %v4419_v0 = vmul.f32 %v10680_v8, %v8725_v39  ;;  %v4620_v58 = vmul.f32 %v10703_v41, %v8725_v39  ;;  %v4061_v9 = vsel %vm2675_vm2, %v4059_v51, %v4060_v32  ;;  %v4247_v62 = vadd.f32 %v4065_v28, %v3706_v45 }
 0x27c   : > { %v4421_v21 = vmul.f32 %v10680_v8, %v8728_v55  ;;  %v4622_v7 = vmul.f32 %v10703_v41, %v8728_v55  ;;  %v4245_v20 = vadd.f32 %v4061_v9, %v3704_v17  ;;  %v4624_v46 = vmul.f32 %v10703_v41, %v4551_v12 }
 0x27d   : > { %v4838_v16 = vrot.slane %v4620_v58, 1  ;;  %v5161_v47 = vmul.f32 %v10645_v22, %v5092_v23  ;;  %v5163_v13 = vmul.f32 %v10645_v22, %v8728_v55  ;;  %v5165_v32 = vmul.f32 %v10645_v22, %v4551_v12 }
 0x27e   : > { %v4485_v33 = vadd.f32 %v4421_v21, %v4247_v62  ;;  %v4839_v38 = vrot.slane %v4622_v7, 1  ;;  %v4483_v45 = vadd.f32 %v4419_v0, %v4245_v20  ;;  %v4843_v51 = vrot.slane %v4624_v46, 1 }
 0x27f   : > { %v5379_v28 = vrot.slane %v5161_v47, 2  ;;  %v5380_v9 = vrot.slane %v5163_v13, 2  ;;  %v5384_v4 = vrot.slane %v5165_v32, 2  ;;  %v1842_v58 = vmul.f32 %v8437_v27, %v10704_v52  ;;  %v8762_v32 = vpop.f32.mrb[88].mxu0 }
 0x280   : > { %v4840_v17 = vsel %vm2133_vm1, %v4838_v16, %v4839_v38  ;;  %v4844_v23 = vsel %vm2133_vm1, %v4839_v38, %v4843_v51  ;;  %v1908_v21 = vunpack.c.l.bf16 %v8663_v57  ;;  %v1977_v12 = vmul.f32 %v8434_v6, %v7320_v30  ;;  %10705 = vst [vmem:[#allocation14_spill] sm:$0xff] %v8762_v32  ;;  %v8767_v51 = vpop.f32.mrb[89].mxu0  ;;  %v10716_v32 = vld [vmem:[#allocation24_spill] sm:$0xff] }
 0x281   : > { %v5024_v62 = vadd.f32 %v4840_v17, %v4483_v45  ;;  %v5026_v0 = vadd.f32 %v4844_v23, %v4485_v33  ;;  %v5381_v7 = vsel %vm2675_vm2, %v5379_v28, %v5380_v9  ;;  %v5385_v20 = vsel %vm2675_vm2, %v5380_v9, %v5384_v4  ;;  %10706 = vst [vmem:[#allocation15_spill] sm:$0xff] %v8767_v51 }
 0x282   : > { %v1979_v13 = vmul.f32 %v8437_v27, %v7320_v30  ;;  %v1981_v16 = vmul.f32 %v7320_v30, %v1908_v21  ;;  %v2194_v47 = vrot.slane %v1977_v12, 1  ;;  %v2450_v38 = vunpack.c.l.bf16 %v8666_v59 }
 0x283   : > { %v5565_v46 = vadd.f32 %v5381_v7, %v5024_v62  ;;  %v5567_v57 = vadd.f32 %v5385_v20, %v5026_v0  ;;  %v2521_v6 = vmul.f32 %v8437_v27, %v7311_v25  ;;  %v2523_v33 = vmul.f32 %v7311_v25, %v1908_v21 }
 0x284   : > { %v2195_v45 = vrot.slane %v1979_v13, 1  ;;  %v2200_v28 = vrot.slane %v1981_v16, 1  ;;  %v2519_v17 = vmul.f32 %v7311_v25, %v2450_v38  ;;  %v3098_v9 = vmul.f32 %v8620_v35, %v7343_v37  ;;  %v8779_v38 = vpop.f32.mrb[90].mxu0 }
 0x285   : > { %v5641_v4 = vadd.f32 %v7433_v24, %v5565_v46  ;;  %v5643_v59 = vadd.f32 %v7433_v24, %v5567_v57  ;;  %v2737_v62 = vrot.slane %v2521_v6, 2  ;;  %v2742_v12 = vrot.slane %v2523_v33, 2  ;;  %10707 = vst [vmem:[#allocation16_spill] sm:$0xff] %v8779_v38 }
 0x286   : > { %v2196_v23 = vsel %vm2133_vm1, %v2194_v47, %v2195_v45  ;;  %v2201_v27 = vsel %vm2133_vm1, %v2195_v45, %v2200_v28  ;;  %v2736_v7 = vrot.slane %v2519_v17, 2  ;;  %v3100_v16 = vmul.f32 %v8624_v61, %v7343_v37  ;;  %v8785_v45 = vpop.f32.mrb[91].mxu0 }
 0x287   : > { %v5705_v0 = vmax.f32 %v5641_v4, 0.0  ;;  %v2382_v21 = vadd.f32 %v2196_v23, %v1840_v44  ;;  %v5707_v20 = vmax.f32 %v5643_v59, 0.0  ;;  %v2384_v13 = vadd.f32 %v2201_v27, %v1842_v58  ;;  %10708 = vst [vmem:[#allocation17_spill] sm:$0xff] %v8785_v45  ;;  %v8789_v28 = vpop.f32.mrb[92].mxu0 }
 0x288   : > { %v2743_v46 = vsel %vm2675_vm2, %v2737_v62, %v2742_v12  ;;  %v2738_v57 = vsel %vm2675_vm2, %v2736_v7, %v2737_v62  ;;  %v3230_v47 = vunpack.c.l.bf16 %v8685_v15  ;;  %v3299_v6 = vmul.f32 %v8620_v35, %v7352_v43  ;;  %10709 = vst [vmem:[#allocation19_spill] sm:$0xff] %v8789_v28  ;;  %v8891_v28 = vld [vmem:[#allocation2 + $0xe0] sm:$0xff] }
 0x289   : > { %v5769_v51 = vmin.f32 %v5705_v0, 6.0  ;;  %v5771_v44 = vmin.f32 %v5707_v20, 6.0  ;;  %v2924_v33 = vadd.f32 %v2738_v57, %v2382_v21  ;;  %v2926_v58 = vadd.f32 %v2743_v46, %v2384_v13 }
 0x28a   : > { %v3301_v4 = vmul.f32 %v8624_v61, %v7352_v43  ;;  %v3303_v17 = vmul.f32 %v7352_v43, %v3230_v47  ;;  %v3515_v59 = vrot.slane %v3299_v6, 1  ;;  %v3771_v23 = vunpack.c.l.bf16 %v8698_v40 }
 0x28b   : > { %v3842_v15 = vmul.f32 %v8624_v61, %v7362_v53  ;;  %v5821_v62 = vpack.c.bf16 %v5771_v44, %v5769_v51  ;;  %v3162_v12 = vadd.f32 %v3098_v9, %v2924_v33  ;;  %v3164_v0 = vadd.f32 %v3100_v16, %v2926_v58 }
 0x28c   : > { %v3516_v27 = vrot.slane %v3301_v4, 1  ;;  %v3521_v7 = vrot.slane %v3303_v17, 1  ;;  %v3840_v21 = vmul.f32 %v7362_v53, %v3771_v23  ;;  %v3844_v20 = vmul.f32 %v7362_v53, %v3230_v47 }
 0x28d   : > { %v4057_v13 = vrot.slane %v3842_v15, 2  ;;  %6666 = vmatprep.mubr.msk.bf16.mxu1 %vm5943_vm4, %v5821_v62  ;;  %v8800_v57 = vunpack.c.l.bf16 %v8710_v56  ;;  %v8803_v40 = vunpack.c.l.bf16 %v8715_v5  ;;  %v4550_v51 = vunpack.c.l.bf16 %v8717_v63 }
 0x28e   : > { %v3517_v46 = vsel %vm2133_vm1, %v3515_v59, %v3516_v27  ;;  %v3522_v9 = vsel %vm2133_vm1, %v3516_v27, %v3521_v7  ;;  %v4056_v6 = vrot.slane %v3840_v21, 2  ;;  %v4062_v44 = vrot.slane %v3844_v20, 2 }
 0x28f   : > { %v3703_v16 = vadd.f32 %v3517_v46, %v3162_v12  ;;  %v3705_v33 = vadd.f32 %v3522_v9, %v3164_v0  ;;  %v4418_v47 = vmul.f32 %v7386_v3, %v8800_v57  ;;  %v4420_v58 = vmul.f32 %v7386_v3, %v8803_v40  ;;  %v10710_v46 = vld [vmem:[#allocation20_spill] sm:$0xff] }
 0x290   : > { %v4619_v56 = vmul.f32 %v7410_v11, %v8800_v57  ;;  %v4058_v5 = vsel %vm2675_vm2, %v4056_v6, %v4057_v13  ;;  %v4063_v4 = vsel %vm2675_vm2, %v4057_v13, %v4062_v44  ;;  %v4621_v63 = vmul.f32 %v7410_v11, %v8803_v40 }
 0x291   : > { %v4623_v17 = vmul.f32 %v7410_v11, %v4550_v51  ;;  %v4244_v59 = vadd.f32 %v4058_v5, %v3703_v16  ;;  %v4246_v23 = vadd.f32 %v4063_v4, %v3705_v33  ;;  %v5091_v62 = vunpack.c.l.bf16 %v8721_v18 }
 0x292   : > { %v4835_v15 = vrot.slane %v4619_v56, 1  ;;  %v4836_v12 = vrot.slane %v4621_v63, 1  ;;  %v5162_v27 = vmul.f32 %v7376_v60, %v8803_v40  ;;  %v5164_v7 = vmul.f32 %v7376_v60, %v4550_v51  ;;  %v10711_v51 = vld [vmem:[#allocation10_spill] sm:$0xff] }
 0x293   : > { %v4841_v0 = vrot.slane %v4623_v17, 1  ;;  %v4482_v21 = vadd.f32 %v4418_v47, %v4244_v59  ;;  %v4484_v20 = vadd.f32 %v4420_v58, %v4246_v23  ;;  %v5160_v13 = vmul.f32 %v7376_v60, %v5091_v62  ;;  %v10712_v58 = vld [vmem:[#allocation21_spill] sm:$0xff]  ;;  %v10713_v59 = vld [vmem:[#allocation22_spill] sm:$0xff] }
 0x294   : > { %v859_v9 = vadd.f32 %v10710_v46, %v7261_v49  ;;  %v4837_v16 = vsel %vm2133_vm1, %v4835_v15, %v4836_v12  ;;  %v5377_v44 = vrot.slane %v5162_v27, 2  ;;  %v5382_v18 = vrot.slane %v5164_v7, 2  ;;  %v8837_v46 = vld [vmem:[#allocation2 + $0xb8] sm:$0x11] }
 0x295   : > { %v4842_v6 = vsel %vm2133_vm1, %v4836_v12, %v4841_v0  ;;  %v5023_v33 = vadd.f32 %v4837_v16, %v4482_v21  ;;  %v5376_v5 = vrot.slane %v5160_v13, 2  ;;  %v861_v47 = vadd.f32 %v10711_v51, %v7264_v50  ;;  %v10714_v0 = vld [vmem:[#allocation23_spill] sm:$0xff] }
 0x296   : > { %v5025_v56 = vadd.f32 %v4842_v6, %v4484_v20  ;;  %v1013_v4 = vmax.f32 %v859_v9, 0.0  ;;  %v5383_v63 = vsel %vm2675_vm2, %v5377_v44, %v5382_v18  ;;  %v863_v17 = vadd.f32 %v10712_v58, %v7261_v49 }
 0x297   : > { %v865_v23 = vadd.f32 %v10713_v59, %v7264_v50  ;;  %v5378_v15 = vsel %vm2675_vm2, %v5376_v5, %v5377_v44  ;;  %v869_v27 = vadd.f32 %v10714_v0, %v7261_v49  ;;  %v1014_v21 = vmax.f32 %v861_v47, 0.0 }
 0x298   : > { %v5566_v62 = vadd.f32 %v5383_v63, %v5025_v56  ;;  %v1121_v12 = vmin.f32 %v1013_v4, 6.0  ;;  %v5564_v7 = vadd.f32 %v5378_v15, %v5023_v33  ;;  %v1015_v20 = vmax.f32 %v863_v17, 0.0  ;;  %v8845_v33 = vld [vmem:[#allocation2 + $0xa8] sm:$0xee] }
 0x299   : > { %v1016_v13 = vmax.f32 %v865_v23, 0.0  ;;  %v1017_v16 = vmax.f32 %v869_v27, 0.0  ;;  %v1845_v6 = vmul.f32 %v8537_v29, %v7340_v36  ;;  %v1847_v44 = vmul.f32 %v8541_v1, %v7340_v36 }
 0x29a   : > { %v5642_v9 = vadd.f32 %v7416_v19, %v5566_v62  ;;  %v5640_v18 = vadd.f32 %v7416_v19, %v5564_v7  ;;  %v1122_v56 = vmin.f32 %v1014_v21, 6.0  ;;  %v1123_v5 = vmin.f32 %v1015_v20, 6.0  ;;  %v8856_v21 = vpop.f32.mrb[93].mxu0 }
 0x29b   : > { %v1124_v4 = vmin.f32 %v1016_v13, 6.0  ;;  %v8847_v51 = vmin.f32 %v1017_v16, 6.0  ;;  %v1911_v47 = vunpack.c.h.bf16 %v8837_v46  ;;  %v1984_v58 = vmul.f32 %v8537_v29, %v7323_v31  ;;  %10715 = vst [vmem:[#allocation20_spill] sm:$0xff] %v8856_v21 }
 0x29c   : > { %v5706_v63 = vmax.f32 %v5642_v9, 0.0  ;;  %v5704_v17 = vmax.f32 %v5640_v18, 0.0  ;;  %v6717_v59 = vpack.c.bf16 %v1122_v56, %v1121_v12  ;;  %v1986_v15 = vmul.f32 %v8541_v1, %v7323_v31  ;;  %v8865_v9 = vld [vmem:[#allocation2 + $0xd0] sm:$0x11] }
 0x29d   : > { %v6718_v23 = vpack.c.bf16 %v1124_v4, %v1123_v5  ;;  %v1988_v0 = vmul.f32 %v7323_v31, %v1911_v47  ;;  %v2207_v27 = vrot.slane %v1984_v58, 1  ;;  %v2453_v7 = vunpack.c.h.bf16 %v8845_v33 }
 0x29e   : > { %v5770_v62 = vmin.f32 %v5706_v63, 6.0  ;;  %v5768_v20 = vmin.f32 %v5704_v17, 6.0  ;;  %1554 = vst.msk [vmem:[#allocation2 + $0x130] sm:$0xff] %vm7272_vm3, %v6717_v59  ;;  %v2208_v29 = vrot.slane %v1986_v15, 1  ;;  %v2528_v12 = vmul.f32 %v8541_v1, %v7314_v26  ;;  %v8873_v59 = vld [vmem:[#allocation2 + $0xc0] sm:$0xee] }
 0x29f   : > { %1555 = vst.msk [vmem:[#allocation2 + $0x138] sm:$0xff] %vm7272_vm3, %v6718_v23  ;;  %v2530_v13 = vmul.f32 %v7314_v26, %v1911_v47  ;;  %v2212_v16 = vrot.slane %v1988_v0, 1  ;;  %v2526_v18 = vmul.f32 %v7314_v26, %v2453_v7  ;;  %v3103_v56 = vmul.f32 %v8725_v39, %v7349_v42 }
 0x2a0   : > { %v3105_v5 = vmul.f32 %v8728_v55, %v7349_v42  ;;  %v5820_v4 = vpack.c.bf16 %v5770_v62, %v5768_v20  ;;  %v2209_v63 = vsel %vm2133_vm1, %v2207_v27, %v2208_v29  ;;  %v2750_v58 = vrot.slane %v2528_v12, 2 }
 0x2a1   : > { %v2754_v17 = vrot.slane %v2530_v13, 2  ;;  %v2213_v1 = vsel %vm2133_vm1, %v2208_v29, %v2212_v16  ;;  %v2387_v47 = vadd.f32 %v2209_v63, %v1845_v6  ;;  %v2749_v23 = vrot.slane %v2526_v18, 2  ;;  %v8887_v18 = vld [vmem:[#allocation2 + $0xd8] sm:$0xff] }
 0x2a2   : > { %v3233_v15 = vunpack.c.h.bf16 %v8865_v9  ;;  %6073 = vmatmul.mubr.bf16.gmra.mrb[24].mxu1 %v5820_v4  ;;  %v2389_v0 = vadd.f32 %v2213_v1, %v1847_v44  ;;  %v3306_v21 = vmul.f32 %v8725_v39, %v10653_v10  ;;  %v3308_v62 = vmul.f32 %v8728_v55, %v10653_v10 }
 0x2a3   : > { %v2755_v7 = vsel %vm2675_vm2, %v2750_v58, %v2754_v17  ;;  %v2751_v27 = vsel %vm2675_vm2, %v2749_v23, %v2750_v58  ;;  %v3774_v29 = vunpack.c.h.bf16 %v8873_v59  ;;  %v3849_v6 = vmul.f32 %v8728_v55, %v10655_v54 }
 0x2a4   : > { %v3310_v20 = vmul.f32 %v10653_v10, %v3233_v15  ;;  %v2929_v12 = vadd.f32 %v2751_v27, %v2387_v47  ;;  %v2931_v13 = vadd.f32 %v2755_v7, %v2389_v0  ;;  %v3528_v44 = vrot.slane %v3306_v21, 1  ;;  %v8897_v7 = vld [vmem:[#allocation2 + $0xe8] sm:$0x11] }
 0x2a5   : > { %v3529_v16 = vrot.slane %v3308_v62, 1  ;;  %v1674_v4 = vld [vmem:[#allocation2 + $0x130] sm:$0xff]  ;;  %v3847_v1 = vmul.f32 %v10655_v54, %v3774_v29  ;;  %v3851_v58 = vmul.f32 %v10655_v54, %v3233_v15  ;;  %v4070_v23 = vrot.slane %v3849_v6, 2  ;;  %v8899_v62 = vld [vmem:[#allocation2 + $0xd8] sm:$0xee] }
 0x2a6   : > { %v1616_v63 = vld [vmem:[#allocation2 + $0x138] sm:$0x11]  ;;  %v3533_v17 = vrot.slane %v3310_v20, 1  ;;  %v1675_v45 = vsel %vm7422_vm15, 0, %v1674_v4  ;;  %v3167_v21 = vadd.f32 %v3103_v56, %v2929_v12  ;;  %v3169_v0 = vadd.f32 %v3105_v5, %v2931_v13 }
 0x2a7   : > { %v1617_v47 = vsel %vm7332_vm12, 0, %v1616_v63  ;;  %1676 = vst [vmem:[#allocation2 + $0x130] sm:$0xff] %v1675_v45  ;;  %v3530_v27 = vsel %vm2133_vm1, %v3528_v44, %v3529_v16  ;;  %v4069_v20 = vrot.slane %v3847_v1, 2  ;;  %v4074_v29 = vrot.slane %v3851_v58, 2 }
 0x2a8   : > { %1618 = vst [vmem:[#allocation2 + $0x138] sm:$0x11] %v1617_v47  ;;  %v3534_v15 = vsel %vm2133_vm1, %v3529_v16, %v3533_v17  ;;  %v3708_v6 = vadd.f32 %v3530_v27, %v3167_v21  ;;  %v8904_v4 = vunpack.c.h.bf16 %v8887_v18  ;;  %v8907_v56 = vunpack.c.h.bf16 %v8891_v28 }
 0x2a9   : > { %v3710_v38 = vadd.f32 %v3534_v15, %v3169_v0  ;;  %v4071_v5 = vsel %vm2675_vm2, %v4069_v20, %v4070_v23  ;;  %v4075_v12 = vsel %vm2675_vm2, %v4070_v23, %v4074_v29  ;;  %v4553_v45 = vunpack.c.h.bf16 %v8897_v7 }
 0x2aa   : > { %v5094_v13 = vunpack.c.h.bf16 %v8899_v62  ;;  %v4249_v44 = vadd.f32 %v4071_v5, %v3708_v6  ;;  %v4423_v63 = vmul.f32 %v10680_v8, %v8904_v4  ;;  %v4425_v17 = vmul.f32 %v10680_v8, %v8907_v56 }
 0x2ab   : > { %v4251_v16 = vadd.f32 %v4075_v12, %v3710_v38  ;;  %v4626_v1 = vmul.f32 %v10703_v41, %v8904_v4  ;;  %v4628_v58 = vmul.f32 %v10703_v41, %v8907_v56  ;;  %v4630_v23 = vmul.f32 %v10703_v41, %v4553_v45 }
 0x2ac   : > { %v5167_v47 = vmul.f32 %v10645_v22, %v5094_v13  ;;  %v4487_v21 = vadd.f32 %v4423_v63, %v4249_v44  ;;  %v5169_v38 = vmul.f32 %v10645_v22, %v8907_v56  ;;  %v5171_v27 = vmul.f32 %v10645_v22, %v4553_v45 }
 0x2ad   : > { %v4489_v0 = vadd.f32 %v4425_v17, %v4251_v16  ;;  %v4848_v15 = vrot.slane %v4626_v1, 1  ;;  %v4849_v20 = vrot.slane %v4628_v58, 1  ;;  %v4853_v29 = vrot.slane %v4630_v23, 1 }
 0x2ae   : > { %v5389_v6 = vrot.slane %v5167_v47, 2  ;;  %v5390_v5 = vrot.slane %v5169_v38, 2  ;;  %v5394_v12 = vrot.slane %v5171_v27, 2  ;;  %v871_v8 = vadd.f32 %v10716_v32, %v7264_v50 }
 0x2af   : > { %v1844_v41 = vmul.f32 %v8620_v35, %v10704_v52  ;;  %v4850_v13 = vsel %vm2133_vm1, %v4848_v15, %v4849_v20  ;;  %v4854_v44 = vsel %vm2133_vm1, %v4849_v20, %v4853_v29  ;;  %v1846_v16 = vmul.f32 %v8624_v61, %v10704_v52 }
 0x2b0   : > { %v1910_v45 = vunpack.c.l.bf16 %v8837_v46  ;;  %v5028_v63 = vadd.f32 %v4850_v13, %v4487_v21  ;;  %v5030_v17 = vadd.f32 %v4854_v44, %v4489_v0  ;;  %v5391_v1 = vsel %vm2675_vm2, %v5389_v6, %v5390_v5 }
 0x2b1   : > { %v5395_v58 = vsel %vm2675_vm2, %v5390_v5, %v5394_v12  ;;  %v1018_v23 = vmax.f32 %v871_v8, 0.0  ;;  %v1983_v32 = vmul.f32 %v8620_v35, %v7320_v30  ;;  %v1985_v47 = vmul.f32 %v8624_v61, %v7320_v30  ;;  %v8945_v8 = vpop.f32.mrb[94].mxu0 }
 0x2b2   : > { %v1987_v38 = vmul.f32 %v7320_v30, %v1910_v45  ;;  %v5569_v27 = vadd.f32 %v5391_v1, %v5028_v63  ;;  %v5571_v15 = vadd.f32 %v5395_v58, %v5030_v17  ;;  %v2452_v20 = vunpack.c.l.bf16 %v8845_v33  ;;  %v8951_v44 = vpop.f32.mrb[95].mxu0 }
 0x2b3   : > { %v2527_v46 = vmul.f32 %v8624_v61, %v7311_v25  ;;  %v1126_v21 = vmin.f32 %v1018_v23, 6.0  ;;  %v2204_v0 = vrot.slane %v1983_v32, 1  ;;  %v2205_v29 = vrot.slane %v1985_v47, 1  ;;  %v8956_v47 = vpop.f32.mrb[96].mxu0 }
 0x2b4   : > { %v2210_v6 = vrot.slane %v1987_v38, 1  ;;  %v5645_v35 = vadd.f32 %v7433_v24, %v5569_v27  ;;  %v5647_v5 = vadd.f32 %v7433_v24, %v5571_v15  ;;  %v2525_v12 = vmul.f32 %v7311_v25, %v2452_v20  ;;  %10717 = vst [vmem:[#allocation10_spill] sm:$0xff] %v8956_v47  ;;  %v8964_v15 = vpop.f32.mrb[97].mxu0 }
 0x2b5   : > { %v2529_v13 = vmul.f32 %v7311_v25, %v1910_v45  ;;  %v6719_v33 = vpack.c.bf16 %v1126_v21, %v8847_v51  ;;  %v2206_v61 = vsel %vm2133_vm1, %v2204_v0, %v2205_v29  ;;  %v2747_v17 = vrot.slane %v2527_v46, 2  ;;  %10718 = vst [vmem:[#allocation21_spill] sm:$0xff] %v8964_v15  ;;  %v8969_v21 = vpop.f32.mrb[98].mxu0 }
 0x2b6   : > { %v2211_v63 = vsel %vm2133_vm1, %v2205_v29, %v2210_v6  ;;  %v5709_v1 = vmax.f32 %v5645_v35, 0.0  ;;  %v5711_v58 = vmax.f32 %v5647_v5, 0.0  ;;  %v2386_v23 = vadd.f32 %v2206_v61, %v1844_v41  ;;  %10719 = vst [vmem:[#allocation22_spill] sm:$0xff] %v8969_v21  ;;  %v8976_v5 = vpop.f32.mrb[99].mxu0 }
 0x2b7   : > { %v2388_v32 = vadd.f32 %v2211_v63, %v1846_v16  ;;  %1556 = vst.msk [vmem:[#allocation2 + $0x140] sm:$0xff] %vm7272_vm3, %v6719_v33  ;;  %v2746_v38 = vrot.slane %v2525_v12, 2  ;;  %v2752_v45 = vrot.slane %v2529_v13, 2  ;;  %v3102_v27 = vmul.f32 %v8800_v57, %v7343_v37  ;;  %10720 = vst [vmem:[#allocation23_spill] sm:$0xff] %v8976_v5 }
 0x2b8   : > { %v3104_v51 = vmul.f32 %v8803_v40, %v7343_v37  ;;  %v5773_v20 = vmin.f32 %v5709_v1, 6.0  ;;  %v5775_v46 = vmin.f32 %v5711_v58, 6.0  ;;  %v3232_v41 = vunpack.c.l.bf16 %v8865_v9 }
 0x2b9   : > { %v3305_v16 = vmul.f32 %v8800_v57, %v7352_v43  ;;  %v2748_v0 = vsel %vm2675_vm2, %v2746_v38, %v2747_v17  ;;  %v2753_v29 = vsel %vm2675_vm2, %v2747_v17, %v2752_v45  ;;  %v3307_v6 = vmul.f32 %v8803_v40, %v7352_v43 }
 0x2ba   : > { %v3773_v35 = vunpack.c.l.bf16 %v8873_v59  ;;  %v5823_v12 = vpack.c.bf16 %v5775_v46, %v5773_v20  ;;  %v2928_v13 = vadd.f32 %v2748_v0, %v2386_v23  ;;  %v2930_v33 = vadd.f32 %v2753_v29, %v2388_v32 }
 0x2bb   : > { %v3309_v9 = vmul.f32 %v7352_v43, %v3232_v41  ;;  %v3525_v61 = vrot.slane %v3305_v16, 1  ;;  %v3526_v63 = vrot.slane %v3307_v6, 1  ;;  %v3848_v58 = vmul.f32 %v8803_v40, %v7362_v53 }
 0x2bc   : > { %v3846_v1 = vmul.f32 %v7362_v53, %v3773_v35  ;;  %6667 = vmatprep.mubr.msk.bf16.mxu1 %vm5943_vm4, %v5823_v12  ;;  %v3166_v17 = vadd.f32 %v3102_v27, %v2928_v13  ;;  %v3168_v38 = vadd.f32 %v3104_v51, %v2930_v33  ;;  %v3850_v59 = vmul.f32 %v7362_v53, %v3232_v41 }
 0x2bd   : > { %v3531_v45 = vrot.slane %v3309_v9, 1  ;;  %v3527_v20 = vsel %vm2133_vm1, %v3525_v61, %v3526_v63  ;;  %v4067_v32 = vrot.slane %v3848_v58, 2  ;;  %v8986_v46 = vunpack.c.l.bf16 %v8887_v18 }
 0x2be   : > { %v4066_v23 = vrot.slane %v3846_v1, 2  ;;  %v3707_v0 = vadd.f32 %v3527_v20, %v3166_v17  ;;  %v4072_v29 = vrot.slane %v3850_v59, 2  ;;  %v8990_v6 = vunpack.c.l.bf16 %v8891_v28 }
 0x2bf   : > { %v3532_v16 = vsel %vm2133_vm1, %v3526_v63, %v3531_v45  ;;  %v4422_v51 = vmul.f32 %v7386_v3, %v8986_v46  ;;  %v4552_v41 = vunpack.c.l.bf16 %v8897_v7  ;;  %v4625_v33 = vmul.f32 %v7410_v11, %v8986_v46 }
 0x2c0   : > { %v3709_v35 = vadd.f32 %v3532_v16, %v3168_v38  ;;  %v4068_v27 = vsel %vm2675_vm2, %v4066_v23, %v4067_v32  ;;  %v4073_v12 = vsel %vm2675_vm2, %v4067_v32, %v4072_v29  ;;  %v4424_v18 = vmul.f32 %v7386_v3, %v8990_v6 }
 0x2c1   : > { %v4248_v13 = vadd.f32 %v4068_v27, %v3707_v0  ;;  %v4627_v28 = vmul.f32 %v7410_v11, %v8990_v6  ;;  %v4629_v61 = vmul.f32 %v7410_v11, %v4552_v41  ;;  %v5093_v63 = vunpack.c.l.bf16 %v8899_v62  ;;  %v10721_v0 = vld [vmem:[#allocation18_spill] sm:$0xff] }
 0x2c2   : > { %v4250_v9 = vadd.f32 %v4073_v12, %v3709_v35  ;;  %v4845_v58 = vrot.slane %v4625_v33, 1  ;;  %v5168_v7 = vmul.f32 %v7376_v60, %v8990_v6  ;;  %v5170_v17 = vmul.f32 %v7376_v60, %v4552_v41 }
 0x2c3   : > { %v4486_v1 = vadd.f32 %v4422_v51, %v4248_v13  ;;  %v4846_v45 = vrot.slane %v4627_v28, 1  ;;  %v4851_v59 = vrot.slane %v4629_v61, 1  ;;  %v5166_v20 = vmul.f32 %v7376_v60, %v5093_v63  ;;  %v10722_v51 = vld [vmem:[#allocation8_spill] sm:$0xff]  ;;  %v10723_v61 = vld [vmem:[#allocation13_spill] sm:$0xff] }
 0x2c4   : > { %v4488_v38 = vadd.f32 %v4424_v18, %v4250_v9  ;;  %v5387_v23 = vrot.slane %v5168_v7, 2  ;;  %v5392_v32 = vrot.slane %v5170_v17, 2  ;;  %v873_v16 = vadd.f32 %v8578_v34, %v7261_v49 }
 0x2c5   : > { %v875_v62 = vadd.f32 %v10721_v0, %v7264_v50  ;;  %v4847_v29 = vsel %vm2133_vm1, %v4845_v58, %v4846_v45  ;;  %v4852_v35 = vsel %vm2133_vm1, %v4846_v45, %v4851_v59  ;;  %v5386_v27 = vrot.slane %v5166_v20, 2  ;;  %v10724_v45 = vld [vmem:[#allocation9_spill] sm:$0xff] }
 0x2c6   : > { %v879_v41 = vadd.f32 %v10722_v51, %v7261_v49  ;;  %v5027_v12 = vadd.f32 %v4847_v29, %v4486_v1  ;;  %v5029_v13 = vadd.f32 %v4852_v35, %v4488_v38  ;;  %v5393_v18 = vsel %vm2675_vm2, %v5387_v23, %v5392_v32  ;;  %v10725_v38 = vld [vmem:[#allocation6_spill] sm:$0xff] }
 0x2c7   : > { %v1019_v33 = vmax.f32 %v873_v16, 0.0  ;;  %v5388_v9 = vsel %vm2675_vm2, %v5386_v27, %v5387_v23  ;;  %v1020_v28 = vmax.f32 %v875_v62, 0.0  ;;  %v881_v63 = vadd.f32 %v10723_v61, %v7264_v50  ;;  %v9025_v16 = vld [vmem:[#allocation2 + $0xd0] sm:$0x11] }
 0x2c8   : > { %v1021_v34 = vmax.f32 %v879_v41, 0.0  ;;  %v5568_v7 = vadd.f32 %v5388_v9, %v5027_v12  ;;  %v5570_v58 = vadd.f32 %v5393_v18, %v5029_v13  ;;  %v883_v59 = vadd.f32 %v10724_v45, %v7261_v49  ;;  %v9033_v13 = vld [vmem:[#allocation2 + $0xc0] sm:$0xee] }
 0x2c9   : > { %v1127_v17 = vmin.f32 %v1019_v33, 6.0  ;;  %v1128_v20 = vmin.f32 %v1020_v28, 6.0  ;;  %v1022_v1 = vmax.f32 %v881_v63, 0.0  ;;  %v885_v32 = vadd.f32 %v10725_v38, %v7264_v50 }
 0x2ca   : > { %v1129_v0 = vmin.f32 %v1021_v34, 6.0  ;;  %v5644_v23 = vadd.f32 %v7416_v19, %v5568_v7  ;;  %v5646_v62 = vadd.f32 %v7416_v19, %v5570_v58  ;;  %v1023_v29 = vmax.f32 %v883_v59, 0.0 }
 0x2cb   : > { %v1849_v35 = vmul.f32 %v8725_v39, %v7340_v36  ;;  %v6720_v27 = vpack.c.bf16 %v1128_v20, %v1127_v17  ;;  %v1130_v51 = vmin.f32 %v1022_v1, 6.0  ;;  %v1024_v41 = vmax.f32 %v885_v32, 0.0 }
 0x2cc   : > { %v1851_v12 = vmul.f32 %v8728_v55, %v7340_v36  ;;  %v5708_v18 = vmax.f32 %v5644_v23, 0.0  ;;  %v5710_v33 = vmax.f32 %v5646_v62, 0.0  ;;  %v1131_v9 = vmin.f32 %v1023_v29, 6.0  ;;  %v9050_v29 = vld [vmem:[#allocation2 + $0xe8] sm:$0x11] }
 0x2cd   : > { %v1913_v28 = vunpack.c.h.bf16 %v9025_v16  ;;  %1557 = vst.msk [vmem:[#allocation2 + $0x148] sm:$0xff] %vm7272_vm3, %v6720_v27  ;;  %v6721_v34 = vpack.c.bf16 %v1130_v51, %v1129_v0  ;;  %v1132_v61 = vmin.f32 %v1024_v41, 6.0  ;;  %v1990_v63 = vmul.f32 %v8725_v39, %v7323_v31 }
 0x2ce   : > { %v1992_v7 = vmul.f32 %v8728_v55, %v7323_v31  ;;  %v5772_v58 = vmin.f32 %v5708_v18, 6.0  ;;  %v5774_v17 = vmin.f32 %v5710_v33, 6.0  ;;  %v2455_v59 = vunpack.c.h.bf16 %v9033_v13  ;;  %v9059_v18 = vld [vmem:[#allocation2 + $0xd8] sm:$0xee] }
 0x2cf   : > { %v1994_v45 = vmul.f32 %v7323_v31, %v1913_v28  ;;  %1558 = vst.msk [vmem:[#allocation2 + $0x150] sm:$0xff] %vm7272_vm3, %v6721_v34  ;;  %v6722_v20 = vpack.c.bf16 %v1132_v61, %v1131_v9  ;;  %v2217_v1 = vrot.slane %v1990_v63, 1  ;;  %v2534_v0 = vmul.f32 %v8728_v55, %v7314_v26 }
 0x2d0   : > { %v2218_v38 = vrot.slane %v1992_v7, 1  ;;  %v5822_v32 = vpack.c.bf16 %v5774_v17, %v5772_v58  ;;  %v2532_v23 = vmul.f32 %v7314_v26, %v2455_v59  ;;  %v2536_v62 = vmul.f32 %v7314_v26, %v1913_v28 }
 0x2d1   : > { %v2222_v39 = vrot.slane %v1994_v45, 1  ;;  %1559 = vst.msk [vmem:[#allocation2 + $0x158] sm:$0xff] %vm7272_vm3, %v6722_v20  ;;  %v2760_v51 = vrot.slane %v2534_v0, 2  ;;  %v3107_v41 = vmul.f32 %v8904_v4, %v7349_v42  ;;  %v3109_v55 = vmul.f32 %v8907_v56, %v7349_v42 }
 0x2d2   : > { %v2219_v27 = vsel %vm2133_vm1, %v2217_v1, %v2218_v38  ;;  %6081 = vmatmul.mubr.bf16.gmra.mrb[28].mxu1 %v5822_v32  ;;  %v2759_v28 = vrot.slane %v2532_v23, 2  ;;  %v2764_v34 = vrot.slane %v2536_v62, 2  ;;  %v3235_v63 = vunpack.c.h.bf16 %v9050_v29 }
 0x2d3   : > { %v2223_v33 = vsel %vm2133_vm1, %v2218_v38, %v2222_v39  ;;  %v2391_v9 = vadd.f32 %v2219_v27, %v1849_v35  ;;  %v3312_v7 = vmul.f32 %v8904_v4, %v10653_v10  ;;  %v3314_v58 = vmul.f32 %v8907_v56, %v10653_v10 }
 0x2d4   : > { %v2393_v61 = vadd.f32 %v2223_v33, %v1851_v12  ;;  %v1677_v17 = vld [vmem:[#allocation2 + $0x148] sm:$0xff]  ;;  %v2761_v45 = vsel %vm2675_vm2, %v2759_v28, %v2760_v51  ;;  %v2765_v59 = vsel %vm2675_vm2, %v2760_v51, %v2764_v34  ;;  %v3776_v20 = vunpack.c.h.bf16 %v9059_v18  ;;  %v9077_v51 = vld [vmem:[#allocation2 + $0xf0] sm:$0xff]  ;;  %v9079_v33 = vld [vmem:[#allocation2 + $0xf8] sm:$0xff] }
 0x2d5   : > { %v3855_v35 = vmul.f32 %v8907_v56, %v10655_v54  ;;  %v1678_v12 = vsel %vm7422_vm15, 0, %v1677_v17  ;;  %v2933_v1 = vadd.f32 %v2761_v45, %v2391_v9  ;;  %v3316_v0 = vmul.f32 %v10653_v10, %v3235_v63  ;;  %v9083_v17 = vld [vmem:[#allocation2 + $0x100] sm:$0x11] }
 0x2d6   : > { %v2935_v38 = vadd.f32 %v2765_v59, %v2393_v61  ;;  %1679 = vst [vmem:[#allocation2 + $0x148] sm:$0xff] %v1678_v12  ;;  %v1619_v32 = vld [vmem:[#allocation2 + $0x150] sm:$0x11]  ;;  %v3538_v39 = vrot.slane %v3312_v7, 1  ;;  %v3539_v23 = vrot.slane %v3314_v58, 1  ;;  %v3853_v62 = vmul.f32 %v10655_v54, %v3776_v20 }
 0x2d7   : > { %v3857_v27 = vmul.f32 %v10655_v54, %v3235_v63  ;;  %v1620_v28 = vsel %vm7332_vm12, 0, %v1619_v32  ;;  %v3171_v34 = vadd.f32 %v3107_v41, %v2933_v1  ;;  %v3543_v61 = vrot.slane %v3316_v0, 1  ;;  %v9093_v41 = vld [vmem:[#allocation2 + $0xf0] sm:$0xee]  ;;  %v10726_v32 = vld [vmem:[#allocation11_spill] sm:$0xff] }
 0x2d8   : > { %v3173_v9 = vadd.f32 %v3109_v55, %v2935_v38  ;;  %1621 = vst [vmem:[#allocation2 + $0x150] sm:$0x11] %v1620_v28  ;;  %v3540_v7 = vsel %vm2133_vm1, %v3538_v39, %v3539_v23  ;;  %v4079_v58 = vrot.slane %v3853_v62, 2  ;;  %v4080_v45 = vrot.slane %v3855_v35, 2  ;;  %v10727_v62 = vld [vmem:[#allocation12_spill] sm:$0xff] }
 0x2d9   : > { %v4084_v59 = vrot.slane %v3857_v27, 2  ;;  %v3544_v63 = vsel %vm2133_vm1, %v3539_v23, %v3543_v61  ;;  %v3712_v20 = vadd.f32 %v3540_v7, %v3171_v34  ;;  %v9088_v12 = vunpack.c.h.bf16 %v9077_v51 }
 0x2da   : > { %v9091_v5 = vunpack.c.h.bf16 %v9079_v33  ;;  %v3714_v55 = vadd.f32 %v3544_v63, %v3173_v9  ;;  %v4081_v1 = vsel %vm2675_vm2, %v4079_v58, %v4080_v45  ;;  %v4555_v0 = vunpack.c.h.bf16 %v9083_v17 }
 0x2db   : > { %v4085_v38 = vsel %vm2675_vm2, %v4080_v45, %v4084_v59  ;;  %v4253_v35 = vadd.f32 %v4081_v1, %v3712_v20  ;;  %v4427_v39 = vmul.f32 %v10726_v32, %v9088_v12  ;;  %v4632_v27 = vmul.f32 %v10727_v62, %v9088_v12 }
 0x2dc   : > { %v4429_v23 = vmul.f32 %v10726_v32, %v9091_v5  ;;  %v4255_v28 = vadd.f32 %v4085_v38, %v3714_v55  ;;  %v4634_v34 = vmul.f32 %v10727_v62, %v9091_v5  ;;  %v4636_v9 = vmul.f32 %v10727_v62, %v4555_v0 }
 0x2dd   : > { %v5096_v61 = vunpack.c.h.bf16 %v9093_v41  ;;  %v4491_v7 = vadd.f32 %v4427_v39, %v4253_v35  ;;  %v4858_v58 = vrot.slane %v4632_v27, 1  ;;  %v5175_v45 = vmul.f32 %v10645_v22, %v9091_v5 }
 0x2de   : > { %v5177_v59 = vmul.f32 %v10645_v22, %v4555_v0  ;;  %v4493_v63 = vadd.f32 %v4429_v23, %v4255_v28  ;;  %v4859_v20 = vrot.slane %v4634_v34, 1  ;;  %v4863_v1 = vrot.slane %v4636_v9, 1 }
 0x2df   : > { %v5173_v21 = vmul.f32 %v10645_v22, %v5096_v61  ;;  %v5400_v55 = vrot.slane %v5175_v45, 2  ;;  %v1848_v15 = vmul.f32 %v8800_v57, %v10704_v52  ;;  %v1850_v47 = vmul.f32 %v8803_v40, %v10704_v52 }
 0x2e0   : > { %v5404_v38 = vrot.slane %v5177_v59, 2  ;;  %v4860_v35 = vsel %vm2133_vm1, %v4858_v58, %v4859_v20  ;;  %v4864_v39 = vsel %vm2133_vm1, %v4859_v20, %v4863_v1  ;;  %v1912_v0 = vunpack.c.l.bf16 %v9025_v16 }
 0x2e1   : > { %v5399_v27 = vrot.slane %v5173_v21, 2  ;;  %v5032_v23 = vadd.f32 %v4860_v35, %v4491_v7  ;;  %v5034_v28 = vadd.f32 %v4864_v39, %v4493_v63  ;;  %v1989_v9 = vmul.f32 %v8800_v57, %v7320_v30  ;;  %v9129_v7 = vpop.f32.mrb[100].mxu0 }
 0x2e2   : > { %v5405_v34 = vsel %vm2675_vm2, %v5400_v55, %v5404_v38  ;;  %v1991_v45 = vmul.f32 %v8803_v40, %v7320_v30  ;;  %v1993_v59 = vmul.f32 %v7320_v30, %v1912_v0  ;;  %v2454_v58 = vunpack.c.l.bf16 %v9033_v13  ;;  %10728 = vst [vmem:[#allocation24_spill] sm:$0xff] %v9129_v7  ;;  %v9133_v35 = vpop.f32.mrb[101].mxu0 }
 0x2e3   : > { %v5401_v61 = vsel %vm2675_vm2, %v5399_v27, %v5400_v55  ;;  %v5575_v21 = vadd.f32 %v5405_v34, %v5034_v28  ;;  %v2214_v1 = vrot.slane %v1989_v9, 1  ;;  %v2533_v16 = vmul.f32 %v8803_v40, %v7311_v25  ;;  %10729 = vst [vmem:[#allocation18_spill] sm:$0xff] %v9133_v35  ;;  %v9146_v35 = vpop.f32.mrb[102].mxu0 }
 0x2e4   : > { %v5573_v20 = vadd.f32 %v5401_v61, %v5032_v23  ;;  %v2215_v63 = vrot.slane %v1991_v45, 1  ;;  %v2220_v38 = vrot.slane %v1993_v59, 1  ;;  %v2531_v57 = vmul.f32 %v7311_v25, %v2454_v58  ;;  %10730 = vst [vmem:[#allocation8_spill] sm:$0xff] %v9146_v35 }
 0x2e5   : > { %v2535_v55 = vmul.f32 %v7311_v25, %v1912_v0  ;;  %v5651_v13 = vadd.f32 %v7433_v24, %v5575_v21  ;;  %v2757_v27 = vrot.slane %v2533_v16, 2  ;;  %v3106_v23 = vmul.f32 %v8986_v46, %v7343_v37 }
 0x2e6   : > { %v5649_v39 = vadd.f32 %v7433_v24, %v5573_v20  ;;  %v2216_v40 = vsel %vm2133_vm1, %v2214_v1, %v2215_v63  ;;  %v2221_v28 = vsel %vm2133_vm1, %v2215_v63, %v2220_v38  ;;  %v2756_v34 = vrot.slane %v2531_v57, 2  ;;  %v9148_v57 = vpop.f32.mrb[103].mxu0 }
 0x2e7   : > { %v2762_v9 = vrot.slane %v2535_v55, 2  ;;  %v5715_v45 = vmax.f32 %v5651_v13, 0.0  ;;  %v2390_v59 = vadd.f32 %v2216_v40, %v1848_v15  ;;  %v2392_v0 = vadd.f32 %v2221_v28, %v1850_v47  ;;  %10731 = vst [vmem:[#allocation13_spill] sm:$0xff] %v9148_v57  ;;  %v9156_v13 = vpop.f32.mrb[104].mxu0 }
 0x2e8   : > { %v5713_v61 = vmax.f32 %v5649_v39, 0.0  ;;  %v2758_v58 = vsel %vm2675_vm2, %v2756_v34, %v2757_v27  ;;  %v3108_v21 = vmul.f32 %v8990_v6, %v7343_v37  ;;  %v3234_v16 = vunpack.c.l.bf16 %v9050_v29  ;;  %10732 = vst [vmem:[#allocation9_spill] sm:$0xff] %v9156_v13 }
 0x2e9   : > { %v2763_v20 = vsel %vm2675_vm2, %v2757_v27, %v2762_v9  ;;  %v5779_v7 = vmin.f32 %v5715_v45, 6.0  ;;  %v2932_v63 = vadd.f32 %v2758_v58, %v2390_v59  ;;  %v3311_v47 = vmul.f32 %v8986_v46, %v7352_v43 }
 0x2ea   : > { %v5777_v1 = vmin.f32 %v5713_v61, 6.0  ;;  %v2934_v38 = vadd.f32 %v2763_v20, %v2392_v0  ;;  %v3313_v15 = vmul.f32 %v8990_v6, %v7352_v43  ;;  %v3315_v55 = vmul.f32 %v7352_v43, %v3234_v16 }
 0x2eb   : > { %v3775_v39 = vunpack.c.l.bf16 %v9059_v18  ;;  %v3170_v27 = vadd.f32 %v3106_v23, %v2932_v63  ;;  %v3854_v28 = vmul.f32 %v8990_v6, %v7362_v53  ;;  %v3535_v34 = vrot.slane %v3311_v47, 1 }
 0x2ec   : > { %v5825_v29 = vpack.c.bf16 %v5779_v7, %v5777_v1  ;;  %v3172_v40 = vadd.f32 %v3108_v21, %v2934_v38  ;;  %v3536_v9 = vrot.slane %v3313_v15, 1  ;;  %v3541_v61 = vrot.slane %v3315_v55, 1 }
 0x2ed   : > { %v3852_v45 = vmul.f32 %v7362_v53, %v3775_v39  ;;  %v3856_v59 = vmul.f32 %v7362_v53, %v3234_v16  ;;  %v4077_v0 = vrot.slane %v3854_v28, 2  ;;  %v9164_v18 = vunpack.c.l.bf16 %v9077_v51 }
 0x2ee   : > { %6668 = vmatprep.mubr.msk.bf16.mxu1 %vm5943_vm4, %v5825_v29  ;;  %v9167_v7 = vunpack.c.l.bf16 %v9079_v33  ;;  %v3537_v23 = vsel %vm2133_vm1, %v3535_v34, %v3536_v9  ;;  %v3542_v58 = vsel %vm2133_vm1, %v3536_v9, %v3541_v61  ;;  %v4554_v21 = vunpack.c.l.bf16 %v9083_v17 }
 0x2ef   : > { %v4076_v20 = vrot.slane %v3852_v45, 2  ;;  %v3711_v1 = vadd.f32 %v3537_v23, %v3170_v27  ;;  %v3713_v63 = vadd.f32 %v3542_v58, %v3172_v40  ;;  %v4082_v38 = vrot.slane %v3856_v59, 2 }
 0x2f0   : > { %v4426_v16 = vmul.f32 %v7386_v3, %v9164_v18  ;;  %v4428_v51 = vmul.f32 %v7386_v3, %v9167_v7  ;;  %v4631_v33 = vmul.f32 %v7410_v11, %v9164_v18  ;;  %v4633_v15 = vmul.f32 %v7410_v11, %v9167_v7 }
 0x2f1   : > { %v4078_v47 = vsel %vm2675_vm2, %v4076_v20, %v4077_v0  ;;  %v4083_v55 = vsel %vm2675_vm2, %v4077_v0, %v4082_v38  ;;  %v4635_v39 = vmul.f32 %v7410_v11, %v4554_v21  ;;  %v5095_v29 = vunpack.c.l.bf16 %v9093_v41  ;;  %v10733_v20 = vld [vmem:[#allocation14_spill] sm:$0xff] }
 0x2f2   : > { %v4252_v17 = vadd.f32 %v4078_v47, %v3711_v1  ;;  %v4254_v27 = vadd.f32 %v4083_v55, %v3713_v63  ;;  %v4855_v40 = vrot.slane %v4631_v33, 1  ;;  %v4856_v28 = vrot.slane %v4633_v15, 1 }
 0x2f3   : > { %v5174_v34 = vmul.f32 %v7376_v60, %v9167_v7  ;;  %v4861_v61 = vrot.slane %v4635_v39, 1  ;;  %v5172_v45 = vmul.f32 %v7376_v60, %v5095_v29  ;;  %v5176_v59 = vmul.f32 %v7376_v60, %v4554_v21  ;;  %v10736_v29 = vld [vmem:[#allocation17_spill] sm:$0xff] }
 0x2f4   : > { %v4490_v9 = vadd.f32 %v4426_v16, %v4252_v17  ;;  %v4492_v23 = vadd.f32 %v4428_v51, %v4254_v27  ;;  %v4857_v0 = vsel %vm2133_vm1, %v4855_v40, %v4856_v28  ;;  %v889_v1 = vadd.f32 %v10733_v20, %v7261_v49  ;;  %v10734_v16 = vld [vmem:[#allocation15_spill] sm:$0xff]  ;;  %v10735_v17 = vld [vmem:[#allocation16_spill] sm:$0xff] }
 0x2f5   : > { %v5397_v58 = vrot.slane %v5174_v34, 2  ;;  %v4862_v41 = vsel %vm2133_vm1, %v4856_v28, %v4861_v61  ;;  %v5396_v38 = vrot.slane %v5172_v45, 2  ;;  %v5402_v47 = vrot.slane %v5176_v59, 2  ;;  %v10737_v40 = vld [vmem:[#allocation19_spill] sm:$0xff] }
 0x2f6   : > { %v5031_v63 = vadd.f32 %v4857_v0, %v4490_v9  ;;  %v5033_v33 = vadd.f32 %v4862_v41, %v4492_v23  ;;  %v1025_v15 = vmax.f32 %v889_v1, 0.0  ;;  %v891_v55 = vadd.f32 %v10734_v16, %v7264_v50  ;;  %v9202_v59 = vld [vmem:[#allocation2 + $0xe8] sm:$0x11] }
 0x2f7   : > { %v893_v21 = vadd.f32 %v10735_v17, %v7261_v49  ;;  %v5398_v51 = vsel %vm2675_vm2, %v5396_v38, %v5397_v58  ;;  %v5403_v39 = vsel %vm2675_vm2, %v5397_v58, %v5402_v47  ;;  %v895_v27 = vadd.f32 %v10736_v29, %v7264_v50 }
 0x2f8   : > { %v899_v28 = vadd.f32 %v10737_v40, %v7261_v49  ;;  %v5572_v34 = vadd.f32 %v5398_v51, %v5031_v63  ;;  %v5574_v9 = vadd.f32 %v5403_v39, %v5033_v33  ;;  %v1133_v61 = vmin.f32 %v1025_v15, 6.0  ;;  %v9210_v63 = vld [vmem:[#allocation2 + $0xd8] sm:$0xee] }
 0x2f9   : > { %v1026_v45 = vmax.f32 %v891_v55, 0.0  ;;  %v1027_v23 = vmax.f32 %v893_v21, 0.0  ;;  %v1028_v0 = vmax.f32 %v895_v27, 0.0  ;;  %v1853_v1 = vmul.f32 %v8904_v4, %v7340_v36 }
 0x2fa   : > { %v1029_v20 = vmax.f32 %v899_v28, 0.0  ;;  %v5648_v58 = vadd.f32 %v7416_v19, %v5572_v34  ;;  %v5650_v41 = vadd.f32 %v7416_v19, %v5574_v9  ;;  %v1855_v47 = vmul.f32 %v8907_v56, %v7340_v36  ;;  %v9221_v34 = vpop.f32.mrb[105].mxu0 }
 0x2fb   : > { %v1134_v38 = vmin.f32 %v1026_v45, 6.0  ;;  %v1135_v33 = vmin.f32 %v1027_v23, 6.0  ;;  %v1136_v15 = vmin.f32 %v1028_v0, 6.0  ;;  %v1915_v55 = vunpack.c.h.bf16 %v9202_v59  ;;  %10738 = vst [vmem:[#allocation6_spill] sm:$0xff] %v9221_v34 }
 0x2fc   : > { %v9212_v16 = vmin.f32 %v1029_v20, 6.0  ;;  %v5712_v17 = vmax.f32 %v5648_v58, 0.0  ;;  %v5714_v21 = vmax.f32 %v5650_v41, 0.0  ;;  %v1996_v39 = vmul.f32 %v8904_v4, %v7323_v31  ;;  %v9231_v41 = vld [vmem:[#allocation2 + $0x100] sm:$0x11] }
 0x2fd   : > { %v6723_v51 = vpack.c.bf16 %v1134_v38, %v1133_v61  ;;  %v6724_v29 = vpack.c.bf16 %v1136_v15, %v1135_v33  ;;  %v1998_v27 = vmul.f32 %v8907_v56, %v7323_v31  ;;  %v2000_v40 = vmul.f32 %v7323_v31, %v1915_v55 }
 0x2fe   : > { %v2457_v28 = vunpack.c.h.bf16 %v9210_v63  ;;  %v5776_v9 = vmin.f32 %v5712_v17, 6.0  ;;  %v5778_v45 = vmin.f32 %v5714_v21, 6.0  ;;  %v2227_v23 = vrot.slane %v1996_v39, 1 }
 0x2ff   : > { %1560 = vst.msk [vmem:[#allocation2 + $0x160] sm:$0xff] %vm7272_vm3, %v6723_v51  ;;  %v2540_v61 = vmul.f32 %v8907_v56, %v7314_v26  ;;  %1561 = vst.msk [vmem:[#allocation2 + $0x168] sm:$0xff] %vm7272_vm3, %v6724_v29  ;;  %v2228_v4 = vrot.slane %v1998_v27, 1  ;;  %v2232_v0 = vrot.slane %v2000_v40, 1  ;;  %v2542_v58 = vmul.f32 %v7314_v26, %v1915_v55  ;;  %v9237_v56 = vld [vmem:[#allocation2 + $0xf0] sm:$0xee] }
 0x300   : > { %v2538_v20 = vmul.f32 %v7314_v26, %v2457_v28  ;;  %v5824_v38 = vpack.c.bf16 %v5778_v45, %v5776_v9  ;;  %v3111_v15 = vmul.f32 %v9088_v12, %v7349_v42  ;;  %v3113_v17 = vmul.f32 %v9091_v5, %v7349_v42 }
 0x301   : > { %v2770_v33 = vrot.slane %v2540_v61, 2  ;;  %v2229_v21 = vsel %vm2133_vm1, %v2227_v23, %v2228_v4  ;;  %v2233_v51 = vsel %vm2133_vm1, %v2228_v4, %v2232_v0  ;;  %v2774_v29 = vrot.slane %v2542_v58, 2 }
 0x302   : > { %v2769_v39 = vrot.slane %v2538_v20, 2  ;;  %6089 = vmatmul.mubr.bf16.gmra.mrb[32].mxu1 %v5824_v38  ;;  %v2395_v55 = vadd.f32 %v2229_v21, %v1853_v1  ;;  %v2397_v27 = vadd.f32 %v2233_v51, %v1855_v47  ;;  %v3237_v40 = vunpack.c.h.bf16 %v9231_v41 }
 0x303   : > { %v3318_v28 = vmul.f32 %v9088_v12, %v10653_v10  ;;  %v2775_v45 = vsel %vm2675_vm2, %v2770_v33, %v2774_v29  ;;  %v3320_v61 = vmul.f32 %v9091_v5, %v10653_v10  ;;  %v3778_v23 = vunpack.c.h.bf16 %v9237_v56 }
 0x304   : > { %v2771_v9 = vsel %vm2675_vm2, %v2769_v39, %v2770_v33  ;;  %v2939_v0 = vadd.f32 %v2775_v45, %v2397_v27  ;;  %v3322_v20 = vmul.f32 %v10653_v10, %v3237_v40  ;;  %v3861_v21 = vmul.f32 %v9091_v5, %v10655_v54  ;;  %v9254_v33 = vld [vmem:[#allocation2 + $0x108] sm:$0xff]  ;;  %v9256_v39 = vld [vmem:[#allocation2 + $0x110] sm:$0xff]  ;;  %v9260_v45 = vld [vmem:[#allocation2 + $0x118] sm:$0x11] }
 0x305   : > { %v2937_v4 = vadd.f32 %v2771_v9, %v2395_v55  ;;  %v3548_v1 = vrot.slane %v3318_v28, 1  ;;  %v3549_v58 = vrot.slane %v3320_v61, 1  ;;  %v3859_v38 = vmul.f32 %v10655_v54, %v3778_v23 }
 0x306   : > { %v1680_v47 = vld [vmem:[#allocation2 + $0x160] sm:$0xff]  ;;  %v3863_v51 = vmul.f32 %v10655_v54, %v3237_v40  ;;  %v1622_v55 = vld [vmem:[#allocation2 + $0x168] sm:$0x11]  ;;  %v3177_v9 = vadd.f32 %v3113_v17, %v2939_v0  ;;  %v3553_v28 = vrot.slane %v3322_v20, 1  ;;  %v4090_v34 = vrot.slane %v3861_v21, 2 }
 0x307   : > { %v1681_v29 = vsel %vm7422_vm15, 0, %v1680_v47  ;;  %v3175_v27 = vadd.f32 %v3111_v15, %v2937_v4  ;;  %v1623_v61 = vsel %vm7332_vm12, 0, %v1622_v55  ;;  %v3550_v23 = vsel %vm2133_vm1, %v3548_v1, %v3549_v58  ;;  %v9274_v20 = vld [vmem:[#allocation2 + $0x108] sm:$0xee] }
 0x308   : > { %1682 = vst [vmem:[#allocation2 + $0x160] sm:$0xff] %v1681_v29  ;;  %v4089_v40 = vrot.slane %v3859_v38, 2  ;;  %1624 = vst [vmem:[#allocation2 + $0x168] sm:$0x11] %v1623_v61  ;;  %v3554_v13 = vsel %vm2133_vm1, %v3549_v58, %v3553_v28  ;;  %v4094_v35 = vrot.slane %v3863_v51, 2  ;;  %v9267_v47 = vunpack.c.h.bf16 %v9254_v33 }
 0x309   : > { %v3716_v57 = vadd.f32 %v3550_v23, %v3175_v27  ;;  %v3718_v15 = vadd.f32 %v3554_v13, %v3177_v9  ;;  %v9271_v4 = vunpack.c.h.bf16 %v9256_v39  ;;  %v4557_v0 = vunpack.c.h.bf16 %v9260_v45 }
 0x30a   : > { %v4091_v17 = vsel %vm2675_vm2, %v4089_v40, %v4090_v34  ;;  %v4095_v1 = vsel %vm2675_vm2, %v4090_v34, %v4094_v35  ;;  %v4431_v58 = vmul.f32 %v10726_v32, %v9267_v47  ;;  %v4638_v21 = vmul.f32 %v10727_v62, %v9267_v47 }
 0x30b   : > { %v4257_v38 = vadd.f32 %v4091_v17, %v3716_v57  ;;  %v4259_v51 = vadd.f32 %v4095_v1, %v3718_v15  ;;  %v4433_v13 = vmul.f32 %v10726_v32, %v9271_v4  ;;  %v4640_v29 = vmul.f32 %v10727_v62, %v9271_v4  ;;  %v10739_v17 = vld [vmem:[#allocation20_spill] sm:$0xff] }
 0x30c   : > { %v4642_v55 = vmul.f32 %v10727_v62, %v4557_v0  ;;  %v4868_v9 = vrot.slane %v4638_v21, 1  ;;  %v5098_v35 = vunpack.c.h.bf16 %v9274_v20  ;;  %v5181_v57 = vmul.f32 %v10645_v22, %v9271_v4 }
 0x30d   : > { %v4495_v27 = vadd.f32 %v4431_v58, %v4257_v38  ;;  %v4497_v34 = vadd.f32 %v4433_v13, %v4259_v51  ;;  %v4869_v28 = vrot.slane %v4640_v29, 1  ;;  %v5183_v23 = vmul.f32 %v10645_v22, %v4557_v0 }
 0x30e   : > { %v4873_v61 = vrot.slane %v4642_v55, 1  ;;  %v5179_v40 = vmul.f32 %v10645_v22, %v5098_v35  ;;  %v5410_v15 = vrot.slane %v5181_v57, 2  ;;  %v901_v1 = vadd.f32 %v10739_v17, %v7264_v50 }
 0x30f   : > { %v1852_v38 = vmul.f32 %v8986_v46, %v10704_v52  ;;  %v4870_v58 = vsel %vm2133_vm1, %v4868_v9, %v4869_v28  ;;  %v5414_v62 = vrot.slane %v5183_v23, 2  ;;  %v1854_v51 = vmul.f32 %v8990_v6, %v10704_v52 }
 0x310   : > { %v4874_v21 = vsel %vm2133_vm1, %v4869_v28, %v4873_v61  ;;  %v5036_v13 = vadd.f32 %v4870_v58, %v4495_v27  ;;  %v5409_v0 = vrot.slane %v5179_v40, 2  ;;  %v1030_v55 = vmax.f32 %v901_v1, 0.0 }
 0x311   : > { %v5038_v29 = vadd.f32 %v4874_v21, %v4497_v34  ;;  %v5415_v35 = vsel %vm2675_vm2, %v5410_v15, %v5414_v62  ;;  %v1914_v57 = vunpack.c.l.bf16 %v9202_v59  ;;  %v1995_v17 = vmul.f32 %v8986_v46, %v7320_v30  ;;  %v9308_v62 = vpop.f32.mrb[106].mxu0 }
 0x312   : > { %v1997_v9 = vmul.f32 %v8990_v6, %v7320_v30  ;;  %v5411_v28 = vsel %vm2675_vm2, %v5409_v0, %v5410_v15  ;;  %v1138_v23 = vmin.f32 %v1030_v55, 6.0  ;;  %v2456_v52 = vunpack.c.l.bf16 %v9210_v63  ;;  %v9315_v21 = vpop.f32.mrb[107].mxu0 }
 0x313   : > { %v5579_v61 = vadd.f32 %v5415_v35, %v5038_v29  ;;  %v5577_v27 = vadd.f32 %v5411_v28, %v5036_v13  ;;  %v1999_v34 = vmul.f32 %v7320_v30, %v1914_v57  ;;  %v2224_v40 = vrot.slane %v1995_v17, 1  ;;  %10740 = vst [vmem:[#allocation14_spill] sm:$0xff] %v9315_v21 }
 0x314   : > { %v2225_v1 = vrot.slane %v1997_v9, 1  ;;  %v6725_v46 = vpack.c.bf16 %v1138_v23, %v9212_v16  ;;  %v2537_v58 = vmul.f32 %v7311_v25, %v2456_v52  ;;  %v2539_v15 = vmul.f32 %v8990_v6, %v7311_v25 }
 0x315   : > { %v5655_v59 = vadd.f32 %v7433_v24, %v5579_v61  ;;  %v5653_v63 = vadd.f32 %v7433_v24, %v5577_v27  ;;  %v2230_v29 = vrot.slane %v1999_v34, 1  ;;  %v2541_v0 = vmul.f32 %v7311_v25, %v1914_v57 }
 0x316   : > { %v2226_v13 = vsel %vm2133_vm1, %v2224_v40, %v2225_v1  ;;  %1562 = vst.msk [vmem:[#allocation2 + $0x170] sm:$0xff] %vm7272_vm3, %v6725_v46  ;;  %v2766_v16 = vrot.slane %v2537_v58, 2  ;;  %v2767_v17 = vrot.slane %v2539_v15, 2  ;;  %v3110_v28 = vmul.f32 %v9164_v18, %v7343_v37 }
 0x317   : > { %v5719_v55 = vmax.f32 %v5655_v59, 0.0  ;;  %v2394_v35 = vadd.f32 %v2226_v13, %v1852_v38  ;;  %v5717_v52 = vmax.f32 %v5653_v63, 0.0  ;;  %v2231_v9 = vsel %vm2133_vm1, %v2225_v1, %v2230_v29 }
 0x318   : > { %v2772_v6 = vrot.slane %v2541_v0, 2  ;;  %v2396_v23 = vadd.f32 %v2231_v9, %v1854_v51  ;;  %v2768_v27 = vsel %vm2675_vm2, %v2766_v16, %v2767_v17  ;;  %v3112_v57 = vmul.f32 %v9167_v7, %v7343_v37 }
 0x319   : > { %v5783_v61 = vmin.f32 %v5719_v55, 6.0  ;;  %v5781_v34 = vmin.f32 %v5717_v52, 6.0  ;;  %v2936_v38 = vadd.f32 %v2768_v27, %v2394_v35  ;;  %v3236_v59 = vunpack.c.l.bf16 %v9231_v41 }
 0x31a   : > { %v2773_v40 = vsel %vm2675_vm2, %v2767_v17, %v2772_v6  ;;  %v3317_v1 = vmul.f32 %v9164_v18, %v7352_v43  ;;  %v3319_v58 = vmul.f32 %v9167_v7, %v7352_v43  ;;  %v3777_v51 = vunpack.c.l.bf16 %v9237_v56 }
 0x31b   : > { %v2938_v46 = vadd.f32 %v2773_v40, %v2396_v23  ;;  %v5827_v15 = vpack.c.bf16 %v5783_v61, %v5781_v34  ;;  %v3174_v63 = vadd.f32 %v3110_v28, %v2936_v38  ;;  %v3321_v13 = vmul.f32 %v7352_v43, %v3236_v59 }
 0x31c   : > { %v3860_v29 = vmul.f32 %v9167_v7, %v7362_v53  ;;  %v3545_v55 = vrot.slane %v3317_v1, 1  ;;  %v3546_v35 = vrot.slane %v3319_v58, 1  ;;  %v3858_v41 = vmul.f32 %v7362_v53, %v3777_v51 }
 0x31d   : > { %v3176_v0 = vadd.f32 %v3112_v57, %v2938_v46  ;;  %6669 = vmatprep.mubr.msk.bf16.mxu1 %vm5943_vm4, %v5827_v15  ;;  %v3551_v16 = vrot.slane %v3321_v13, 1  ;;  %v3862_v17 = vmul.f32 %v7362_v53, %v3236_v59  ;;  %v9342_v56 = vunpack.c.l.bf16 %v9254_v33 }
 0x31e   : > { %v4087_v52 = vrot.slane %v3860_v29, 2  ;;  %v3547_v9 = vsel %vm2133_vm1, %v3545_v55, %v3546_v35  ;;  %v4086_v6 = vrot.slane %v3858_v41, 2  ;;  %v9346_v28 = vunpack.c.l.bf16 %v9256_v39 }
 0x31f   : > { %v4556_v61 = vunpack.c.l.bf16 %v9260_v45  ;;  %v3552_v23 = vsel %vm2133_vm1, %v3546_v35, %v3551_v16  ;;  %v3715_v27 = vadd.f32 %v3547_v9, %v3174_v63  ;;  %v4092_v57 = vrot.slane %v3862_v17, 2 }
 0x320   : > { %v4430_v34 = vmul.f32 %v7386_v3, %v9342_v56  ;;  %v3717_v40 = vadd.f32 %v3552_v23, %v3176_v0  ;;  %v4088_v38 = vsel %vm2675_vm2, %v4086_v6, %v4087_v52  ;;  %v4432_v33 = vmul.f32 %v7386_v3, %v9346_v28 }
 0x321   : > { %v4637_v59 = vmul.f32 %v7410_v11, %v9342_v56  ;;  %v4093_v39 = vsel %vm2675_vm2, %v4087_v52, %v4092_v57  ;;  %v4256_v46 = vadd.f32 %v4088_v38, %v3715_v27  ;;  %v4639_v45 = vmul.f32 %v7410_v11, %v9346_v28  ;;  %v10741_v38 = vld [vmem:[#allocation10_spill] sm:$0xff] }
 0x322   : > { %v4641_v1 = vmul.f32 %v7410_v11, %v4556_v61  ;;  %v4258_v58 = vadd.f32 %v4093_v39, %v3717_v40  ;;  %v5097_v15 = vunpack.c.l.bf16 %v9274_v20  ;;  %v5180_v63 = vmul.f32 %v7376_v60, %v9346_v28 }
 0x323   : > { %v4865_v51 = vrot.slane %v4637_v59, 1  ;;  %v4494_v13 = vadd.f32 %v4430_v34, %v4256_v46  ;;  %v4866_v29 = vrot.slane %v4639_v45, 1  ;;  %v5182_v55 = vmul.f32 %v7376_v60, %v4556_v61 }
 0x324   : > { %v4871_v0 = vrot.slane %v4641_v1, 1  ;;  %v4496_v35 = vadd.f32 %v4432_v33, %v4258_v58  ;;  %v5178_v41 = vmul.f32 %v7376_v60, %v5097_v15  ;;  %v5407_v16 = vrot.slane %v5180_v63, 2  ;;  %v10743_v1 = vld [vmem:[#allocation22_spill] sm:$0xff] }
 0x325   : > { %v903_v17 = vadd.f32 %v8945_v8, %v7261_v49  ;;  %v4867_v52 = vsel %vm2133_vm1, %v4865_v51, %v4866_v29  ;;  %v5412_v20 = vrot.slane %v5182_v55, 2  ;;  %v905_v6 = vadd.f32 %v8951_v44, %v7264_v50  ;;  %v10742_v8 = vld [vmem:[#allocation21_spill] sm:$0xff] }
 0x326   : > { %v4872_v9 = vsel %vm2133_vm1, %v4866_v29, %v4871_v0  ;;  %v5035_v23 = vadd.f32 %v4867_v52, %v4494_v13  ;;  %v5406_v57 = vrot.slane %v5178_v41, 2  ;;  %v909_v33 = vadd.f32 %v10741_v38, %v7261_v49  ;;  %v10744_v0 = vld [vmem:[#allocation23_spill] sm:$0xff]  ;;  %v9385_v41 = vld [vmem:[#allocation2 + $0x100] sm:$0x11] }
 0x327   : > { %v5037_v27 = vadd.f32 %v4872_v9, %v4496_v35  ;;  %v1031_v34 = vmax.f32 %v903_v17, 0.0  ;;  %v5413_v61 = vsel %vm2675_vm2, %v5407_v16, %v5412_v20  ;;  %v1032_v40 = vmax.f32 %v905_v6, 0.0  ;;  %v9388_v20 = vld [vmem:[#allocation2 + $0xf0] sm:$0xee] }
 0x328   : > { %v911_v59 = vadd.f32 %v10742_v8, %v7264_v50  ;;  %v5408_v39 = vsel %vm2675_vm2, %v5406_v57, %v5407_v16  ;;  %v913_v44 = vadd.f32 %v10743_v1, %v7261_v49  ;;  %v1033_v15 = vmax.f32 %v909_v33, 0.0 }
 0x329   : > { %v5578_v46 = vadd.f32 %v5413_v61, %v5037_v27  ;;  %v1139_v45 = vmin.f32 %v1031_v34, 6.0  ;;  %v5576_v58 = vadd.f32 %v5408_v39, %v5035_v23  ;;  %v1140_v51 = vmin.f32 %v1032_v40, 6.0 }
 0x32a   : > { %v1034_v63 = vmax.f32 %v911_v59, 0.0  ;;  %v1035_v29 = vmax.f32 %v913_v44, 0.0  ;;  %v915_v55 = vadd.f32 %v10744_v0, %v7264_v50  ;;  %v1857_v35 = vmul.f32 %v9088_v12, %v7340_v36 }
 0x32b   : > { %v5654_v13 = vadd.f32 %v7416_v19, %v5578_v46  ;;  %v5652_v16 = vadd.f32 %v7416_v19, %v5576_v58  ;;  %v6726_v17 = vpack.c.bf16 %v1140_v51, %v1139_v45  ;;  %v1141_v52 = vmin.f32 %v1033_v15, 6.0 }
 0x32c   : > { %v1142_v9 = vmin.f32 %v1034_v63, 6.0  ;;  %v1143_v23 = vmin.f32 %v1035_v29, 6.0  ;;  %v1036_v27 = vmax.f32 %v915_v55, 0.0  ;;  %v1859_v57 = vmul.f32 %v9091_v5, %v7340_v36  ;;  %v9407_v63 = vld [vmem:[#allocation2 + $0x118] sm:$0x11] }
 0x32d   : > { %v5718_v6 = vmax.f32 %v5654_v13, 0.0  ;;  %v5716_v34 = vmax.f32 %v5652_v16, 0.0  ;;  %1563 = vst.msk [vmem:[#allocation2 + $0x178] sm:$0xff] %vm7272_vm3, %v6726_v17  ;;  %v1917_v40 = vunpack.c.h.bf16 %v9385_v41  ;;  %v2002_v38 = vmul.f32 %v9088_v12, %v7323_v31 }
 0x32e   : > { %v6727_v61 = vpack.c.bf16 %v1142_v9, %v1141_v52  ;;  %v1144_v8 = vmin.f32 %v1036_v27, 6.0  ;;  %v2004_v59 = vmul.f32 %v9091_v5, %v7323_v31  ;;  %v2459_v39 = vunpack.c.h.bf16 %v9388_v20 }
 0x32f   : > { %v5782_v33 = vmin.f32 %v5718_v6, 6.0  ;;  %v5780_v46 = vmin.f32 %v5716_v34, 6.0  ;;  %v2006_v45 = vmul.f32 %v7323_v31, %v1917_v40  ;;  %v2237_v1 = vrot.slane %v2002_v38, 1  ;;  %v9420_v34 = vld [vmem:[#allocation2 + $0x108] sm:$0xee] }
 0x330   : > { %1564 = vst.msk [vmem:[#allocation2 + $0x180] sm:$0xff] %vm7272_vm3, %v6727_v61  ;;  %v2546_v44 = vmul.f32 %v9091_v5, %v7314_v26  ;;  %v6728_v58 = vpack.c.bf16 %v1144_v8, %v1143_v23  ;;  %v2238_v51 = vrot.slane %v2004_v59, 1  ;;  %v2544_v12 = vmul.f32 %v7314_v26, %v2459_v39 }
 0x331   : > { %v2548_v15 = vmul.f32 %v7314_v26, %v1917_v40  ;;  %v5826_v13 = vpack.c.bf16 %v5782_v33, %v5780_v46  ;;  %v2242_v29 = vrot.slane %v2006_v45, 1  ;;  %v3115_v55 = vmul.f32 %v9267_v47, %v7349_v42 }
 0x332   : > { %v2780_v0 = vrot.slane %v2546_v44, 2  ;;  %1565 = vst.msk [vmem:[#allocation2 + $0x188] sm:$0xff] %vm7272_vm3, %v6728_v58  ;;  %v2239_v16 = vsel %vm2133_vm1, %v2237_v1, %v2238_v51  ;;  %v2779_v5 = vrot.slane %v2544_v12, 2  ;;  %v3117_v52 = vmul.f32 %v9271_v4, %v7349_v42 }
 0x333   : > { %v2784_v17 = vrot.slane %v2548_v15, 2  ;;  %6097 = vmatmul.mubr.bf16.gmra.mrb[36].mxu1 %v5826_v13  ;;  %v2243_v9 = vsel %vm2133_vm1, %v2238_v51, %v2242_v29  ;;  %v2399_v6 = vadd.f32 %v2239_v16, %v1857_v35  ;;  %v3239_v23 = vunpack.c.h.bf16 %v9407_v63  ;;  %v9432_v51 = vld [vmem:[#allocation2 + $0x120] sm:$0xff]  ;;  %v9439_v16 = vld [vmem:[#allocation2 + $0x130] sm:$0x11] }
 0x334   : > { %v3324_v27 = vmul.f32 %v9267_v47, %v10653_v10  ;;  %v1683_v61 = vld [vmem:[#allocation2 + $0x178] sm:$0xff]  ;;  %v2401_v40 = vadd.f32 %v2243_v9, %v1859_v57  ;;  %v2781_v38 = vsel %vm2675_vm2, %v2779_v5, %v2780_v0  ;;  %v3326_v8 = vmul.f32 %v9271_v4, %v10653_v10 }
 0x335   : > { %v2785_v33 = vsel %vm2675_vm2, %v2780_v0, %v2784_v17  ;;  %v1684_v59 = vsel %vm7422_vm15, 0, %v1683_v61  ;;  %v2941_v35 = vadd.f32 %v2781_v38, %v2399_v6  ;;  %v3328_v39 = vmul.f32 %v10653_v10, %v3239_v23  ;;  %v9437_v0 = vld [vmem:[#allocation2 + $0x128] sm:$0xff] }
 0x336   : > { %v3558_v46 = vrot.slane %v3324_v27, 1  ;;  %1685 = vst [vmem:[#allocation2 + $0x178] sm:$0xff] %v1684_v59  ;;  %v2943_v1 = vadd.f32 %v2785_v33, %v2401_v40  ;;  %v3559_v44 = vrot.slane %v3326_v8, 1  ;;  %v3780_v57 = vunpack.c.h.bf16 %v9420_v34  ;;  %v9443_v27 = vld [vmem:[#allocation2 + $0x120] sm:$0xee] }
 0x337   : > { %v1625_v45 = vld [vmem:[#allocation2 + $0x180] sm:$0x11]  ;;  %v3867_v58 = vmul.f32 %v9271_v4, %v10655_v54  ;;  %v3179_v15 = vadd.f32 %v3115_v55, %v2941_v35  ;;  %v3563_v13 = vrot.slane %v3328_v39, 1  ;;  %v3869_v29 = vmul.f32 %v10655_v54, %v3239_v23  ;;  %v10745_v39 = vld [vmem:[#allocation12_spill] sm:$0xff] }
 0x338   : > { %v1626_v12 = vsel %vm7332_vm12, 0, %v1625_v45  ;;  %v3181_v5 = vadd.f32 %v3117_v52, %v2943_v1  ;;  %v3560_v17 = vsel %vm2133_vm1, %v3558_v46, %v3559_v44  ;;  %v3865_v9 = vmul.f32 %v10655_v54, %v3780_v57 }
 0x339   : > { %1627 = vst [vmem:[#allocation2 + $0x180] sm:$0x11] %v1626_v12  ;;  %v4100_v6 = vrot.slane %v3867_v58, 2  ;;  %v3564_v61 = vsel %vm2133_vm1, %v3559_v44, %v3563_v13  ;;  %v3720_v40 = vadd.f32 %v3560_v17, %v3179_v15  ;;  %v4104_v55 = vrot.slane %v3869_v29, 2 }
 0x33a   : > { %v9447_v38 = vunpack.c.h.bf16 %v9432_v51  ;;  %v3722_v23 = vadd.f32 %v3564_v61, %v3181_v5  ;;  %v4099_v33 = vrot.slane %v3865_v9, 2  ;;  %v9450_v8 = vunpack.c.h.bf16 %v9437_v0 }
 0x33b   : > { %v4559_v52 = vunpack.c.h.bf16 %v9439_v16  ;;  %v4105_v59 = vsel %vm2675_vm2, %v4100_v6, %v4104_v55  ;;  %v5100_v45 = vunpack.c.h.bf16 %v9443_v27 }
 0x33c   : > { %v4435_v35 = vmul.f32 %v10726_v32, %v9447_v38  ;;  %v4644_v46 = vmul.f32 %v10745_v39, %v9447_v38  ;;  %v4101_v1 = vsel %vm2675_vm2, %v4099_v33, %v4100_v6  ;;  %v4263_v44 = vadd.f32 %v4105_v59, %v3722_v23  ;;  %v10746_v33 = vld [vmem:[#allocation7_spill] sm:$0xff] }
 0x33d   : > { %v4437_v57 = vmul.f32 %v10726_v32, %v9450_v8  ;;  %v4646_v58 = vmul.f32 %v10745_v39, %v9450_v8  ;;  %v4261_v12 = vadd.f32 %v4101_v1, %v3720_v40  ;;  %v4648_v15 = vmul.f32 %v10745_v39, %v4559_v52 }
 0x33e   : > { %v4878_v13 = vrot.slane %v4644_v46, 1  ;;  %v5185_v29 = vmul.f32 %v10645_v22, %v5100_v45  ;;  %v5187_v9 = vmul.f32 %v10645_v22, %v9450_v8  ;;  %v5189_v6 = vmul.f32 %v10645_v22, %v4559_v52 }
 0x33f   : > { %v4501_v5 = vadd.f32 %v4437_v57, %v4263_v44  ;;  %v4879_v17 = vrot.slane %v4646_v58, 1  ;;  %v4499_v61 = vadd.f32 %v4435_v35, %v4261_v12  ;;  %v4883_v55 = vrot.slane %v4648_v15, 1 }
 0x340   : > { %v5419_v23 = vrot.slane %v5185_v29, 2  ;;  %v1856_v59 = vmul.f32 %v9164_v18, %v10746_v33  ;;  %v5420_v1 = vrot.slane %v5187_v9, 2  ;;  %v5424_v21 = vrot.slane %v5189_v6, 2 }
 0x341   : > { %v4880_v40 = vsel %vm2133_vm1, %v4878_v13, %v4879_v17  ;;  %v1858_v46 = vmul.f32 %v9167_v7, %v10746_v33  ;;  %v4884_v45 = vsel %vm2133_vm1, %v4879_v17, %v4883_v55  ;;  %v1916_v57 = vunpack.c.l.bf16 %v9385_v41 }
 0x342   : > { %v5040_v44 = vadd.f32 %v4880_v40, %v4499_v61  ;;  %v2001_v52 = vmul.f32 %v9164_v18, %v7320_v30  ;;  %v5042_v35 = vadd.f32 %v4884_v45, %v4501_v5  ;;  %v5421_v58 = vsel %vm2675_vm2, %v5419_v23, %v5420_v1 }
 0x343   : > { %v5425_v12 = vsel %vm2675_vm2, %v5420_v1, %v5424_v21  ;;  %v2003_v15 = vmul.f32 %v9167_v7, %v7320_v30  ;;  %v2005_v29 = vmul.f32 %v7320_v30, %v1916_v57  ;;  %v2458_v17 = vunpack.c.l.bf16 %v9388_v20 }
 0x344   : > { %v5581_v13 = vadd.f32 %v5421_v58, %v5040_v44  ;;  %v2234_v9 = vrot.slane %v2001_v52, 1  ;;  %v5583_v6 = vadd.f32 %v5425_v12, %v5042_v35  ;;  %v2545_v41 = vmul.f32 %v9167_v7, %v7311_v25 }
 0x345   : > { %v2235_v61 = vrot.slane %v2003_v15, 1  ;;  %v2547_v18 = vmul.f32 %v7311_v25, %v1916_v57  ;;  %v2240_v55 = vrot.slane %v2005_v29, 1  ;;  %v2543_v21 = vmul.f32 %v7311_v25, %v2458_v17 }
 0x346   : > { %v5657_v5 = vadd.f32 %v7433_v24, %v5581_v13  ;;  %v3114_v23 = vmul.f32 %v9342_v56, %v7343_v37  ;;  %v5659_v40 = vadd.f32 %v7433_v24, %v5583_v6  ;;  %v2777_v20 = vrot.slane %v2545_v41, 2 }
 0x347   : > { %v2236_v1 = vsel %vm2133_vm1, %v2234_v9, %v2235_v61  ;;  %v2782_v45 = vrot.slane %v2547_v18, 2  ;;  %v2241_v52 = vsel %vm2133_vm1, %v2235_v61, %v2240_v55  ;;  %v2776_v35 = vrot.slane %v2543_v21, 2 }
 0x348   : > { %v5721_v44 = vmax.f32 %v5657_v5, 0.0  ;;  %v2398_v7 = vadd.f32 %v2236_v1, %v1856_v59  ;;  %v5723_v57 = vmax.f32 %v5659_v40, 0.0  ;;  %v2400_v58 = vadd.f32 %v2241_v52, %v1858_v46 }
 0x349   : > { %v2783_v12 = vsel %vm2675_vm2, %v2777_v20, %v2782_v45  ;;  %v3116_v15 = vmul.f32 %v9346_v28, %v7343_v37  ;;  %v2778_v29 = vsel %vm2675_vm2, %v2776_v35, %v2777_v20  ;;  %v3238_v17 = vunpack.c.l.bf16 %v9407_v63 }
 0x34a   : > { %v5785_v13 = vmin.f32 %v5721_v44, 6.0  ;;  %v3323_v9 = vmul.f32 %v9342_v56, %v7352_v43  ;;  %v5787_v6 = vmin.f32 %v5723_v57, 6.0  ;;  %v2940_v41 = vadd.f32 %v2778_v29, %v2398_v7 }
 0x34b   : > { %v2942_v61 = vadd.f32 %v2783_v12, %v2400_v58  ;;  %v3325_v59 = vmul.f32 %v9346_v28, %v7352_v43  ;;  %v3327_v46 = vmul.f32 %v7352_v43, %v3238_v17  ;;  %v3779_v5 = vunpack.c.l.bf16 %v9420_v34 }
 0x34c   : > { %v3555_v18 = vrot.slane %v3323_v9, 1  ;;  %v3866_v55 = vmul.f32 %v9346_v28, %v7362_v53  ;;  %v5829_v21 = vpack.c.bf16 %v5787_v6, %v5785_v13  ;;  %v3178_v40 = vadd.f32 %v3114_v23, %v2940_v41 }
 0x34d   : > { %v3180_v63 = vadd.f32 %v3116_v15, %v2942_v61  ;;  %v3556_v1 = vrot.slane %v3325_v59, 1  ;;  %v3561_v20 = vrot.slane %v3327_v46, 1  ;;  %v3864_v45 = vmul.f32 %v7362_v53, %v3779_v5 }
 0x34e   : > { %v3868_v44 = vmul.f32 %v7362_v53, %v3238_v17  ;;  %v4097_v52 = vrot.slane %v3866_v55, 2  ;;  %6670 = vmatprep.mubr.msk.bf16.mxu1 %vm5943_vm4, %v5829_v21  ;;  %v9512_v35 = vunpack.c.l.bf16 %v9432_v51  ;;  %v9515_v34 = vunpack.c.l.bf16 %v9437_v0 }
 0x34f   : > { %v3557_v7 = vsel %vm2133_vm1, %v3555_v18, %v3556_v1  ;;  %v4558_v23 = vunpack.c.l.bf16 %v9439_v16  ;;  %v3562_v57 = vsel %vm2133_vm1, %v3556_v1, %v3561_v20  ;;  %v4096_v12 = vrot.slane %v3864_v45, 2  ;;  %v10747_v20 = vld [vmem:[#allocation24_spill] sm:$0xff] }
 0x350   : > { %v3719_v58 = vadd.f32 %v3557_v7, %v3178_v40  ;;  %v4102_v15 = vrot.slane %v3868_v44, 2  ;;  %v3721_v13 = vadd.f32 %v3562_v57, %v3180_v63  ;;  %v4434_v29 = vmul.f32 %v7386_v3, %v9512_v35 }
 0x351   : > { %v4436_v17 = vmul.f32 %v7386_v3, %v9515_v34  ;;  %v4643_v51 = vmul.f32 %v7410_v11, %v9512_v35  ;;  %v4098_v0 = vsel %vm2675_vm2, %v4096_v12, %v4097_v52  ;;  %v4645_v16 = vmul.f32 %v7410_v11, %v9515_v34 }
 0x352   : > { %v4103_v9 = vsel %vm2675_vm2, %v4097_v52, %v4102_v15  ;;  %v4647_v6 = vmul.f32 %v7410_v11, %v4558_v23  ;;  %v4260_v41 = vadd.f32 %v4098_v0, %v3719_v58  ;;  %v5099_v46 = vunpack.c.l.bf16 %v9443_v27  ;;  %v10750_v0 = vld [vmem:[#allocation13_spill] sm:$0xff] }
 0x353   : > { %v4262_v61 = vadd.f32 %v4103_v9, %v3721_v13  ;;  %v4875_v59 = vrot.slane %v4643_v51, 1  ;;  %v4876_v18 = vrot.slane %v4645_v16, 1  ;;  %v5186_v55 = vmul.f32 %v7376_v60, %v9515_v34 }
 0x354   : > { %v4881_v5 = vrot.slane %v4647_v6, 1  ;;  %v5188_v21 = vmul.f32 %v7376_v60, %v4558_v23  ;;  %v4498_v40 = vadd.f32 %v4434_v29, %v4260_v41  ;;  %v5184_v1 = vmul.f32 %v7376_v60, %v5099_v46  ;;  %v10748_v23 = vld [vmem:[#allocation18_spill] sm:$0xff] }
 0x355   : > { %v4500_v63 = vadd.f32 %v4436_v17, %v4262_v61  ;;  %v919_v45 = vadd.f32 %v10747_v20, %v7261_v49  ;;  %v4877_v44 = vsel %vm2133_vm1, %v4875_v59, %v4876_v18  ;;  %v5417_v7 = vrot.slane %v5186_v55, 2  ;;  %v10749_v17 = vld [vmem:[#allocation8_spill] sm:$0xff]  ;;  %v10751_v61 = vld [vmem:[#allocation9_spill] sm:$0xff] }
 0x356   : > { %v4882_v52 = vsel %vm2133_vm1, %v4876_v18, %v4881_v5  ;;  %v5422_v27 = vrot.slane %v5188_v21, 2  ;;  %v5039_v57 = vadd.f32 %v4877_v44, %v4498_v40  ;;  %v5416_v12 = vrot.slane %v5184_v1, 2  ;;  %v9549_v21 = vld [vmem:[#allocation2 + $0x118] sm:$0x11] }
 0x357   : > { %v5041_v58 = vadd.f32 %v4882_v52, %v4500_v63  ;;  %v1037_v15 = vmax.f32 %v919_v45, 0.0  ;;  %v921_v29 = vadd.f32 %v10748_v23, %v7264_v50  ;;  %v923_v51 = vadd.f32 %v10749_v17, %v7261_v49 }
 0x358   : > { %v5423_v13 = vsel %vm2675_vm2, %v5417_v7, %v5422_v27  ;;  %v925_v9 = vadd.f32 %v10750_v0, %v7264_v50  ;;  %v5418_v16 = vsel %vm2675_vm2, %v5416_v12, %v5417_v7  ;;  %v929_v59 = vadd.f32 %v10751_v61, %v7261_v49  ;;  %v9557_v27 = vld [vmem:[#allocation2 + $0x108] sm:$0xee] }
 0x359   : > { %v5582_v6 = vadd.f32 %v5423_v13, %v5041_v58  ;;  %v1145_v41 = vmin.f32 %v1037_v15, 6.0  ;;  %v5580_v46 = vadd.f32 %v5418_v16, %v5039_v57  ;;  %v1038_v18 = vmax.f32 %v921_v29, 0.0 }
 0x35a   : > { %v1039_v5 = vmax.f32 %v923_v51, 0.0  ;;  %v1040_v55 = vmax.f32 %v925_v9, 0.0  ;;  %v1041_v63 = vmax.f32 %v929_v59, 0.0  ;;  %v1861_v1 = vmul.f32 %v9267_v47, %v7340_v36  ;;  %v9575_v59 = vld [vmem:[#allocation2 + $0x130] sm:$0x11] }
 0x35b   : > { %v5658_v40 = vadd.f32 %v7416_v19, %v5582_v6  ;;  %v1863_v20 = vmul.f32 %v9271_v4, %v7340_v36  ;;  %v5656_v45 = vadd.f32 %v7416_v19, %v5580_v46  ;;  %v1146_v44 = vmin.f32 %v1038_v18, 6.0 }
 0x35c   : > { %v1147_v52 = vmin.f32 %v1039_v5, 6.0  ;;  %v1148_v7 = vmin.f32 %v1040_v55, 6.0  ;;  %v9559_v58 = vmin.f32 %v1041_v63, 6.0  ;;  %v1919_v12 = vunpack.c.h.bf16 %v9549_v21 }
 0x35d   : > { %v5722_v57 = vmax.f32 %v5658_v40, 0.0  ;;  %v2008_v15 = vmul.f32 %v9267_v47, %v7323_v31  ;;  %v5720_v13 = vmax.f32 %v5656_v45, 0.0  ;;  %v6729_v23 = vpack.c.bf16 %v1146_v44, %v1145_v41 }
 0x35e   : > { %v6730_v29 = vpack.c.bf16 %v1148_v7, %v1147_v52  ;;  %v2010_v17 = vmul.f32 %v9271_v4, %v7323_v31  ;;  %v2012_v0 = vmul.f32 %v7323_v31, %v1919_v12  ;;  %v2461_v16 = vunpack.c.h.bf16 %v9557_v27  ;;  %v9583_v52 = vld [vmem:[#allocation2 + $0x120] sm:$0xee] }
 0x35f   : > { %v5786_v51 = vmin.f32 %v5722_v57, 6.0  ;;  %v2247_v9 = vrot.slane %v2008_v15, 1  ;;  %v5784_v6 = vmin.f32 %v5720_v13, 6.0  ;;  %1566 = vst.msk [vmem:[#allocation2 + $0x190] sm:$0xff] %vm7272_vm3, %v6729_v23  ;;  %v2552_v41 = vmul.f32 %v9271_v4, %v7314_v26 }
 0x360   : > { %1567 = vst.msk [vmem:[#allocation2 + $0x198] sm:$0xff] %vm7272_vm3, %v6730_v29  ;;  %v2248_v47 = vrot.slane %v2010_v17, 1  ;;  %v2554_v61 = vmul.f32 %v7314_v26, %v1919_v12  ;;  %v2252_v46 = vrot.slane %v2012_v0, 1  ;;  %v2550_v18 = vmul.f32 %v7314_v26, %v2461_v16 }
 0x361   : > { %v3119_v5 = vmul.f32 %v9447_v38, %v7349_v42  ;;  %v3121_v55 = vmul.f32 %v9450_v8, %v7349_v42  ;;  %v5828_v40 = vpack.c.bf16 %v5786_v51, %v5784_v6  ;;  %v2790_v45 = vrot.slane %v2552_v41, 2 }
 0x362   : > { %v2249_v63 = vsel %vm2133_vm1, %v2247_v9, %v2248_v47  ;;  %v2794_v44 = vrot.slane %v2554_v61, 2  ;;  %v2253_v4 = vsel %vm2133_vm1, %v2248_v47, %v2252_v46  ;;  %v2789_v57 = vrot.slane %v2550_v18, 2  ;;  %v9597_v47 = vld [vmem:[#allocation2 + $0x138] sm:$0xff] }
 0x363   : > { %v2403_v7 = vadd.f32 %v2249_v63, %v1861_v1  ;;  %v3241_v12 = vunpack.c.h.bf16 %v9575_v59  ;;  %6105 = vmatmul.mubr.bf16.gmra.mrb[40].mxu1 %v5828_v40  ;;  %v2405_v15 = vadd.f32 %v2253_v4, %v1863_v20  ;;  %v3330_v23 = vmul.f32 %v9447_v38, %v10653_v10 }
 0x364   : > { %v2795_v13 = vsel %vm2675_vm2, %v2790_v45, %v2794_v44  ;;  %v3332_v29 = vmul.f32 %v9450_v8, %v10653_v10  ;;  %v2791_v17 = vsel %vm2675_vm2, %v2789_v57, %v2790_v45  ;;  %v3782_v0 = vunpack.c.h.bf16 %v9583_v52  ;;  %v9601_v45 = vld [vmem:[#allocation2 + $0x140] sm:$0xff] }
 0x365   : > { %v3334_v51 = vmul.f32 %v10653_v10, %v3241_v12  ;;  %v3873_v1 = vmul.f32 %v9450_v8, %v10655_v54  ;;  %v2945_v9 = vadd.f32 %v2791_v17, %v2403_v7  ;;  %v2947_v16 = vadd.f32 %v2795_v13, %v2405_v15  ;;  %v9607_v15 = vld [vmem:[#allocation2 + $0x148] sm:$0x11]  ;;  %v9609_v13 = vld [vmem:[#allocation2 + $0x138] sm:$0xee] }
 0x366   : > { %v3568_v20 = vrot.slane %v3330_v23, 1  ;;  %v3569_v6 = vrot.slane %v3332_v29, 1  ;;  %v1686_v41 = vld [vmem:[#allocation2 + $0x190] sm:$0xff]  ;;  %v3871_v18 = vmul.f32 %v10655_v54, %v3782_v0  ;;  %v3875_v40 = vmul.f32 %v10655_v54, %v3241_v12 }
 0x367   : > { %v1628_v61 = vld [vmem:[#allocation2 + $0x198] sm:$0x11]  ;;  %v3573_v46 = vrot.slane %v3334_v51, 1  ;;  %v4110_v63 = vrot.slane %v3873_v1, 2  ;;  %v1687_v44 = vsel %vm7422_vm15, 0, %v1686_v41  ;;  %v3183_v7 = vadd.f32 %v3119_v5, %v2945_v9 }
 0x368   : > { %v1629_v4 = vsel %vm7332_vm12, 0, %v1628_v61  ;;  %v3185_v57 = vadd.f32 %v3121_v55, %v2947_v16  ;;  %1688 = vst [vmem:[#allocation2 + $0x190] sm:$0xff] %v1687_v44  ;;  %v3570_v23 = vsel %vm2133_vm1, %v3568_v20, %v3569_v6  ;;  %v4109_v29 = vrot.slane %v3871_v18, 2 }
 0x369   : > { %1630 = vst [vmem:[#allocation2 + $0x198] sm:$0x11] %v1629_v4  ;;  %v3574_v12 = vsel %vm2133_vm1, %v3569_v6, %v3573_v46  ;;  %v4114_v17 = vrot.slane %v3875_v40, 2  ;;  %v10752_v51 = vmov 0   ;;  %v3724_v14 = vadd.f32 %v3570_v23, %v3183_v7 }
 0x36a   : > { %1705 = vst.msk [vmem:[#allocation2 + $0x198] sm:$0xff] %vm7272_vm3, %v10752_v51  ;;  %v3726_v0 = vadd.f32 %v3574_v12, %v3185_v57  ;;  %v9617_v5 = vunpack.c.h.bf16 %v9597_v47  ;;  %v9620_v55 = vunpack.c.h.bf16 %v9601_v45  ;;  %v4111_v1 = vsel %vm2675_vm2, %v4109_v29, %v4110_v63 }
 0x36b   : > { %v4115_v9 = vsel %vm2675_vm2, %v4110_v63, %v4114_v17  ;;  %v4561_v16 = vunpack.c.h.bf16 %v9607_v15  ;;  %v5102_v20 = vunpack.c.h.bf16 %v9609_v13  ;;  %v4265_v6 = vadd.f32 %v4111_v1, %v3724_v14 }
 0x36c   : > { %v4267_v41 = vadd.f32 %v4115_v9, %v3726_v0  ;;  %v4439_v61 = vmul.f32 %v10726_v32, %v9617_v5  ;;  %v4441_v46 = vmul.f32 %v10726_v32, %v9620_v55  ;;  %v4650_v18 = vmul.f32 %v10745_v39, %v9617_v5  ;;  %v10753_v9 = vld [vmem:[#allocation6_spill] sm:$0xff] }
 0x36d   : > { %v4652_v40 = vmul.f32 %v10745_v39, %v9620_v55  ;;  %v4654_v63 = vmul.f32 %v10745_v39, %v4561_v16  ;;  %v5191_v44 = vmul.f32 %v10645_v22, %v5102_v20  ;;  %v5193_v57 = vmul.f32 %v10645_v22, %v9620_v55 }
 0x36e   : > { %v4503_v4 = vadd.f32 %v4439_v61, %v4265_v6  ;;  %v4505_v7 = vadd.f32 %v4441_v46, %v4267_v41  ;;  %v5195_v23 = vmul.f32 %v10645_v22, %v4561_v16  ;;  %v4888_v12 = vrot.slane %v4650_v18, 1 }
 0x36f   : > { %v4889_v29 = vrot.slane %v4652_v40, 1  ;;  %v4893_v17 = vrot.slane %v4654_v63, 1  ;;  %v5429_v14 = vrot.slane %v5191_v44, 2  ;;  %v5430_v0 = vrot.slane %v5193_v57, 2 }
 0x370   : > { %v5434_v1 = vrot.slane %v5195_v23, 2  ;;  %v931_v32 = vadd.f32 %v10753_v9, %v7264_v50  ;;  %v1860_v39 = vmul.f32 %v9342_v56, %v10746_v33  ;;  %v1862_v41 = vmul.f32 %v9346_v28, %v10746_v33 }
 0x371   : > { %v4890_v20 = vsel %vm2133_vm1, %v4888_v12, %v4889_v29  ;;  %v4894_v6 = vsel %vm2133_vm1, %v4889_v29, %v4893_v17  ;;  %v1918_v16 = vunpack.c.l.bf16 %v9549_v21  ;;  %v5431_v18 = vsel %vm2675_vm2, %v5429_v14, %v5430_v0 }
 0x372   : > { %v5044_v61 = vadd.f32 %v4890_v20, %v4503_v4  ;;  %v5046_v46 = vadd.f32 %v4894_v6, %v4505_v7  ;;  %v5435_v40 = vsel %vm2675_vm2, %v5430_v0, %v5434_v1  ;;  %v1042_v63 = vmax.f32 %v931_v32, 0.0 }
 0x373   : > { %v2007_v44 = vmul.f32 %v9342_v56, %v7320_v30  ;;  %v2009_v57 = vmul.f32 %v9346_v28, %v7320_v30  ;;  %v2011_v23 = vmul.f32 %v7320_v30, %v1918_v16  ;;  %v2460_v17 = vunpack.c.l.bf16 %v9557_v27 }
 0x374   : > { %v5585_v12 = vadd.f32 %v5431_v18, %v5044_v61  ;;  %v5587_v29 = vadd.f32 %v5435_v40, %v5046_v46  ;;  %v2551_v21 = vmul.f32 %v9346_v28, %v7311_v25  ;;  %v1150_v4 = vmin.f32 %v1042_v63, 6.0 }
 0x375   : > { %v2244_v7 = vrot.slane %v2007_v44, 1  ;;  %v2245_v14 = vrot.slane %v2009_v57, 1  ;;  %v2250_v0 = vrot.slane %v2011_v23, 1  ;;  %v2549_v1 = vmul.f32 %v7311_v25, %v2460_v17 }
 0x376   : > { %v5661_v32 = vadd.f32 %v7433_v24, %v5585_v12  ;;  %v5663_v56 = vadd.f32 %v7433_v24, %v5587_v29  ;;  %v2553_v9 = vmul.f32 %v7311_v25, %v1918_v16  ;;  %v6731_v20 = vpack.c.bf16 %v1150_v4, %v9559_v58 }
 0x377   : > { %v2246_v6 = vsel %vm2133_vm1, %v2244_v7, %v2245_v14  ;;  %v2251_v27 = vsel %vm2133_vm1, %v2245_v14, %v2250_v0  ;;  %v2787_v61 = vrot.slane %v2551_v21, 2  ;;  %v2786_v63 = vrot.slane %v2549_v1, 2 }
 0x378   : > { %v5725_v28 = vmax.f32 %v5661_v32, 0.0  ;;  %v5727_v46 = vmax.f32 %v5663_v56, 0.0  ;;  %v2402_v18 = vadd.f32 %v2246_v6, %v1860_v39  ;;  %v2404_v40 = vadd.f32 %v2251_v27, %v1862_v41  ;;  %1568 = vst.msk [vmem:[#allocation2 + $0x1a0] sm:$0xff] %vm7272_vm3, %v6731_v20 }
 0x379   : > { %v2792_v44 = vrot.slane %v2553_v9, 2  ;;  %v3118_v57 = vmul.f32 %v9512_v35, %v7343_v37  ;;  %v3120_v58 = vmul.f32 %v9515_v34, %v7343_v37  ;;  %1706 = vst.msk [vmem:[#allocation2 + $0x1a0] sm:$0xff] %vm7272_vm3, %v10752_v51  ;;  %v3240_v39 = vunpack.c.l.bf16 %v9575_v59 }
 0x37a   : > { %v5789_v16 = vmin.f32 %v5725_v28, 6.0  ;;  %v5791_v23 = vmin.f32 %v5727_v46, 6.0  ;;  %v3329_v41 = vmul.f32 %v9512_v35, %v7352_v43  ;;  %v2788_v12 = vsel %vm2675_vm2, %v2786_v63, %v2787_v61 }
 0x37b   : > { %v2793_v29 = vsel %vm2675_vm2, %v2787_v61, %v2792_v44  ;;  %v3331_v17 = vmul.f32 %v9515_v34, %v7352_v43  ;;  %v3781_v21 = vunpack.c.l.bf16 %v9583_v52  ;;  %v2944_v7 = vadd.f32 %v2788_v12, %v2402_v18 }
 0x37c   : > { %v5831_v4 = vpack.c.bf16 %v5791_v23, %v5789_v16  ;;  %v2946_v14 = vadd.f32 %v2793_v29, %v2404_v40  ;;  %v3333_v0 = vmul.f32 %v7352_v43, %v3240_v39  ;;  %v3565_v32 = vrot.slane %v3329_v41, 1 }
 0x37d   : > { %v3566_v56 = vrot.slane %v3331_v17, 1  ;;  %v3870_v59 = vmul.f32 %v7362_v53, %v3781_v21  ;;  %v3872_v1 = vmul.f32 %v9515_v34, %v7362_v53  ;;  %v3182_v9 = vadd.f32 %v3118_v57, %v2944_v7 }
 0x37e   : > { %6671 = vmatprep.mubr.msk.bf16.mxu1 %vm5943_vm4, %v5831_v4  ;;  %v3184_v20 = vadd.f32 %v3120_v58, %v2946_v14  ;;  %v3571_v6 = vrot.slane %v3333_v0, 1  ;;  %v3874_v27 = vmul.f32 %v7362_v53, %v3240_v39  ;;  %v9690_v46 = vunpack.c.l.bf16 %v9597_v47 }
 0x37f   : > { %v3567_v52 = vsel %vm2133_vm1, %v3565_v32, %v3566_v56  ;;  %v4106_v61 = vrot.slane %v3870_v59, 2  ;;  %v4107_v28 = vrot.slane %v3872_v1, 2  ;;  %v9694_v44 = vunpack.c.l.bf16 %v9601_v45 }
 0x380   : > { %v3572_v18 = vsel %vm2133_vm1, %v3566_v56, %v3571_v6  ;;  %v3723_v40 = vadd.f32 %v3567_v52, %v3182_v9  ;;  %v4112_v63 = vrot.slane %v3874_v27, 2  ;;  %v4438_v58 = vmul.f32 %v7386_v3, %v9690_v46  ;;  %v10754_v6 = vld [vmem:[#allocation14_spill] sm:$0xff]  ;;  %v9717_v27 = vld [vmem:[#allocation2 + $0x130] sm:$0x11] }
 0x381   : > { %v3725_v16 = vadd.f32 %v3572_v18, %v3184_v20  ;;  %v4108_v57 = vsel %vm2675_vm2, %v4106_v61, %v4107_v28  ;;  %v4560_v23 = vunpack.c.l.bf16 %v9607_v15  ;;  %v4440_v47 = vmul.f32 %v7386_v3, %v9694_v44 }
 0x382   : > { %v4113_v39 = vsel %vm2675_vm2, %v4107_v28, %v4112_v63  ;;  %v4264_v41 = vadd.f32 %v4108_v57, %v3723_v40  ;;  %v4649_v12 = vmul.f32 %v7410_v11, %v9690_v46  ;;  %v4651_v45 = vmul.f32 %v7410_v11, %v9694_v44 }
 0x383   : > { %v4266_v29 = vadd.f32 %v4113_v39, %v3725_v16  ;;  %v4653_v17 = vmul.f32 %v7410_v11, %v4560_v23  ;;  %v5101_v21 = vunpack.c.l.bf16 %v9609_v13  ;;  %v5192_v15 = vmul.f32 %v7376_v60, %v9694_v44 }
 0x384   : > { %v4502_v4 = vadd.f32 %v4438_v58, %v4264_v41  ;;  %v4885_v7 = vrot.slane %v4649_v12, 1  ;;  %v5194_v14 = vmul.f32 %v7376_v60, %v4560_v23  ;;  %v4886_v32 = vrot.slane %v4651_v45, 1  ;;  %v9724_v58 = vld [vmem:[#allocation2 + $0x120] sm:$0xee] }
 0x385   : > { %v4504_v0 = vadd.f32 %v4440_v47, %v4266_v29  ;;  %v4891_v56 = vrot.slane %v4653_v17, 1  ;;  %v5190_v59 = vmul.f32 %v7376_v60, %v5101_v21  ;;  %v5427_v1 = vrot.slane %v5192_v15, 2 }
 0x386   : > { %v5432_v9 = vrot.slane %v5194_v14, 2  ;;  %v933_v20 = vadd.f32 %v9308_v62, %v7261_v49  ;;  %v935_v13 = vadd.f32 %v10754_v6, %v7264_v50  ;;  %v4887_v52 = vsel %vm2133_vm1, %v4885_v7, %v4886_v32  ;;  %v9742_v6 = vld [vmem:[#allocation2 + $0x148] sm:$0x11] }
 0x387   : > { %v4892_v61 = vsel %vm2133_vm1, %v4886_v32, %v4891_v56  ;;  %v5426_v28 = vrot.slane %v5190_v59, 2  ;;  %v1865_v18 = vmul.f32 %v9447_v38, %v7340_v36  ;;  %v5043_v40 = vadd.f32 %v4887_v52, %v4502_v4 }
 0x388   : > { %v5045_v63 = vadd.f32 %v4892_v61, %v4504_v0  ;;  %v5433_v16 = vsel %vm2675_vm2, %v5427_v1, %v5432_v9  ;;  %v1043_v57 = vmax.f32 %v933_v20, 0.0  ;;  %v1044_v50 = vmax.f32 %v935_v13, 0.0 }
 0x389   : > { %v5428_v49 = vsel %vm2675_vm2, %v5426_v28, %v5427_v1  ;;  %v1867_v62 = vmul.f32 %v9450_v8, %v7340_v36  ;;  %v1921_v23 = vunpack.c.h.bf16 %v9717_v27  ;;  %v2014_v12 = vmul.f32 %v9447_v38, %v7323_v31 }
 0x38a   : > { %v5584_v39 = vadd.f32 %v5428_v49, %v5043_v40  ;;  %v5586_v41 = vadd.f32 %v5433_v16, %v5045_v63  ;;  %v1151_v47 = vmin.f32 %v1043_v57, 6.0  ;;  %v1152_v29 = vmin.f32 %v1044_v50, 6.0  ;;  %v9750_v57 = vld [vmem:[#allocation2 + $0x138] sm:$0xee] }
 0x38b   : > { %v2016_v45 = vmul.f32 %v9450_v8, %v7323_v31  ;;  %v2018_v17 = vmul.f32 %v7323_v31, %v1921_v23  ;;  %v2463_v21 = vunpack.c.h.bf16 %v9724_v58  ;;  %v2257_v15 = vrot.slane %v2014_v12, 1 }
 0x38c   : > { %v5660_v4 = vadd.f32 %v7416_v19, %v5584_v39  ;;  %v5662_v7 = vadd.f32 %v7416_v19, %v5586_v41  ;;  %v2558_v14 = vmul.f32 %v9450_v8, %v7314_v26  ;;  %v6732_v0 = vpack.c.bf16 %v1152_v29, %v1151_v47 }
 0x38d   : > { %v2258_v32 = vrot.slane %v2016_v45, 1  ;;  %v2262_v56 = vrot.slane %v2018_v17, 1  ;;  %v2556_v38 = vmul.f32 %v7314_v26, %v2463_v21  ;;  %v2560_v9 = vmul.f32 %v7314_v26, %v1921_v23  ;;  %v9765_v21 = vld [vmem:[#allocation2 + $0x150] sm:$0xff] }
 0x38e   : > { %v5724_v59 = vmax.f32 %v5660_v4, 0.0  ;;  %v5726_v1 = vmax.f32 %v5662_v7, 0.0  ;;  %v2800_v20 = vrot.slane %v2558_v14, 2  ;;  %1569 = vst.msk [vmem:[#allocation2 + $0x1a8] sm:$0xff] %vm7272_vm3, %v6732_v0  ;;  %v3123_v61 = vmul.f32 %v9617_v5, %v7349_v42  ;;  %v9767_v4 = vld [vmem:[#allocation2 + $0x158] sm:$0xff] }
 0x38f   : > { %v2259_v13 = vsel %vm2133_vm1, %v2257_v15, %v2258_v32  ;;  %v2263_v52 = vsel %vm2133_vm1, %v2258_v32, %v2262_v56  ;;  %v2799_v8 = vrot.slane %v2556_v38, 2  ;;  %v2804_v50 = vrot.slane %v2560_v9, 2 }
 0x390   : > { %v5788_v28 = vmin.f32 %v5724_v59, 6.0  ;;  %v5790_v40 = vmin.f32 %v5726_v1, 6.0  ;;  %v2407_v63 = vadd.f32 %v2259_v13, %v1865_v18  ;;  %v2409_v16 = vadd.f32 %v2263_v52, %v1867_v62 }
 0x391   : > { %v2801_v49 = vsel %vm2675_vm2, %v2799_v8, %v2800_v20  ;;  %v3125_v23 = vmul.f32 %v9620_v55, %v7349_v42  ;;  %v3243_v39 = vunpack.c.h.bf16 %v9742_v6  ;;  %v3336_v12 = vmul.f32 %v9617_v5, %v10653_v10  ;;  %v9778_v8 = vld [vmem:[#allocation2 + $0x160] sm:$0x11] }
 0x392   : > { %v5830_v41 = vpack.c.bf16 %v5790_v40, %v5788_v28  ;;  %v2949_v47 = vadd.f32 %v2801_v49, %v2407_v63  ;;  %v3338_v29 = vmul.f32 %v9620_v55, %v10653_v10  ;;  %v2805_v18 = vsel %vm2675_vm2, %v2800_v20, %v2804_v50 }
 0x393   : > { %v3340_v62 = vmul.f32 %v10653_v10, %v3243_v39  ;;  %v3784_v45 = vunpack.c.h.bf16 %v9750_v57  ;;  %v3879_v17 = vmul.f32 %v9620_v55, %v10655_v54  ;;  %v2951_v7 = vadd.f32 %v2805_v18, %v2409_v16  ;;  %v9783_v16 = vld [vmem:[#allocation2 + $0x150] sm:$0xee] }
 0x394   : > { %6113 = vmatmul.mubr.bf16.gmra.mrb[44].mxu1 %v5830_v41  ;;  %v3187_v15 = vadd.f32 %v3123_v61, %v2949_v47  ;;  %v3578_v14 = vrot.slane %v3336_v12, 1  ;;  %v3579_v0 = vrot.slane %v3338_v29, 1  ;;  %v3881_v38 = vmul.f32 %v10655_v54, %v3243_v39  ;;  %v10756_v12 = vld [vmem:[#allocation12_spill] sm:$0xff] }
 0x395   : > { %v3583_v32 = vrot.slane %v3340_v62, 1  ;;  %v3877_v56 = vmul.f32 %v10655_v54, %v3784_v45  ;;  %v4120_v59 = vrot.slane %v3879_v17, 2  ;;  %v1689_v1 = vld [vmem:[#allocation2 + $0x1a8] sm:$0xff]  ;;  %v3189_v9 = vadd.f32 %v3125_v23, %v2951_v7 }
 0x396   : > { %v3580_v20 = vsel %vm2133_vm1, %v3578_v14, %v3579_v0  ;;  %v9773_v13 = vunpack.c.h.bf16 %v9765_v21  ;;  %v9776_v52 = vunpack.c.h.bf16 %v9767_v4  ;;  %v1690_v61 = vsel %vm7422_vm15, 0, %v1689_v1  ;;  %v10755_v23 = vld [vmem:[#allocation11_spill] sm:$0xff] }
 0x397   : > { %v3584_v28 = vsel %vm2133_vm1, %v3579_v0, %v3583_v32  ;;  %v3728_v40 = vadd.f32 %v3580_v20, %v3187_v15  ;;  %v4119_v63 = vrot.slane %v3877_v56, 2  ;;  %1691 = vst [vmem:[#allocation2 + $0x1a8] sm:$0xff] %v1690_v61  ;;  %v4124_v50 = vrot.slane %v3881_v38, 2 }
 0x398   : > { %v3730_v49 = vadd.f32 %v3584_v28, %v3189_v9  ;;  %v4443_v39 = vmul.f32 %v10755_v23, %v9773_v13  ;;  %v4445_v41 = vmul.f32 %v10755_v23, %v9776_v52  ;;  %1707 = vst.msk [vmem:[#allocation2 + $0x1a8] sm:$0xff] %vm7272_vm3, %v10752_v51  ;;  %v4563_v47 = vunpack.c.h.bf16 %v9778_v8 }
 0x399   : > { %v4121_v48 = vsel %vm2675_vm2, %v4119_v63, %v4120_v59  ;;  %v4656_v29 = vmul.f32 %v10756_v12, %v9773_v13  ;;  %v4658_v18 = vmul.f32 %v10756_v12, %v9776_v52  ;;  %v4125_v62 = vsel %vm2675_vm2, %v4120_v59, %v4124_v50 }
 0x39a   : > { %v4269_v45 = vadd.f32 %v4121_v48, %v3728_v40  ;;  %v5104_v17 = vunpack.c.h.bf16 %v9783_v16  ;;  %v5199_v7 = vmul.f32 %v10645_v22, %v9776_v52  ;;  %v4271_v2 = vadd.f32 %v4125_v62, %v3730_v49 }
 0x39b   : > { %v4660_v51 = vmul.f32 %v10756_v12, %v4563_v47  ;;  %v4898_v15 = vrot.slane %v4656_v29, 1  ;;  %v4899_v14 = vrot.slane %v4658_v18, 1  ;;  %v5201_v56 = vmul.f32 %v10645_v22, %v4563_v47 }
 0x39c   : > { %v4507_v0 = vadd.f32 %v4443_v39, %v4269_v45  ;;  %v5197_v32 = vmul.f32 %v10645_v22, %v5104_v17  ;;  %v5440_v38 = vrot.slane %v5199_v7, 2  ;;  %v4509_v1 = vadd.f32 %v4445_v41, %v4271_v2 }
 0x39d   : > { %v4900_v59 = vsel %vm2133_vm1, %v4898_v15, %v4899_v14  ;;  %v4903_v9 = vrot.slane %v4660_v51, 1  ;;  %v1864_v20 = vmul.f32 %v9512_v35, %v10746_v33  ;;  %v5444_v40 = vrot.slane %v5201_v56, 2 }
 0x39e   : > { %v5048_v61 = vadd.f32 %v4900_v59, %v4507_v0  ;;  %v5439_v28 = vrot.slane %v5197_v32, 2  ;;  %v1866_v63 = vmul.f32 %v9515_v34, %v10746_v33  ;;  %v1920_v50 = vunpack.c.l.bf16 %v9717_v27 }
 0x39f   : > { %v4904_v49 = vsel %vm2133_vm1, %v4899_v14, %v4903_v9  ;;  %v2013_v39 = vmul.f32 %v9512_v35, %v7320_v30  ;;  %v2015_v41 = vmul.f32 %v9515_v34, %v7320_v30  ;;  %v5445_v29 = vsel %vm2675_vm2, %v5440_v38, %v5444_v40 }
 0x3a0   : > { %v5050_v48 = vadd.f32 %v4904_v49, %v4509_v1  ;;  %v5441_v47 = vsel %vm2675_vm2, %v5439_v28, %v5440_v38  ;;  %v2462_v18 = vunpack.c.l.bf16 %v9724_v58  ;;  %v2017_v45 = vmul.f32 %v7320_v30, %v1920_v50 }
 0x3a1   : > { %v5589_v62 = vadd.f32 %v5441_v47, %v5048_v61  ;;  %v2254_v17 = vrot.slane %v2013_v39, 1  ;;  %v2255_v7 = vrot.slane %v2015_v41, 1  ;;  %v2557_v35 = vmul.f32 %v9515_v34, %v7311_v25 }
 0x3a2   : > { %v5591_v2 = vadd.f32 %v5445_v29, %v5050_v48  ;;  %v2555_v27 = vmul.f32 %v7311_v25, %v2462_v18  ;;  %v2559_v51 = vmul.f32 %v7311_v25, %v1920_v50  ;;  %v2260_v0 = vrot.slane %v2017_v45, 1 }
 0x3a3   : > { %v5665_v15 = vadd.f32 %v7433_v24, %v5589_v62  ;;  %v2256_v14 = vsel %vm2133_vm1, %v2254_v17, %v2255_v7  ;;  %v3122_v58 = vmul.f32 %v9690_v46, %v7343_v37  ;;  %v2797_v1 = vrot.slane %v2557_v35, 2 }
 0x3a4   : > { %v5667_v32 = vadd.f32 %v7433_v24, %v5591_v2  ;;  %v2406_v56 = vadd.f32 %v2256_v14, %v1864_v20  ;;  %v2796_v38 = vrot.slane %v2555_v27, 2  ;;  %v2261_v9 = vsel %vm2133_vm1, %v2255_v7, %v2260_v0 }
 0x3a5   : > { %v5729_v59 = vmax.f32 %v5665_v15, 0.0  ;;  %v2802_v61 = vrot.slane %v2559_v51, 2  ;;  %v3124_v34 = vmul.f32 %v9694_v44, %v7343_v37  ;;  %v2408_v40 = vadd.f32 %v2261_v9, %v1866_v63 }
 0x3a6   : > { %v5731_v28 = vmax.f32 %v5667_v32, 0.0  ;;  %v2798_v49 = vsel %vm2675_vm2, %v2796_v38, %v2797_v1  ;;  %v3242_v50 = vunpack.c.l.bf16 %v9742_v6  ;;  %v3335_v20 = vmul.f32 %v9690_v46, %v7352_v43 }
 0x3a7   : > { %v5793_v39 = vmin.f32 %v5729_v59, 6.0  ;;  %v2803_v41 = vsel %vm2675_vm2, %v2797_v1, %v2802_v61  ;;  %v2948_v48 = vadd.f32 %v2798_v49, %v2406_v56  ;;  %v3337_v18 = vmul.f32 %v9694_v44, %v7352_v43 }
 0x3a8   : > { %v5795_v47 = vmin.f32 %v5731_v28, 6.0  ;;  %v2950_v29 = vadd.f32 %v2803_v41, %v2408_v40  ;;  %v3339_v62 = vmul.f32 %v7352_v43, %v3242_v50  ;;  %v3575_v63 = vrot.slane %v3335_v20, 1 }
 0x3a9   : > { %v3186_v45 = vadd.f32 %v3122_v58, %v2948_v48  ;;  %v3783_v17 = vunpack.c.l.bf16 %v9750_v57  ;;  %v3878_v6 = vmul.f32 %v9694_v44, %v7362_v53  ;;  %v3576_v27 = vrot.slane %v3337_v18, 1 }
 0x3aa   : > { %v5833_v7 = vpack.c.bf16 %v5795_v47, %v5793_v39  ;;  %v3188_v2 = vadd.f32 %v3124_v34, %v2950_v29  ;;  %v3581_v35 = vrot.slane %v3339_v62, 1  ;;  %v3880_v15 = vmul.f32 %v7362_v53, %v3242_v50  ;;  %v9871_v62 = vld [vmem:[#allocation2 + $0x148] sm:$0x11] }
 0x3ab   : > { %v3876_v51 = vmul.f32 %v7362_v53, %v3783_v17  ;;  %v4117_v14 = vrot.slane %v3878_v6, 2  ;;  %v9846_v0 = vunpack.c.l.bf16 %v9765_v21  ;;  %v3577_v58 = vsel %vm2133_vm1, %v3575_v63, %v3576_v27 }
 0x3ac   : > { %6672 = vmatprep.mubr.msk.bf16.mxu1 %vm5943_vm4, %v5833_v7  ;;  %v3582_v57 = vsel %vm2133_vm1, %v3576_v27, %v3581_v35  ;;  %v9852_v32 = vunpack.c.l.bf16 %v9767_v4  ;;  %v4562_v56 = vunpack.c.l.bf16 %v9778_v8  ;;  %v3727_v38 = vadd.f32 %v3577_v58, %v3186_v45  ;;  %v9877_v35 = vld [vmem:[#allocation2 + $0x138] sm:$0xee] }
 0x3ad   : > { %v3729_v1 = vadd.f32 %v3582_v57, %v3188_v2  ;;  %v4116_v59 = vrot.slane %v3876_v51, 2  ;;  %v4122_v9 = vrot.slane %v3880_v15, 2  ;;  %v4442_v61 = vmul.f32 %v7386_v3, %v9846_v0 }
 0x3ae   : > { %v4444_v21 = vmul.f32 %v7386_v3, %v9852_v32  ;;  %v4655_v34 = vmul.f32 %v7410_v11, %v9846_v0  ;;  %v4657_v28 = vmul.f32 %v7410_v11, %v9852_v32  ;;  %v4659_v40 = vmul.f32 %v7410_v11, %v4562_v56 }
 0x3af   : > { %v4118_v4 = vsel %vm2675_vm2, %v4116_v59, %v4117_v14  ;;  %v4123_v8 = vsel %vm2675_vm2, %v4117_v14, %v4122_v9  ;;  %v5103_v49 = vunpack.c.l.bf16 %v9783_v16  ;;  %v5198_v29 = vmul.f32 %v7376_v60, %v9852_v32 }
 0x3b0   : > { %v4268_v50 = vadd.f32 %v4118_v4, %v3727_v38  ;;  %v4270_v39 = vadd.f32 %v4123_v8, %v3729_v1  ;;  %v4895_v41 = vrot.slane %v4655_v34, 1  ;;  %v4896_v48 = vrot.slane %v4657_v28, 1 }
 0x3b1   : > { %v4901_v20 = vrot.slane %v4659_v40, 1  ;;  %v5196_v47 = vmul.f32 %v7376_v60, %v5103_v49  ;;  %v5200_v18 = vmul.f32 %v7376_v60, %v4562_v56  ;;  %v1869_v16 = vmul.f32 %v9617_v5, %v7340_v36 }
 0x3b2   : > { %v4506_v45 = vadd.f32 %v4442_v61, %v4268_v50  ;;  %v4508_v63 = vadd.f32 %v4444_v21, %v4270_v39  ;;  %v4897_v17 = vsel %vm2133_vm1, %v4895_v41, %v4896_v48  ;;  %v5437_v2 = vrot.slane %v5198_v29, 2 }
 0x3b3   : > { %v4902_v6 = vsel %vm2133_vm1, %v4896_v48, %v4901_v20  ;;  %v5436_v7 = vrot.slane %v5196_v47, 2  ;;  %v5442_v27 = vrot.slane %v5200_v18, 2  ;;  %v1871_v14 = vmul.f32 %v9620_v55, %v7340_v36  ;;  %v9899_v47 = vld [vmem:[#allocation2 + $0x160] sm:$0x11] }
 0x3b4   : > { %v5047_v51 = vadd.f32 %v4897_v17, %v4506_v45  ;;  %v5049_v15 = vadd.f32 %v4902_v6, %v4508_v63  ;;  %v1923_v58 = vunpack.c.h.bf16 %v9871_v62  ;;  %v2020_v38 = vmul.f32 %v9617_v5, %v7323_v31  ;;  %v9902_v63 = vld [vmem:[#allocation2 + $0x150] sm:$0xee] }
 0x3b5   : > { %v5438_v57 = vsel %vm2675_vm2, %v5436_v7, %v5437_v2  ;;  %v5443_v56 = vsel %vm2675_vm2, %v5437_v2, %v5442_v27  ;;  %v2022_v1 = vmul.f32 %v9620_v55, %v7323_v31  ;;  %v2465_v21 = vunpack.c.h.bf16 %v9877_v35 }
 0x3b6   : > { %v5588_v59 = vadd.f32 %v5438_v57, %v5047_v51  ;;  %v5590_v9 = vadd.f32 %v5443_v56, %v5049_v15  ;;  %v2024_v61 = vmul.f32 %v7323_v31, %v1923_v58  ;;  %v2267_v34 = vrot.slane %v2020_v38, 1  ;;  %v9914_v38 = vld [vmem:[#allocation2 + $0x168] sm:$0xff] }
 0x3b7   : > { %v2268_v28 = vrot.slane %v2022_v1, 1  ;;  %v2564_v4 = vmul.f32 %v9620_v55, %v7314_v26  ;;  %v2566_v8 = vmul.f32 %v7314_v26, %v1923_v58  ;;  %v2562_v50 = vmul.f32 %v7314_v26, %v2465_v21  ;;  %v9917_v21 = vld [vmem:[#allocation2 + $0x170] sm:$0xff] }
 0x3b8   : > { %v5664_v40 = vadd.f32 %v7416_v19, %v5588_v59  ;;  %v5666_v5 = vadd.f32 %v7416_v19, %v5590_v9  ;;  %v2272_v49 = vrot.slane %v2024_v61, 1  ;;  %v3127_v20 = vmul.f32 %v9773_v13, %v7349_v42 }
 0x3b9   : > { %v2269_v39 = vsel %vm2133_vm1, %v2267_v34, %v2268_v28  ;;  %v2810_v41 = vrot.slane %v2564_v4, 2  ;;  %v2814_v48 = vrot.slane %v2566_v8, 2  ;;  %v2809_v6 = vrot.slane %v2562_v50, 2 }
 0x3ba   : > { %v5728_v29 = vmax.f32 %v5664_v40, 0.0  ;;  %v5730_v55 = vmax.f32 %v5666_v5, 0.0  ;;  %v2273_v18 = vsel %vm2133_vm1, %v2268_v28, %v2272_v49  ;;  %v2411_v45 = vadd.f32 %v2269_v39, %v1869_v16  ;;  %v9926_v39 = vld [vmem:[#allocation2 + $0x178] sm:$0x11] }
 0x3bb   : > { %v2413_v17 = vadd.f32 %v2273_v18, %v1871_v14  ;;  %v2815_v7 = vsel %vm2675_vm2, %v2810_v41, %v2814_v48  ;;  %v3129_v2 = vmul.f32 %v9776_v52, %v7349_v42  ;;  %v3245_v15 = vunpack.c.h.bf16 %v9899_v47 }
 0x3bc   : > { %v5792_v27 = vmin.f32 %v5728_v29, 6.0  ;;  %v5794_v51 = vmin.f32 %v5730_v55, 6.0  ;;  %v3342_v58 = vmul.f32 %v9773_v13, %v10653_v10  ;;  %v2811_v57 = vsel %vm2675_vm2, %v2809_v6, %v2810_v41  ;;  %v9928_v41 = vpop.f32.mrb[0].mxu1 }
 0x3bd   : > { %v2955_v56 = vadd.f32 %v2815_v7, %v2413_v17  ;;  %v3344_v16 = vmul.f32 %v9776_v52, %v10653_v10  ;;  %v3786_v14 = vunpack.c.h.bf16 %v9902_v63  ;;  %v2953_v59 = vadd.f32 %v2811_v57, %v2411_v45  ;;  %v6028_v45 = vpop.f32.mrb[1].mxu1 }
 0x3be   : > { %v5832_v1 = vpack.c.bf16 %v5794_v51, %v5792_v27  ;;  %v3346_v9 = vmul.f32 %v10653_v10, %v3245_v15  ;;  %v3588_v61 = vrot.slane %v3342_v58, 1  ;;  %v3885_v8 = vmul.f32 %v9776_v52, %v10655_v54  ;;  %v9939_v27 = vpop.f32.mrb[2].mxu1 }
 0x3bf   : > { %v3193_v34 = vadd.f32 %v3129_v2, %v2955_v56  ;;  %v3589_v28 = vrot.slane %v3344_v16, 1  ;;  %v3883_v4 = vmul.f32 %v10655_v54, %v3786_v14  ;;  %v3191_v40 = vadd.f32 %v3127_v20, %v2953_v59  ;;  %v9937_v2 = vld [vmem:[#allocation2 + $0x168] sm:$0xee]  ;;  %v6031_v56 = vpop.f32.mrb[3].mxu1 }
 0x3c0   : > { %6121 = vmatmul.mubr.bf16.gmra.mrb[48].mxu1 %v5832_v1  ;;  %v3593_v5 = vrot.slane %v3346_v9, 1  ;;  %v3887_v49 = vmul.f32 %v10655_v54, %v3245_v15  ;;  %v9924_v50 = vunpack.c.h.bf16 %v9914_v38  ;;  %v4130_v55 = vrot.slane %v3885_v8, 2  ;;  %v9950_v9 = vpop.f32.mrb[4].mxu1 }
 0x3c1   : > { %v3590_v48 = vsel %vm2133_vm1, %v3588_v61, %v3589_v28  ;;  %v4129_v29 = vrot.slane %v3883_v4, 2  ;;  %v9932_v18 = vunpack.c.h.bf16 %v9917_v21  ;;  %v4565_v57 = vunpack.c.h.bf16 %v9926_v39  ;;  %v6036_v8 = vpop.f32.mrb[5].mxu1 }
 0x3c2   : > { %v3594_v20 = vsel %vm2133_vm1, %v3589_v28, %v3593_v5  ;;  %v3732_v17 = vadd.f32 %v3590_v48, %v3191_v40  ;;  %v4134_v6 = vrot.slane %v3887_v49, 2  ;;  %v4447_v7 = vmul.f32 %v10755_v23, %v9924_v50 }
 0x3c3   : > { %v3734_v51 = vadd.f32 %v3594_v20, %v3193_v34  ;;  %v4131_v15 = vsel %vm2675_vm2, %v4129_v29, %v4130_v55  ;;  %v4449_v58 = vmul.f32 %v10755_v23, %v9932_v18  ;;  %v4662_v1 = vmul.f32 %v10756_v12, %v9924_v50  ;;  %v9957_v29 = vpop.f32.mrb[6].mxu1 }
 0x3c4   : > { %v4135_v16 = vsel %vm2675_vm2, %v4130_v55, %v4134_v6  ;;  %v4273_v14 = vadd.f32 %v4131_v15, %v3732_v17  ;;  %v4664_v59 = vmul.f32 %v10756_v12, %v9932_v18  ;;  %v4666_v34 = vmul.f32 %v10756_v12, %v4565_v57  ;;  %v6039_v6 = vpop.f32.mrb[7].mxu1 }
 0x3c5   : > { %v4275_v61 = vadd.f32 %v4135_v16, %v3734_v51  ;;  %v5106_v28 = vunpack.c.h.bf16 %v9937_v2  ;;  %v5205_v4 = vmul.f32 %v10645_v22, %v9932_v18  ;;  %v4908_v5 = vrot.slane %v4662_v1, 1  ;;  %v9965_v16 = vpop.f32.mrb[8].mxu1 }
 0x3c6   : > { %v4511_v40 = vadd.f32 %v4447_v7, %v4273_v14  ;;  %v4909_v49 = vrot.slane %v4664_v59, 1  ;;  %v5207_v48 = vmul.f32 %v10645_v22, %v4565_v57  ;;  %v4913_v45 = vrot.slane %v4666_v34, 1  ;;  %v6044_v59 = vpop.f32.mrb[9].mxu1 }
 0x3c7   : > { %v4513_v55 = vadd.f32 %v4449_v58, %v4275_v61  ;;  %v5203_v20 = vmul.f32 %v10645_v22, %v5106_v28  ;;  %v5450_v17 = vrot.slane %v5205_v4, 2  ;;  %v1868_v56 = vmul.f32 %v9690_v46, %v10746_v33  ;;  %v9974_v8 = vpop.f32.mrb[10].mxu1 }
 0x3c8   : > { %v4910_v51 = vsel %vm2133_vm1, %v4908_v5, %v4909_v49  ;;  %v5454_v15 = vrot.slane %v5207_v48, 2  ;;  %v1870_v7 = vmul.f32 %v9694_v44, %v10746_v33  ;;  %v4914_v57 = vsel %vm2133_vm1, %v4909_v49, %v4913_v45  ;;  %10757 = vst [vmem:[#allocation15_spill] sm:$0xff] %v9974_v8  ;;  %v6047_v48 = vpop.f32.mrb[11].mxu1 }
 0x3c9   : > { %v5052_v14 = vadd.f32 %v4910_v51, %v4511_v40  ;;  %v5449_v58 = vrot.slane %v5203_v20, 2  ;;  %v1922_v1 = vunpack.c.l.bf16 %v9871_v62  ;;  %v5054_v61 = vadd.f32 %v4914_v57, %v4513_v55 }
 0x3ca   : > { %v5455_v34 = vsel %vm2675_vm2, %v5450_v17, %v5454_v15  ;;  %v2019_v28 = vmul.f32 %v9690_v46, %v7320_v30  ;;  %v2021_v4 = vmul.f32 %v9694_v44, %v7320_v30  ;;  %v2464_v40 = vunpack.c.l.bf16 %v9877_v35  ;;  %v9981_v46 = vpop.f32.mrb[12].mxu1 }
 0x3cb   : > { %v5451_v5 = vsel %vm2675_vm2, %v5449_v58, %v5450_v17  ;;  %v2023_v49 = vmul.f32 %v7320_v30, %v1922_v1  ;;  %v2563_v62 = vmul.f32 %v9694_v44, %v7311_v25  ;;  %v5595_v45 = vadd.f32 %v5455_v34, %v5054_v61  ;;  %10758 = vst [vmem:[#allocation16_spill] sm:$0xff] %v9981_v46  ;;  %v6052_v58 = vpop.f32.mrb[13].mxu1 }
 0x3cc   : > { %v5593_v55 = vadd.f32 %v5451_v5, %v5052_v14  ;;  %v2264_v20 = vrot.slane %v2019_v28, 1  ;;  %v2265_v6 = vrot.slane %v2021_v4, 1  ;;  %v2561_v15 = vmul.f32 %v7311_v25, %v2464_v40  ;;  %v9990_v61 = vpop.f32.mrb[14].mxu1 }
 0x3cd   : > { %v2270_v51 = vrot.slane %v2023_v49, 1  ;;  %v2565_v57 = vmul.f32 %v7311_v25, %v1922_v1  ;;  %v2807_v17 = vrot.slane %v2563_v62, 2  ;;  %v5671_v35 = vadd.f32 %v7433_v24, %v5595_v45  ;;  %10759 = vst [vmem:[#allocation17_spill] sm:$0xff] %v9990_v61  ;;  %v6055_v49 = vpop.f32.mrb[15].mxu1 }
 0x3ce   : > { %v5669_v59 = vadd.f32 %v7433_v24, %v5593_v55  ;;  %v2266_v44 = vsel %vm2133_vm1, %v2264_v20, %v2265_v6  ;;  %v3126_v14 = vmul.f32 %v9846_v0, %v7343_v37  ;;  %v2806_v4 = vrot.slane %v2561_v15, 2  ;;  %v9995_v55 = vpop.f32.mrb[16].mxu1 }
 0x3cf   : > { %v2271_v34 = vsel %vm2133_vm1, %v2265_v6, %v2270_v51  ;;  %v2410_v28 = vadd.f32 %v2266_v44, %v1868_v56  ;;  %v2812_v5 = vrot.slane %v2565_v57, 2  ;;  %v5735_v40 = vmax.f32 %v5671_v35, 0.0  ;;  %10760 = vst [vmem:[#allocation19_spill] sm:$0xff] %v9995_v55  ;;  %v6060_v6 = vpop.f32.mrb[17].mxu1 }
 0x3d0   : > { %v5733_v1 = vmax.f32 %v5669_v59, 0.0  ;;  %v2412_v62 = vadd.f32 %v2271_v34, %v1870_v7  ;;  %v3128_v48 = vmul.f32 %v9852_v32, %v7343_v37  ;;  %v2808_v45 = vsel %vm2675_vm2, %v2806_v4, %v2807_v17  ;;  %v10002_v7 = vpop.f32.mrb[18].mxu1 }
 0x3d1   : > { %v2813_v20 = vsel %vm2675_vm2, %v2807_v17, %v2812_v5  ;;  %v3244_v58 = vunpack.c.l.bf16 %v9899_v47  ;;  %v3341_v56 = vmul.f32 %v9846_v0, %v7352_v43  ;;  %v5799_v15 = vmin.f32 %v5735_v40, 6.0  ;;  %10761 = vst [vmem:[#allocation20_spill] sm:$0xff] %v10002_v7  ;;  %v6063_v4 = vpop.f32.mrb[19].mxu1 }
 0x3d2   : > { %v5797_v51 = vmin.f32 %v5733_v1, 6.0  ;;  %v2952_v57 = vadd.f32 %v2808_v45, %v2410_v28  ;;  %v2954_v59 = vadd.f32 %v2813_v20, %v2412_v62  ;;  %v3343_v35 = vmul.f32 %v9852_v32, %v7352_v43  ;;  %v10010_v40 = vpop.f32.mrb[20].mxu1 }
 0x3d3   : > { %v3345_v44 = vmul.f32 %v7352_v43, %v3244_v58  ;;  %v3585_v34 = vrot.slane %v3341_v56, 1  ;;  %v3785_v17 = vunpack.c.l.bf16 %v9902_v63  ;;  %v3884_v1 = vmul.f32 %v9852_v32, %v7362_v53  ;;  %10762 = vst [vmem:[#allocation10_spill] sm:$0xff] %v10010_v40  ;;  %v6068_v6 = vpop.f32.mrb[21].mxu1 }
 0x3d4   : > { %v5835_v47 = vpack.c.bf16 %v5799_v15, %v5797_v51  ;;  %v3190_v5 = vadd.f32 %v3126_v14, %v2952_v57  ;;  %v3192_v49 = vadd.f32 %v3128_v48, %v2954_v59  ;;  %v3586_v28 = vrot.slane %v3343_v35, 1  ;;  %v10022_v51 = vpop.f32.mrb[22].mxu1 }
 0x3d5   : > { %v3591_v62 = vrot.slane %v3345_v44, 1  ;;  %v3882_v45 = vmul.f32 %v7362_v53, %v3785_v17  ;;  %v3886_v20 = vmul.f32 %v7362_v53, %v3244_v58  ;;  %v4127_v56 = vrot.slane %v3884_v1, 2  ;;  %10763 = vst [vmem:[#allocation21_spill] sm:$0xff] %v10022_v51  ;;  %v6071_v35 = vpop.f32.mrb[23].mxu1 }
 0x3d6   : > { %6673 = vmatprep.mubr.msk.bf16.mxu1 %vm5943_vm4, %v5835_v47  ;;  %v10016_v63 = vunpack.c.l.bf16 %v9914_v38  ;;  %v10019_v14 = vunpack.c.l.bf16 %v9917_v21  ;;  %v4564_v48 = vunpack.c.l.bf16 %v9926_v39  ;;  %v3587_v15 = vsel %vm2133_vm1, %v3585_v34, %v3586_v28  ;;  %v10030_v4 = vpop.f32.mrb[24].mxu1 }
 0x3d7   : > { %v3592_v57 = vsel %vm2133_vm1, %v3586_v28, %v3591_v62  ;;  %v4126_v59 = vrot.slane %v3882_v45, 2  ;;  %v4132_v58 = vrot.slane %v3886_v20, 2  ;;  %v3731_v44 = vadd.f32 %v3587_v15, %v3190_v5  ;;  %10764 = vst [vmem:[#allocation22_spill] sm:$0xff] %v10030_v4  ;;  %v6076_v5 = vpop.f32.mrb[25].mxu1 }
 0x3d8   : > { %v3733_v17 = vadd.f32 %v3592_v57, %v3192_v49  ;;  %v4446_v38 = vmul.f32 %v7386_v3, %v10016_v63  ;;  %v4448_v21 = vmul.f32 %v7386_v3, %v10019_v14  ;;  %v4661_v34 = vmul.f32 %v7410_v11, %v10016_v63  ;;  %v10040_v20 = vpop.f32.mrb[26].mxu1  ;;  %v10053_v5 = vld [vmem:[#allocation2 + $0x150] sm:$0xee] }
 0x3d9   : > { %v4128_v39 = vsel %vm2675_vm2, %v4126_v59, %v4127_v56  ;;  %v4133_v47 = vsel %vm2675_vm2, %v4127_v56, %v4132_v58  ;;  %v4663_v1 = vmul.f32 %v7410_v11, %v10019_v14  ;;  %v4665_v62 = vmul.f32 %v7410_v11, %v4564_v48  ;;  %10765 = vst [vmem:[#allocation23_spill] sm:$0xff] %v10040_v20  ;;  %v6079_v59 = vpop.f32.mrb[27].mxu1 }
 0x3da   : > { %v4272_v49 = vadd.f32 %v4128_v39, %v3731_v44  ;;  %v4274_v28 = vadd.f32 %v4133_v47, %v3733_v17  ;;  %v5105_v45 = vunpack.c.l.bf16 %v9937_v2  ;;  %v4905_v6 = vrot.slane %v4661_v34, 1  ;;  %v10046_v17 = vld [vmem:[#allocation2 + $0x160] sm:$0x11]  ;;  %v10048_v39 = vpop.f32.mrb[28].mxu1 }
 0x3db   : > { %v4906_v15 = vrot.slane %v4663_v1, 1  ;;  %v5204_v56 = vmul.f32 %v7376_v60, %v10019_v14  ;;  %v5206_v57 = vmul.f32 %v7376_v60, %v4564_v48  ;;  %v4911_v4 = vrot.slane %v4665_v62, 1  ;;  %10766 = vst [vmem:[#allocation7_spill] sm:$0xff] %v10048_v39  ;;  %v6084_v48 = vpop.f32.mrb[29].mxu1 }
 0x3dc   : > { %v4510_v58 = vadd.f32 %v4446_v38, %v4272_v49  ;;  %v4512_v35 = vadd.f32 %v4448_v21, %v4274_v28  ;;  %v5202_v44 = vmul.f32 %v7376_v60, %v5105_v45  ;;  %v1873_v1 = vmul.f32 %v9773_v13, %v7340_v36  ;;  %v10058_v62 = vpop.f32.mrb[30].mxu1 }
 0x3dd   : > { %v4907_v2 = vsel %vm2133_vm1, %v4905_v6, %v4906_v15  ;;  %v5447_v47 = vrot.slane %v5204_v56, 2  ;;  %v5452_v34 = vrot.slane %v5206_v57, 2  ;;  %v4912_v38 = vsel %vm2133_vm1, %v4906_v15, %v4911_v4  ;;  %10767 = vst [vmem:[#allocation24_spill] sm:$0xff] %v10058_v62  ;;  %v6087_v59 = vpop.f32.mrb[31].mxu1 }
 0x3de   : > { %v5051_v21 = vadd.f32 %v4907_v2, %v4510_v58  ;;  %v5446_v49 = vrot.slane %v5202_v44, 2  ;;  %v1875_v28 = vmul.f32 %v9776_v52, %v7340_v36  ;;  %v5053_v45 = vadd.f32 %v4912_v38, %v4512_v35  ;;  %v10070_v44 = vpop.f32.mrb[32].mxu1 }
 0x3df   : > { %v5453_v6 = vsel %vm2675_vm2, %v5447_v47, %v5452_v34  ;;  %v1925_v56 = vunpack.c.h.bf16 %v10046_v17  ;;  %v2026_v57 = vmul.f32 %v9773_v13, %v7323_v31  ;;  %v2028_v4 = vmul.f32 %v9776_v52, %v7323_v31  ;;  %10768 = vst [vmem:[#allocation18_spill] sm:$0xff] %v10070_v44  ;;  %v6092_v62 = vpop.f32.mrb[33].mxu1 }
 0x3e0   : > { %v5448_v48 = vsel %vm2675_vm2, %v5446_v49, %v5447_v47  ;;  %v2467_v15 = vunpack.c.h.bf16 %v10053_v5  ;;  %v2570_v58 = vmul.f32 %v9776_v52, %v7314_v26  ;;  %v5594_v2 = vadd.f32 %v5453_v6, %v5053_v45  ;;  %v10075_v39 = vpop.f32.mrb[34].mxu1  ;;  %v10081_v45 = vld [vmem:[#allocation2 + $0x178] sm:$0x11] }
 0x3e1   : > { %v5592_v35 = vadd.f32 %v5448_v48, %v5051_v21  ;;  %v2030_v34 = vmul.f32 %v7323_v31, %v1925_v56  ;;  %v2277_v38 = vrot.slane %v2026_v57, 1  ;;  %v2278_v13 = vrot.slane %v2028_v4, 1  ;;  %10769 = vst [vmem:[#allocation8_spill] sm:$0xff] %v10075_v39  ;;  %v6095_v6 = vpop.f32.mrb[35].mxu1 }
 0x3e2   : > { %v2568_v59 = vmul.f32 %v7314_v26, %v2467_v15  ;;  %v2572_v47 = vmul.f32 %v7314_v26, %v1925_v56  ;;  %v2820_v49 = vrot.slane %v2570_v58, 2  ;;  %v5670_v52 = vadd.f32 %v7416_v19, %v5594_v2  ;;  %v10087_v2 = vld [vmem:[#allocation2 + $0x168] sm:$0xee] }
 0x3e3   : > { %v5668_v20 = vadd.f32 %v7416_v19, %v5592_v35  ;;  %v2282_v51 = vrot.slane %v2030_v34, 1  ;;  %v3131_v21 = vmul.f32 %v9924_v50, %v7349_v42  ;;  %v2279_v62 = vsel %vm2133_vm1, %v2277_v38, %v2278_v13 }
 0x3e4   : > { %v2819_v57 = vrot.slane %v2568_v59, 2  ;;  %v2824_v48 = vrot.slane %v2572_v47, 2  ;;  %v3133_v56 = vmul.f32 %v9932_v18, %v7349_v42  ;;  %v5734_v15 = vmax.f32 %v5670_v52, 0.0  ;;  %v10100_v52 = vld [vmem:[#allocation2 + $0x188] sm:$0xff] }
 0x3e5   : > { %v5732_v4 = vmax.f32 %v5668_v20, 0.0  ;;  %v2283_v58 = vsel %vm2133_vm1, %v2278_v13, %v2282_v51  ;;  %v2415_v35 = vadd.f32 %v2279_v62, %v1873_v1  ;;  %v3247_v6 = vunpack.c.h.bf16 %v10081_v45  ;;  %v10098_v13 = vld [vmem:[#allocation2 + $0x180] sm:$0xff] }
 0x3e6   : > { %v2417_v34 = vadd.f32 %v2283_v58, %v1875_v28  ;;  %v2821_v39 = vsel %vm2675_vm2, %v2819_v57, %v2820_v49  ;;  %v2825_v44 = vsel %vm2675_vm2, %v2820_v49, %v2824_v48  ;;  %v5798_v59 = vmin.f32 %v5734_v15, 6.0  ;;  %v10104_v48 = vld [vmem:[#allocation2 + $0x190] sm:$0x11] }
 0x3e7   : > { %v5796_v38 = vmin.f32 %v5732_v4, 6.0  ;;  %v2957_v47 = vadd.f32 %v2821_v39, %v2415_v35  ;;  %v3348_v40 = vmul.f32 %v9924_v50, %v10653_v10  ;;  %v3350_v51 = vmul.f32 %v9932_v18, %v10653_v10 }
 0x3e8   : > { %v2959_v20 = vadd.f32 %v2825_v44, %v2417_v34  ;;  %v3352_v1 = vmul.f32 %v10653_v10, %v3247_v6  ;;  %v3788_v28 = vunpack.c.h.bf16 %v10087_v2  ;;  %v3891_v39 = vmul.f32 %v9932_v18, %v10655_v54 }
 0x3e9   : > { %v5834_v49 = vpack.c.bf16 %v5798_v59, %v5796_v38  ;;  %v3195_v62 = vadd.f32 %v3131_v21, %v2957_v47  ;;  %v3598_v57 = vrot.slane %v3348_v40, 1  ;;  %v3599_v4 = vrot.slane %v3350_v51, 1  ;;  %v10117_v47 = vld [vmem:[#allocation2 + $0x180] sm:$0xee] }
 0x3ea   : > { %v3197_v44 = vadd.f32 %v3133_v56, %v2959_v20  ;;  %v3603_v15 = vrot.slane %v3352_v1, 1  ;;  %v3889_v58 = vmul.f32 %v10655_v54, %v3788_v28  ;;  %v3893_v35 = vmul.f32 %v10655_v54, %v3247_v6 }
 0x3eb   : > { %6129 = vmatmul.mubr.bf16.gmra.mrb[52].mxu1 %v5834_v49  ;;  %v4140_v34 = vrot.slane %v3891_v39, 2  ;;  %v10109_v7 = vunpack.c.h.bf16 %v10098_v13  ;;  %v10112_v21 = vunpack.c.h.bf16 %v10100_v52  ;;  %v3600_v40 = vsel %vm2133_vm1, %v3598_v57, %v3599_v4 }
 0x3ec   : > { %v3604_v38 = vsel %vm2133_vm1, %v3599_v4, %v3603_v15  ;;  %v4139_v59 = vrot.slane %v3889_v58, 2  ;;  %v4567_v56 = vunpack.c.h.bf16 %v10104_v48  ;;  %v3736_v20 = vadd.f32 %v3600_v40, %v3195_v62 }
 0x3ed   : > { %v3738_v51 = vadd.f32 %v3604_v38, %v3197_v44  ;;  %v4144_v1 = vrot.slane %v3893_v35, 2  ;;  %v4451_v6 = vmul.f32 %v10755_v23, %v10109_v7  ;;  %v4453_v49 = vmul.f32 %v10755_v23, %v10112_v21 }
 0x3ee   : > { %v4141_v28 = vsel %vm2675_vm2, %v4139_v59, %v4140_v34  ;;  %v4668_v57 = vmul.f32 %v10756_v12, %v10109_v7  ;;  %v4670_v39 = vmul.f32 %v10756_v12, %v10112_v21  ;;  %v4672_v62 = vmul.f32 %v10756_v12, %v4567_v56 }
 0x3ef   : > { %v4145_v4 = vsel %vm2675_vm2, %v4140_v34, %v4144_v1  ;;  %v4277_v15 = vadd.f32 %v4141_v28, %v3736_v20  ;;  %v5108_v44 = vunpack.c.h.bf16 %v10117_v47  ;;  %v5211_v38 = vmul.f32 %v10645_v22, %v10112_v21 }
 0x3f0   : > { %v4279_v58 = vadd.f32 %v4145_v4, %v3738_v51  ;;  %v4918_v35 = vrot.slane %v4668_v57, 1  ;;  %v4919_v40 = vrot.slane %v4670_v39, 1  ;;  %v4923_v55 = vrot.slane %v4672_v62, 1 }
 0x3f1   : > { %v4515_v59 = vadd.f32 %v4451_v6, %v4277_v15  ;;  %v5209_v61 = vmul.f32 %v10645_v22, %v5108_v44  ;;  %v5213_v46 = vmul.f32 %v10645_v22, %v4567_v56  ;;  %v5460_v20 = vrot.slane %v5211_v38, 2 }
 0x3f2   : > { %v4517_v8 = vadd.f32 %v4453_v49, %v4279_v58  ;;  %v4920_v34 = vsel %vm2133_vm1, %v4918_v35, %v4919_v40  ;;  %v1872_v1 = vmul.f32 %v9846_v0, %v10746_v33  ;;  %v4924_v51 = vsel %vm2133_vm1, %v4919_v40, %v4923_v55 }
 0x3f3   : > { %v5056_v28 = vadd.f32 %v4920_v34, %v4515_v59  ;;  %v5459_v57 = vrot.slane %v5209_v61, 2  ;;  %v5464_v39 = vrot.slane %v5213_v46, 2  ;;  %v1874_v6 = vmul.f32 %v9852_v32, %v10746_v33 }
 0x3f4   : > { %v5058_v4 = vadd.f32 %v4924_v51, %v4517_v8  ;;  %v1924_v15 = vunpack.c.l.bf16 %v10046_v17  ;;  %v2025_v56 = vmul.f32 %v9846_v0, %v7320_v30  ;;  %v2027_v44 = vmul.f32 %v9852_v32, %v7320_v30 }
 0x3f5   : > { %v5461_v49 = vsel %vm2675_vm2, %v5459_v57, %v5460_v20  ;;  %v5465_v62 = vsel %vm2675_vm2, %v5460_v20, %v5464_v39  ;;  %v2466_v55 = vunpack.c.l.bf16 %v10053_v5  ;;  %v2569_v0 = vmul.f32 %v9852_v32, %v7311_v25 }
 0x3f6   : > { %v5597_v61 = vadd.f32 %v5461_v49, %v5056_v28  ;;  %v5599_v46 = vadd.f32 %v5465_v62, %v5058_v4  ;;  %v2029_v8 = vmul.f32 %v7320_v30, %v1924_v15  ;;  %v2274_v58 = vrot.slane %v2025_v56, 1 }
 0x3f7   : > { %v2275_v35 = vrot.slane %v2027_v44, 1  ;;  %v2567_v17 = vmul.f32 %v7311_v25, %v2466_v55  ;;  %v2571_v40 = vmul.f32 %v7311_v25, %v1924_v15  ;;  %v3130_v5 = vmul.f32 %v10016_v63, %v7343_v37 }
 0x3f8   : > { %v5673_v38 = vadd.f32 %v7433_v24, %v5597_v61  ;;  %v5675_v59 = vadd.f32 %v7433_v24, %v5599_v46  ;;  %v2280_v34 = vrot.slane %v2029_v8, 1  ;;  %v2817_v28 = vrot.slane %v2569_v0, 2 }
 0x3f9   : > { %v2276_v20 = vsel %vm2133_vm1, %v2274_v58, %v2275_v35  ;;  %v2816_v51 = vrot.slane %v2567_v17, 2  ;;  %v2822_v57 = vrot.slane %v2571_v40, 2  ;;  %v3132_v44 = vmul.f32 %v10019_v14, %v7343_v37 }
 0x3fa   : > { %v5737_v39 = vmax.f32 %v5673_v38, 0.0  ;;  %v5739_v4 = vmax.f32 %v5675_v59, 0.0  ;;  %v2281_v56 = vsel %vm2133_vm1, %v2275_v35, %v2280_v34  ;;  %v2414_v32 = vadd.f32 %v2276_v20, %v1872_v1 }
 0x3fb   : > { %v2416_v49 = vadd.f32 %v2281_v56, %v1874_v6  ;;  %v2818_v15 = vsel %vm2675_vm2, %v2816_v51, %v2817_v28  ;;  %v2823_v62 = vsel %vm2675_vm2, %v2817_v28, %v2822_v57  ;;  %v3246_v8 = vunpack.c.l.bf16 %v10081_v45 }
 0x3fc   : > { %v5801_v55 = vmin.f32 %v5737_v39, 6.0  ;;  %v5803_v61 = vmin.f32 %v5739_v4, 6.0  ;;  %v2956_v46 = vadd.f32 %v2818_v15, %v2414_v32  ;;  %v3347_v17 = vmul.f32 %v10016_v63, %v7352_v43 }
 0x3fd   : > { %v2958_v58 = vadd.f32 %v2823_v62, %v2416_v49  ;;  %v3349_v1 = vmul.f32 %v10019_v14, %v7352_v43  ;;  %v3787_v6 = vunpack.c.l.bf16 %v10087_v2  ;;  %v3351_v40 = vmul.f32 %v7352_v43, %v3246_v8 }
 0x3fe   : > { %v5837_v35 = vpack.c.bf16 %v5803_v61, %v5801_v55  ;;  %v3194_v0 = vadd.f32 %v3130_v5, %v2956_v46  ;;  %v3890_v38 = vmul.f32 %v10019_v14, %v7362_v53  ;;  %v3595_v34 = vrot.slane %v3347_v17, 1 }
 0x3ff   : > { %v3196_v59 = vadd.f32 %v3132_v44, %v2958_v58  ;;  %v3596_v20 = vrot.slane %v3349_v1, 1  ;;  %v3888_v45 = vmul.f32 %v7362_v53, %v3787_v6  ;;  %v3601_v51 = vrot.slane %v3351_v40, 1 }
 0x400   : > { %6674 = vmatprep.mubr.msk.bf16.mxu1 %vm5943_vm4, %v5837_v35  ;;  %v3892_v28 = vmul.f32 %v7362_v53, %v3246_v8  ;;  %v4137_v57 = vrot.slane %v3890_v38, 2  ;;  %v10177_v2 = vunpack.c.l.bf16 %v10098_v13  ;;  %v10181_v4 = vunpack.c.l.bf16 %v10100_v52 }
 0x401   : > { %v3597_v5 = vsel %vm2133_vm1, %v3595_v34, %v3596_v20  ;;  %v4136_v39 = vrot.slane %v3888_v45, 2  ;;  %v4566_v56 = vunpack.c.l.bf16 %v10104_v48  ;;  %v3602_v32 = vsel %vm2133_vm1, %v3596_v20, %v3601_v51 }
 0x402   : > { %v3735_v49 = vadd.f32 %v3597_v5, %v3194_v0  ;;  %v4142_v15 = vrot.slane %v3892_v28, 2  ;;  %v4450_v62 = vmul.f32 %v7386_v3, %v10177_v2  ;;  %v3737_v44 = vadd.f32 %v3602_v32, %v3196_v59  ;;  %v10200_v59 = vld [vmem:[#allocation2 + $0x178] sm:$0x11]  ;;  %v10205_v28 = vld [vmem:[#allocation2 + $0x168] sm:$0xee] }
 0x403   : > { %v4138_v55 = vsel %vm2675_vm2, %v4136_v39, %v4137_v57  ;;  %v4452_v13 = vmul.f32 %v7386_v3, %v10181_v4  ;;  %v4667_v61 = vmul.f32 %v7410_v11, %v10177_v2  ;;  %v4669_v48 = vmul.f32 %v7410_v11, %v10181_v4 }
 0x404   : > { %v4143_v52 = vsel %vm2675_vm2, %v4137_v57, %v4142_v15  ;;  %v4276_v46 = vadd.f32 %v4138_v55, %v3735_v49  ;;  %v4671_v8 = vmul.f32 %v7410_v11, %v4566_v56  ;;  %v5107_v1 = vunpack.c.l.bf16 %v10117_v47 }
 0x405   : > { %v4278_v58 = vadd.f32 %v4143_v52, %v3737_v44  ;;  %v4915_v17 = vrot.slane %v4667_v61, 1  ;;  %v5210_v6 = vmul.f32 %v7376_v60, %v10181_v4  ;;  %v4916_v0 = vrot.slane %v4669_v48, 1 }
 0x406   : > { %v4514_v35 = vadd.f32 %v4450_v62, %v4276_v46  ;;  %v4921_v40 = vrot.slane %v4671_v8, 1  ;;  %v5212_v38 = vmul.f32 %v7376_v60, %v4566_v56  ;;  %v5208_v20 = vmul.f32 %v7376_v60, %v5107_v1  ;;  %v10207_v47 = vpop.f32.mrb[36].mxu1 }
 0x407   : > { %v4516_v34 = vadd.f32 %v4452_v13, %v4278_v58  ;;  %v5457_v45 = vrot.slane %v5210_v6, 2  ;;  %v1877_v51 = vmul.f32 %v9924_v50, %v7340_v36  ;;  %v4917_v57 = vsel %vm2133_vm1, %v4915_v17, %v4916_v0  ;;  %v6100_v32 = vpop.f32.mrb[37].mxu1 }
 0x408   : > { %v4922_v5 = vsel %vm2133_vm1, %v4916_v0, %v4921_v40  ;;  %v5462_v39 = vrot.slane %v5212_v38, 2  ;;  %v1879_v56 = vmul.f32 %v9932_v18, %v7340_v36  ;;  %v5055_v49 = vadd.f32 %v4917_v57, %v4514_v35  ;;  %v10214_v55 = vpop.f32.mrb[38].mxu1 }
 0x409   : > { %v5057_v15 = vadd.f32 %v4922_v5, %v4516_v34  ;;  %v5456_v62 = vrot.slane %v5208_v20, 2  ;;  %v1927_v44 = vunpack.c.h.bf16 %v10200_v59  ;;  %v2032_v61 = vmul.f32 %v9924_v50, %v7323_v31  ;;  %v6103_v48 = vpop.f32.mrb[39].mxu1 }
 0x40a   : > { %v5463_v13 = vsel %vm2675_vm2, %v5457_v45, %v5462_v39  ;;  %v2034_v52 = vmul.f32 %v9932_v18, %v7323_v31  ;;  %v2469_v46 = vunpack.c.h.bf16 %v10205_v28  ;;  %v2576_v17 = vmul.f32 %v9932_v18, %v7314_v26  ;;  %v10233_v18 = vld [vmem:[#allocation2 + $0x190] sm:$0x11] }
 0x40b   : > { %v5458_v36 = vsel %vm2675_vm2, %v5456_v62, %v5457_v45  ;;  %v5598_v8 = vadd.f32 %v5463_v13, %v5057_v15  ;;  %v2036_v58 = vmul.f32 %v7323_v31, %v1927_v44  ;;  %v2287_v6 = vrot.slane %v2032_v61, 1  ;;  %v10239_v13 = vld [vmem:[#allocation2 + $0x180] sm:$0xee] }
 0x40c   : > { %v5596_v1 = vadd.f32 %v5458_v36, %v5055_v49  ;;  %v2288_v35 = vrot.slane %v2034_v52, 1  ;;  %v2574_v0 = vmul.f32 %v7314_v26, %v2469_v46  ;;  %v2578_v38 = vmul.f32 %v7314_v26, %v1927_v44 }
 0x40d   : > { %v5674_v50 = vadd.f32 %v7416_v19, %v5598_v8  ;;  %v2292_v40 = vrot.slane %v2036_v58, 1  ;;  %v2830_v34 = vrot.slane %v2576_v17, 2  ;;  %v3135_v31 = vmul.f32 %v10109_v7, %v7349_v42 }
 0x40e   : > { %v5672_v20 = vadd.f32 %v7416_v19, %v5596_v1  ;;  %v2289_v45 = vsel %vm2133_vm1, %v2287_v6, %v2288_v35  ;;  %v2829_v57 = vrot.slane %v2574_v0, 2  ;;  %v2834_v49 = vrot.slane %v2578_v38, 2  ;;  %v10251_v6 = vld [vmem:[#allocation2 + $0x198] sm:$0xff]  ;;  %v10255_v0 = vld [vmem:[#allocation2 + $0x1a8] sm:$0x11] }
 0x40f   : > { %v5738_v5 = vmax.f32 %v5674_v50, 0.0  ;;  %v2293_v39 = vsel %vm2133_vm1, %v2288_v35, %v2292_v40  ;;  %v2419_v32 = vadd.f32 %v2289_v45, %v1877_v51  ;;  %v3137_v44 = vmul.f32 %v10112_v21, %v7349_v42  ;;  %v10253_v35 = vld [vmem:[#allocation2 + $0x1a0] sm:$0xff] }
 0x410   : > { %v5736_v15 = vmax.f32 %v5672_v20, 0.0  ;;  %v2421_v62 = vadd.f32 %v2293_v39, %v1879_v56  ;;  %v2831_v26 = vsel %vm2675_vm2, %v2829_v57, %v2830_v34  ;;  %v2835_v52 = vsel %vm2675_vm2, %v2830_v34, %v2834_v49 }
 0x411   : > { %v5802_v61 = vmin.f32 %v5738_v5, 6.0  ;;  %v2961_v46 = vadd.f32 %v2831_v26, %v2419_v32  ;;  %v3249_v48 = vunpack.c.h.bf16 %v10233_v18  ;;  %v3354_v51 = vmul.f32 %v10109_v7, %v10653_v10 }
 0x412   : > { %v5800_v36 = vmin.f32 %v5736_v15, 6.0  ;;  %v2963_v8 = vadd.f32 %v2835_v52, %v2421_v62  ;;  %v3356_v56 = vmul.f32 %v10112_v21, %v10653_v10  ;;  %v3790_v42 = vunpack.c.h.bf16 %v10239_v13  ;;  %v10264_v62 = vld [vmem:[#allocation2 + $0x198] sm:$0xee] }
 0x413   : > { %v3199_v58 = vadd.f32 %v3135_v31, %v2961_v46  ;;  %v3358_v17 = vmul.f32 %v10653_v10, %v3249_v48  ;;  %v3897_v1 = vmul.f32 %v10112_v21, %v10655_v54  ;;  %v3608_v7 = vrot.slane %v3354_v51, 1 }
 0x414   : > { %v5836_v50 = vpack.c.bf16 %v5802_v61, %v5800_v36  ;;  %v3201_v40 = vadd.f32 %v3137_v44, %v2963_v8  ;;  %v3609_v38 = vrot.slane %v3356_v56, 1  ;;  %v3895_v20 = vmul.f32 %v10655_v54, %v3790_v42 }
 0x415   : > { %v3613_v34 = vrot.slane %v3358_v17, 1  ;;  %v3899_v10 = vmul.f32 %v10655_v54, %v3249_v48  ;;  %v4150_v45 = vrot.slane %v3897_v1, 2  ;;  %v4378_v21 = vunpack.c.h.bf16 %v10251_v6 }
 0x416   : > { %6137 = vmatmul.mubr.bf16.gmra.mrb[56].mxu1 %v5836_v50  ;;  %v3610_v57 = vsel %vm2133_vm1, %v3608_v7, %v3609_v38  ;;  %v4380_v31 = vunpack.c.h.bf16 %v10253_v35  ;;  %v4569_v5 = vunpack.c.h.bf16 %v10255_v0  ;;  %v4149_v49 = vrot.slane %v3895_v20, 2 }
 0x417   : > { %v3614_v39 = vsel %vm2133_vm1, %v3609_v38, %v3613_v34  ;;  %v3740_v32 = vadd.f32 %v3610_v57, %v3199_v58  ;;  %v4154_v15 = vrot.slane %v3899_v10, 2  ;;  %v4455_v54 = vmul.f32 %v10755_v23, %v4378_v21 }
 0x418   : > { %v3742_v26 = vadd.f32 %v3614_v39, %v3201_v40  ;;  %v4457_v44 = vmul.f32 %v10755_v23, %v4380_v31  ;;  %v4674_v61 = vmul.f32 %v10756_v12, %v4378_v21  ;;  %v4151_v52 = vsel %vm2675_vm2, %v4149_v49, %v4150_v45 }
 0x419   : > { %v4155_v46 = vsel %vm2675_vm2, %v4150_v45, %v4154_v15  ;;  %v4676_v48 = vmul.f32 %v10756_v12, %v4380_v31  ;;  %v4678_v36 = vmul.f32 %v10756_v12, %v4569_v5  ;;  %v4281_v8 = vadd.f32 %v4151_v52, %v3740_v32 }
 0x41a   : > { %v4283_v51 = vadd.f32 %v4155_v46, %v3742_v26  ;;  %v4928_v56 = vrot.slane %v4674_v61, 1  ;;  %v5110_v58 = vunpack.c.h.bf16 %v10264_v62  ;;  %v5217_v1 = vmul.f32 %v10645_v22, %v4380_v31 }
 0x41b   : > { %v4929_v17 = vrot.slane %v4676_v48, 1  ;;  %v4933_v42 = vrot.slane %v4678_v36, 1  ;;  %v5219_v23 = vmul.f32 %v10645_v22, %v4569_v5  ;;  %v4519_v50 = vadd.f32 %v4455_v54, %v4281_v8 }
 0x41c   : > { %v4521_v40 = vadd.f32 %v4457_v44, %v4283_v51  ;;  %v5215_v7 = vmul.f32 %v10645_v22, %v5110_v58  ;;  %v1876_v38 = vmul.f32 %v10016_v63, %v10746_v33  ;;  %v5470_v20 = vrot.slane %v5217_v1, 2 }
 0x41d   : > { %v4930_v12 = vsel %vm2133_vm1, %v4928_v56, %v4929_v17  ;;  %v4934_v34 = vsel %vm2133_vm1, %v4929_v17, %v4933_v42  ;;  %v5474_v10 = vrot.slane %v5219_v23, 2  ;;  %v1878_v31 = vmul.f32 %v10019_v14, %v10746_v33 }
 0x41e   : > { %v5060_v45 = vadd.f32 %v4930_v12, %v4519_v50  ;;  %v5062_v57 = vadd.f32 %v4934_v34, %v4521_v40  ;;  %v5469_v21 = vrot.slane %v5215_v7, 2  ;;  %v1926_v39 = vunpack.c.l.bf16 %v10200_v59 }
 0x41f   : > { %v5475_v5 = vsel %vm2675_vm2, %v5470_v20, %v5474_v10  ;;  %v2031_v22 = vmul.f32 %v10016_v63, %v7320_v30  ;;  %v2033_v32 = vmul.f32 %v10019_v14, %v7320_v30  ;;  %v2468_v26 = vunpack.c.l.bf16 %v10205_v28 }
 0x420   : > { %v5471_v49 = vsel %vm2675_vm2, %v5469_v21, %v5470_v20  ;;  %v5603_v15 = vadd.f32 %v5475_v5, %v5062_v57  ;;  %v2575_v54 = vmul.f32 %v10019_v14, %v7311_v25  ;;  %v2035_v33 = vmul.f32 %v7320_v30, %v1926_v39 }
 0x421   : > { %v5601_v44 = vadd.f32 %v5471_v49, %v5060_v45  ;;  %v2284_v61 = vrot.slane %v2031_v22, 1  ;;  %v2285_v52 = vrot.slane %v2033_v32, 1  ;;  %v2573_v63 = vmul.f32 %v7311_v25, %v2468_v26 }
 0x422   : > { %v5679_v59 = vadd.f32 %v7433_v24, %v5603_v15  ;;  %v2577_v46 = vmul.f32 %v7311_v25, %v1926_v39  ;;  %v2827_v48 = vrot.slane %v2575_v54, 2  ;;  %v2290_v28 = vrot.slane %v2035_v33, 1 }
 0x423   : > { %v5677_v36 = vadd.f32 %v7433_v24, %v5601_v44  ;;  %v2286_v8 = vsel %vm2133_vm1, %v2284_v61, %v2285_v52  ;;  %v3134_v14 = vmul.f32 %v10177_v2, %v7343_v37  ;;  %v2826_v30 = vrot.slane %v2573_v63, 2 }
 0x424   : > { %v5743_v51 = vmax.f32 %v5679_v59, 0.0  ;;  %v2418_v56 = vadd.f32 %v2286_v8, %v1876_v38  ;;  %v2832_v58 = vrot.slane %v2577_v46, 2  ;;  %v2291_v42 = vsel %vm2133_vm1, %v2285_v52, %v2290_v28 }
 0x425   : > { %v5741_v17 = vmax.f32 %v5677_v36, 0.0  ;;  %v3136_v1 = vmul.f32 %v10181_v4, %v7343_v37  ;;  %v3248_v25 = vunpack.c.l.bf16 %v10233_v18  ;;  %v2420_v24 = vadd.f32 %v2291_v42, %v1878_v31 }
 0x426   : > { %v5807_v23 = vmin.f32 %v5743_v51, 6.0  ;;  %v2828_v50 = vsel %vm2675_vm2, %v2826_v30, %v2827_v48  ;;  %v2833_v40 = vsel %vm2675_vm2, %v2827_v48, %v2832_v58  ;;  %v3353_v38 = vmul.f32 %v10177_v2, %v7352_v43 }
 0x427   : > { %v5805_v7 = vmin.f32 %v5741_v17, 6.0  ;;  %v2960_v12 = vadd.f32 %v2828_v50, %v2418_v56  ;;  %v3355_v34 = vmul.f32 %v10181_v4, %v7352_v43  ;;  %v2962_v20 = vadd.f32 %v2833_v40, %v2420_v24  ;;  %v6864_v24 = vld [vmem:[%s7106_s10 + $0x8] sm:$0xff]  }
 0x428   : > { %v3357_v10 = vmul.f32 %v7352_v43, %v3248_v25  ;;  %v3789_v37 = vunpack.c.l.bf16 %v10239_v13  ;;  %v3896_v18 = vmul.f32 %v10181_v4, %v7362_v53  ;;  %v3605_v21 = vrot.slane %v3353_v38, 1 }
 0x429   : > { %v5839_v45 = vpack.c.bf16 %v5807_v23, %v5805_v7  ;;  %v3198_v57 = vadd.f32 %v3134_v14, %v2960_v12  ;;  %v3606_v31 = vrot.slane %v3355_v34, 1  ;;  %v3200_v5 = vadd.f32 %v3136_v1, %v2962_v20  ;;  %v6865_v7 = vld [vmem:[%s7106_s10 + $0x10] sm:$0xff]  }
 0x42a   : > { %v3611_v39 = vrot.slane %v3357_v10, 1  ;;  %v3894_v2 = vmul.f32 %v7362_v53, %v3789_v37  ;;  %v3898_v22 = vmul.f32 %v7362_v53, %v3248_v25  ;;  %v4147_v32 = vrot.slane %v3896_v18, 2 }
 0x42b   : > { %6675 = vmatprep.mubr.msk.bf16.mxu1 %vm5943_vm4, %v5839_v45  ;;  %v3607_v43 = vsel %vm2133_vm1, %v3605_v21, %v3606_v31  ;;  %v4377_v13 = vunpack.c.l.bf16 %v10251_v6  ;;  %v4379_v4 = vunpack.c.l.bf16 %v10253_v35  ;;  %v4568_v53 = vunpack.c.l.bf16 %v10255_v0 }
 0x42c   : > { %v3612_v49 = vsel %vm2133_vm1, %v3606_v31, %v3611_v39  ;;  %v3739_v15 = vadd.f32 %v3607_v43, %v3198_v57  ;;  %v4146_v26 = vrot.slane %v3894_v2, 2  ;;  %v4152_v54 = vrot.slane %v3898_v22, 2  ;;  %v6866_v57 = vld [vmem:[%s7106_s10 + $0x18] sm:$0xff]   ;;  %v6867_v2 = vld [vmem:[%s7106_s10 + $0x20] sm:$0xff]  }
 0x42d   : > { %v3741_v44 = vadd.f32 %v3612_v49, %v3200_v5  ;;  %v4454_v33 = vmul.f32 %v7386_v3, %v4377_v13  ;;  %v4456_v61 = vmul.f32 %v7386_v3, %v4379_v4  ;;  %v4673_v6 = vmul.f32 %v7410_v11, %v4377_v13  ;;  %v10335_v3 = vld [vmem:[%s10560_s6] ss:$0 sm:$0xff] }
 0x42e   : > { %v4148_v52 = vsel %vm2675_vm2, %v4146_v26, %v4147_v32  ;;  %v4153_v59 = vsel %vm2675_vm2, %v4147_v32, %v4152_v54  ;;  %v4675_v35 = vmul.f32 %v7410_v11, %v4379_v4  ;;  %v4677_v48 = vmul.f32 %v7410_v11, %v4568_v53 }
 0x42f   : > { %v4280_v63 = vadd.f32 %v4148_v52, %v3739_v15  ;;  %v4282_v46 = vadd.f32 %v4153_v59, %v3741_v44  ;;  %v5109_v36 = vunpack.c.l.bf16 %v10264_v62  ;;  %v4925_v0 = vrot.slane %v4673_v6, 1 }
 0x430   : > { %v4926_v8 = vrot.slane %v4675_v35, 1  ;;  %v5216_v28 = vmul.f32 %v7376_v60, %v4379_v4  ;;  %v5218_v14 = vmul.f32 %v7376_v60, %v4568_v53  ;;  %v4931_v30 = vrot.slane %v4677_v48, 1  ;;  %v6868_v35 = vld [vmem:[%s7106_s10 + $0x28] sm:$0xff]  }
 0x431   : > { %v4518_v51 = vadd.f32 %v4454_v33, %v4280_v63  ;;  %v4520_v56 = vadd.f32 %v4456_v61, %v4282_v46  ;;  %v5214_v11 = vmul.f32 %v7376_v60, %v5109_v36  ;;  %v6027_v42 = vadd.f32 %v10335_v3, %v9928_v41 }
 0x432   : > { %v4927_v62 = vsel %vm2133_vm1, %v4925_v0, %v4926_v8  ;;  %v5467_v58 = vrot.slane %v5216_v28, 2  ;;  %v5472_v17 = vrot.slane %v5218_v14, 2  ;;  %v4932_v1 = vsel %vm2133_vm1, %v4926_v8, %v4931_v30  ;;  %v10770_v28 = vld [vmem:[#allocation15_spill] sm:$0xff]  ;;  %v10771_v30 = vld [vmem:[#allocation16_spill] sm:$0xff] }
 0x433   : > { %v5059_v25 = vadd.f32 %v4927_v62, %v4518_v51  ;;  %v5466_v23 = vrot.slane %v5214_v11, 2  ;;  %v6153_v50 = vunpack.c.h.bf16 %v6864_v24  ;;  %v5061_v40 = vadd.f32 %v4932_v1, %v4520_v56  ;;  %v6869_v62 = vld [vmem:[%s7106_s10 + $0x30] sm:$0xff]   ;;  %v6870_v24 = vld [vmem:[%s7106_s10 + $0x38] sm:$0xff]  }
 0x434   : > { %v5473_v60 = vsel %vm2675_vm2, %v5467_v58, %v5472_v17  ;;  %v6154_v12 = vunpack.c.l.bf16 %v6865_v7  ;;  %v6030_v38 = vadd.f32 %v10335_v3, %v9939_v27  ;;  %v6155_v20 = vunpack.c.h.bf16 %v6865_v7 }
 0x435   : > { %v5468_v34 = vsel %vm2675_vm2, %v5466_v23, %v5467_v58  ;;  %v6249_v41 = vrot.slane %v6153_v50, 1  ;;  %v6035_v10 = vadd.f32 %v10335_v3, %v9950_v9  ;;  %v5602_v18 = vadd.f32 %v5473_v60, %v5061_v40 }
 0x436   : > { %v5600_v37 = vadd.f32 %v5468_v34, %v5059_v25  ;;  %v6250_v45 = vrot.slane %v6154_v12, 1  ;;  %v6156_v21 = vunpack.c.l.bf16 %v6866_v57  ;;  %v6252_v31 = vrot.slane %v6155_v20, 1  ;;  %v10362_v22 = vpop.f32.mrb[40].mxu1  ;;  %v10772_v25 = vld [vmem:[#allocation17_spill] sm:$0xff]  ;;  %v10773_v12 = vld [vmem:[#allocation19_spill] sm:$0xff] }
 0x437   : > { %v6157_v5 = vunpack.c.h.bf16 %v6866_v57  ;;  %v6038_v39 = vadd.f32 %v10335_v3, %v9957_v29  ;;  %v6158_v27 = vunpack.c.l.bf16 %v6867_v2  ;;  %v5678_v32 = vadd.f32 %v7416_v19, %v5602_v18  ;;  %v6108_v4 = vpop.f32.mrb[41].mxu1  ;;  %v10774_v57 = vld [vmem:[#allocation20_spill] sm:$0xff] }
 0x438   : > { %v5676_v43 = vadd.f32 %v7416_v19, %v5600_v37  ;;  %v6251_v9 = vsel %vm2133_vm1, %v6249_v41, %v6250_v45  ;;  %v6254_v13 = vrot.slane %v6156_v21, 1  ;;  %v6253_v49 = vsel %vm2133_vm1, %v6250_v45, %v6252_v31  ;;  %v10373_v54 = vpop.f32.mrb[42].mxu1 }
 0x439   : > { %v6361_v29 = vadd.f32 %v6251_v9, %v6027_v42  ;;  %v6255_v15 = vrot.slane %v6157_v5, 1  ;;  %v6257_v26 = vrot.slane %v6158_v27, 1  ;;  %v5742_v44 = vmax.f32 %v5678_v32, 0.0  ;;  %v6111_v53 = vpop.f32.mrb[43].mxu1  ;;  %v6872_v9 = vld [vmem:[%s7106_s10 + $0x48] sm:$0xff]  }
 0x43a   : > { %v5740_v19 = vmax.f32 %v5676_v43, 0.0  ;;  %v6362_v33 = vadd.f32 %v6253_v49, %v6030_v38  ;;  %v6043_v61 = vadd.f32 %v10335_v3, %v9965_v16  ;;  %v6159_v6 = vunpack.c.h.bf16 %v6867_v2  ;;  %v10776_v53 = vld [vmem:[#allocation21_spill] sm:$0xff] }
 0x43b   : > { %6393 = vst.msk [vmem:[%s10369_s30] sm:$0xff] %vm552_vm0, %v6361_v29  ;;  %v6256_v52 = vsel %vm2133_vm1, %v6254_v13, %v6255_v15  ;;  %v6258_v59 = vsel %vm2133_vm1, %v6255_v15, %v6257_v26  ;;  %v6160_v63 = vunpack.c.l.bf16 %v6868_v35  ;;  %v5806_v48 = vmin.f32 %v5742_v44, 6.0  ;;  %v10775_v29 = vld [vmem:[#allocation10_spill] sm:$0xff] }
 0x43c   : > { %v5804_v46 = vmin.f32 %v5740_v19, 6.0  ;;  %6394 = vst.msk [vmem:[%s10369_s30 + $0x8] sm:$0xff] %vm552_vm0, %v6362_v33  ;;  %v6363_v36 = vadd.f32 %v6256_v52, %v6035_v10  ;;  %v6364_v16 = vadd.f32 %v6258_v59, %v6038_v39  ;;  %v6259_v0 = vrot.slane %v6159_v6, 1  ;;  %v6871_v10 = vld [vmem:[%s7106_s10 + $0x40] sm:$0xff]   ;;  %v6873_v26 = vld [vmem:[%s7106_s10 + $0x50] sm:$0xff]  }
 0x43d   : > { %v6260_v8 = vrot.slane %v6160_v63, 1  ;;  %v6046_v14 = vadd.f32 %v10335_v3, %v10770_v28  ;;  %v6161_v51 = vunpack.c.h.bf16 %v6868_v35  ;;  %v6051_v11 = vadd.f32 %v10335_v3, %v10771_v30  ;;  %v6875_v30 = vld [vmem:[%s7106_s10 + $0x60] sm:$0xff]  }
 0x43e   : > { %v5838_v56 = vpack.c.bf16 %v5806_v48, %v5804_v46  ;;  %6395 = vst.msk [vmem:[%s10369_s30 + $0x10] sm:$0xff] %vm552_vm0, %v6363_v36  ;;  %6396 = vst.msk [vmem:[%s10369_s30 + $0x18] sm:$0xff] %vm552_vm0, %v6364_v16  ;;  %v6162_v58 = vunpack.c.l.bf16 %v6869_v62  ;;  %v6163_v17 = vunpack.c.h.bf16 %v6869_v62  ;;  %v6054_v23 = vadd.f32 %v10335_v3, %v10772_v25  ;;  %v10777_v46 = vld [vmem:[#allocation22_spill] sm:$0xff] }
 0x43f   : > { %v6261_v42 = vsel %vm2133_vm1, %v6259_v0, %v6260_v8  ;;  %v6262_v1 = vrot.slane %v6161_v51, 1  ;;  %v6164_v50 = vunpack.c.l.bf16 %v6870_v24  ;;  %v6059_v38 = vadd.f32 %v10335_v3, %v10773_v12  ;;  %v6874_v36 = vld [vmem:[%s7106_s10 + $0x58] sm:$0xff]   ;;  %v10780_v12 = vld [vmem:[#allocation24_spill] sm:$0xff] }
 0x440   : > { %6145 = vmatmul.mubr.bf16.gmra.mrb[60].mxu1 %v5838_v56  ;;  %v6365_v40 = vadd.f32 %v6261_v42, %v6043_v61  ;;  %v6264_v60 = vrot.slane %v6162_v58, 1  ;;  %v6265_v7 = vrot.slane %v6163_v17, 1  ;;  %v6165_v20 = vunpack.c.h.bf16 %v6870_v24  ;;  %v10778_v0 = vld [vmem:[#allocation23_spill] sm:$0xff] }
 0x441   : > { %v6263_v34 = vsel %vm2133_vm1, %v6260_v8, %v6262_v1  ;;  %v6267_v41 = vrot.slane %v6164_v50, 1  ;;  %v6166_v37 = vunpack.c.l.bf16 %v6871_v10  ;;  %v6062_v21 = vadd.f32 %v10335_v3, %v10774_v57  ;;  %v10779_v1 = vld [vmem:[#allocation7_spill] sm:$0xff]  ;;  %v6876_v50 = vld [vmem:[%s7106_s10 + $0x68] sm:$0xff]   ;;  %v6877_v57 = vld [vmem:[%s7106_s10 + $0x70] sm:$0xff]  }
 0x442   : > { %6397 = vst.msk [vmem:[%s10369_s30 + $0x20] sm:$0xff] %vm552_vm0, %v6365_v40  ;;  %v6366_v18 = vadd.f32 %v6263_v34, %v6046_v14  ;;  %v6266_v45 = vsel %vm2133_vm1, %v6264_v60, %v6265_v7  ;;  %v6167_v31 = vunpack.c.h.bf16 %v6871_v10  ;;  %v6269_v2 = vrot.slane %v6165_v20, 1 }
 0x443   : > { %v6367_v5 = vadd.f32 %v6266_v45, %v6051_v11  ;;  %v6268_v39 = vsel %vm2133_vm1, %v6265_v7, %v6267_v41  ;;  %v6270_v27 = vrot.slane %v6166_v37, 1  ;;  %v6168_v13 = vunpack.c.l.bf16 %v6872_v9 }
 0x444   : > { %6398 = vst.msk [vmem:[%s10369_s30 + $0x28] sm:$0xff] %vm552_vm0, %v6366_v18  ;;  %v6368_v43 = vadd.f32 %v6268_v39, %v6054_v23  ;;  %v6272_v32 = vrot.slane %v6167_v31, 1  ;;  %v6067_v49 = vadd.f32 %v10335_v3, %v10775_v29  ;;  %v6169_v15 = vunpack.c.h.bf16 %v6872_v9  ;;  %v10781_v18 = vld [vmem:[#allocation18_spill] sm:$0xff] }
 0x445   : > { %6399 = vst.msk [vmem:[%s10369_s30 + $0x30] sm:$0xff] %vm552_vm0, %v6367_v5  ;;  %v6271_v4 = vsel %vm2133_vm1, %v6269_v2, %v6270_v27  ;;  %v6170_v19 = vunpack.c.l.bf16 %v6873_v26  ;;  %v6274_v61 = vrot.slane %v6168_v13, 1  ;;  %v6070_v52 = vadd.f32 %v10335_v3, %v10776_v53 }
 0x446   : > { %6400 = vst.msk [vmem:[%s10369_s30 + $0x38] sm:$0xff] %vm552_vm0, %v6368_v43  ;;  %v6369_v44 = vadd.f32 %v6271_v4, %v6059_v38  ;;  %v6273_v33 = vsel %vm2133_vm1, %v6270_v27, %v6272_v32  ;;  %v6275_v6 = vrot.slane %v6169_v15, 1  ;;  %v6171_v63 = vunpack.c.h.bf16 %v6873_v26  ;;  %v10782_v27 = vld [vmem:[#allocation8_spill] sm:$0xff]  ;;  %v6878_v32 = vld [vmem:[%s7106_s10 + $0x78] sm:$0xff]  }
 0x447   : > { %v6370_v59 = vadd.f32 %v6273_v33, %v6062_v21  ;;  %v6277_v35 = vrot.slane %v6170_v19, 1  ;;  %v6075_v48 = vadd.f32 %v10335_v3, %v10777_v46  ;;  %v6172_v16 = vunpack.c.l.bf16 %v6874_v36  ;;  %v6880_v46 = vld [vmem:[%s7106_s10 + $0x88] sm:$0xff]  }
 0x448   : > { %6401 = vst.msk [vmem:[%s10369_s30 + $0x40] sm:$0xff] %vm552_vm0, %v6369_v44  ;;  %v6078_v8 = vadd.f32 %v10335_v3, %v10778_v0  ;;  %v6173_v28 = vunpack.c.h.bf16 %v6874_v36  ;;  %v6276_v14 = vsel %vm2133_vm1, %v6274_v61, %v6275_v6  ;;  %v6279_v56 = vrot.slane %v6171_v63, 1  ;;  %v6879_v44 = vld [vmem:[%s7106_s10 + $0x80] sm:$0xff]  }
 0x449   : > { %6402 = vst.msk [vmem:[%s10369_s30 + $0x48] sm:$0xff] %vm552_vm0, %v6370_v59  ;;  %v6278_v51 = vsel %vm2133_vm1, %v6275_v6, %v6277_v35  ;;  %v6174_v11 = vunpack.c.l.bf16 %v6875_v30  ;;  %v6371_v62 = vadd.f32 %v6276_v14, %v6067_v49  ;;  %v6280_v17 = vrot.slane %v6172_v16, 1 }
 0x44a   : > { %v6372_v58 = vadd.f32 %v6278_v51, %v6070_v52  ;;  %v6282_v42 = vrot.slane %v6173_v28, 1  ;;  %v6083_v25 = vadd.f32 %v10335_v3, %v10779_v1  ;;  %v6175_v23 = vunpack.c.h.bf16 %v6875_v30  ;;  %v6882_v1 = vld [vmem:[%s7106_s10 + $0x98] sm:$0xff]  }
 0x44b   : > { %v6284_v24 = vrot.slane %v6174_v11, 1  ;;  %v6176_v40 = vunpack.c.l.bf16 %v6876_v50  ;;  %6403 = vst.msk [vmem:[%s10369_s30 + $0x50] sm:$0xff] %vm552_vm0, %v6371_v62  ;;  %v6281_v60 = vsel %vm2133_vm1, %v6279_v56, %v6280_v17  ;;  %v6086_v38 = vadd.f32 %v10335_v3, %v10780_v12 }
 0x44c   : > { %6404 = vst.msk [vmem:[%s10369_s30 + $0x58] sm:$0xff] %vm552_vm0, %v6372_v58  ;;  %v6283_v7 = vsel %vm2133_vm1, %v6280_v17, %v6282_v42  ;;  %v6177_v34 = vunpack.c.h.bf16 %v6876_v50  ;;  %v6373_v41 = vadd.f32 %v6281_v60, %v6075_v48  ;;  %v6285_v10 = vrot.slane %v6175_v23, 1 }
 0x44d   : > { %v6374_v20 = vadd.f32 %v6283_v7, %v6078_v8  ;;  %v6287_v37 = vrot.slane %v6176_v40, 1  ;;  %v6091_v45 = vadd.f32 %v10335_v3, %v10781_v18  ;;  %v6178_v21 = vunpack.c.l.bf16 %v6877_v57 }
 0x44e   : > { %v6289_v31 = vrot.slane %v6177_v34, 1  ;;  %v6179_v5 = vunpack.c.h.bf16 %v6877_v57  ;;  %6405 = vst.msk [vmem:[%s10369_s30 + $0x60] sm:$0xff] %vm552_vm0, %v6373_v41  ;;  %v6286_v39 = vsel %vm2133_vm1, %v6284_v24, %v6285_v10  ;;  %v6094_v43 = vadd.f32 %v10335_v3, %v10782_v27 }
 0x44f   : > { %6406 = vst.msk [vmem:[%s10369_s30 + $0x68] sm:$0xff] %vm552_vm0, %v6374_v20  ;;  %v6288_v2 = vsel %vm2133_vm1, %v6285_v10, %v6287_v37  ;;  %v6180_v9 = vunpack.c.l.bf16 %v6878_v32  ;;  %v6375_v13 = vadd.f32 %v6286_v39, %v6083_v25  ;;  %v6290_v29 = vrot.slane %v6178_v21, 1 }
 0x450   : > { %v6376_v4 = vadd.f32 %v6288_v2, %v6086_v38  ;;  %v6292_v49 = vrot.slane %v6179_v5, 1  ;;  %v6099_v15 = vadd.f32 %v10335_v3, %v10207_v47  ;;  %v6181_v26 = vunpack.c.h.bf16 %v6878_v32 }
 0x451   : > { %v6294_v19 = vrot.slane %v6180_v9, 1  ;;  %v6182_v33 = vunpack.c.l.bf16 %v6879_v44  ;;  %6407 = vst.msk [vmem:[%s10369_s30 + $0x70] sm:$0xff] %vm552_vm0, %v6375_v13  ;;  %v6291_v61 = vsel %vm2133_vm1, %v6289_v31, %v6290_v29  ;;  %v6102_v52 = vadd.f32 %v10335_v3, %v10214_v55 }
 0x452   : > { %6408 = vst.msk [vmem:[%s10369_s30 + $0x78] sm:$0xff] %vm552_vm0, %v6376_v4  ;;  %v6293_v53 = vsel %vm2133_vm1, %v6290_v29, %v6292_v49  ;;  %v6183_v59 = vunpack.c.h.bf16 %v6879_v44  ;;  %v6377_v6 = vadd.f32 %v6291_v61, %v6091_v45  ;;  %v6295_v35 = vrot.slane %v6181_v26, 1  ;;  %v6883_v45 = vld [vmem:[%s7106_s10 + $0xa0] sm:$0xff]   ;;  %v6884_v26 = vld [vmem:[%s7106_s10 + $0xa8] sm:$0xff]  }
 0x453   : > { %v6378_v47 = vadd.f32 %v6293_v53, %v6094_v43  ;;  %v6297_v63 = vrot.slane %v6182_v33, 1  ;;  %v6184_v48 = vunpack.c.l.bf16 %v6880_v46  ;;  %v6185_v16 = vunpack.c.h.bf16 %v6880_v46  ;;  %v6885_v33 = vld [vmem:[%s7106_s10 + $0xb0] sm:$0xff]  }
 0x454   : > { %v6299_v36 = vrot.slane %v6183_v59, 1  ;;  %6409 = vst.msk [vmem:[%s10369_s30 + $0x80] sm:$0xff] %vm552_vm0, %v6377_v6  ;;  %v6296_v0 = vsel %vm2133_vm1, %v6294_v19, %v6295_v35  ;;  %v6107_v8 = vadd.f32 %v10335_v3, %v10362_v22  ;;  %v6110_v28 = vadd.f32 %v10335_v3, %v10373_v54  ;;  %v6881_v22 = vld [vmem:[%s7106_s10 + $0x90] sm:$0xff]  }
 0x455   : > { %6410 = vst.msk [vmem:[%s10369_s30 + $0x88] sm:$0xff] %vm552_vm0, %v6378_v47  ;;  %v6298_v55 = vsel %vm2133_vm1, %v6295_v35, %v6297_v63  ;;  %v6379_v14 = vadd.f32 %v6296_v0, %v6099_v15  ;;  %v6300_v56 = vrot.slane %v6184_v48, 1  ;;  %v6302_v30 = vrot.slane %v6185_v16, 1 }
 0x456   : > { %v6380_v51 = vadd.f32 %v6298_v55, %v6102_v52  ;;  %v6186_v54 = vunpack.c.l.bf16 %v6881_v22  ;;  %v6187_v42 = vunpack.c.h.bf16 %v6881_v22  ;;  %v6188_v25 = vunpack.c.l.bf16 %v6882_v1 }
 0x457   : > { %6411 = vst.msk [vmem:[%s10369_s30 + $0x90] sm:$0xff] %vm552_vm0, %v6379_v14  ;;  %v6301_v11 = vsel %vm2133_vm1, %v6299_v36, %v6300_v56  ;;  %v6303_v62 = vsel %vm2133_vm1, %v6300_v56, %v6302_v30  ;;  %v6189_v18 = vunpack.c.h.bf16 %v6882_v1  ;;  %v6190_v57 = vunpack.c.l.bf16 %v6883_v45 }
 0x458   : > { %6412 = vst.msk [vmem:[%s10369_s30 + $0x98] sm:$0xff] %vm552_vm0, %v6380_v51  ;;  %v6381_v58 = vadd.f32 %v6301_v11, %v6107_v8  ;;  %v6382_v17 = vadd.f32 %v6303_v62, %v6110_v28  ;;  %v6304_v23 = vrot.slane %v6186_v54, 1  ;;  %v6305_v24 = vrot.slane %v6187_v42, 1  ;;  %v6886_v28 = vld [vmem:[%s7106_s10 + $0xb8] sm:$0xff]  }
 0x459   : > { %v6307_v50 = vrot.slane %v6188_v25, 1  ;;  %v6191_v21 = vunpack.c.h.bf16 %v6883_v45  ;;  %v6309_v31 = vrot.slane %v6189_v18, 1  ;;  %v6310_v5 = vrot.slane %v6190_v57, 1 }
 0x45a   : > { %6413 = vst.msk [vmem:[%s10369_s30 + $0xa0] sm:$0xff] %vm552_vm0, %v6381_v58  ;;  %6414 = vst.msk [vmem:[%s10369_s30 + $0xa8] sm:$0xff] %vm552_vm0, %v6382_v17  ;;  %v6306_v60 = vsel %vm2133_vm1, %v6304_v23, %v6305_v24  ;;  %v6192_v19 = vunpack.c.l.bf16 %v6884_v26  ;;  %v6193_v44 = vunpack.c.h.bf16 %v6884_v26  ;;  %v6194_v61 = vunpack.c.l.bf16 %v6885_v33 }
 0x45b   : > { %v6308_v34 = vsel %vm2133_vm1, %v6305_v24, %v6307_v50  ;;  %v6312_v39 = vrot.slane %v6191_v21, 1  ;;  %v6311_v27 = vsel %vm2133_vm1, %v6309_v31, %v6310_v5  ;;  %v6195_v8 = vunpack.c.h.bf16 %v6885_v33  ;;  %v6887_v50 = vld [vmem:[%s7106_s10 + $0xc0] sm:$0xff]  }
 0x45c   : > { %v6314_v53 = vrot.slane %v6192_v19, 1  ;;  %v6315_v52 = vrot.slane %v6193_v44, 1  ;;  %v6317_v59 = vrot.slane %v6194_v61, 1  ;;  %v6196_v14 = vunpack.c.l.bf16 %v6886_v28 }
 0x45d   : > { %v6313_v13 = vsel %vm2133_vm1, %v6310_v5, %v6312_v39  ;;  %v6197_v51 = vunpack.c.h.bf16 %v6886_v28  ;;  %v6319_v56 = vrot.slane %v6195_v8, 1 }
 0x45e   : > { %v6316_v47 = vsel %vm2133_vm1, %v6314_v53, %v6315_v52  ;;  %v6318_v48 = vsel %vm2133_vm1, %v6315_v52, %v6317_v59  ;;  %v6320_v30 = vrot.slane %v6196_v14, 1 }
 0x45f   : > { %v6322_v11 = vrot.slane %v6197_v51, 1 }
 0x460   : > { %v6321_v58 = vsel %vm2133_vm1, %v6319_v56, %v6320_v30 }
 0x461   : > { %v6323_v42 = vsel %vm2133_vm1, %v6320_v30, %v6322_v11 }
 0x467   : > { %v6114_v40 = vpop.f32.mrb[44].mxu1 }
 0x468   : > { %v6115_v7 = vadd.f32 %v10335_v3, %v6114_v40  ;;  %v6116_v12 = vpop.f32.mrb[45].mxu1  ;;  %v6198_v40 = vunpack.c.l.bf16 %v6887_v50 }
 0x469   : > { %v6117_v38 = vpop.f32.mrb[46].mxu1 }
 0x46a   : > { %v6383_v41 = vadd.f32 %v6306_v60, %v6115_v7  ;;  %v6118_v20 = vadd.f32 %v10335_v3, %v6117_v38  ;;  %v6119_v10 = vpop.f32.mrb[47].mxu1  ;;  %v6199_v60 = vunpack.c.h.bf16 %v6887_v50  ;;  %v6888_v7 = vld [vmem:[%s7106_s10 + $0xc8] sm:$0xff]   ;;  %v6324_v38 = vrot.slane %v6198_v40, 1 }
 0x46b   : > { %v6200_v12 = vunpack.c.l.bf16 %v6888_v7 }
 0x46c   : > { %6415 = vst.msk [vmem:[%s10369_s30 + $0xb0] sm:$0xff] %vm552_vm0, %v6383_v41  ;;  %v6384_v37 = vadd.f32 %v6308_v34, %v6118_v20  ;;  %v6325_v34 = vrot.slane %v6199_v60, 1 }
 0x46d   : > { %v6327_v41 = vrot.slane %v6200_v12, 1 }
 0x46e   : > { %6416 = vst.msk [vmem:[%s10369_s30 + $0xb8] sm:$0xff] %vm552_vm0, %v6384_v37  ;;  %v6326_v10 = vsel %vm2133_vm1, %v6324_v38, %v6325_v34 }
 0x46f   : > { %v6328_v57 = vsel %vm2133_vm1, %v6325_v34, %v6327_v41 }
 0x493   : > { %v6122_v2 = vpop.f32.mrb[48].mxu1 }
 0x494   : > { %v6123_v43 = vadd.f32 %v10335_v3, %v6122_v2  ;;  %v6124_v32 = vpop.f32.mrb[49].mxu1 }
 0x495   : > { %v6125_v9 = vpop.f32.mrb[50].mxu1 }
 0x496   : > { %v6385_v4 = vadd.f32 %v6311_v27, %v6123_v43  ;;  %v6126_v29 = vadd.f32 %v10335_v3, %v6125_v9  ;;  %v6127_v49 = vpop.f32.mrb[51].mxu1 }
 0x498   : > { %6417 = vst.msk [vmem:[%s10369_s30 + $0xc0] sm:$0xff] %vm552_vm0, %v6385_v4  ;;  %v6386_v15 = vadd.f32 %v6313_v13, %v6126_v29 }
 0x49a   : > { %6418 = vst.msk [vmem:[%s10369_s30 + $0xc8] sm:$0xff] %vm552_vm0, %v6386_v15 }
 0x4be   : > { %v6130_v6 = vpop.f32.mrb[52].mxu1 }
 0x4bf   : > { %v6131_v35 = vadd.f32 %v10335_v3, %v6130_v6  ;;  %v6132_v63 = vpop.f32.mrb[53].mxu1 }
 0x4c0   : > { %v6133_v46 = vpop.f32.mrb[54].mxu1 }
 0x4c1   : > { %v6387_v36 = vadd.f32 %v6316_v47, %v6131_v35  ;;  %v6134_v16 = vadd.f32 %v10335_v3, %v6133_v46  ;;  %v6135_v0 = vpop.f32.mrb[55].mxu1 }
 0x4c3   : > { %6419 = vst.msk [vmem:[%s10369_s30 + $0xd0] sm:$0xff] %vm552_vm0, %v6387_v36  ;;  %v6388_v55 = vadd.f32 %v6318_v48, %v6134_v16 }
 0x4c5   : > { %6420 = vst.msk [vmem:[%s10369_s30 + $0xd8] sm:$0xff] %vm552_vm0, %v6388_v55 }
 0x4e9   : > { %v6138_v62 = vpop.f32.mrb[56].mxu1 }
 0x4ea   : > { %v6139_v17 = vadd.f32 %v10335_v3, %v6138_v62  ;;  %v6140_v22 = vpop.f32.mrb[57].mxu1 }
 0x4eb   : > { %v6141_v54 = vpop.f32.mrb[58].mxu1 }
 0x4ec   : > { %v6389_v1 = vadd.f32 %v6321_v58, %v6139_v17  ;;  %v6142_v25 = vadd.f32 %v10335_v3, %v6141_v54  ;;  %v6143_v23 = vpop.f32.mrb[59].mxu1 }
 0x4ee   : > { %6421 = vst.msk [vmem:[%s10369_s30 + $0xe0] sm:$0xff] %vm552_vm0, %v6389_v1  ;;  %v6390_v24 = vadd.f32 %v6323_v42, %v6142_v25 }
 0x4f0   : > { %6422 = vst.msk [vmem:[%s10369_s30 + $0xe8] sm:$0xff] %vm552_vm0, %v6390_v24 }
 0x513   : > { %v6146_v20 = vpop.f32.mrb[60].mxu1 }
 0x514   : > { %v6147_v37 = vadd.f32 %v10335_v3, %v6146_v20  ;;  %v6148_v18 = vpop.f32.mrb[61].mxu1 }
 0x515   : > { %v6149_v45 = vpop.f32.mrb[62].mxu1 }
 0x516   : > { %v6391_v21 = vadd.f32 %v6326_v10, %v6147_v37  ;;  %v6150_v31 = vadd.f32 %v10335_v3, %v6149_v45  ;;  %v6151_v5 = vpop.f32.mrb[63].mxu1 }
 0x518   : > { %6423 = vst.msk [vmem:[%s10369_s30 + $0xf0] sm:$0xff] %vm552_vm0, %v6391_v21  ;;  %v6392_v39 = vadd.f32 %v6328_v57, %v6150_v31 }
 0x51a   : > { %6424 = vst.msk [vmem:[%s10369_s30 + $0xf8] sm:$0xff] %vm552_vm0, %v6392_v39 }
 0x51b PF: > { %s20_s29 = sadd.s32 1, %s6969_s29   ;;  %s10783_s24 = smov %s6953_s25 }
 0x51c   : > { %p17_p9 = scmp.ge.s32.totalorder %s20_s29, 4   ;;  %s10784_s25 = smov %s6957_s26 }
 0x51d   : > { %s10785_s26 = smov %s7060_s12  ;;  %s10786_s27 = smov %s6965_s28 }
 0x51e   : > { %s10787_s28 = smov %s10789_s8  ;;  %19 = sbr.rel (!%p17_p9) target bundleno = 4 (0x4), region = 108 }
 0x525   :  { %6455 = vsyncpa [#allocation4], 1 }
 0x526   :  { %6457 = vsyncpa [#allocation4 + $0x1], 1 }

</bundles_post_ra>
